<compile_context>
chip_gen: v6e
topology: v6e:2x2x1
jax: 0.10.0
libtpu: 0.0.40
codegen_flags: <defaults>
</compile_context>

<pallas_src>
import functools

import jax
import jax.numpy as jnp
import numpy as np
from jax.experimental import pallas as pl
from jax.experimental.pallas import tpu as pltpu


# ---------------------------------------------------------------------------
# Kernel: one grid step processes TB temporal windows.
# ---------------------------------------------------------------------------
def times_attention_kernel(x_ref, w1_ref, w2_ref, bias_ref, pbias_ref,
                           o_ref, qkv_scr, out_scr, *, num_heads, frames, dim):
    N = frames
    C = dim
    C2 = C // 2
    hd = C2 // num_heads
    TB = x_ref.shape[0]

    # ---- single XLU transpose: window/batch axis -> lanes -------------------
    xt = x_ref[...].T                                           # (N*C, TB)

    # ---- fused qkv projection over all frames: one MXU matmul ---------------
    # w1 row index = o*N + n  with o = {q,k,v}-major channel, n = frame.
    qkv_scr[...] = jnp.dot(w1_ref[...], xt,
                           preferred_element_type=jnp.float32)  # (3*C2*N, TB)

    # ---- per-head attention; batch (TB) stays on the lane axis --------------
    for h in range(num_heads):
        q = [qkv_scr[(h * hd + d) * N:(h * hd + d + 1) * N, :]
             for d in range(hd)]                                # each (N, TB)
        k = [qkv_scr[(C2 + h * hd + d) * N:(C2 + h * hd + d + 1) * N, :]
             for d in range(hd)]
        v = [qkv_scr[(2 * C2 + h * hd + d) * N:(2 * C2 + h * hd + d + 1) * N, :]
             for d in range(hd)]

        # scores s[i, j, b] = sum_d q[d][i, b] * k[d][j, b]   (VPU, no tiny matmuls)
        s = q[0][:, None, :] * k[0][None, :, :]                 # (N, N, TB)
        for d in range(1, hd):
            s = s + q[d][:, None, :] * k[d][None, :, :]
        s = s + bias_ref[h]                                     # (N, N, 1) lane-bcast

        # numerically-stable softmax over j (sublane axis)
        m = jnp.max(s, axis=1, keepdims=True)                   # (N, 1, TB)
        e = jnp.exp(s - m)
        denom = jnp.sum(e, axis=1, keepdims=True)
        p = e * pl.reciprocal(denom, approx=True)

        # out[(h*hd+d)*N + i, b] = sum_j p[i, j, b] * v[d][j, b]
        for d in range(hd):
            oc = h * hd + d
            out_scr[oc * N:(oc + 1) * N, :] = jnp.sum(p * v[d][None, :, :], axis=1)

    # ---- fused output projection straight into the lane-dense layout --------
    out_t = out_scr[...].T                                      # (TB, C2*N) half-size xpose
    y = jnp.dot(out_t, w2_ref[...],
                preferred_element_type=jnp.float32) + pbias_ref[...]
    o_ref[...] = y.astype(o_ref.dtype)                          # (TB, N*C) unmasked store


# ---------------------------------------------------------------------------
# Wrapper
# ---------------------------------------------------------------------------
def _round_up(v, m):
    return (v + m - 1) // m * m


def times_attention_3d(x, w_qkv, w_proj, b_proj, rel_bias, *, num_heads, scale,
                       block_b=256):
    """x: (B, N, C); w_qkv: (C, 3*C//2); w_proj: (C//2, C); b_proj: (C,);
    rel_bias: (num_heads, N, N). Returns (B, N, C)."""
    B, N, C = x.shape
    C2 = C // 2
    assert C2 % num_heads == 0
    NC = N * C

    # One-time parameter prep (trace-time, tiny):
    #   fold the softmax scale into the q columns and build frame-fused weights
    #   so the kernel does ONE qkv matmul and ONE proj matmul per tile.
    col_scale = jnp.concatenate(
        [jnp.full((C2,), scale, w_qkv.dtype), jnp.ones((2 * C2,), w_qkv.dtype)])
    w_qkv_s = w_qkv * col_scale[None, :]                          # (C, 3*C2)
    eye_n = jnp.eye(N, dtype=w_qkv.dtype)
    # w1[o*N + n, n'*C + c] = w_qkv_s[c, o] * (n == n')
    w1 = jnp.einsum("co,nm->onmc", w_qkv_s, eye_n).reshape(3 * C2 * N, NC)
    # w2[c2*N + n, n'*C + c] = w_proj[c2, c] * (n == n')
    w2 = jnp.einsum("pc,nm->pnmc", w_proj, eye_n).reshape(C2 * N, NC)
    pbias = jnp.tile(b_proj, N).reshape(1, NC)                    # row bias, lane-dense
    bias4 = jnp.reshape(rel_bias, (num_heads, N, N, 1))           # lane-broadcastable

    TB = min(block_b, _round_up(B, 8))
    Bp = _round_up(B, TB)
    x2 = jnp.reshape(x, (B, NC))                                  # lane-dense HBM layout
    if Bp != B:
        x2 = jnp.pad(x2, ((0, Bp - B), (0, 0)))

    kernel = functools.partial(times_attention_kernel,
                               num_heads=num_heads, frames=N, dim=C)
    out2 = pl.pallas_call(
        kernel,
        out_shape=jax.ShapeDtypeStruct((Bp, NC), x.dtype),
        grid_spec=pltpu.PrefetchScalarGridSpec(
            num_scalar_prefetch=0,
            grid=(Bp // TB,),
            in_specs=[
                pl.BlockSpec((TB, NC), lambda b: (b, 0)),
                pl.BlockSpec(w1.shape, lambda b: (0, 0)),
                pl.BlockSpec(w2.shape, lambda b: (0, 0)),
                pl.BlockSpec(bias4.shape, lambda b: (0, 0, 0, 0)),
                pl.BlockSpec(pbias.shape, lambda b: (0, 0)),
            ],
            out_specs=pl.BlockSpec((TB, NC), lambda b: (b, 0)),
            scratch_shapes=[
                pltpu.VMEM((3 * C2 * N, TB), jnp.float32),        # qkv, channel-major rows
                pltpu.VMEM((C2 * N, TB), jnp.float32),            # head outputs
            ],
        ),
        compiler_params=pltpu.CompilerParams(
            dimension_semantics=("parallel",)),
    )(x2, w1, w2, bias4, pbias)
    return jnp.reshape(out2[:B], (B, N, C))


# ---------------------------------------------------------------------------
# Relative position index (identical to the PyTorch buffer computation)
# ---------------------------------------------------------------------------
def compute_relative_position_index(window_size):
    coords_d = np.arange(window_size[0])
    coords_h = np.arange(window_size[1])
    coords_w = np.arange(window_size[2])
    coords = np.stack(np.meshgrid(coords_d, coords_h, coords_w, indexing="ij"))
    coords_flatten = coords.reshape(3, -1)
    relative_coords = coords_flatten[:, :, None] - coords_flatten[:, None, :]
    relative_coords = relative_coords.transpose(1, 2, 0).copy()
    relative_coords[:, :, 0] += window_size[0] - 1
    relative_coords[:, :, 1] += window_size[1] - 1
    relative_coords[:, :, 2] += window_size[2] - 1
    relative_coords[:, :, 0] *= (2 * window_size[1] - 1) * (2 * window_size[2] - 1)
    relative_coords[:, :, 1] *= 2 * window_size[2] - 1
    return relative_coords.sum(-1)  # (frames, frames)


# ---------------------------------------------------------------------------
# Pure-JAX reference (mirrors the PyTorch forward)
# ---------------------------------------------------------------------------
def reference(x, w_qkv, w_proj, b_proj, rel_bias, *, num_heads, scale):
    B, N, C = x.shape
    C2 = C // 2
    hd = C2 // num_heads
    qkv = (x @ w_qkv).reshape(B, N, 3, num_heads, hd).transpose(2, 0, 3, 1, 4)
    q, k, v = qkv[0] * scale, qkv[1], qkv[2]
    attn = jnp.einsum("bhnd,bhmd->bhnm", q, k) + rel_bias[None]
    attn = jax.nn.softmax(attn, axis=-1)
    out = jnp.einsum("bhnm,bhmd->bhnd", attn, v).transpose(0, 2, 1, 3).reshape(B, N, C2)
    return out @ w_proj + b_proj


if __name__ == "__main__":
    dim = 32            # C
    num_heads = 4
    frames = 8          # N
    batch, win_h, win_w = 2, 16, 16
    B = batch * win_h * win_w          # 512 temporal windows (= B_ in the module)
    N = frames
    # NOTE: module uses head_dim = dim // num_heads for the scale even though
    # q/k/v actually have (dim//2)//num_heads channels — reproduced exactly.
    scale = float((dim // num_heads) ** (-0.5))

    key = jax.random.PRNGKey(0)
    kx, kq, kp, kb, kt = jax.random.split(key, 5)

    x = jax.random.normal(kx, (B, N, dim), dtype=jnp.float32)
    w_qkv = jax.random.normal(kq, (dim, dim // 2 * 3), dtype=jnp.float32) * 0.05
    w_proj = jax.random.normal(kp, (dim // 2, dim), dtype=jnp.float32) * 0.05
    b_proj = jax.random.normal(kb, (dim,), dtype=jnp.float32) * 0.05
    table = jax.random.normal(kt, (2 * frames - 1, num_heads), dtype=jnp.float32) * 0.05

    rel_idx = compute_relative_position_index([frames, 1, 1])[:N, :N]
    rel_bias = jnp.transpose(
        table[jnp.asarray(rel_idx.reshape(-1))].reshape(N, N, num_heads), (2, 0, 1))

    # TODO(synk): attn_drop / proj_drop have p=0.0 in the module defaults (identity) — omitted.
    out = times_attention_3d(x, w_qkv, w_proj, b_proj, rel_bias,
                             num_heads=num_heads, scale=scale)
    out = jax.block_until_ready(out)

    ref = reference(x, w_qkv, w_proj, b_proj, rel_bias,
                    num_heads=num_heads, scale=scale)
    np.testing.assert_allclose(np.asarray(out), np.asarray(ref),
                               rtol=1e-3, atol=1e-3)
    print("KERNEL_OK")
</pallas_src>

<mosaic_0001>
module attributes {stable_mosaic.version = 11 : i64} {
  func.func @times_attention_kernel(%arg0: i32, %arg1: memref<256x256xf32, #tpu.memory_space<vmem>>, %arg2: memref<384x256xf32, #tpu.memory_space<vmem>>, %arg3: memref<128x256xf32, #tpu.memory_space<vmem>>, %arg4: memref<4x8x8x1xf32, #tpu.memory_space<vmem>>, %arg5: memref<1x256xf32, #tpu.memory_space<vmem>>, %arg6: memref<256x256xf32, #tpu.memory_space<vmem>>, %arg7: memref<384x256xf32, #tpu.memory_space<vmem>>, %arg8: memref<128x256xf32, #tpu.memory_space<vmem>>) attributes {dimension_semantics = [#tpu.dimension_semantics<parallel>], iteration_bounds = array<i64: 2>, scalar_prefetch = 0 : i64, scratch_operands = 2 : i64, tpu.core_type = #tpu.core_type<tc>, window_params = [{transform_indices = @transform_0, window_bounds = array<i64: 256, 256>}, {pipeline_mode = #tpu.pipeline_mode<synchronous>, transform_indices = @transform_1, window_bounds = array<i64: 384, 256>}, {pipeline_mode = #tpu.pipeline_mode<synchronous>, transform_indices = @transform_2, window_bounds = array<i64: 128, 256>}, {pipeline_mode = #tpu.pipeline_mode<synchronous>, transform_indices = @transform_3, window_bounds = array<i64: 4, 8, 8, 1>}, {pipeline_mode = #tpu.pipeline_mode<synchronous>, transform_indices = @transform_4, window_bounds = array<i64: 1, 256>}, {transform_indices = @transform_5, window_bounds = array<i64: 256, 256>}]} {
    %c0 = arith.constant 0 : index
    %c0_0 = arith.constant 0 : index
    %0 = vector.load %arg1[%c0, %c0_0] : memref<256x256xf32, #tpu.memory_space<vmem>>, vector<256x256xf32>
    %1 = tpu.transpose %0, [1, 0] : vector<256x256xf32> -> vector<256x256xf32>
    %c0_1 = arith.constant 0 : index
    %c0_2 = arith.constant 0 : index
    %2 = vector.load %arg2[%c0_1, %c0_2] : memref<384x256xf32, #tpu.memory_space<vmem>>, vector<384x256xf32>
    %cst = arith.constant dense<0.000000e+00> : vector<384x256xf32>
    %3 = tpu.matmul %2, %1, %cst {dimension_numbers = #tpu.dot_dimension_numbers<[1], [0], [0], [1], [0, 0, 1, 1], [], []>} : vector<384x256xf32>, vector<256x256xf32>, vector<384x256xf32> -> vector<384x256xf32>
    %c0_3 = arith.constant 0 : index
    %c0_4 = arith.constant 0 : index
    %4 = vector.load %arg7[%c0_3, %c0_4] : memref<384x256xf32, #tpu.memory_space<vmem>>, vector<384x256xf32>
    tpu.vector_store %arg7[%c0_3, %c0_4], %3 {strides = array<i32>} : memref<384x256xf32, #tpu.memory_space<vmem>>, vector<384x256xf32>,
    %c0_5 = arith.constant 0 : index
    %c0_6 = arith.constant 0 : index
    %5 = vector.load %arg7[%c0_5, %c0_6] : memref<384x256xf32, #tpu.memory_space<vmem>>, vector<8x256xf32>
    %c8 = arith.constant 8 : index
    %c0_7 = arith.constant 0 : index
    %6 = vector.load %arg7[%c8, %c0_7] : memref<384x256xf32, #tpu.memory_space<vmem>>, vector<8x256xf32>
    %c16 = arith.constant 16 : index
    %c0_8 = arith.constant 0 : index
    %7 = vector.load %arg7[%c16, %c0_8] : memref<384x256xf32, #tpu.memory_space<vmem>>, vector<8x256xf32>
    %c24 = arith.constant 24 : index
    %c0_9 = arith.constant 0 : index
    %8 = vector.load %arg7[%c24, %c0_9] : memref<384x256xf32, #tpu.memory_space<vmem>>, vector<8x256xf32>
    %c128 = arith.constant 128 : index
    %c0_10 = arith.constant 0 : index
    %9 = vector.load %arg7[%c128, %c0_10] : memref<384x256xf32, #tpu.memory_space<vmem>>, vector<8x256xf32>
    %c136 = arith.constant 136 : index
    %c0_11 = arith.constant 0 : index
    %10 = vector.load %arg7[%c136, %c0_11] : memref<384x256xf32, #tpu.memory_space<vmem>>, vector<8x256xf32>
    %c144 = arith.constant 144 : index
    %c0_12 = arith.constant 0 : index
    %11 = vector.load %arg7[%c144, %c0_12] : memref<384x256xf32, #tpu.memory_space<vmem>>, vector<8x256xf32>
    %c152 = arith.constant 152 : index
    %c0_13 = arith.constant 0 : index
    %12 = vector.load %arg7[%c152, %c0_13] : memref<384x256xf32, #tpu.memory_space<vmem>>, vector<8x256xf32>
    %c256 = arith.constant 256 : index
    %c0_14 = arith.constant 0 : index
    %13 = vector.load %arg7[%c256, %c0_14] : memref<384x256xf32, #tpu.memory_space<vmem>>, vector<8x256xf32>
    %c264 = arith.constant 264 : index
    %c0_15 = arith.constant 0 : index
    %14 = vector.load %arg7[%c264, %c0_15] : memref<384x256xf32, #tpu.memory_space<vmem>>, vector<8x256xf32>
    %c272 = arith.constant 272 : index
    %c0_16 = arith.constant 0 : index
    %15 = vector.load %arg7[%c272, %c0_16] : memref<384x256xf32, #tpu.memory_space<vmem>>, vector<8x256xf32>
    %c280 = arith.constant 280 : index
    %c0_17 = arith.constant 0 : index
    %16 = vector.load %arg7[%c280, %c0_17] : memref<384x256xf32, #tpu.memory_space<vmem>>, vector<8x256xf32>
    %17 = vector.shape_cast %5 : vector<8x256xf32> to vector<8x1x256xf32>
    %18 = vector.shape_cast %9 : vector<8x256xf32> to vector<1x8x256xf32>
    %19 = vector.broadcast %17 : vector<8x1x256xf32> to vector<8x8x256xf32>
    %20 = vector.broadcast %18 : vector<1x8x256xf32> to vector<8x8x256xf32>
    %21 = arith.mulf %19, %20 : vector<8x8x256xf32>
    %22 = vector.shape_cast %6 : vector<8x256xf32> to vector<8x1x256xf32>
    %23 = vector.shape_cast %10 : vector<8x256xf32> to vector<1x8x256xf32>
    %24 = vector.broadcast %22 : vector<8x1x256xf32> to vector<8x8x256xf32>
    %25 = vector.broadcast %23 : vector<1x8x256xf32> to vector<8x8x256xf32>
    %26 = arith.mulf %24, %25 : vector<8x8x256xf32>
    %27 = arith.addf %21, %26 : vector<8x8x256xf32>
    %28 = vector.shape_cast %7 : vector<8x256xf32> to vector<8x1x256xf32>
    %29 = vector.shape_cast %11 : vector<8x256xf32> to vector<1x8x256xf32>
    %30 = vector.broadcast %28 : vector<8x1x256xf32> to vector<8x8x256xf32>
    %31 = vector.broadcast %29 : vector<1x8x256xf32> to vector<8x8x256xf32>
    %32 = arith.mulf %30, %31 : vector<8x8x256xf32>
    %33 = arith.addf %27, %32 : vector<8x8x256xf32>
    %34 = vector.shape_cast %8 : vector<8x256xf32> to vector<8x1x256xf32>
    %35 = vector.shape_cast %12 : vector<8x256xf32> to vector<1x8x256xf32>
    %36 = vector.broadcast %34 : vector<8x1x256xf32> to vector<8x8x256xf32>
    %37 = vector.broadcast %35 : vector<1x8x256xf32> to vector<8x8x256xf32>
    %38 = arith.mulf %36, %37 : vector<8x8x256xf32>
    %39 = arith.addf %33, %38 : vector<8x8x256xf32>
    %c0_18 = arith.constant 0 : index
    %c0_19 = arith.constant 0 : index
    %c0_20 = arith.constant 0 : index
    %c0_21 = arith.constant 0 : index
    %40 = vector.load %arg4[%c0_18, %c0_19, %c0_20, %c0_21] : memref<4x8x8x1xf32, #tpu.memory_space<vmem>>, vector<1x8x8x1xf32>
    %41 = vector.shape_cast %40 : vector<1x8x8x1xf32> to vector<8x8x1xf32>
    %42 = vector.broadcast %41 : vector<8x8x1xf32> to vector<8x8x256xf32>
    %43 = arith.addf %39, %42 : vector<8x8x256xf32>
    %cst_22 = arith.constant dense<0xFF800000> : vector<8x256xf32>
    %44 = vector.multi_reduction <maximumf>, %43, %cst_22 [1] : vector<8x8x256xf32> to vector<8x256xf32>
    %45 = vector.shape_cast %44 : vector<8x256xf32> to vector<8x1x256xf32>
    %46 = vector.broadcast %45 : vector<8x1x256xf32> to vector<8x8x256xf32>
    %47 = arith.subf %43, %46 : vector<8x8x256xf32>
    %48 = math.exp %47 : vector<8x8x256xf32>
    %cst_23 = arith.constant dense<0.000000e+00> : vector<8x256xf32>
    %49 = vector.multi_reduction <add>, %48, %cst_23 [1] : vector<8x8x256xf32> to vector<8x256xf32>
    %50 = vector.shape_cast %49 : vector<8x256xf32> to vector<8x1x256xf32>
    %51 = tpu.reciprocal %50 {approx = true} : vector<8x1x256xf32> -> vector<8x1x256xf32>
    %52 = vector.broadcast %51 : vector<8x1x256xf32> to vector<8x8x256xf32>
    %53 = arith.mulf %48, %52 : vector<8x8x256xf32>
    %54 = vector.shape_cast %13 : vector<8x256xf32> to vector<1x8x256xf32>
    %55 = vector.broadcast %54 : vector<1x8x256xf32> to vector<8x8x256xf32>
    %56 = arith.mulf %53, %55 : vector<8x8x256xf32>
    %cst_24 = arith.constant dense<0.000000e+00> : vector<8x256xf32>
    %57 = vector.multi_reduction <add>, %56, %cst_24 [1] : vector<8x8x256xf32> to vector<8x256xf32>
    %c0_25 = arith.constant 0 : index
    %c0_26 = arith.constant 0 : index
    %58 = vector.load %arg8[%c0_25, %c0_26] : memref<128x256xf32, #tpu.memory_space<vmem>>, vector<8x256xf32>
    tpu.vector_store %arg8[%c0_25, %c0_26], %57 {strides = array<i32>} : memref<128x256xf32, #tpu.memory_space<vmem>>, vector<8x256xf32>,
    %59 = vector.shape_cast %14 : vector<8x256xf32> to vector<1x8x256xf32>
    %60 = vector.broadcast %59 : vector<1x8x256xf32> to vector<8x8x256xf32>
    %61 = arith.mulf %53, %60 : vector<8x8x256xf32>
    %cst_27 = arith.constant dense<0.000000e+00> : vector<8x256xf32>
    %62 = vector.multi_reduction <add>, %61, %cst_27 [1] : vector<8x8x256xf32> to vector<8x256xf32>
    %c8_28 = arith.constant 8 : index
    %c0_29 = arith.constant 0 : index
    %63 = vector.load %arg8[%c8_28, %c0_29] : memref<128x256xf32, #tpu.memory_space<vmem>>, vector<8x256xf32>
    tpu.vector_store %arg8[%c8_28, %c0_29], %62 {strides = array<i32>} : memref<128x256xf32, #tpu.memory_space<vmem>>, vector<8x256xf32>,
    %64 = vector.shape_cast %15 : vector<8x256xf32> to vector<1x8x256xf32>
    %65 = vector.broadcast %64 : vector<1x8x256xf32> to vector<8x8x256xf32>
    %66 = arith.mulf %53, %65 : vector<8x8x256xf32>
    %cst_30 = arith.constant dense<0.000000e+00> : vector<8x256xf32>
    %67 = vector.multi_reduction <add>, %66, %cst_30 [1] : vector<8x8x256xf32> to vector<8x256xf32>
    %c16_31 = arith.constant 16 : index
    %c0_32 = arith.constant 0 : index
    %68 = vector.load %arg8[%c16_31, %c0_32] : memref<128x256xf32, #tpu.memory_space<vmem>>, vector<8x256xf32>
    tpu.vector_store %arg8[%c16_31, %c0_32], %67 {strides = array<i32>} : memref<128x256xf32, #tpu.memory_space<vmem>>, vector<8x256xf32>,
    %69 = vector.shape_cast %16 : vector<8x256xf32> to vector<1x8x256xf32>
    %70 = vector.broadcast %69 : vector<1x8x256xf32> to vector<8x8x256xf32>
    %71 = arith.mulf %53, %70 : vector<8x8x256xf32>
    %cst_33 = arith.constant dense<0.000000e+00> : vector<8x256xf32>
    %72 = vector.multi_reduction <add>, %71, %cst_33 [1] : vector<8x8x256xf32> to vector<8x256xf32>
    %c24_34 = arith.constant 24 : index
    %c0_35 = arith.constant 0 : index
    %73 = vector.load %arg8[%c24_34, %c0_35] : memref<128x256xf32, #tpu.memory_space<vmem>>, vector<8x256xf32>
    tpu.vector_store %arg8[%c24_34, %c0_35], %72 {strides = array<i32>} : memref<128x256xf32, #tpu.memory_space<vmem>>, vector<8x256xf32>,
    %c32 = arith.constant 32 : index
    %c0_36 = arith.constant 0 : index
    %74 = vector.load %arg7[%c32, %c0_36] : memref<384x256xf32, #tpu.memory_space<vmem>>, vector<8x256xf32>
    %c40 = arith.constant 40 : index
    %c0_37 = arith.constant 0 : index
    %75 = vector.load %arg7[%c40, %c0_37] : memref<384x256xf32, #tpu.memory_space<vmem>>, vector<8x256xf32>
    %c48 = arith.constant 48 : index
    %c0_38 = arith.constant 0 : index
    %76 = vector.load %arg7[%c48, %c0_38] : memref<384x256xf32, #tpu.memory_space<vmem>>, vector<8x256xf32>
    %c56 = arith.constant 56 : index
    %c0_39 = arith.constant 0 : index
    %77 = vector.load %arg7[%c56, %c0_39] : memref<384x256xf32, #tpu.memory_space<vmem>>, vector<8x256xf32>
    %c160 = arith.constant 160 : index
    %c0_40 = arith.constant 0 : index
    %78 = vector.load %arg7[%c160, %c0_40] : memref<384x256xf32, #tpu.memory_space<vmem>>, vector<8x256xf32>
    %c168 = arith.constant 168 : index
    %c0_41 = arith.constant 0 : index
    %79 = vector.load %arg7[%c168, %c0_41] : memref<384x256xf32, #tpu.memory_space<vmem>>, vector<8x256xf32>
    %c176 = arith.constant 176 : index
    %c0_42 = arith.constant 0 : index
    %80 = vector.load %arg7[%c176, %c0_42] : memref<384x256xf32, #tpu.memory_space<vmem>>, vector<8x256xf32>
    %c184 = arith.constant 184 : index
    %c0_43 = arith.constant 0 : index
    %81 = vector.load %arg7[%c184, %c0_43] : memref<384x256xf32, #tpu.memory_space<vmem>>, vector<8x256xf32>
    %c288 = arith.constant 288 : index
    %c0_44 = arith.constant 0 : index
    %82 = vector.load %arg7[%c288, %c0_44] : memref<384x256xf32, #tpu.memory_space<vmem>>, vector<8x256xf32>
    %c296 = arith.constant 296 : index
    %c0_45 = arith.constant 0 : index
    %83 = vector.load %arg7[%c296, %c0_45] : memref<384x256xf32, #tpu.memory_space<vmem>>, vector<8x256xf32>
    %c304 = arith.constant 304 : index
    %c0_46 = arith.constant 0 : index
    %84 = vector.load %arg7[%c304, %c0_46] : memref<384x256xf32, #tpu.memory_space<vmem>>, vector<8x256xf32>
    %c312 = arith.constant 312 : index
    %c0_47 = arith.constant 0 : index
    %85 = vector.load %arg7[%c312, %c0_47] : memref<384x256xf32, #tpu.memory_space<vmem>>, vector<8x256xf32>
    %86 = vector.shape_cast %74 : vector<8x256xf32> to vector<8x1x256xf32>
    %87 = vector.shape_cast %78 : vector<8x256xf32> to vector<1x8x256xf32>
    %88 = vector.broadcast %86 : vector<8x1x256xf32> to vector<8x8x256xf32>
    %89 = vector.broadcast %87 : vector<1x8x256xf32> to vector<8x8x256xf32>
    %90 = arith.mulf %88, %89 : vector<8x8x256xf32>
    %91 = vector.shape_cast %75 : vector<8x256xf32> to vector<8x1x256xf32>
    %92 = vector.shape_cast %79 : vector<8x256xf32> to vector<1x8x256xf32>
    %93 = vector.broadcast %91 : vector<8x1x256xf32> to vector<8x8x256xf32>
    %94 = vector.broadcast %92 : vector<1x8x256xf32> to vector<8x8x256xf32>
    %95 = arith.mulf %93, %94 : vector<8x8x256xf32>
    %96 = arith.addf %90, %95 : vector<8x8x256xf32>
    %97 = vector.shape_cast %76 : vector<8x256xf32> to vector<8x1x256xf32>
    %98 = vector.shape_cast %80 : vector<8x256xf32> to vector<1x8x256xf32>
    %99 = vector.broadcast %97 : vector<8x1x256xf32> to vector<8x8x256xf32>
    %100 = vector.broadcast %98 : vector<1x8x256xf32> to vector<8x8x256xf32>
    %101 = arith.mulf %99, %100 : vector<8x8x256xf32>
    %102 = arith.addf %96, %101 : vector<8x8x256xf32>
    %103 = vector.shape_cast %77 : vector<8x256xf32> to vector<8x1x256xf32>
    %104 = vector.shape_cast %81 : vector<8x256xf32> to vector<1x8x256xf32>
    %105 = vector.broadcast %103 : vector<8x1x256xf32> to vector<8x8x256xf32>
    %106 = vector.broadcast %104 : vector<1x8x256xf32> to vector<8x8x256xf32>
    %107 = arith.mulf %105, %106 : vector<8x8x256xf32>
    %108 = arith.addf %102, %107 : vector<8x8x256xf32>
    %c1 = arith.constant 1 : index
    %c0_48 = arith.constant 0 : index
    %c0_49 = arith.constant 0 : index
    %c0_50 = arith.constant 0 : index
    %109 = vector.load %arg4[%c1, %c0_48, %c0_49, %c0_50] : memref<4x8x8x1xf32, #tpu.memory_space<vmem>>, vector<1x8x8x1xf32>
    %110 = vector.shape_cast %109 : vector<1x8x8x1xf32> to vector<8x8x1xf32>
    %111 = vector.broadcast %110 : vector<8x8x1xf32> to vector<8x8x256xf32>
    %112 = arith.addf %108, %111 : vector<8x8x256xf32>
    %cst_51 = arith.constant dense<0xFF800000> : vector<8x256xf32>
    %113 = vector.multi_reduction <maximumf>, %112, %cst_51 [1] : vector<8x8x256xf32> to vector<8x256xf32>
    %114 = vector.shape_cast %113 : vector<8x256xf32> to vector<8x1x256xf32>
    %115 = vector.broadcast %114 : vector<8x1x256xf32> to vector<8x8x256xf32>
    %116 = arith.subf %112, %115 : vector<8x8x256xf32>
    %117 = math.exp %116 : vector<8x8x256xf32>
    %cst_52 = arith.constant dense<0.000000e+00> : vector<8x256xf32>
    %118 = vector.multi_reduction <add>, %117, %cst_52 [1] : vector<8x8x256xf32> to vector<8x256xf32>
    %119 = vector.shape_cast %118 : vector<8x256xf32> to vector<8x1x256xf32>
    %120 = tpu.reciprocal %119 {approx = true} : vector<8x1x256xf32> -> vector<8x1x256xf32>
    %121 = vector.broadcast %120 : vector<8x1x256xf32> to vector<8x8x256xf32>
    %122 = arith.mulf %117, %121 : vector<8x8x256xf32>
    %123 = vector.shape_cast %82 : vector<8x256xf32> to vector<1x8x256xf32>
    %124 = vector.broadcast %123 : vector<1x8x256xf32> to vector<8x8x256xf32>
    %125 = arith.mulf %122, %124 : vector<8x8x256xf32>
    %cst_53 = arith.constant dense<0.000000e+00> : vector<8x256xf32>
    %126 = vector.multi_reduction <add>, %125, %cst_53 [1] : vector<8x8x256xf32> to vector<8x256xf32>
    %c32_54 = arith.constant 32 : index
    %c0_55 = arith.constant 0 : index
    %127 = vector.load %arg8[%c32_54, %c0_55] : memref<128x256xf32, #tpu.memory_space<vmem>>, vector<8x256xf32>
    tpu.vector_store %arg8[%c32_54, %c0_55], %126 {strides = array<i32>} : memref<128x256xf32, #tpu.memory_space<vmem>>, vector<8x256xf32>,
    %128 = vector.shape_cast %83 : vector<8x256xf32> to vector<1x8x256xf32>
    %129 = vector.broadcast %128 : vector<1x8x256xf32> to vector<8x8x256xf32>
    %130 = arith.mulf %122, %129 : vector<8x8x256xf32>
    %cst_56 = arith.constant dense<0.000000e+00> : vector<8x256xf32>
    %131 = vector.multi_reduction <add>, %130, %cst_56 [1] : vector<8x8x256xf32> to vector<8x256xf32>
    %c40_57 = arith.constant 40 : index
    %c0_58 = arith.constant 0 : index
    %132 = vector.load %arg8[%c40_57, %c0_58] : memref<128x256xf32, #tpu.memory_space<vmem>>, vector<8x256xf32>
    tpu.vector_store %arg8[%c40_57, %c0_58], %131 {strides = array<i32>} : memref<128x256xf32, #tpu.memory_space<vmem>>, vector<8x256xf32>,
    %133 = vector.shape_cast %84 : vector<8x256xf32> to vector<1x8x256xf32>
    %134 = vector.broadcast %133 : vector<1x8x256xf32> to vector<8x8x256xf32>
    %135 = arith.mulf %122, %134 : vector<8x8x256xf32>
    %cst_59 = arith.constant dense<0.000000e+00> : vector<8x256xf32>
    %136 = vector.multi_reduction <add>, %135, %cst_59 [1] : vector<8x8x256xf32> to vector<8x256xf32>
    %c48_60 = arith.constant 48 : index
    %c0_61 = arith.constant 0 : index
    %137 = vector.load %arg8[%c48_60, %c0_61] : memref<128x256xf32, #tpu.memory_space<vmem>>, vector<8x256xf32>
    tpu.vector_store %arg8[%c48_60, %c0_61], %136 {strides = array<i32>} : memref<128x256xf32, #tpu.memory_space<vmem>>, vector<8x256xf32>,
    %138 = vector.shape_cast %85 : vector<8x256xf32> to vector<1x8x256xf32>
    %139 = vector.broadcast %138 : vector<1x8x256xf32> to vector<8x8x256xf32>
    %140 = arith.mulf %122, %139 : vector<8x8x256xf32>
    %cst_62 = arith.constant dense<0.000000e+00> : vector<8x256xf32>
    %141 = vector.multi_reduction <add>, %140, %cst_62 [1] : vector<8x8x256xf32> to vector<8x256xf32>
    %c56_63 = arith.constant 56 : index
    %c0_64 = arith.constant 0 : index
    %142 = vector.load %arg8[%c56_63, %c0_64] : memref<128x256xf32, #tpu.memory_space<vmem>>, vector<8x256xf32>
    tpu.vector_store %arg8[%c56_63, %c0_64], %141 {strides = array<i32>} : memref<128x256xf32, #tpu.memory_space<vmem>>, vector<8x256xf32>,
    %c64 = arith.constant 64 : index
    %c0_65 = arith.constant 0 : index
    %143 = vector.load %arg7[%c64, %c0_65] : memref<384x256xf32, #tpu.memory_space<vmem>>, vector<8x256xf32>
    %c72 = arith.constant 72 : index
    %c0_66 = arith.constant 0 : index
    %144 = vector.load %arg7[%c72, %c0_66] : memref<384x256xf32, #tpu.memory_space<vmem>>, vector<8x256xf32>
    %c80 = arith.constant 80 : index
    %c0_67 = arith.constant 0 : index
    %145 = vector.load %arg7[%c80, %c0_67] : memref<384x256xf32, #tpu.memory_space<vmem>>, vector<8x256xf32>
    %c88 = arith.constant 88 : index
    %c0_68 = arith.constant 0 : index
    %146 = vector.load %arg7[%c88, %c0_68] : memref<384x256xf32, #tpu.memory_space<vmem>>, vector<8x256xf32>
    %c192 = arith.constant 192 : index
    %c0_69 = arith.constant 0 : index
    %147 = vector.load %arg7[%c192, %c0_69] : memref<384x256xf32, #tpu.memory_space<vmem>>, vector<8x256xf32>
    %c200 = arith.constant 200 : index
    %c0_70 = arith.constant 0 : index
    %148 = vector.load %arg7[%c200, %c0_70] : memref<384x256xf32, #tpu.memory_space<vmem>>, vector<8x256xf32>
    %c208 = arith.constant 208 : index
    %c0_71 = arith.constant 0 : index
    %149 = vector.load %arg7[%c208, %c0_71] : memref<384x256xf32, #tpu.memory_space<vmem>>, vector<8x256xf32>
    %c216 = arith.constant 216 : index
    %c0_72 = arith.constant 0 : index
    %150 = vector.load %arg7[%c216, %c0_72] : memref<384x256xf32, #tpu.memory_space<vmem>>, vector<8x256xf32>
    %c320 = arith.constant 320 : index
    %c0_73 = arith.constant 0 : index
    %151 = vector.load %arg7[%c320, %c0_73] : memref<384x256xf32, #tpu.memory_space<vmem>>, vector<8x256xf32>
    %c328 = arith.constant 328 : index
    %c0_74 = arith.constant 0 : index
    %152 = vector.load %arg7[%c328, %c0_74] : memref<384x256xf32, #tpu.memory_space<vmem>>, vector<8x256xf32>
    %c336 = arith.constant 336 : index
    %c0_75 = arith.constant 0 : index
    %153 = vector.load %arg7[%c336, %c0_75] : memref<384x256xf32, #tpu.memory_space<vmem>>, vector<8x256xf32>
    %c344 = arith.constant 344 : index
    %c0_76 = arith.constant 0 : index
    %154 = vector.load %arg7[%c344, %c0_76] : memref<384x256xf32, #tpu.memory_space<vmem>>, vector<8x256xf32>
    %155 = vector.shape_cast %143 : vector<8x256xf32> to vector<8x1x256xf32>
    %156 = vector.shape_cast %147 : vector<8x256xf32> to vector<1x8x256xf32>
    %157 = vector.broadcast %155 : vector<8x1x256xf32> to vector<8x8x256xf32>
    %158 = vector.broadcast %156 : vector<1x8x256xf32> to vector<8x8x256xf32>
    %159 = arith.mulf %157, %158 : vector<8x8x256xf32>
    %160 = vector.shape_cast %144 : vector<8x256xf32> to vector<8x1x256xf32>
    %161 = vector.shape_cast %148 : vector<8x256xf32> to vector<1x8x256xf32>
    %162 = vector.broadcast %160 : vector<8x1x256xf32> to vector<8x8x256xf32>
    %163 = vector.broadcast %161 : vector<1x8x256xf32> to vector<8x8x256xf32>
    %164 = arith.mulf %162, %163 : vector<8x8x256xf32>
    %165 = arith.addf %159, %164 : vector<8x8x256xf32>
    %166 = vector.shape_cast %145 : vector<8x256xf32> to vector<8x1x256xf32>
    %167 = vector.shape_cast %149 : vector<8x256xf32> to vector<1x8x256xf32>
    %168 = vector.broadcast %166 : vector<8x1x256xf32> to vector<8x8x256xf32>
    %169 = vector.broadcast %167 : vector<1x8x256xf32> to vector<8x8x256xf32>
    %170 = arith.mulf %168, %169 : vector<8x8x256xf32>
    %171 = arith.addf %165, %170 : vector<8x8x256xf32>
    %172 = vector.shape_cast %146 : vector<8x256xf32> to vector<8x1x256xf32>
    %173 = vector.shape_cast %150 : vector<8x256xf32> to vector<1x8x256xf32>
    %174 = vector.broadcast %172 : vector<8x1x256xf32> to vector<8x8x256xf32>
    %175 = vector.broadcast %173 : vector<1x8x256xf32> to vector<8x8x256xf32>
    %176 = arith.mulf %174, %175 : vector<8x8x256xf32>
    %177 = arith.addf %171, %176 : vector<8x8x256xf32>
    %c2 = arith.constant 2 : index
    %c0_77 = arith.constant 0 : index
    %c0_78 = arith.constant 0 : index
    %c0_79 = arith.constant 0 : index
    %178 = vector.load %arg4[%c2, %c0_77, %c0_78, %c0_79] : memref<4x8x8x1xf32, #tpu.memory_space<vmem>>, vector<1x8x8x1xf32>
    %179 = vector.shape_cast %178 : vector<1x8x8x1xf32> to vector<8x8x1xf32>
    %180 = vector.broadcast %179 : vector<8x8x1xf32> to vector<8x8x256xf32>
    %181 = arith.addf %177, %180 : vector<8x8x256xf32>
    %cst_80 = arith.constant dense<0xFF800000> : vector<8x256xf32>
    %182 = vector.multi_reduction <maximumf>, %181, %cst_80 [1] : vector<8x8x256xf32> to vector<8x256xf32>
    %183 = vector.shape_cast %182 : vector<8x256xf32> to vector<8x1x256xf32>
    %184 = vector.broadcast %183 : vector<8x1x256xf32> to vector<8x8x256xf32>
    %185 = arith.subf %181, %184 : vector<8x8x256xf32>
    %186 = math.exp %185 : vector<8x8x256xf32>
    %cst_81 = arith.constant dense<0.000000e+00> : vector<8x256xf32>
    %187 = vector.multi_reduction <add>, %186, %cst_81 [1] : vector<8x8x256xf32> to vector<8x256xf32>
    %188 = vector.shape_cast %187 : vector<8x256xf32> to vector<8x1x256xf32>
    %189 = tpu.reciprocal %188 {approx = true} : vector<8x1x256xf32> -> vector<8x1x256xf32>
    %190 = vector.broadcast %189 : vector<8x1x256xf32> to vector<8x8x256xf32>
    %191 = arith.mulf %186, %190 : vector<8x8x256xf32>
    %192 = vector.shape_cast %151 : vector<8x256xf32> to vector<1x8x256xf32>
    %193 = vector.broadcast %192 : vector<1x8x256xf32> to vector<8x8x256xf32>
    %194 = arith.mulf %191, %193 : vector<8x8x256xf32>
    %cst_82 = arith.constant dense<0.000000e+00> : vector<8x256xf32>
    %195 = vector.multi_reduction <add>, %194, %cst_82 [1] : vector<8x8x256xf32> to vector<8x256xf32>
    %c64_83 = arith.constant 64 : index
    %c0_84 = arith.constant 0 : index
    %196 = vector.load %arg8[%c64_83, %c0_84] : memref<128x256xf32, #tpu.memory_space<vmem>>, vector<8x256xf32>
    tpu.vector_store %arg8[%c64_83, %c0_84], %195 {strides = array<i32>} : memref<128x256xf32, #tpu.memory_space<vmem>>, vector<8x256xf32>,
    %197 = vector.shape_cast %152 : vector<8x256xf32> to vector<1x8x256xf32>
    %198 = vector.broadcast %197 : vector<1x8x256xf32> to vector<8x8x256xf32>
    %199 = arith.mulf %191, %198 : vector<8x8x256xf32>
    %cst_85 = arith.constant dense<0.000000e+00> : vector<8x256xf32>
    %200 = vector.multi_reduction <add>, %199, %cst_85 [1] : vector<8x8x256xf32> to vector<8x256xf32>
    %c72_86 = arith.constant 72 : index
    %c0_87 = arith.constant 0 : index
    %201 = vector.load %arg8[%c72_86, %c0_87] : memref<128x256xf32, #tpu.memory_space<vmem>>, vector<8x256xf32>
    tpu.vector_store %arg8[%c72_86, %c0_87], %200 {strides = array<i32>} : memref<128x256xf32, #tpu.memory_space<vmem>>, vector<8x256xf32>,
    %202 = vector.shape_cast %153 : vector<8x256xf32> to vector<1x8x256xf32>
    %203 = vector.broadcast %202 : vector<1x8x256xf32> to vector<8x8x256xf32>
    %204 = arith.mulf %191, %203 : vector<8x8x256xf32>
    %cst_88 = arith.constant dense<0.000000e+00> : vector<8x256xf32>
    %205 = vector.multi_reduction <add>, %204, %cst_88 [1] : vector<8x8x256xf32> to vector<8x256xf32>
    %c80_89 = arith.constant 80 : index
    %c0_90 = arith.constant 0 : index
    %206 = vector.load %arg8[%c80_89, %c0_90] : memref<128x256xf32, #tpu.memory_space<vmem>>, vector<8x256xf32>
    tpu.vector_store %arg8[%c80_89, %c0_90], %205 {strides = array<i32>} : memref<128x256xf32, #tpu.memory_space<vmem>>, vector<8x256xf32>,
    %207 = vector.shape_cast %154 : vector<8x256xf32> to vector<1x8x256xf32>
    %208 = vector.broadcast %207 : vector<1x8x256xf32> to vector<8x8x256xf32>
    %209 = arith.mulf %191, %208 : vector<8x8x256xf32>
    %cst_91 = arith.constant dense<0.000000e+00> : vector<8x256xf32>
    %210 = vector.multi_reduction <add>, %209, %cst_91 [1] : vector<8x8x256xf32> to vector<8x256xf32>
    %c88_92 = arith.constant 88 : index
    %c0_93 = arith.constant 0 : index
    %211 = vector.load %arg8[%c88_92, %c0_93] : memref<128x256xf32, #tpu.memory_space<vmem>>, vector<8x256xf32>
    tpu.vector_store %arg8[%c88_92, %c0_93], %210 {strides = array<i32>} : memref<128x256xf32, #tpu.memory_space<vmem>>, vector<8x256xf32>,
    %c96 = arith.constant 96 : index
    %c0_94 = arith.constant 0 : index
    %212 = vector.load %arg7[%c96, %c0_94] : memref<384x256xf32, #tpu.memory_space<vmem>>, vector<8x256xf32>
    %c104 = arith.constant 104 : index
    %c0_95 = arith.constant 0 : index
    %213 = vector.load %arg7[%c104, %c0_95] : memref<384x256xf32, #tpu.memory_space<vmem>>, vector<8x256xf32>
    %c112 = arith.constant 112 : index
    %c0_96 = arith.constant 0 : index
    %214 = vector.load %arg7[%c112, %c0_96] : memref<384x256xf32, #tpu.memory_space<vmem>>, vector<8x256xf32>
    %c120 = arith.constant 120 : index
    %c0_97 = arith.constant 0 : index
    %215 = vector.load %arg7[%c120, %c0_97] : memref<384x256xf32, #tpu.memory_space<vmem>>, vector<8x256xf32>
    %c224 = arith.constant 224 : index
    %c0_98 = arith.constant 0 : index
    %216 = vector.load %arg7[%c224, %c0_98] : memref<384x256xf32, #tpu.memory_space<vmem>>, vector<8x256xf32>
    %c232 = arith.constant 232 : index
    %c0_99 = arith.constant 0 : index
    %217 = vector.load %arg7[%c232, %c0_99] : memref<384x256xf32, #tpu.memory_space<vmem>>, vector<8x256xf32>
    %c240 = arith.constant 240 : index
    %c0_100 = arith.constant 0 : index
    %218 = vector.load %arg7[%c240, %c0_100] : memref<384x256xf32, #tpu.memory_space<vmem>>, vector<8x256xf32>
    %c248 = arith.constant 248 : index
    %c0_101 = arith.constant 0 : index
    %219 = vector.load %arg7[%c248, %c0_101] : memref<384x256xf32, #tpu.memory_space<vmem>>, vector<8x256xf32>
    %c352 = arith.constant 352 : index
    %c0_102 = arith.constant 0 : index
    %220 = vector.load %arg7[%c352, %c0_102] : memref<384x256xf32, #tpu.memory_space<vmem>>, vector<8x256xf32>
    %c360 = arith.constant 360 : index
    %c0_103 = arith.constant 0 : index
    %221 = vector.load %arg7[%c360, %c0_103] : memref<384x256xf32, #tpu.memory_space<vmem>>, vector<8x256xf32>
    %c368 = arith.constant 368 : index
    %c0_104 = arith.constant 0 : index
    %222 = vector.load %arg7[%c368, %c0_104] : memref<384x256xf32, #tpu.memory_space<vmem>>, vector<8x256xf32>
    %c376 = arith.constant 376 : index
    %c0_105 = arith.constant 0 : index
    %223 = vector.load %arg7[%c376, %c0_105] : memref<384x256xf32, #tpu.memory_space<vmem>>, vector<8x256xf32>
    %224 = vector.shape_cast %212 : vector<8x256xf32> to vector<8x1x256xf32>
    %225 = vector.shape_cast %216 : vector<8x256xf32> to vector<1x8x256xf32>
    %226 = vector.broadcast %224 : vector<8x1x256xf32> to vector<8x8x256xf32>
    %227 = vector.broadcast %225 : vector<1x8x256xf32> to vector<8x8x256xf32>
    %228 = arith.mulf %226, %227 : vector<8x8x256xf32>
    %229 = vector.shape_cast %213 : vector<8x256xf32> to vector<8x1x256xf32>
    %230 = vector.shape_cast %217 : vector<8x256xf32> to vector<1x8x256xf32>
    %231 = vector.broadcast %229 : vector<8x1x256xf32> to vector<8x8x256xf32>
    %232 = vector.broadcast %230 : vector<1x8x256xf32> to vector<8x8x256xf32>
    %233 = arith.mulf %231, %232 : vector<8x8x256xf32>
    %234 = arith.addf %228, %233 : vector<8x8x256xf32>
    %235 = vector.shape_cast %214 : vector<8x256xf32> to vector<8x1x256xf32>
    %236 = vector.shape_cast %218 : vector<8x256xf32> to vector<1x8x256xf32>
    %237 = vector.broadcast %235 : vector<8x1x256xf32> to vector<8x8x256xf32>
    %238 = vector.broadcast %236 : vector<1x8x256xf32> to vector<8x8x256xf32>
    %239 = arith.mulf %237, %238 : vector<8x8x256xf32>
    %240 = arith.addf %234, %239 : vector<8x8x256xf32>
    %241 = vector.shape_cast %215 : vector<8x256xf32> to vector<8x1x256xf32>
    %242 = vector.shape_cast %219 : vector<8x256xf32> to vector<1x8x256xf32>
    %243 = vector.broadcast %241 : vector<8x1x256xf32> to vector<8x8x256xf32>
    %244 = vector.broadcast %242 : vector<1x8x256xf32> to vector<8x8x256xf32>
    %245 = arith.mulf %243, %244 : vector<8x8x256xf32>
    %246 = arith.addf %240, %245 : vector<8x8x256xf32>
    %c3 = arith.constant 3 : index
    %c0_106 = arith.constant 0 : index
    %c0_107 = arith.constant 0 : index
    %c0_108 = arith.constant 0 : index
    %247 = vector.load %arg4[%c3, %c0_106, %c0_107, %c0_108] : memref<4x8x8x1xf32, #tpu.memory_space<vmem>>, vector<1x8x8x1xf32>
    %248 = vector.shape_cast %247 : vector<1x8x8x1xf32> to vector<8x8x1xf32>
    %249 = vector.broadcast %248 : vector<8x8x1xf32> to vector<8x8x256xf32>
    %250 = arith.addf %246, %249 : vector<8x8x256xf32>
    %cst_109 = arith.constant dense<0xFF800000> : vector<8x256xf32>
    %251 = vector.multi_reduction <maximumf>, %250, %cst_109 [1] : vector<8x8x256xf32> to vector<8x256xf32>
    %252 = vector.shape_cast %251 : vector<8x256xf32> to vector<8x1x256xf32>
    %253 = vector.broadcast %252 : vector<8x1x256xf32> to vector<8x8x256xf32>
    %254 = arith.subf %250, %253 : vector<8x8x256xf32>
    %255 = math.exp %254 : vector<8x8x256xf32>
    %cst_110 = arith.constant dense<0.000000e+00> : vector<8x256xf32>
    %256 = vector.multi_reduction <add>, %255, %cst_110 [1] : vector<8x8x256xf32> to vector<8x256xf32>
    %257 = vector.shape_cast %256 : vector<8x256xf32> to vector<8x1x256xf32>
    %258 = tpu.reciprocal %257 {approx = true} : vector<8x1x256xf32> -> vector<8x1x256xf32>
    %259 = vector.broadcast %258 : vector<8x1x256xf32> to vector<8x8x256xf32>
    %260 = arith.mulf %255, %259 : vector<8x8x256xf32>
    %261 = vector.shape_cast %220 : vector<8x256xf32> to vector<1x8x256xf32>
    %262 = vector.broadcast %261 : vector<1x8x256xf32> to vector<8x8x256xf32>
    %263 = arith.mulf %260, %262 : vector<8x8x256xf32>
    %cst_111 = arith.constant dense<0.000000e+00> : vector<8x256xf32>
    %264 = vector.multi_reduction <add>, %263, %cst_111 [1] : vector<8x8x256xf32> to vector<8x256xf32>
    %c96_112 = arith.constant 96 : index
    %c0_113 = arith.constant 0 : index
    %265 = vector.load %arg8[%c96_112, %c0_113] : memref<128x256xf32, #tpu.memory_space<vmem>>, vector<8x256xf32>
    tpu.vector_store %arg8[%c96_112, %c0_113], %264 {strides = array<i32>} : memref<128x256xf32, #tpu.memory_space<vmem>>, vector<8x256xf32>,
    %266 = vector.shape_cast %221 : vector<8x256xf32> to vector<1x8x256xf32>
    %267 = vector.broadcast %266 : vector<1x8x256xf32> to vector<8x8x256xf32>
    %268 = arith.mulf %260, %267 : vector<8x8x256xf32>
    %cst_114 = arith.constant dense<0.000000e+00> : vector<8x256xf32>
    %269 = vector.multi_reduction <add>, %268, %cst_114 [1] : vector<8x8x256xf32> to vector<8x256xf32>
    %c104_115 = arith.constant 104 : index
    %c0_116 = arith.constant 0 : index
    %270 = vector.load %arg8[%c104_115, %c0_116] : memref<128x256xf32, #tpu.memory_space<vmem>>, vector<8x256xf32>
    tpu.vector_store %arg8[%c104_115, %c0_116], %269 {strides = array<i32>} : memref<128x256xf32, #tpu.memory_space<vmem>>, vector<8x256xf32>,
    %271 = vector.shape_cast %222 : vector<8x256xf32> to vector<1x8x256xf32>
    %272 = vector.broadcast %271 : vector<1x8x256xf32> to vector<8x8x256xf32>
    %273 = arith.mulf %260, %272 : vector<8x8x256xf32>
    %cst_117 = arith.constant dense<0.000000e+00> : vector<8x256xf32>
    %274 = vector.multi_reduction <add>, %273, %cst_117 [1] : vector<8x8x256xf32> to vector<8x256xf32>
    %c112_118 = arith.constant 112 : index
    %c0_119 = arith.constant 0 : index
    %275 = vector.load %arg8[%c112_118, %c0_119] : memref<128x256xf32, #tpu.memory_space<vmem>>, vector<8x256xf32>
    tpu.vector_store %arg8[%c112_118, %c0_119], %274 {strides = array<i32>} : memref<128x256xf32, #tpu.memory_space<vmem>>, vector<8x256xf32>,
    %276 = vector.shape_cast %223 : vector<8x256xf32> to vector<1x8x256xf32>
    %277 = vector.broadcast %276 : vector<1x8x256xf32> to vector<8x8x256xf32>
    %278 = arith.mulf %260, %277 : vector<8x8x256xf32>
    %cst_120 = arith.constant dense<0.000000e+00> : vector<8x256xf32>
    %279 = vector.multi_reduction <add>, %278, %cst_120 [1] : vector<8x8x256xf32> to vector<8x256xf32>
    %c120_121 = arith.constant 120 : index
    %c0_122 = arith.constant 0 : index
    %280 = vector.load %arg8[%c120_121, %c0_122] : memref<128x256xf32, #tpu.memory_space<vmem>>, vector<8x256xf32>
    tpu.vector_store %arg8[%c120_121, %c0_122], %279 {strides = array<i32>} : memref<128x256xf32, #tpu.memory_space<vmem>>, vector<8x256xf32>,
    %c0_123 = arith.constant 0 : index
    %c0_124 = arith.constant 0 : index
    %281 = vector.load %arg8[%c0_123, %c0_124] : memref<128x256xf32, #tpu.memory_space<vmem>>, vector<128x256xf32>
    %282 = tpu.transpose %281, [1, 0] : vector<128x256xf32> -> vector<256x128xf32>
    %c0_125 = arith.constant 0 : index
    %c0_126 = arith.constant 0 : index
    %283 = vector.load %arg3[%c0_125, %c0_126] : memref<128x256xf32, #tpu.memory_space<vmem>>, vector<128x256xf32>
    %cst_127 = arith.constant dense<0.000000e+00> : vector<256x256xf32>
    %284 = tpu.matmul %282, %283, %cst_127 {dimension_numbers = #tpu.dot_dimension_numbers<[1], [0], [0], [1], [0, 0, 1, 1], [], []>} : vector<256x128xf32>, vector<128x256xf32>, vector<256x256xf32> -> vector<256x256xf32>
    %c0_128 = arith.constant 0 : index
    %c0_129 = arith.constant 0 : index
    %285 = vector.load %arg5[%c0_128, %c0_129] : memref<1x256xf32, #tpu.memory_space<vmem>>, vector<1x256xf32>
    %286 = vector.broadcast %285 : vector<1x256xf32> to vector<256x256xf32>
    %287 = arith.addf %284, %286 : vector<256x256xf32>
    %c0_130 = arith.constant 0 : index
    %c0_131 = arith.constant 0 : index
    %288 = vector.load %arg6[%c0_130, %c0_131] : memref<256x256xf32, #tpu.memory_space<vmem>>, vector<256x256xf32>
    tpu.vector_store %arg6[%c0_130, %c0_131], %287 {strides = array<i32>} : memref<256x256xf32, #tpu.memory_space<vmem>>, vector<256x256xf32>,
    return
  }
  func.func @transform_0(%arg0: i32) -> (i32, i32) {
    %c0_i32 = arith.constant 0 : i32
    %c0_i32_0 = arith.constant 0 : i32
    return %arg0, %c0_i32 : i32, i32
  }
  func.func @transform_1(%arg0: i32) -> (i32, i32) {
    %c0_i32 = arith.constant 0 : i32
    %c0_i32_0 = arith.constant 0 : i32
    %c0_i32_1 = arith.constant 0 : i32
    return %c0_i32, %c0_i32_0 : i32, i32
  }
  func.func @transform_2(%arg0: i32) -> (i32, i32) {
    %c0_i32 = arith.constant 0 : i32
    %c0_i32_0 = arith.constant 0 : i32
    %c0_i32_1 = arith.constant 0 : i32
    return %c0_i32, %c0_i32_0 : i32, i32
  }
  func.func @transform_3(%arg0: i32) -> (i32, i32, i32, i32) {
    %c0_i32 = arith.constant 0 : i32
    %c0_i32_0 = arith.constant 0 : i32
    %c0_i32_1 = arith.constant 0 : i32
    %c0_i32_2 = arith.constant 0 : i32
    %c0_i32_3 = arith.constant 0 : i32
    return %c0_i32, %c0_i32_0, %c0_i32_1, %c0_i32_2 : i32, i32, i32, i32
  }
  func.func @transform_4(%arg0: i32) -> (i32, i32) {
    %c0_i32 = arith.constant 0 : i32
    %c0_i32_0 = arith.constant 0 : i32
    %c0_i32_1 = arith.constant 0 : i32
    return %c0_i32, %c0_i32_0 : i32, i32
  }
  func.func @transform_5(%arg0: i32) -> (i32, i32) {
    %c0_i32 = arith.constant 0 : i32
    %c0_i32_0 = arith.constant 0 : i32
    return %arg0, %c0_i32 : i32, i32
  }
}

</mosaic_0001>

<bundles_post_ra>
// kernel: tpu_custom_call.1
= control target key start
LH: loop header
LB: loop body
LE: loop exit
PB: predicated region body
PF: predicated region fallthrough
CT: control target
= control target key end

     0   :  { %10 = vsyncpa [#allocation5], 0  ;;  %s13511_s0 = inlined_call_operand.hbm [shape: f32[512,256], index: 0, kind: input, shape index: {}]   ;;  %s13512_s1 = inlined_call_operand.hbm [shape: f32[384,256], index: 1, kind: input, shape index: {}]   ;;  %s13513_s2 = inlined_call_operand.vmem [shape: f32[128,256], index: 2, kind: input, shape index: {}]   ;;  %s13514_s3 = inlined_call_operand.vmem [shape: f32[4,8,8,1], index: 3, kind: input, shape index: {}]   ;;  %s13515_s4 = inlined_call_operand.vmem [shape: f32[1,256], index: 4, kind: input, shape index: {}]   ;;  %s13516_s5 = inlined_call_operand.hbm [shape: f32[512,256], index: 5, kind: output, shape index: {}]  }
   0x1   :  { %12 = vsyncpa [#allocation5 + $0x1], 0 }
   0x2   :  { %13 = vsyncpa [#allocation8], 0 }
   0x3   :  { %14 = vsyncpa [#allocation6], 0 }
   0x4   :  { %16 = vsyncpa [#allocation6 + $0x1], 0  ;;  %s8371_s18 = smov 0   ;;  %s8373_s19 = smov 0  }
   0x5   :  { %s8375_s20 = smov 0   ;;  %s8377_s21 = smov 0  }
   0x6 LB: > { %s8392_s22 = sadd.s32 4294967295, %s8329_s21   ;;  %s7775_s23 = sadd.s32 4294967294, %s8329_s21   ;;  %s8329_s21 = sphi %s8377_s21, %s15085_s21   ;;  %s8325_s20 = sphi %s8375_s20, %s15084_s20   ;;  %s8321_s19 = sphi %s8373_s19, %s15083_s19   ;;  %s8317_s18 = sphi %s8371_s18, %s15082_s18  }
   0x7   : > { %p42_p0 = scmp.ne.s32.totalorder %s8321_s19, %s8317_s18  ;;  %p13517_p1 = scmp.eq.s32.totalorder %s8392_s22, 0 }
   0x8   : > { %p156_p3 = scmp.eq.s32.totalorder %s7775_s23, 1  ;;  %p7776_p5 = scmp.ge.s32.totalorder %s8329_s21, 1 }
   0x9   : > { %p8401_p4 = por %p13517_p1, %p42_p0  ;;  %p163_p7 = scmp.lt.s32.totalorder %s8329_s21, 3 }
   0xa   : > { %p8406_p6 = por %p156_p3, %p42_p0  ;;  %s8331_s27 = smov [#allocation7]  }
   0xb   : > { %s14048_s24 = scalar_select %p8401_p4, 1, 0 }
   0xc   : > { %s14049_s25 = scalar_select %p8406_p6, 1, 0 }
   0xd   : > { %p8411_p8 = pnand %p7776_p5, %p163_p7  ;;  %s175_s28 = sshll.u32 %s8331_s27, 4  ;;  %s176_s28 = int_to_ptr.vmem [resolvable:$true] %s175_s28 }
   0xe   : > { %s8425_s30 = sadd.s32 1, %s8329_s21   ;;  %s29_s6 = sadd.s32 1, %s8325_s20 }
   0xf   : > { %s14050_s26 = scalar_select %p8411_p8, 1, 0 }
  0x10   : > { %p7893_p9 = pneg %p8411_p8  ;;  %s26_s7 = ssub.s32 %s8329_s21, %s8425_s30 }
  0x11   : > { %s8218_s8 = scalar_lea.vmem %s176_s28, 12288  ;;  %p8226_p5 = scmp.lt.s32.totalorder %s176_s28, %s176_s28 }
  0x12   : > { %p8420_p11 = pnand %p7893_p9, %p13517_p1  ;;  %p8219_p13 = scmp.ne.s32.totalorder %s176_s28, %s8218_s8 }
  0x13   : > { %p8227_p7 = scmp.lt.s32.totalorder %s8218_s8, %s8218_s8 }
  0x14   : > { %p8209_p12 = pneg %p8420_p11 }
  0x15   : > { %p8228_p10 = por %p8227_p7, %p8226_p5 }
  0x16   : > { %p8221_p0 = pnand %p8219_p13, %p8209_p12 }
  0x18   : > { %p8222_p3 = pneg %p8221_p0 }
  0x1a   : > { %p8229_p2 = pnand %p8228_p10, %p8222_p3 }
  0x1c   : > { %8232 = shalt.err (!%p8229_p2)
}
  0x1d   : > { %s13518_s9 = smov 256   ;;  %s8333_s10 = smov 16  }
  0x1e   : > { %7896 = dma.hbm_to_vmem [thread:$0]  (!%p8420_p11), %s13512_s1, 12288, %s176_s28, [#allocation8], %s13518_s9, %s13518_s9, %s8333_s10  }
  0x1f   : > { %p27_p2 = scmp.eq.s32.totalorder %s26_s7, 0  ;;  %p36_p9 = scmp.ne.s32.totalorder %s8325_s20, %s8321_s19 }
  0x20   : > { %p37_p10 = scmp.eq.s32.totalorder %s8329_s21, 0  ;;  %p7906_p12 = scmp.lt.s32.totalorder %s8329_s21, 2 }
  0x21   : > { %s8445_s13 = scalar_select %p27_p2, %s8325_s20, %s29_s6  }
  0x22   : > { %p38_p13 = por %p37_p10, %p36_p9  ;;  %p14052_p0 = scmp.eq.s32.totalorder %s8392_s22, 1 }
  0x23   : > { %s198_s15 = sand.u32 1, %s8325_s20   ;;  %s7818_s16 = sshll.u32 %s8329_s21, 13 }
  0x24   : > { %p8449_p3 = por %p14052_p0, %p36_p9  ;;  %s7779_s17 = sshll.u32 %s198_s15, 9 }
  0x25   : > { %s8458_s29 = scalar_lea.hbm %s13511_s0, %s7818_s16  ;;  %s202_s28 = scalar_lea.vmem [#allocation4], %s7779_s17 }
  0x26   : > { %s14053_s14 = scalar_select %p8449_p3, 1, 0 }
  0x27   : > { %s210_s6 = sshll.u32 %s202_s28, 4  ;;  %p8460_p11 = pnand %p7906_p12, %p38_p13  ;;  %s8464_s6 = int_to_ptr.vmem [resolvable:$true] %s210_s6 }
  0x28   : > { %s8466_s8 = scalar_lea.sflag [#allocation5], %s198_s15  ;;  %s8233_s11 = scalar_lea.hbm %s8458_s29, 8192 }
  0x29   : > { %p8234_p5 = scmp.ne.s32.totalorder %s8458_s29, %s8233_s11  ;;  %p8235_p7 = pneg %p8460_p11 }
  0x2a   : > { %s8238_s17 = scalar_lea.hbm %s13511_s0, 16384  ;;  %p8239_p10 = scmp.lt.s32.totalorder %s8458_s29, %s13511_s0 }
  0x2b   : > { %p8236_p2 = pnand %p8235_p7, %p8234_p5  ;;  %p8240_p12 = scmp.lt.s32.totalorder %s8238_s17, %s8233_s11 }
  0x2d   : > { %p8237_p9 = pneg %p8236_p2  ;;  %p8241_p13 = por %p8240_p12, %p8239_p10 }
  0x2f   : > { %p8242_p0 = pnand %p8241_p13, %p8237_p9 }
  0x31   : > { %8245 = shalt.err (!%p8242_p0)
}
  0x32   : > { %s8246_s15 = scalar_lea.vmem %s8464_s6, 8192  ;;  %s8334_s28 = smov [#allocation4]  }
  0x33   : > { %p8247_p1 = scmp.ne.s32.totalorder %s8464_s6, %s8246_s15  ;;  %s8251_s9 = sshll.u32 %s8334_s28, 4  ;;  %s8252_s9 = int_to_ptr.vmem [resolvable:$false] %s8251_s9 }
  0x34   : > { %s8253_s12 = scalar_lea.vmem %s8252_s9, 16384  ;;  %p8254_p2 = scmp.lt.s32.totalorder %s8464_s6, %s8252_s9 }
  0x35   : > { %p8249_p6 = pnand %p8247_p1, %p8235_p7  ;;  %p8255_p3 = scmp.lt.s32.totalorder %s8253_s12, %s8246_s15 }
  0x37   : > { %p8250_p5 = pneg %p8249_p6  ;;  %p8256_p4 = por %p8255_p3, %p8254_p2 }
  0x39   : > { %p8257_p8 = pnand %p8256_p4, %p8250_p5 }
  0x3b   : > { %8260 = shalt.err (!%p8257_p8)
}
  0x3c   : > { %s14055_s11 = smov 256   ;;  %p14056_p1 = scmp.ne.s32.totalorder %s14050_s26, 0 }
  0x3d   : > { %7900 = dma.hbm_to_vmem [thread:$0]  (!%p8460_p11), %s8458_s29, 8192, %s8464_s6, %s8466_s8, %s14055_s11, %s14055_s11, %s8333_s10  }
  0x3e   : > { %222 = sbr.rel (%p14056_p1) target bundleno = 1842 (0x732), region = 40 }
  0x43   : > { %s8493_s16 = sand.u32 1, %s8321_s19   ;;  %p14057_p4 = scmp.ne.s32.totalorder %s14048_s24, 0 }
  0x44   : > { %s7784_s9 = sshll.u32 %s8493_s16, 9  ;;  %s225_s17 = scalar_lea.sflag [#allocation5], %s8493_s16 }
  0x45   : > { %s8499_s7 = scalar_lea.vmem [#allocation4], %s7784_s9 }
  0x46   : > { %8304 = dma.done.wait (%p14057_p4), %s225_s17, 8192  }
  0x47   : > { %8306 = vsyncadd (%p14057_p4), %s225_s17, 4294959104  ;;  %p14058_p6 = scmp.eq.s32.totalorder %s8392_s22, 0 }
  0x49   : > { %8308 = dma.done.wait (%p14058_p6), [#allocation8], 12288   ;;  %p14059_p8 = pmov %p14058_p6 }
  0x4a   : > { %v292_v0 = vld [vmem:[%s8499_s7 + $0xf8] sm:$0xff]  ;;  %v291_v1 = vld [vmem:[%s8499_s7 + $0xf0] sm:$0xff]  ;;  %v290_v2 = vld [vmem:[%s8499_s7 + $0xe8] sm:$0xff]  ;;  %v8335_v46 = vmov 0   ;;  %vm1998_vm0 = vcmask 1041409   ;;  %vm2000_vm1 = vcmask 1042434  }
  0x4b   : > { %8310 = vsyncadd (%p14059_p8), [#allocation8], 4294955008  ;;  %421 = vmatprep.subr.mxu0 %v292_v0  ;;  %7821 = vmatprep.subr.mxu1 %v292_v0  ;;  %v289_v3 = vld [vmem:[%s8499_s7 + $0xe0] sm:$0xff]  ;;  %v288_v4 = vld [vmem:[%s8499_s7 + $0xd8] sm:$0xff]  ;;  %vm2002_vm2 = vcmask 1043459   ;;  %vm2004_vm3 = vcmask 1044484  }
  0x4c   : > { %422 = vmatpush1.xpose.msra.mxu0 %v291_v1  ;;  %7853 = vmatpush1.xpose.msra.mxu1 %v291_v1  ;;  %v287_v5 = vld [vmem:[%s8499_s7 + $0xd0] sm:$0xff]  ;;  %v286_v6 = vld [vmem:[%s8499_s7 + $0xc8] sm:$0xff]  ;;  %v285_v7 = vld [vmem:[%s8499_s7 + $0xc0] sm:$0xff]  ;;  %vm2006_vm4 = vcmask 1045509   ;;  %vm2008_vm5 = vcmask 1046534   ;;  %vm2010_vm6 = vcmask 1047559  }
  0x4d   : > { %423 = vmatprep.subr.mxu0 %v290_v2  ;;  %7822 = vmatprep.subr.mxu1 %v290_v2  ;;  %v284_v8 = vld [vmem:[%s8499_s7 + $0xb8] sm:$0xff]  ;;  %v283_v9 = vld [vmem:[%s8499_s7 + $0xb0] sm:$0xff]  ;;  %v282_v10 = vld [vmem:[%s8499_s7 + $0xa8] sm:$0xff]  ;;  %s13332_s27 = scalar_lea.vmem [#allocation9], %s7784_s9  ;;  %s7820_s9 = sshll.u32 %s8392_s22, 13 }
  0x4e   : > { %v281_v11 = vld [vmem:[%s8499_s7 + $0xa0] sm:$0xff]  ;;  %v280_v12 = vld [vmem:[%s8499_s7 + $0x98] sm:$0xff]  ;;  %v326_v13 = vld [vmem:[#allocation7 + $0x8] sm:$0xff]  ;;  %7949 = vset.pattern.permute.xlu0 %v8335_v46  ;;  %7950 = vset.pattern.permute.xlu1 %v8335_v46  ;;  %s7692_s15 = sshll.u32 %s13332_s27, 4  ;;  %s13463_s12 = scalar_lea.hbm %s13516_s5, %s7820_s9  ;;  %s13465_s15 = int_to_ptr.vmem [resolvable:$true] %s7692_s15 }
  0x4f   : > { %485 = vmatprep.mubr.f32.mxu0 %v326_v13  ;;  %v279_v14 = vld [vmem:[%s8499_s7 + $0x90] sm:$0xff]  ;;  %v278_v15 = vld [vmem:[%s8499_s7 + $0x88] sm:$0xff]  ;;  %v277_v16 = vld [vmem:[%s8499_s7 + $0x80] sm:$0xff]  ;;  %s7678_s22 = scalar_lea.sflag [#allocation6], %s8493_s16  ;;  %s8261_s11 = scalar_lea.vmem %s13465_s15, 8192 }
  0x50   : > { %424 = vmatpush1.xpose.msra.mxu0 %v289_v3  ;;  %7854 = vmatpush1.xpose.msra.mxu1 %v289_v3  ;;  %v276_v17 = vld [vmem:[%s8499_s7 + $0x78] sm:$0xff]  ;;  %v275_v18 = vld [vmem:[%s8499_s7 + $0x70] sm:$0xff]  ;;  %v274_v19 = vld [vmem:[%s8499_s7 + $0x68] sm:$0xff]  ;;  %p8262_p3 = scmp.ne.s32.totalorder %s13465_s15, %s8261_s11  ;;  %p15079_p11 = scmp.ne.s32.totalorder %s14053_s14, 0 }
  0x51   : > { %425 = vmatprep.subr.mxu0 %v288_v4  ;;  %7823 = vmatprep.subr.mxu1 %v288_v4  ;;  %v273_v20 = vld [vmem:[%s8499_s7 + $0x60] sm:$0xff]  ;;  %v272_v21 = vld [vmem:[%s8499_s7 + $0x58] sm:$0xff]  ;;  %v271_v22 = vld [vmem:[%s8499_s7 + $0x50] sm:$0xff]  ;;  %s8338_s17 = smov [#allocation9]  }
  0x52   : > { %v270_v23 = vld [vmem:[%s8499_s7 + $0x48] sm:$0xff]  ;;  %v269_v24 = vld [vmem:[%s8499_s7 + $0x40] sm:$0xff]  ;;  %v268_v25 = vld [vmem:[%s8499_s7 + $0x38] sm:$0xff]  ;;  %p8263_p7 = pnand %p8262_p3, %p15079_p11  ;;  %s8265_s24 = sshll.u32 %s8338_s17, 4  ;;  %s8266_s24 = int_to_ptr.vmem [resolvable:$false] %s8265_s24 }
  0x53   : > { %v267_v26 = vld [vmem:[%s8499_s7 + $0x30] sm:$0xff]  ;;  %v266_v27 = vld [vmem:[%s8499_s7 + $0x28] sm:$0xff]  ;;  %v265_v28 = vld [vmem:[%s8499_s7 + $0x20] sm:$0xff]  ;;  %s8267_s26 = scalar_lea.vmem %s8266_s24, 16384  ;;  %p8268_p10 = scmp.lt.s32.totalorder %s13465_s15, %s8266_s24 }
  0x54   : > { %426 = vmatpush1.xpose.msra.mxu0 %v287_v5  ;;  %7855 = vmatpush1.xpose.msra.mxu1 %v287_v5  ;;  %v264_v29 = vld [vmem:[%s8499_s7 + $0x18] sm:$0xff]  ;;  %v263_v30 = vld [vmem:[%s8499_s7 + $0x10] sm:$0xff]  ;;  %v262_v31 = vld [vmem:[%s8499_s7 + $0x8] sm:$0xff]  ;;  %p8264_p9 = pneg %p8263_p7  ;;  %p8269_p12 = scmp.lt.s32.totalorder %s8267_s26, %s8261_s11 }
  0x55   : > { %427 = vmatprep.subr.mxu0 %v286_v6  ;;  %7824 = vmatprep.subr.mxu1 %v286_v6  ;;  %v261_v32 = vld [vmem:[%s8499_s7] sm:$0xff]  ;;  %v324_v33 = vld [vmem:[%s8499_s7 + $0x1f8] sm:$0xff]  ;;  %v323_v34 = vld [vmem:[%s8499_s7 + $0x1f0] sm:$0xff] }
  0x56   : > { %v322_v35 = vld [vmem:[%s8499_s7 + $0x1e8] sm:$0xff]  ;;  %v321_v36 = vld [vmem:[%s8499_s7 + $0x1e0] sm:$0xff]  ;;  %v320_v37 = vld [vmem:[%s8499_s7 + $0x1d8] sm:$0xff]  ;;  %p8270_p13 = por %p8269_p12, %p8268_p10 }
  0x57   : > { %v319_v38 = vld [vmem:[%s8499_s7 + $0x1d0] sm:$0xff]  ;;  %v318_v39 = vld [vmem:[%s8499_s7 + $0x1c8] sm:$0xff]  ;;  %v317_v40 = vld [vmem:[%s8499_s7 + $0x1c0] sm:$0xff] }
  0x58   : > { %428 = vmatpush1.xpose.msra.mxu0 %v285_v7  ;;  %7856 = vmatpush1.xpose.msra.mxu1 %v285_v7  ;;  %v316_v41 = vld [vmem:[%s8499_s7 + $0x1b8] sm:$0xff]  ;;  %v315_v42 = vld [vmem:[%s8499_s7 + $0x1b0] sm:$0xff]  ;;  %v314_v43 = vld [vmem:[%s8499_s7 + $0x1a8] sm:$0xff]  ;;  %p8271_p0 = pnand %p8270_p13, %p8264_p9 }
  0x59   : > { %429 = vmatprep.subr.mxu0 %v284_v8  ;;  %7825 = vmatprep.subr.mxu1 %v284_v8  ;;  %v1534_v44 = vld [vmem:[%s13514_s3] sm:$0xff]  ;;  %v1536_v45 = vld [vmem:[%s13514_s3 + $0x10] sm:$0xff]  ;;  %v312_v48 = vld [vmem:[%s8499_s7 + $0x198] sm:$0xff] }
  0x5a   : > { %v313_v47 = vld [vmem:[%s8499_s7 + $0x1a0] sm:$0xff]  ;;  %1544 = vperm.xlu0 %7949, %v1534_v44   ;;  %1554 = vperm.xlu1 %7950, %v1536_v45   ;;  %v1535_v49 = vld [vmem:[%s13514_s3 + $0x8] sm:$0xff]  ;;  %v1537_v50 = vld [vmem:[%s13514_s3 + $0x18] sm:$0xff] }
  0x5b   : > { %v311_v51 = vld [vmem:[%s8499_s7 + $0x190] sm:$0xff]  ;;  %v310_v52 = vld [vmem:[%s8499_s7 + $0x188] sm:$0xff]  ;;  %v1538_v53 = vld [vmem:[%s13514_s3 + $0x20] sm:$0xff] }
  0x5c   : > { %430 = vmatpush1.xpose.msra.mxu0 %v283_v9  ;;  %7857 = vmatpush1.xpose.msra.mxu1 %v283_v9  ;;  %v1539_v54 = vld [vmem:[%s13514_s3 + $0x28] sm:$0xff]  ;;  %v309_v55 = vld [vmem:[%s8499_s7 + $0x180] sm:$0xff]  ;;  %v308_v56 = vld [vmem:[%s8499_s7 + $0x178] sm:$0xff] }
  0x5d   : > { %431 = vmatprep.subr.mxu0 %v282_v10  ;;  %7826 = vmatprep.subr.mxu1 %v282_v10  ;;  %v1540_v57 = vld [vmem:[%s13514_s3 + $0x30] sm:$0xff]  ;;  %v1541_v58 = vld [vmem:[%s13514_s3 + $0x38] sm:$0xff]  ;;  %v306_v60 = vld [vmem:[%s8499_s7 + $0x168] sm:$0xff] }
  0x5e   : > { %1549 = vperm.xlu0 %7949, %v1535_v49   ;;  %1559 = vperm.xlu1 %7950, %v1537_v50   ;;  %v307_v59 = vld [vmem:[%s8499_s7 + $0x170] sm:$0xff]  ;;  %v7787_v61 = vld [vmem:[%s13514_s3 + $0x40] sm:$0xff]  ;;  %v7788_v62 = vld [vmem:[%s13514_s3 + $0x48] sm:$0xff] }
  0x5f   : > { %v305_v63 = vld [vmem:[%s8499_s7 + $0x160] sm:$0xff]  ;;  %v304_v0 = vld [vmem:[%s8499_s7 + $0x158] sm:$0xff]  ;;  %v7789_v1 = vld [vmem:[%s13514_s3 + $0x50] sm:$0xff] }
  0x60   : > { %432 = vmatpush1.xpose.msra.mxu0 %v281_v11  ;;  %7858 = vmatpush1.xpose.msra.mxu1 %v281_v11  ;;  %v7790_v2 = vld [vmem:[%s13514_s3 + $0x58] sm:$0xff]  ;;  %v303_v3 = vld [vmem:[%s8499_s7 + $0x150] sm:$0xff]  ;;  %v302_v4 = vld [vmem:[%s8499_s7 + $0x148] sm:$0xff] }
  0x61   : > { %433 = vmatprep.subr.mxu0 %v280_v12  ;;  %7827 = vmatprep.subr.mxu1 %v280_v12  ;;  %v7791_v5 = vld [vmem:[%s13514_s3 + $0x60] sm:$0xff]  ;;  %v7792_v6 = vld [vmem:[%s13514_s3 + $0x68] sm:$0xff]  ;;  %v300_v8 = vld [vmem:[%s8499_s7 + $0x138] sm:$0xff] }
  0x62   : > { %1564 = vperm.xlu0 %7949, %v1538_v53   ;;  %1569 = vperm.xlu1 %7950, %v1539_v54   ;;  %v301_v7 = vld [vmem:[%s8499_s7 + $0x140] sm:$0xff]  ;;  %v7793_v9 = vld [vmem:[%s13514_s3 + $0x70] sm:$0xff]  ;;  %v7794_v10 = vld [vmem:[%s13514_s3 + $0x78] sm:$0xff] }
  0x63   : > { %v299_v11 = vld [vmem:[%s8499_s7 + $0x130] sm:$0xff]  ;;  %v298_v12 = vld [vmem:[%s8499_s7 + $0x128] sm:$0xff]  ;;  %v7795_v13 = vld [vmem:[%s13514_s3 + $0x80] sm:$0xff] }
  0x64   : > { %434 = vmatpush1.xpose.msra.mxu0 %v279_v14  ;;  %7859 = vmatpush1.xpose.msra.mxu1 %v279_v14  ;;  %v7796_v14 = vld [vmem:[%s13514_s3 + $0x88] sm:$0xff]  ;;  %v335_v44 = vld [vmem:[#allocation7 + $0x50] sm:$0xff]  ;;  %v337_v46 = vld [vmem:[#allocation7 + $0x60] sm:$0xff] }
  0x65   : > { %435 = vmatprep.subr.mxu0 %v278_v15  ;;  %7828 = vmatprep.subr.mxu1 %v278_v15  ;;  %v297_v15 = vld [vmem:[%s8499_s7 + $0x120] sm:$0xff]  ;;  %v338_v45 = vld [vmem:[#allocation7 + $0x68] sm:$0xff]  ;;  %v344_v54 = vld [vmem:[#allocation7 + $0x98] sm:$0xff] }
  0x66   : > { %1574 = vperm.xlu0 %7949, %v1540_v57   ;;  %1579 = vperm.xlu1 %7950, %v1541_v58   ;;  %v342_v49 = vld [vmem:[#allocation7 + $0x88] sm:$0xff]  ;;  %v341_v53 = vld [vmem:[#allocation7 + $0x80] sm:$0xff]  ;;  %v343_v57 = vld [vmem:[#allocation7 + $0x90] sm:$0xff] }
  0x67   : > { %v406_v50 = vld [vmem:[#allocation7 + $0x288] sm:$0xff] }
  0x68   : > { %436 = vmatpush1.xpose.msra.mxu0 %v277_v16  ;;  %7860 = vmatpush1.xpose.msra.mxu1 %v277_v16  ;;  %v296_v16 = vld [vmem:[%s8499_s7 + $0x118] sm:$0xff]  ;;  %v346_v58 = vld [vmem:[#allocation7 + $0xa8] sm:$0xff] }
  0x69   : > { %437 = vmatprep.subr.mxu0 %v276_v17  ;;  %7829 = vmatprep.subr.mxu1 %v276_v17  ;;  %v7797_v17 = vld [vmem:[%s13514_s3 + $0x90] sm:$0xff] }
  0x6a   : > { %3136 = vperm.xlu0 %7949, %v7787_v61   ;;  %3141 = vperm.xlu1 %7950, %v7788_v62   ;;  %v345_v61 = vld [vmem:[#allocation7 + $0xa0] sm:$0xff]  ;;  %v348_v62 = vld [vmem:[#allocation7 + $0xb8] sm:$0xff] }
  0x6b   : > { %725 = vmatprep.mubr.f32.mxu1 %v406_v50  ;;  %v389_v50 = vld [vmem:[#allocation7 + $0x200] sm:$0xff] }
  0x6c   : > { %438 = vmatpush1.xpose.msra.mxu0 %v275_v18  ;;  %7861 = vmatpush1.xpose.msra.mxu1 %v275_v18  ;;  %v7798_v18 = vld [vmem:[%s13514_s3 + $0x98] sm:$0xff] }
  0x6d   : > { %439 = vmatprep.subr.mxu0 %v274_v19  ;;  %7830 = vmatprep.subr.mxu1 %v274_v19  ;;  %v295_v19 = vld [vmem:[%s8499_s7 + $0x110] sm:$0xff] }
  0x6e   : > { %3146 = vperm.xlu0 %7949, %v7789_v1   ;;  %3151 = vperm.xlu1 %7950, %v7790_v2   ;;  %v347_v1 = vld [vmem:[#allocation7 + $0xb0] sm:$0xff]  ;;  %v350_v2 = vld [vmem:[#allocation7 + $0xc8] sm:$0xff] }
  0x70   : > { %440 = vmatpush1.xpose.msra.mxu0 %v273_v20  ;;  %7862 = vmatpush1.xpose.msra.mxu1 %v273_v20  ;;  %v294_v20 = vld [vmem:[%s8499_s7 + $0x108] sm:$0xff] }
  0x71   : > { %441 = vmatprep.subr.mxu0 %v272_v21  ;;  %7831 = vmatprep.subr.mxu1 %v272_v21  ;;  %v7799_v21 = vld [vmem:[%s13514_s3 + $0xa0] sm:$0xff] }
  0x72   : > { %3156 = vperm.xlu0 %7949, %v7791_v5   ;;  %3161 = vperm.xlu1 %7950, %v7792_v6   ;;  %v349_v5 = vld [vmem:[#allocation7 + $0xc0] sm:$0xff]  ;;  %v352_v6 = vld [vmem:[#allocation7 + $0xd8] sm:$0xff] }
  0x74   : > { %442 = vmatpush1.xpose.msra.mxu0 %v271_v22  ;;  %7863 = vmatpush1.xpose.msra.mxu1 %v271_v22  ;;  %v7800_v22 = vld [vmem:[%s13514_s3 + $0xa8] sm:$0xff] }
  0x75   : > { %443 = vmatprep.subr.mxu0 %v270_v23  ;;  %7832 = vmatprep.subr.mxu1 %v270_v23  ;;  %v293_v23 = vld [vmem:[%s8499_s7 + $0x100] sm:$0xff] }
  0x76   : > { %3166 = vperm.xlu0 %7949, %v7793_v9   ;;  %3171 = vperm.xlu1 %7950, %v7794_v10   ;;  %v351_v9 = vld [vmem:[#allocation7 + $0xd0] sm:$0xff]  ;;  %v354_v10 = vld [vmem:[#allocation7 + $0xe8] sm:$0xff] }
  0x78   : > { %444 = vmatpush1.xpose.msra.mxu0 %v269_v24  ;;  %7864 = vmatpush1.xpose.msra.mxu1 %v269_v24  ;;  %v7801_v24 = vld [vmem:[%s13514_s3 + $0xb0] sm:$0xff] }
  0x79   : > { %445 = vmatprep.subr.mxu0 %v268_v25  ;;  %7833 = vmatprep.subr.mxu1 %v268_v25  ;;  %v7802_v25 = vld [vmem:[%s13514_s3 + $0xb8] sm:$0xff] }
  0x7a   : > { %4721 = vperm.xlu0 %7949, %v7795_v13   ;;  %4726 = vperm.xlu1 %7950, %v7796_v14   ;;  %v353_v13 = vld [vmem:[#allocation7 + $0xe0] sm:$0xff]  ;;  %v356_v14 = vld [vmem:[#allocation7 + $0xf8] sm:$0xff] }
  0x7c   : > { %446 = vmatpush1.xpose.msra.mxu0 %v267_v26  ;;  %7865 = vmatpush1.xpose.msra.mxu1 %v267_v26  ;;  %v325_v26 = vld [vmem:[#allocation7] sm:$0xff] }
  0x7d   : > { %447 = vmatprep.subr.mxu0 %v266_v27  ;;  %7834 = vmatprep.subr.mxu1 %v266_v27  ;;  %v328_v27 = vld [vmem:[#allocation7 + $0x18] sm:$0xff] }
  0x7e   : > { %4731 = vperm.xlu0 %7949, %v7797_v17   ;;  %4736 = vperm.xlu1 %7950, %v7798_v18   ;;  %v358_v17 = vld [vmem:[#allocation7 + $0x108] sm:$0xff]  ;;  %v357_v18 = vld [vmem:[#allocation7 + $0x100] sm:$0xff] }
  0x80   : > { %448 = vmatpush1.xpose.msra.mxu0 %v265_v28  ;;  %7866 = vmatpush1.xpose.msra.mxu1 %v265_v28  ;;  %v7803_v28 = vld [vmem:[%s13514_s3 + $0xc0] sm:$0xff] }
  0x81   : > { %449 = vmatprep.subr.mxu0 %v264_v29  ;;  %7835 = vmatprep.subr.mxu1 %v264_v29  ;;  %v7804_v29 = vld [vmem:[%s13514_s3 + $0xc8] sm:$0xff] }
  0x82   : > { %4741 = vperm.xlu0 %7949, %v7799_v21   ;;  %4746 = vperm.xlu1 %7950, %v7800_v22   ;;  %v362_v21 = vld [vmem:[#allocation7 + $0x128] sm:$0xff]  ;;  %v361_v22 = vld [vmem:[#allocation7 + $0x120] sm:$0xff] }
  0x84   : > { %450 = vmatpush1.xpose.msra.mxu0 %v263_v30  ;;  %7867 = vmatpush1.xpose.msra.mxu1 %v263_v30  ;;  %v327_v30 = vld [vmem:[#allocation7 + $0x10] sm:$0xff] }
  0x85   : > { %451 = vmatprep.subr.mxu0 %v262_v31  ;;  %7836 = vmatprep.subr.mxu1 %v262_v31  ;;  %v330_v31 = vld [vmem:[#allocation7 + $0x28] sm:$0xff] }
  0x86   : > { %4751 = vperm.xlu0 %7949, %v7801_v24   ;;  %4756 = vperm.xlu1 %7950, %v7802_v25   ;;  %v363_v24 = vld [vmem:[#allocation7 + $0x130] sm:$0xff]  ;;  %v366_v25 = vld [vmem:[#allocation7 + $0x148] sm:$0xff] }
  0x88   : > { %452 = vmatpush1.xpose.msra.mxu0 %v261_v32  ;;  %7868 = vmatpush1.xpose.msra.mxu1 %v261_v32  ;;  %v7805_v32 = vld [vmem:[%s13514_s3 + $0xd0] sm:$0xff] }
  0x89   : > { %453 = vmatprep.subr.mxu0 %v324_v33  ;;  %7837 = vmatprep.subr.mxu1 %v324_v33  ;;  %v7806_v33 = vld [vmem:[%s13514_s3 + $0xd8] sm:$0xff] }
  0x8a   : > { %6306 = vperm.xlu0 %7949, %v7803_v28   ;;  %6311 = vperm.xlu1 %7950, %v7804_v29   ;;  %v367_v28 = vld [vmem:[#allocation7 + $0x150] sm:$0xff]  ;;  %v370_v29 = vld [vmem:[#allocation7 + $0x168] sm:$0xff] }
  0x8c   : > { %454 = vmatpush2.xpose.msra.mxu0 %v323_v34  ;;  %7869 = vmatpush2.xpose.msra.mxu1 %v323_v34  ;;  %v329_v34 = vld [vmem:[#allocation7 + $0x20] sm:$0xff] }
  0x8d   : > { %455 = vmatprep.subr.mxu0 %v322_v35  ;;  %7838 = vmatprep.subr.mxu1 %v322_v35  ;;  %v332_v35 = vld [vmem:[#allocation7 + $0x38] sm:$0xff] }
  0x8e   : > { %6316 = vperm.xlu0 %7949, %v7805_v32   ;;  %6321 = vperm.xlu1 %7950, %v7806_v33   ;;  %v371_v32 = vld [vmem:[#allocation7 + $0x170] sm:$0xff]  ;;  %v374_v33 = vld [vmem:[#allocation7 + $0x188] sm:$0xff] }
  0x90   : > { %456 = vmatpush2.xpose.msra.mxu0 %v321_v36  ;;  %7870 = vmatpush2.xpose.msra.mxu1 %v321_v36  ;;  %v7807_v36 = vld [vmem:[%s13514_s3 + $0xe0] sm:$0xff] }
  0x91   : > { %457 = vmatprep.subr.mxu0 %v320_v37  ;;  %7839 = vmatprep.subr.mxu1 %v320_v37  ;;  %v7808_v37 = vld [vmem:[%s13514_s3 + $0xe8] sm:$0xff] }
  0x92   : > { %6326 = vperm.xlu0 %7949, %v7807_v36   ;;  %6331 = vperm.xlu1 %7950, %v7808_v37   ;;  %v375_v36 = vld [vmem:[#allocation7 + $0x190] sm:$0xff]  ;;  %v378_v37 = vld [vmem:[#allocation7 + $0x1a8] sm:$0xff] }
  0x94   : > { %458 = vmatpush2.xpose.msra.mxu0 %v319_v38  ;;  %7871 = vmatpush2.xpose.msra.mxu1 %v319_v38  ;;  %v331_v38 = vld [vmem:[#allocation7 + $0x30] sm:$0xff] }
  0x95   : > { %459 = vmatprep.subr.mxu0 %v318_v39  ;;  %7840 = vmatprep.subr.mxu1 %v318_v39  ;;  %v334_v39 = vld [vmem:[#allocation7 + $0x48] sm:$0xff] }
  0x98   : > { %460 = vmatpush2.xpose.msra.mxu0 %v317_v40  ;;  %7872 = vmatpush2.xpose.msra.mxu1 %v317_v40  ;;  %v7809_v40 = vld [vmem:[%s13514_s3 + $0xf0] sm:$0xff] }
  0x99   : > { %461 = vmatprep.subr.mxu0 %v316_v41  ;;  %7841 = vmatprep.subr.mxu1 %v316_v41  ;;  %v7810_v41 = vld [vmem:[%s13514_s3 + $0xf8] sm:$0xff] }
  0x9a   : > { %6336 = vperm.xlu0 %7949, %v7809_v40   ;;  %6341 = vperm.xlu1 %7950, %v7810_v41   ;;  %v379_v40 = vld [vmem:[#allocation7 + $0x1b0] sm:$0xff]  ;;  %v382_v41 = vld [vmem:[#allocation7 + $0x1c8] sm:$0xff] }
  0x9c   : > { %462 = vmatpush2.xpose.msra.mxu0 %v315_v42  ;;  %7873 = vmatpush2.xpose.msra.mxu1 %v315_v42  ;;  %v333_v42 = vld [vmem:[#allocation7 + $0x40] sm:$0xff] }
  0x9d   : > { %463 = vmatprep.subr.mxu0 %v314_v43  ;;  %7842 = vmatprep.subr.mxu1 %v314_v43  ;;  %v336_v43 = vld [vmem:[#allocation7 + $0x58] sm:$0xff] }
  0xa0   : > { %464 = vmatpush2.xpose.msra.mxu0 %v313_v47  ;;  %7874 = vmatpush2.xpose.msra.mxu1 %v313_v47  ;;  %v340_v47 = vld [vmem:[#allocation7 + $0x78] sm:$0xff] }
  0xa1   : > { %465 = vmatprep.subr.mxu0 %v312_v48  ;;  %7843 = vmatprep.subr.mxu1 %v312_v48  ;;  %v339_v48 = vld [vmem:[#allocation7 + $0x70] sm:$0xff] }
  0xa4   : > { %466 = vmatpush2.xpose.msra.mxu0 %v311_v51  ;;  %7875 = vmatpush2.xpose.msra.mxu1 %v311_v51  ;;  %v405_v51 = vld [vmem:[#allocation7 + $0x280] sm:$0xff] }
  0xa5   : > { %467 = vmatprep.subr.mxu0 %v310_v52  ;;  %7844 = vmatprep.subr.mxu1 %v310_v52  ;;  %v408_v52 = vld [vmem:[#allocation7 + $0x298] sm:$0xff] }
  0xa8   : > { %468 = vmatpush2.xpose.msra.mxu0 %v309_v55  ;;  %7876 = vmatpush2.xpose.msra.mxu1 %v309_v55  ;;  %v407_v55 = vld [vmem:[#allocation7 + $0x290] sm:$0xff] }
  0xa9   : > { %469 = vmatprep.subr.mxu0 %v308_v56  ;;  %7845 = vmatprep.subr.mxu1 %v308_v56  ;;  %v410_v56 = vld [vmem:[#allocation7 + $0x2a8] sm:$0xff] }
  0xac   : > { %470 = vmatpush2.xpose.msra.mxu0 %v307_v59  ;;  %7877 = vmatpush2.xpose.msra.mxu1 %v307_v59  ;;  %v409_v59 = vld [vmem:[#allocation7 + $0x2a0] sm:$0xff] }
  0xad   : > { %471 = vmatprep.subr.mxu0 %v306_v60  ;;  %7846 = vmatprep.subr.mxu1 %v306_v60  ;;  %v412_v60 = vld [vmem:[#allocation7 + $0x2b8] sm:$0xff] }
  0xb0   : > { %472 = vmatpush2.xpose.msra.mxu0 %v305_v63  ;;  %7878 = vmatpush2.xpose.msra.mxu1 %v305_v63  ;;  %v411_v63 = vld [vmem:[#allocation7 + $0x2b0] sm:$0xff] }
  0xb1   : > { %473 = vmatprep.subr.mxu0 %v304_v0  ;;  %7847 = vmatprep.subr.mxu1 %v304_v0  ;;  %v414_v0 = vld [vmem:[#allocation7 + $0x2c8] sm:$0xff] }
  0xb4   : > { %474 = vmatpush2.xpose.msra.mxu0 %v303_v3  ;;  %7879 = vmatpush2.xpose.msra.mxu1 %v303_v3  ;;  %v413_v3 = vld [vmem:[#allocation7 + $0x2c0] sm:$0xff] }
  0xb5   : > { %475 = vmatprep.subr.mxu0 %v302_v4  ;;  %7848 = vmatprep.subr.mxu1 %v302_v4  ;;  %v416_v4 = vld [vmem:[#allocation7 + $0x2d8] sm:$0xff] }
  0xb8   : > { %476 = vmatpush2.xpose.msra.mxu0 %v301_v7  ;;  %7880 = vmatpush2.xpose.msra.mxu1 %v301_v7  ;;  %v415_v7 = vld [vmem:[#allocation7 + $0x2d0] sm:$0xff] }
  0xb9   : > { %477 = vmatprep.subr.mxu0 %v300_v8  ;;  %7849 = vmatprep.subr.mxu1 %v300_v8  ;;  %v418_v8 = vld [vmem:[#allocation7 + $0x2e8] sm:$0xff] }
  0xbc   : > { %478 = vmatpush2.xpose.msra.mxu0 %v299_v11  ;;  %7881 = vmatpush2.xpose.msra.mxu1 %v299_v11  ;;  %v417_v11 = vld [vmem:[#allocation7 + $0x2e0] sm:$0xff] }
  0xbd   : > { %479 = vmatprep.subr.mxu0 %v298_v12  ;;  %7850 = vmatprep.subr.mxu1 %v298_v12  ;;  %v420_v12 = vld [vmem:[#allocation7 + $0x2f8] sm:$0xff] }
  0xc0   : > { %480 = vmatpush2.xpose.msra.mxu0 %v297_v15  ;;  %7882 = vmatpush2.xpose.msra.mxu1 %v297_v15  ;;  %v419_v15 = vld [vmem:[#allocation7 + $0x2f0] sm:$0xff] }
  0xc1   : > { %481 = vmatprep.subr.mxu0 %v296_v16  ;;  %7851 = vmatprep.subr.mxu1 %v296_v16  ;;  %v355_v16 = vld [vmem:[#allocation7 + $0xf0] sm:$0xff] }
  0xc4   : > { %482 = vmatpush2.xpose.msra.mxu0 %v295_v19  ;;  %7883 = vmatpush2.xpose.msra.mxu1 %v295_v19  ;;  %v360_v19 = vld [vmem:[#allocation7 + $0x118] sm:$0xff] }
  0xc5   : > { %483 = vmatprep.subr.mxu0 %v294_v20  ;;  %7852 = vmatprep.subr.mxu1 %v294_v20  ;;  %v359_v20 = vld [vmem:[#allocation7 + $0x110] sm:$0xff] }
  0xc8   : > { %484 = vmatpush2.xpose.msra.mxu0 %v293_v23  ;;  %7884 = vmatpush2.xpose.msra.mxu1 %v293_v23  ;;  %v364_v23 = vld [vmem:[#allocation7 + $0x138] sm:$0xff] }
  0xcb   : > { %486 = vmatmul.mubr.f32.vlgmr.msra.gmra.mxu0 %v325_v26  ;;  %726 = vmatmul.mubr.f32.vlgmr.msra.gmra.mxu1 %v405_v51  ;;  %v365_v26 = vld [vmem:[#allocation7 + $0x140] sm:$0xff]  ;;  %v392_v51 = vld [vmem:[#allocation7 + $0x218] sm:$0xff] }
  0xcc   : > { %491 = vmatprep.mubr.f32.mxu0 %v328_v27  ;;  %731 = vmatprep.mubr.f32.mxu1 %v408_v52  ;;  %v368_v27 = vld [vmem:[#allocation7 + $0x158] sm:$0xff]  ;;  %v391_v52 = vld [vmem:[#allocation7 + $0x210] sm:$0xff] }
  0xcf   : > { %492 = vmatmul.mubr.f32.gmra.mxu0 %v327_v30  ;;  %732 = vmatmul.mubr.f32.gmra.mxu1 %v407_v55  ;;  %v369_v30 = vld [vmem:[#allocation7 + $0x160] sm:$0xff]  ;;  %v396_v55 = vld [vmem:[#allocation7 + $0x238] sm:$0xff] }
  0xd0   : > { %497 = vmatprep.mubr.f32.mxu0 %v330_v31  ;;  %737 = vmatprep.mubr.f32.mxu1 %v410_v56  ;;  %v372_v31 = vld [vmem:[#allocation7 + $0x178] sm:$0xff]  ;;  %v395_v56 = vld [vmem:[#allocation7 + $0x230] sm:$0xff] }
  0xd3   : > { %498 = vmatmul.mubr.f32.gmra.mxu0 %v329_v34  ;;  %738 = vmatmul.mubr.f32.gmra.mxu1 %v409_v59  ;;  %v373_v34 = vld [vmem:[#allocation7 + $0x180] sm:$0xff]  ;;  %v400_v59 = vld [vmem:[#allocation7 + $0x258] sm:$0xff] }
  0xd4   : > { %503 = vmatprep.mubr.f32.mxu0 %v332_v35  ;;  %743 = vmatprep.mubr.f32.mxu1 %v412_v60  ;;  %v376_v35 = vld [vmem:[#allocation7 + $0x198] sm:$0xff]  ;;  %v399_v60 = vld [vmem:[#allocation7 + $0x250] sm:$0xff] }
  0xd7   : > { %504 = vmatmul.mubr.f32.gmra.mxu0 %v331_v38  ;;  %744 = vmatmul.mubr.f32.gmra.mxu1 %v411_v63  ;;  %v377_v38 = vld [vmem:[#allocation7 + $0x1a0] sm:$0xff]  ;;  %v404_v63 = vld [vmem:[#allocation7 + $0x278] sm:$0xff] }
  0xd8   : > { %509 = vmatprep.mubr.f32.mxu0 %v334_v39  ;;  %749 = vmatprep.mubr.f32.mxu1 %v414_v0  ;;  %v380_v39 = vld [vmem:[#allocation7 + $0x1b8] sm:$0xff]  ;;  %v403_v0 = vld [vmem:[#allocation7 + $0x270] sm:$0xff] }
  0xdb   : > { %510 = vmatmul.mubr.f32.gmra.mxu0 %v333_v42  ;;  %750 = vmatmul.mubr.f32.gmra.mxu1 %v413_v3  ;;  %v381_v42 = vld [vmem:[#allocation7 + $0x1c0] sm:$0xff]  ;;  %v901_v3 = vlaneseq }
  0xdc   : > { %515 = vmatprep.mubr.f32.mxu0 %v336_v43  ;;  %755 = vmatprep.mubr.f32.mxu1 %v416_v4  ;;  %v384_v43 = vld [vmem:[#allocation7 + $0x1d8] sm:$0xff] }
  0xdf   : > { %516 = vmatmul.mubr.f32.gmra.mxu0 %v335_v44  ;;  %756 = vmatmul.mubr.f32.gmra.mxu1 %v415_v7  ;;  %v383_v44 = vld [vmem:[#allocation7 + $0x1d0] sm:$0xff] }
  0xe0   : > { %521 = vmatprep.mubr.f32.mxu0 %v338_v45  ;;  %761 = vmatprep.mubr.f32.mxu1 %v418_v8  ;;  %v386_v45 = vld [vmem:[#allocation7 + $0x1e8] sm:$0xff] }
  0xe3   : > { %522 = vmatmul.mubr.f32.gmra.mxu0 %v337_v46  ;;  %762 = vmatmul.mubr.f32.gmra.mxu1 %v417_v11  ;;  %v385_v46 = vld [vmem:[#allocation7 + $0x1e0] sm:$0xff] }
  0xe4   : > { %527 = vmatprep.mubr.f32.mxu0 %v340_v47  ;;  %767 = vmatprep.mubr.f32.mxu1 %v420_v12  ;;  %v388_v47 = vld [vmem:[#allocation7 + $0x1f8] sm:$0xff] }
  0xe7   : > { %528 = vmatmul.mubr.f32.gmra.mxu0 %v339_v48  ;;  %768 = vmatmul.mubr.f32.gmra.mxu1 %v419_v15  ;;  %v387_v48 = vld [vmem:[#allocation7 + $0x1f0] sm:$0xff] }
  0xe8   : > { %533 = vmatprep.mubr.f32.mxu0 %v342_v49  ;;  %v390_v49 = vld [vmem:[#allocation7 + $0x208] sm:$0xff] }
  0xeb   : > { %534 = vmatmul.mubr.f32.gmra.mxu0 %v341_v53  ;;  %v394_v53 = vld [vmem:[#allocation7 + $0x228] sm:$0xff] }
  0xec   : > { %539 = vmatprep.mubr.f32.mxu0 %v344_v54  ;;  %v393_v54 = vld [vmem:[#allocation7 + $0x220] sm:$0xff] }
  0xef   : > { %540 = vmatmul.mubr.f32.gmra.mxu0 %v343_v57  ;;  %v398_v57 = vld [vmem:[#allocation7 + $0x248] sm:$0xff] }
  0xf0   : > { %545 = vmatprep.mubr.f32.mxu0 %v346_v58  ;;  %v397_v58 = vld [vmem:[#allocation7 + $0x240] sm:$0xff] }
  0xf3   : > { %546 = vmatmul.mubr.f32.gmra.mxu0 %v345_v61  ;;  %v402_v61 = vld [vmem:[#allocation7 + $0x268] sm:$0xff] }
  0xf4   : > { %551 = vmatprep.mubr.f32.mxu0 %v348_v62  ;;  %v401_v62 = vld [vmem:[#allocation7 + $0x260] sm:$0xff] }
  0xf7   : > { %552 = vmatmul.mubr.f32.gmra.mxu0 %v347_v1  ;;  %v8336_v1 = vmov 1966171168  }
  0xf8   : > { %557 = vmatprep.mubr.f32.mxu0 %v350_v2  ;;  %v899_v2 = vunpack.c.l.s4 %v8336_v1 }
  0xfa   : > { %v900_v4 = vunpack.c.0.s8 %v899_v2 }
  0xfb   : > { %558 = vmatmul.mubr.f32.gmra.mxu0 %v349_v5  ;;  %v902_v5 = vshrl.u32 %v901_v3, 7 }
  0xfc   : > { %563 = vmatprep.mubr.f32.mxu0 %v352_v6 }
  0xfd   : > { %v8669_v7 = vsub.s32 %v900_v4, %v902_v5  ;;  %v8675_v15 = vsub.s32 1, %v902_v5 }
  0xff   : > { %564 = vmatmul.mubr.f32.gmra.mxu0 %v351_v9  ;;  %14061 = vst [vmem:[#allocation14_spill] sm:$0xff] %v8675_v15 }
 0x100   : > { %569 = vmatprep.mubr.f32.mxu0 %v354_v10 }
 0x103   : > { %570 = vmatmul.mubr.f32.gmra.mxu0 %v353_v13 }
 0x104   : > { %575 = vmatprep.mubr.f32.mxu0 %v356_v14  ;;  %v8673_v14 = vsub.s32 0, %v902_v5 }
 0x106   : > { %14060 = vst [vmem:[#allocation13_spill] sm:$0xff] %v8673_v14 }
 0x107   : > { %576 = vmatmul.mubr.f32.gmra.mxu0 %v355_v16 }
 0x108   : > { %581 = vmatprep.mubr.f32.mxu0 %v358_v17 }
 0x10b   : > { %582 = vmatmul.mubr.f32.gmra.mxu0 %v357_v18 }
 0x10c   : > { %587 = vmatprep.mubr.f32.mxu0 %v360_v19 }
 0x10f   : > { %588 = vmatmul.mubr.f32.gmra.mxu0 %v359_v20 }
 0x110   : > { %593 = vmatprep.mubr.f32.mxu0 %v362_v21 }
 0x113   : > { %594 = vmatmul.mubr.f32.gmra.mxu0 %v361_v22 }
 0x114   : > { %599 = vmatprep.mubr.f32.mxu0 %v364_v23 }
 0x117   : > { %600 = vmatmul.mubr.f32.gmra.mxu0 %v363_v24 }
 0x118   : > { %605 = vmatprep.mubr.f32.mxu0 %v366_v25 }
 0x11b   : > { %606 = vmatmul.mubr.f32.gmra.mxu0 %v365_v26 }
 0x11c   : > { %611 = vmatprep.mubr.f32.mxu0 %v368_v27 }
 0x11f   : > { %612 = vmatmul.mubr.f32.gmra.mxu0 %v367_v28 }
 0x120   : > { %617 = vmatprep.mubr.f32.mxu0 %v370_v29 }
 0x123   : > { %618 = vmatmul.mubr.f32.gmra.mxu0 %v369_v30 }
 0x124   : > { %623 = vmatprep.mubr.f32.mxu0 %v372_v31 }
 0x127   : > { %624 = vmatmul.mubr.f32.gmra.mxu0 %v371_v32 }
 0x128   : > { %629 = vmatprep.mubr.f32.mxu0 %v374_v33 }
 0x12b   : > { %630 = vmatmul.mubr.f32.gmra.mxu0 %v373_v34 }
 0x12c   : > { %635 = vmatprep.mubr.f32.mxu0 %v376_v35 }
 0x12f   : > { %636 = vmatmul.mubr.f32.gmra.mxu0 %v375_v36 }
 0x130   : > { %641 = vmatprep.mubr.f32.mxu0 %v378_v37 }
 0x133   : > { %642 = vmatmul.mubr.f32.gmra.mxu0 %v377_v38 }
 0x134   : > { %647 = vmatprep.mubr.f32.mxu0 %v380_v39 }
 0x137   : > { %648 = vmatmul.mubr.f32.gmra.mxu0 %v379_v40 }
 0x138   : > { %653 = vmatprep.mubr.f32.mxu0 %v382_v41 }
 0x13b   : > { %654 = vmatmul.mubr.f32.gmra.mxu0 %v381_v42 }
 0x13c   : > { %659 = vmatprep.mubr.f32.mxu0 %v384_v43 }
 0x13f   : > { %660 = vmatmul.mubr.f32.gmra.mxu0 %v383_v44 }
 0x140   : > { %665 = vmatprep.mubr.f32.mxu0 %v386_v45 }
 0x143   : > { %666 = vmatmul.mubr.f32.gmra.mxu0 %v385_v46 }
 0x144   : > { %671 = vmatprep.mubr.f32.mxu0 %v388_v47 }
 0x147   : > { %672 = vmatmul.mubr.f32.gmra.mxu0 %v387_v48 }
 0x148   : > { %677 = vmatprep.mubr.f32.mxu0 %v390_v49 }
 0x14b   : > { %678 = vmatmul.mubr.f32.gmra.mxu0 %v389_v50 }
 0x14c   : > { %683 = vmatprep.mubr.f32.mxu0 %v392_v51 }
 0x14f   : > { %684 = vmatmul.mubr.f32.gmra.mxu0 %v391_v52 }
 0x150   : > { %689 = vmatprep.mubr.f32.mxu0 %v394_v53 }
 0x153   : > { %690 = vmatmul.mubr.f32.gmra.mxu0 %v393_v54 }
 0x154   : > { %695 = vmatprep.mubr.f32.mxu0 %v396_v55 }
 0x157   : > { %696 = vmatmul.mubr.f32.gmra.mxu0 %v395_v56 }
 0x158   : > { %701 = vmatprep.mubr.f32.mxu0 %v398_v57 }
 0x15b   : > { %702 = vmatmul.mubr.f32.gmra.mxu0 %v397_v58 }
 0x15c   : > { %707 = vmatprep.mubr.f32.mxu0 %v400_v59 }
 0x15f   : > { %708 = vmatmul.mubr.f32.gmra.mxu0 %v399_v60 }
 0x160   : > { %713 = vmatprep.mubr.f32.mxu0 %v402_v61 }
 0x163   : > { %714 = vmatmul.mubr.f32.gmra.mxu0 %v401_v62 }
 0x164   : > { %719 = vmatprep.mubr.f32.mxu0 %v404_v63 }
 0x167   : > { %720 = vmatmul.mubr.f32.gmra.mxu0 %v403_v0 }
 0x18b   : > { %v487_v6 = vpop.f32.mrf.mxu0 }
 0x18d   : > { %v489_v8 = vpop.f32.mrf.mxu0 }
 0x18e   : > { %v896_v9 = vcombine.low %v487_v6, %v489_v8  ;;  %v897_v10 = vcombine.high %v487_v6, %v489_v8 }
 0x18f   : > { %v493_v11 = vpop.f32.mrf.mxu0 }
 0x190   : > { %v904_v12 = vrot.slane %v896_v9, %v8669_v7  ;;  %v911_v13 = vrot.slane %v897_v10, %v8669_v7 }
 0x191   : > { %v495_v16 = vpop.f32.mrf.mxu0 }
 0x192   : > { %v912_v17 = vcombine.high %v904_v12, %v904_v12  ;;  %v913_v18 = vcombine.high %v911_v13, %v911_v13  ;;  %v8678_v19 = vrot.slane %v904_v12, %v8669_v7  ;;  %v8681_v20 = vrot.slane %v911_v13, %v8669_v7 }
 0x193   : > { %v1044_v21 = vcombine.low %v493_v11, %v495_v16  ;;  %v499_v22 = vpop.f32.mrf.mxu0  ;;  %v1045_v30 = vcombine.high %v493_v11, %v495_v16 }
 0x194   : > { %v8684_v23 = vrot.slane %v912_v17, %v8669_v7  ;;  %v8687_v24 = vrot.slane %v913_v18, %v8669_v7  ;;  %v8691_v25 = vcombine.high %v8678_v19, %v8678_v19  ;;  %v8695_v26 = vcombine.high %v8681_v20, %v8681_v20 }
 0x195   : > { %v501_v31 = vpop.f32.mrf.mxu0  ;;  %v1052_v47 = vrot.slane %v1044_v21, %v8669_v7  ;;  %v1059_v48 = vrot.slane %v1045_v30, %v8669_v7 }
 0x196   : > { %v8705_v32 = vcombine.high %v8684_v23, %v8684_v23  ;;  %v8709_v33 = vcombine.high %v8687_v24, %v8687_v24  ;;  %v1208_v50 = vcombine.low %v499_v22, %v501_v31  ;;  %v1209_v51 = vcombine.high %v499_v22, %v501_v31 }
 0x197   : > { %v505_v40 = vpop.f32.mrf.mxu0  ;;  %v1060_v54 = vcombine.high %v1052_v47, %v1052_v47  ;;  %v1061_v55 = vcombine.high %v1059_v48, %v1059_v48  ;;  %v8738_v56 = vrot.slane %v1052_v47, %v8669_v7  ;;  %v8741_v57 = vrot.slane %v1059_v48, %v8669_v7 }
 0x198   : > { %v1216_v60 = vrot.slane %v1208_v50, %v8669_v7  ;;  %v1223_v61 = vrot.slane %v1209_v51, %v8669_v7 }
 0x199   : > { %v507_v49 = vpop.f32.mrf.mxu0  ;;  %v8751_v63 = vrot.slane %v1060_v54, %v8669_v7  ;;  %v8754_v0 = vrot.slane %v1061_v55, %v8669_v7  ;;  %v8758_v1 = vcombine.high %v8738_v56, %v8738_v56  ;;  %v8762_v2 = vcombine.high %v8741_v57, %v8741_v57 }
 0x19a   : > { %v1372_v52 = vcombine.low %v505_v40, %v507_v49  ;;  %v1373_v53 = vcombine.high %v505_v40, %v507_v49  ;;  %v1224_v50 = vcombine.high %v1216_v60, %v1216_v60  ;;  %v1225_v51 = vcombine.high %v1223_v61, %v1223_v61 }
 0x19b   : > { %v8743_v58 = vpop.f32.mrf.mxu0  ;;  %v8775_v9 = vcombine.high %v8751_v63, %v8751_v63  ;;  %v8779_v10 = vcombine.high %v8754_v0, %v8754_v0  ;;  %v8815_v54 = vrot.slane %v1223_v61, %v8669_v7 }
 0x19c   : > { %v1380_v62 = vrot.slane %v1372_v52, %v8669_v7  ;;  %v1387_v8 = vrot.slane %v1373_v53, %v8669_v7  ;;  %v8812_v53 = vrot.slane %v1216_v60, %v8669_v7  ;;  %v8820_v12 = vrot.slane %v1224_v50, %v8669_v7 }
 0x19d   : > { %v8764_v3 = vpop.f32.mrf.mxu0  ;;  %v8823_v48 = vrot.slane %v1225_v51, %v8669_v7  ;;  %v8834_v61 = vcombine.high %v8815_v54, %v8815_v54 }
 0x19e   : > { %v1388_v55 = vcombine.high %v1380_v62, %v1380_v62  ;;  %v1389_v30 = vcombine.high %v1387_v8, %v1387_v8  ;;  %v8826_v18 = vrot.slane %v1380_v62, %v8669_v7  ;;  %v8830_v60 = vcombine.high %v8812_v53, %v8812_v53 }
 0x19f   : > { %v8785_v13 = vpop.f32.mrf.mxu0  ;;  %v8839_v50 = vrot.slane %v1387_v8, %v8669_v7  ;;  %v8843_v51 = vcombine.high %v8820_v12, %v8820_v12  ;;  %v8847_v62 = vcombine.high %v8823_v48, %v8823_v48  ;;  %v2487_v4 = vcombine.low %v8743_v58, %v8764_v3 }
 0x1a0   : > { %v8878_v16 = vrot.slane %v1388_v55, %v8669_v7  ;;  %v8881_v5 = vrot.slane %v1389_v30, %v8669_v7  ;;  %v8885_v52 = vcombine.high %v8826_v18, %v8826_v18  ;;  %v2488_v59 = vcombine.high %v8743_v58, %v8764_v3 }
 0x1a1   : > { %v8803_v47 = vpop.f32.mrf.mxu0  ;;  %v8889_v8 = vcombine.high %v8839_v50, %v8839_v50  ;;  %v2495_v17 = vrot.slane %v2487_v4, %v8669_v7 }
 0x1a2   : > { %v8903_v6 = vcombine.high %v8878_v16, %v8878_v16  ;;  %v8907_v22 = vcombine.high %v8881_v5, %v8881_v5  ;;  %v2635_v55 = vcombine.low %v8785_v13, %v8803_v47  ;;  %v2636_v30 = vcombine.high %v8785_v13, %v8803_v47 }
 0x1a3   : > { %v8817_v31 = vpop.f32.mrf.mxu0  ;;  %v2502_v11 = vrot.slane %v2488_v59, %v8669_v7  ;;  %v8959_v59 = vrot.slane %v2495_v17, %v8669_v7 }
 0x1a4   : > { %14062 = vst [vmem:[#allocation15_spill] sm:$0xff] %v8907_v22  ;;  %v2643_v42 = vrot.slane %v2635_v55, %v8669_v7  ;;  %v2650_v13 = vrot.slane %v2636_v30, %v8669_v7 }
 0x1a5   : > { %v525_v49 = vpop.f32.mrf.mxu0  ;;  %v2504_v4 = vcombine.high %v2502_v11, %v2502_v11  ;;  %14063 = vst [vmem:[#allocation16_spill] sm:$0xff] %v8959_v59 }
 0x1a6   : > { %v2799_v21 = vcombine.low %v8817_v31, %v525_v49  ;;  %v2800_v43 = vcombine.high %v8817_v31, %v525_v49  ;;  %v2503_v31 = vcombine.high %v2495_v17, %v2495_v17  ;;  %v8962_v49 = vrot.slane %v2502_v11, %v8669_v7 }
 0x1a7   : > { %v8891_v40 = vpop.f32.mrf.mxu0  ;;  %v2651_v38 = vcombine.high %v2643_v42, %v2643_v42  ;;  %v2652_v36 = vcombine.high %v2650_v13, %v2650_v13  ;;  %v8965_v28 = vrot.slane %v2643_v42, %v8669_v7  ;;  %v8976_v17 = vcombine.high %v8959_v59, %v8959_v59 }
 0x1a8   : > { %v8956_v47 = vrot.slane %v2799_v21, %v8669_v7  ;;  %14064 = vst [vmem:[#allocation17_spill] sm:$0xff] %v8962_v49  ;;  %v2814_v55 = vrot.slane %v2800_v43, %v8669_v7  ;;  %v8969_v30 = vrot.slane %v2503_v31, %v8669_v7  ;;  %v8972_v21 = vrot.slane %v2504_v4, %v8669_v7 }
 0x1a9   : > { %v8929_v45 = vpop.f32.mrf.mxu0  ;;  %14065 = vst [vmem:[#allocation18_spill] sm:$0xff] %v8965_v28  ;;  %14068 = vst [vmem:[#allocation21_spill] sm:$0xff] %v8976_v17  ;;  %v8980_v11 = vcombine.high %v8962_v49, %v8962_v49  ;;  %v8989_v4 = vrot.slane %v2650_v13, %v8669_v7  ;;  %v9026_v29 = vrot.slane %v2651_v38, %v8669_v7 }
 0x1aa   : > { %14066 = vst [vmem:[#allocation19_spill] sm:$0xff] %v8969_v30  ;;  %14067 = vst [vmem:[#allocation20_spill] sm:$0xff] %v8972_v21  ;;  %v8993_v3 = vcombine.high %v8969_v30, %v8969_v30  ;;  %v8997_v46 = vcombine.high %v8972_v21, %v8972_v21  ;;  %v9029_v42 = vrot.slane %v2652_v36, %v8669_v7 }
 0x1ab   : > { %14069 = vst [vmem:[#allocation22_spill] sm:$0xff] %v8980_v11  ;;  %14070 = vst [vmem:[#allocation23_spill] sm:$0xff] %v8989_v4  ;;  %v9003_v44 = vpop.f32.mrf.mxu0  ;;  %v9035_v41 = vcombine.high %v8965_v28, %v8965_v28  ;;  %v9039_v13 = vcombine.high %v8989_v4, %v8989_v4  ;;  %v9047_v36 = vcombine.high %v9026_v29, %v9026_v29 }
 0x1ac   : > { %14071 = vst [vmem:[#allocation24_spill] sm:$0xff] %v8993_v3  ;;  %14072 = vst [vmem:[#allocation25_spill] sm:$0xff] %v8997_v46  ;;  %v9051_v38 = vcombine.high %v9029_v42, %v9029_v42  ;;  %v2815_v37 = vcombine.high %v8956_v47, %v8956_v47  ;;  %v2816_v43 = vcombine.high %v2814_v55, %v2814_v55  ;;  %v9831_v3 = vpop.permute.xlu1 %1554 }
 0x1ad   : > { %14073 = vst [vmem:[#allocation26_spill] sm:$0xff] %v9026_v29  ;;  %14074 = vst [vmem:[#allocation27_spill] sm:$0xff] %v9029_v42  ;;  %v9043_v39 = vpop.f32.mrf.mxu0  ;;  %v9087_v34 = vrot.slane %v8956_v47, %v8669_v7  ;;  %v9090_v31 = vrot.slane %v2814_v55, %v8669_v7  ;;  %v14081_v58 = vcombine.low %v8891_v40, %v8929_v45 }
 0x1ae   : > { %14075 = vst [vmem:[#allocation28_spill] sm:$0xff] %v9035_v41  ;;  %14076 = vst [vmem:[#allocation29_spill] sm:$0xff] %v9039_v13  ;;  %v4072_v13 = vcombine.low %v9003_v44, %v9043_v39  ;;  %v4073_v42 = vcombine.high %v9003_v44, %v9043_v39  ;;  %v9103_v47 = vrot.slane %v2815_v37, %v8669_v7 }
 0x1af   : > { %14077 = vst [vmem:[#allocation30_spill] sm:$0xff] %v9047_v36  ;;  %14078 = vst [vmem:[#allocation31_spill] sm:$0xff] %v9051_v38  ;;  %v9081_v41 = vpop.f32.mrf.mxu0  ;;  %v2971_v35 = vrot.slane %v14081_v58, %v8669_v7  ;;  %v9106_v55 = vrot.slane %v2816_v43, %v8669_v7  ;;  %v9110_v27 = vcombine.high %v9087_v34, %v9087_v34 }
 0x1b0   : > { %14079 = vst [vmem:[#allocation32_spill] sm:$0xff] %v9087_v34  ;;  %14080 = vst [vmem:[#allocation33_spill] sm:$0xff] %v9090_v31  ;;  %v9114_v38 = vcombine.high %v9090_v31, %v9090_v31  ;;  %v14086_v44 = vcombine.high %v8891_v40, %v8929_v45  ;;  %v9130_v36 = vcombine.high %v9103_v47, %v9103_v47 }
 0x1b1   : > { %14082 = vst [vmem:[#allocation34_spill] sm:$0xff] %v9103_v47  ;;  %14083 = vst [vmem:[#allocation35_spill] sm:$0xff] %v9106_v55  ;;  %v9126_v4 = vpop.f32.mrf.mxu0  ;;  %v9134_v58 = vcombine.high %v9106_v55, %v9106_v55  ;;  %v2979_v31 = vcombine.high %v2971_v35, %v2971_v35  ;;  %v9165_v39 = vrot.slane %v2971_v35, %v8669_v7 }
 0x1b2   : > { %14084 = vst [vmem:[#allocation36_spill] sm:$0xff] %v9110_v27  ;;  %14085 = vst [vmem:[#allocation37_spill] sm:$0xff] %v9114_v38  ;;  %v2978_v43 = vrot.slane %v14086_v44, %v8669_v7  ;;  %v4080_v45 = vrot.slane %v4072_v13, %v8669_v7  ;;  %v4220_v38 = vcombine.low %v9081_v41, %v9126_v4 }
 0x1b3   : > { %14087 = vst [vmem:[#allocation38_spill] sm:$0xff] %v9130_v36  ;;  %14088 = vst [vmem:[#allocation39_spill] sm:$0xff] %v9134_v58  ;;  %v9160_v27 = vpop.f32.mrf.mxu0  ;;  %v9172_v40 = vrot.slane %v2979_v31, %v8669_v7  ;;  %v4221_v29 = vcombine.high %v9081_v41, %v9126_v4  ;;  %v9183_v35 = vcombine.high %v9165_v39, %v9165_v39 }
 0x1b4   : > { %v2980_v34 = vcombine.high %v2978_v43, %v2978_v43  ;;  %14089 = vst [vmem:[#allocation40_spill] sm:$0xff] %v9165_v39  ;;  %v9168_v37 = vrot.slane %v2978_v43, %v8669_v7  ;;  %v4228_v36 = vrot.slane %v4220_v38, %v8669_v7  ;;  %v14170_v46 = vrot.slane %v8684_v23, %v8675_v15 }
 0x1b5   : > { %14091 = vst [vmem:[#allocation42_spill] sm:$0xff] %v9172_v40  ;;  %14093 = vst [vmem:[#allocation44_spill] sm:$0xff] %v9183_v35  ;;  %v9194_v13 = vcombine.high %v9172_v40, %v9172_v40  ;;  %v549_v55 = vpop.f32.mrf.mxu0  ;;  %v4088_v35 = vcombine.high %v4080_v45, %v4080_v45 }
 0x1b6   : > { %14090 = vst [vmem:[#allocation41_spill] sm:$0xff] %v9168_v37  ;;  %v9175_v44 = vrot.slane %v2980_v34, %v8669_v7  ;;  %v9187_v43 = vcombine.high %v9168_v37, %v9168_v37  ;;  %v4087_v34 = vrot.slane %v4073_v42, %v8669_v7  ;;  %v4384_v47 = vcombine.low %v9160_v27, %v549_v55 }
 0x1b7   : > { %14095 = vst [vmem:[#allocation46_spill] sm:$0xff] %v9194_v13  ;;  %v9229_v13 = vrot.slane %v4080_v45, %v8669_v7  ;;  %v9234_v31 = vpop.f32.mrf.mxu0  ;;  %v9242_v28 = vrot.slane %v4088_v35, %v8669_v7  ;;  %v4235_v35 = vrot.slane %v4221_v29, %v8669_v7 }
 0x1b8   : > { %14092 = vst [vmem:[#allocation43_spill] sm:$0xff] %v9175_v44  ;;  %14094 = vst [vmem:[#allocation45_spill] sm:$0xff] %v9187_v43  ;;  %v9198_v41 = vcombine.high %v9175_v44, %v9175_v44  ;;  %v4089_v4 = vcombine.high %v4087_v34, %v4087_v34  ;;  %v9232_v58 = vrot.slane %v4087_v34, %v8669_v7 }
 0x1b9   : > { %14097 = vst [vmem:[#allocation48_spill] sm:$0xff] %v9229_v13  ;;  %v4385_v43 = vcombine.high %v9160_v27, %v549_v55  ;;  %14099 = vst [vmem:[#allocation50_spill] sm:$0xff] %v9242_v28  ;;  %v9249_v34 = vcombine.high %v9229_v13, %v9229_v13  ;;  %v555_v27 = vpop.f32.mrf.mxu0  ;;  %v4237_v37 = vcombine.high %v4235_v35, %v4235_v35 }
 0x1ba   : > { %14096 = vst [vmem:[#allocation47_spill] sm:$0xff] %v9198_v41  ;;  %14098 = vst [vmem:[#allocation49_spill] sm:$0xff] %v9232_v58  ;;  %v9245_v45 = vrot.slane %v4089_v4, %v8669_v7  ;;  %v9253_v44 = vcombine.high %v9232_v58, %v9232_v58  ;;  %v9264_v4 = vcombine.high %v9242_v28, %v9242_v28 }
 0x1bb   : > { %14101 = vst [vmem:[#allocation52_spill] sm:$0xff] %v9249_v34  ;;  %v4236_v58 = vcombine.high %v4228_v36, %v4228_v36  ;;  %v9297_v34 = vrot.slane %v4228_v36, %v8669_v7  ;;  %v9300_v41 = vrot.slane %v4235_v35, %v8669_v7  ;;  %v4392_v38 = vrot.slane %v4384_v47, %v8669_v7  ;;  %v9303_v55 = vpop.f32.mrf.mxu0 }
 0x1bc   : > { %14100 = vst [vmem:[#allocation51_spill] sm:$0xff] %v9245_v45  ;;  %14102 = vst [vmem:[#allocation53_spill] sm:$0xff] %v9253_v44  ;;  %v9268_v42 = vcombine.high %v9245_v45, %v9245_v45  ;;  %v9309_v13 = vrot.slane %v4237_v37, %v8669_v7  ;;  %v4548_v44 = vcombine.low %v9234_v31, %v555_v27 }
 0x1bd   : > { %14103 = vst [vmem:[#allocation54_spill] sm:$0xff] %v9264_v4  ;;  %14105 = vst [vmem:[#allocation56_spill] sm:$0xff] %v9297_v34  ;;  %v9306_v29 = vrot.slane %v4236_v58, %v8669_v7  ;;  %v4549_v40 = vcombine.high %v9234_v31, %v555_v27  ;;  %v9315_v36 = vcombine.high %v9297_v34, %v9297_v34  ;;  %v561_v28 = vpop.f32.mrf.mxu0 }
 0x1be   : > { %14104 = vst [vmem:[#allocation55_spill] sm:$0xff] %v9268_v42  ;;  %14106 = vst [vmem:[#allocation57_spill] sm:$0xff] %v9300_v41  ;;  %v9319_v35 = vcombine.high %v9300_v41, %v9300_v41  ;;  %v4399_v58 = vrot.slane %v4385_v43, %v8669_v7  ;;  %v9330_v31 = vcombine.high %v9309_v13, %v9309_v13 }
 0x1bf   : > { %14107 = vst [vmem:[#allocation58_spill] sm:$0xff] %v9306_v29  ;;  %14108 = vst [vmem:[#allocation59_spill] sm:$0xff] %v9309_v13  ;;  %v9326_v37 = vcombine.high %v9306_v29, %v9306_v29  ;;  %v4556_v45 = vrot.slane %v4548_v44, %v8669_v7  ;;  %v5657_v47 = vcombine.low %v9303_v55, %v561_v28 }
 0x1c0   : > { %14109 = vst [vmem:[#allocation60_spill] sm:$0xff] %v9315_v36  ;;  %14110 = vst [vmem:[#allocation61_spill] sm:$0xff] %v9319_v35  ;;  %v4400_v36 = vcombine.high %v4392_v38, %v4392_v38  ;;  %v4401_v27 = vcombine.high %v4399_v58, %v4399_v58  ;;  %v9364_v42 = vrot.slane %v4399_v58, %v8669_v7  ;;  %v9371_v35 = vpop.f32.mrf.mxu0 }
 0x1c1   : > { %14111 = vst [vmem:[#allocation62_spill] sm:$0xff] %v9326_v37  ;;  %14112 = vst [vmem:[#allocation63_spill] sm:$0xff] %v9330_v31  ;;  %v9361_v37 = vrot.slane %v4392_v38, %v8669_v7  ;;  %v5658_v4 = vcombine.high %v9303_v55, %v561_v28  ;;  %v5665_v44 = vrot.slane %v5657_v47, %v8669_v7 }
 0x1c2   : > { %14114 = vst [vmem:[#allocation65_spill] sm:$0xff] %v9364_v42  ;;  %v9374_v39 = vrot.slane %v4400_v36, %v8669_v7  ;;  %v9377_v38 = vrot.slane %v4401_v27, %v8669_v7  ;;  %v9385_v43 = vcombine.high %v9364_v42, %v9364_v42  ;;  %v4563_v36 = vrot.slane %v4549_v40, %v8669_v7  ;;  %v567_v41 = vpop.f32.mrf.mxu0 }
 0x1c3   : > { %14113 = vst [vmem:[#allocation64_spill] sm:$0xff] %v9361_v37  ;;  %v9381_v58 = vcombine.high %v9361_v37, %v9361_v37  ;;  %v4564_v37 = vcombine.high %v4556_v45, %v4556_v45  ;;  %v5805_v55 = vcombine.low %v9371_v35, %v567_v41  ;;  %v9493_v29 = vrot.slane %v5665_v44, %v8669_v7 }
 0x1c4   : > { %14115 = vst [vmem:[#allocation66_spill] sm:$0xff] %v9374_v39  ;;  %14116 = vst [vmem:[#allocation67_spill] sm:$0xff] %v9377_v38  ;;  %v9396_v27 = vcombine.high %v9374_v39, %v9374_v39  ;;  %v9400_v31 = vcombine.high %v9377_v38, %v9377_v38  ;;  %v4565_v42 = vcombine.high %v4563_v36, %v4563_v36  ;;  %v9443_v38 = vpop.f32.mrf.mxu0 }
 0x1c5   : > { %14117 = vst [vmem:[#allocation68_spill] sm:$0xff] %v9381_v58  ;;  %14118 = vst [vmem:[#allocation69_spill] sm:$0xff] %v9385_v43  ;;  %v9429_v58 = vrot.slane %v4556_v45, %v8669_v7  ;;  %v9432_v13 = vrot.slane %v4563_v36, %v8669_v7  ;;  %v9436_v28 = vrot.slane %v4564_v37, %v8669_v7 }
 0x1c6   : > { %14119 = vst [vmem:[#allocation70_spill] sm:$0xff] %v9396_v27  ;;  %14120 = vst [vmem:[#allocation71_spill] sm:$0xff] %v9400_v31  ;;  %v9439_v40 = vrot.slane %v4565_v42, %v8669_v7  ;;  %v5806_v43 = vcombine.high %v9371_v35, %v567_v41  ;;  %v5672_v42 = vrot.slane %v5658_v4, %v8669_v7 }
 0x1c7   : > { %14121 = vst [vmem:[#allocation72_spill] sm:$0xff] %v9429_v58  ;;  %14122 = vst [vmem:[#allocation73_spill] sm:$0xff] %v9432_v13  ;;  %v9447_v45 = vcombine.high %v9429_v58, %v9429_v58  ;;  %v9451_v36 = vcombine.high %v9432_v13, %v9432_v13  ;;  %v9458_v37 = vcombine.high %v9436_v28, %v9436_v28 }
 0x1c8   : > { %14123 = vst [vmem:[#allocation74_spill] sm:$0xff] %v9436_v28  ;;  %14124 = vst [vmem:[#allocation75_spill] sm:$0xff] %v9439_v40  ;;  %v9462_v41 = vcombine.high %v9439_v40, %v9439_v40  ;;  %v573_v28 = vpop.f32.mrf.mxu0  ;;  %v5673_v35 = vcombine.high %v5665_v44, %v5665_v44  ;;  %v9496_v31 = vrot.slane %v5672_v42, %v8669_v7 }
 0x1c9   : > { %14125 = vst [vmem:[#allocation76_spill] sm:$0xff] %v9447_v45  ;;  %14126 = vst [vmem:[#allocation77_spill] sm:$0xff] %v9451_v36  ;;  %v5813_v40 = vrot.slane %v5805_v55, %v8669_v7  ;;  %v5969_v47 = vcombine.low %v9443_v38, %v573_v28  ;;  %v5970_v27 = vcombine.high %v9443_v38, %v573_v28 }
 0x1ca   : > { %14127 = vst [vmem:[#allocation78_spill] sm:$0xff] %v9458_v37  ;;  %14128 = vst [vmem:[#allocation79_spill] sm:$0xff] %v9462_v41  ;;  %v5674_v37 = vcombine.high %v5672_v42, %v5672_v42  ;;  %v9504_v36 = vrot.slane %v5673_v35, %v8669_v7  ;;  %v9511_v44 = vcombine.high %v9493_v29, %v9493_v29  ;;  %v577_v4 = vpop.f32.mrf.mxu0 }
 0x1cb   : > { %14129 = vst [vmem:[#allocation80_spill] sm:$0xff] %v9493_v29  ;;  %14130 = vst [vmem:[#allocation81_spill] sm:$0xff] %v9496_v31  ;;  %v9515_v42 = vcombine.high %v9496_v31, %v9496_v31  ;;  %v5821_v29 = vcombine.high %v5813_v40, %v5813_v40  ;;  %v9559_v13 = vrot.slane %v5813_v40, %v8669_v7 }
 0x1cc   : > { %14131 = vst [vmem:[#allocation82_spill] sm:$0xff] %v9504_v36  ;;  %v9507_v39 = vrot.slane %v5674_v37, %v8669_v7  ;;  %14133 = vst [vmem:[#allocation84_spill] sm:$0xff] %v9511_v44  ;;  %v5820_v37 = vrot.slane %v5806_v43, %v8669_v7  ;;  %v9526_v35 = vcombine.high %v9504_v36, %v9504_v36  ;;  %v579_v31 = vpop.f32.mrf.mxu0 }
 0x1cd   : > { %14134 = vst [vmem:[#allocation85_spill] sm:$0xff] %v9515_v42  ;;  %14137 = vst [vmem:[#allocation88_spill] sm:$0xff] %v9559_v13  ;;  %v5977_v38 = vrot.slane %v5969_v47, %v8669_v7  ;;  %v6133_v28 = vcombine.low %v577_v4, %v579_v31  ;;  %v6134_v42 = vcombine.high %v577_v4, %v579_v31 }
 0x1ce   : > { %14132 = vst [vmem:[#allocation83_spill] sm:$0xff] %v9507_v39  ;;  %14135 = vst [vmem:[#allocation86_spill] sm:$0xff] %v9526_v35  ;;  %v9530_v41 = vcombine.high %v9507_v39, %v9507_v39  ;;  %v5822_v44 = vcombine.high %v5820_v37, %v5820_v37  ;;  %v9562_v55 = vrot.slane %v5820_v37, %v8669_v7 }
 0x1cf   : > { %v9566_v39 = vrot.slane %v5821_v29, %v8669_v7  ;;  %v9573_v35 = vcombine.high %v9559_v13, %v9559_v13  ;;  %v5984_v47 = vrot.slane %v5970_v27, %v8669_v7  ;;  %v5985_v27 = vcombine.high %v5977_v38, %v5977_v38 }
 0x1d0   : > { %14136 = vst [vmem:[#allocation87_spill] sm:$0xff] %v9530_v41  ;;  %14138 = vst [vmem:[#allocation89_spill] sm:$0xff] %v9562_v55  ;;  %v9569_v43 = vrot.slane %v5822_v44, %v8669_v7  ;;  %v9577_v40 = vcombine.high %v9562_v55, %v9562_v55  ;;  %v9621_v44 = vrot.slane %v5977_v38, %v8669_v7 }
 0x1d1   : > { %14139 = vst [vmem:[#allocation90_spill] sm:$0xff] %v9566_v39  ;;  %14141 = vst [vmem:[#allocation92_spill] sm:$0xff] %v9573_v35  ;;  %v9584_v29 = vcombine.high %v9566_v39, %v9566_v39  ;;  %v9610_v39 = vpop.f32.mrf.mxu0  ;;  %v9624_v45 = vrot.slane %v5984_v47, %v8669_v7  ;;  %v6148_v41 = vrot.slane %v6134_v42, %v8669_v7 }
 0x1d2   : > { %14140 = vst [vmem:[#allocation91_spill] sm:$0xff] %v9569_v43  ;;  %14142 = vst [vmem:[#allocation93_spill] sm:$0xff] %v9577_v40  ;;  %v9588_v31 = vcombine.high %v9569_v43, %v9569_v43  ;;  %v6141_v43 = vrot.slane %v6133_v28, %v8669_v7  ;;  %v14147_v36 = vrot.slane %v8678_v19, %v8673_v14 }
 0x1d3   : > { %14143 = vst [vmem:[#allocation94_spill] sm:$0xff] %v9584_v29  ;;  %v5986_v29 = vcombine.high %v5984_v47, %v5984_v47  ;;  %14145 = vst [vmem:[#allocation96_spill] sm:$0xff] %v9621_v44  ;;  %v9637_v40 = vrot.slane %v5985_v27, %v8669_v7  ;;  %v9644_v47 = vcombine.high %v9621_v44, %v9621_v44 }
 0x1d4   : > { %14144 = vst [vmem:[#allocation95_spill] sm:$0xff] %v9588_v31  ;;  %14146 = vst [vmem:[#allocation97_spill] sm:$0xff] %v9624_v45  ;;  %v9634_v4 = vmul.f32 %v14147_v36, %v9610_v39  ;;  %v9648_v28 = vcombine.high %v9624_v45, %v9624_v45  ;;  %v6149_v45 = vcombine.high %v6141_v43, %v6141_v43 }
 0x1d5   : > { %14148 = vst [vmem:[#allocation98_spill] sm:$0xff] %v9637_v40  ;;  %v9640_v38 = vrot.slane %v5986_v29, %v8669_v7  ;;  %14150 = vst [vmem:[#allocation100_spill] sm:$0xff] %v9644_v47  ;;  %v14152_v29 = vrot.slane %v8684_v23, %v8673_v14  ;;  %v9664_v31 = vcombine.high %v9637_v40, %v9637_v40 }
 0x1d6   : > { %14151 = vst [vmem:[#allocation101_spill] sm:$0xff] %v9648_v28  ;;  %v6150_v35 = vcombine.high %v6148_v41, %v6148_v41  ;;  %v9697_v47 = vrot.slane %v6141_v43, %v8669_v7  ;;  %v9700_v36 = vrot.slane %v6148_v41, %v8669_v7  ;;  %v14157_v27 = vrot.slane %v8691_v25, %v8673_v14 }
 0x1d7   : > { %14149 = vst [vmem:[#allocation99_spill] sm:$0xff] %v9640_v38  ;;  %v9660_v37 = vmul.f32 %v14152_v29, %v9610_v39  ;;  %14153 = vst [vmem:[#allocation102_spill] sm:$0xff] %v9664_v31  ;;  %v9668_v55 = vcombine.high %v9640_v38, %v9640_v38  ;;  %v9707_v29 = vrot.slane %v6149_v45, %v8669_v7 }
 0x1d8   : > { %14155 = vst [vmem:[#allocation104_spill] sm:$0xff] %v9697_v47  ;;  %14156 = vst [vmem:[#allocation105_spill] sm:$0xff] %v9700_v36  ;;  %v1030_v42 = vmul.f32 %v14157_v27, %v9610_v39  ;;  %v9710_v44 = vrot.slane %v6150_v35, %v8669_v7  ;;  %v14160_v13 = vrot.slane %v8705_v32, %v8673_v14  ;;  %v585_v27 = vpop.f32.mrf.mxu0 }
 0x1d9   : > { %14154 = vst [vmem:[#allocation103_spill] sm:$0xff] %v9668_v55  ;;  %14158 = vst [vmem:[#allocation106_spill] sm:$0xff] %v9707_v29  ;;  %v14161_v41 = vrot.slane %v8681_v20, %v8673_v14  ;;  %v9722_v28 = vcombine.high %v9697_v47, %v9697_v47  ;;  %v9726_v45 = vcombine.high %v9700_v36, %v9700_v36  ;;  %v9819_v47 = vpop.permute.xlu0 %1544 }
 0x1da   : > { %14159 = vst [vmem:[#allocation107_spill] sm:$0xff] %v9710_v44  ;;  %v1032_v43 = vmul.f32 %v14160_v13, %v9610_v39  ;;  %v14164_v13 = vrot.slane %v8687_v24, %v8673_v14  ;;  %v9740_v38 = vcombine.high %v9710_v44, %v9710_v44  ;;  %v14167_v7 = vrot.slane %v8695_v26, %v8673_v14 }
 0x1db   : > { %v1034_v55 = vmul.f32 %v14161_v41, %v9610_v39  ;;  %14162 = vst [vmem:[#allocation108_spill] sm:$0xff] %v9722_v28  ;;  %14163 = vst [vmem:[#allocation109_spill] sm:$0xff] %v9726_v45  ;;  %v9736_v41 = vcombine.high %v9707_v29, %v9707_v29  ;;  %v589_v28 = vpop.f32.mrf.mxu0  ;;  %v14169_v34 = vrot.slane %v8678_v19, %v8675_v15 }
 0x1dc   : > { %v1036_v35 = vmul.f32 %v14164_v13, %v9610_v39  ;;  %14166 = vst [vmem:[#allocation111_spill] sm:$0xff] %v9740_v38  ;;  %v1038_v40 = vmul.f32 %v14167_v7, %v9610_v39  ;;  %v14168_v13 = vrot.slane %v8709_v33, %v8673_v14  ;;  %v1029_v44 = vmul.f32 %v14170_v46, %v585_v27 }
 0x1dd   : > { %14165 = vst [vmem:[#allocation110_spill] sm:$0xff] %v9736_v41  ;;  %v1027_v45 = vmul.f32 %v14169_v34, %v585_v27  ;;  %v14171_v31 = vrot.slane %v8691_v25, %v8675_v15  ;;  %v14172_v7 = vrot.slane %v8705_v32, %v8675_v15  ;;  %v14173_v41 = vrot.slane %v8681_v20, %v8675_v15  ;;  %v591_v29 = vpop.f32.mrf.mxu0 }
 0x1de   : > { %v1040_v58 = vmul.f32 %v14168_v13, %v9610_v39  ;;  %v14174_v19 = vrot.slane %v8687_v24, %v8675_v15  ;;  %v14175_v23 = vrot.slane %v8695_v26, %v8675_v15  ;;  %v14176_v25 = vrot.slane %v8738_v56, %v8673_v14  ;;  %14182 = vst [vmem:[#allocation112_spill] sm:$0xff] %v9819_v47 }
 0x1df   : > { %v1031_v38 = vmul.f32 %v14171_v31, %v585_v27  ;;  %v1033_v36 = vmul.f32 %v14172_v7, %v585_v27  ;;  %v1035_v39 = vmul.f32 %v14173_v41, %v585_v27  ;;  %v14177_v32 = vrot.slane %v8751_v63, %v8673_v14 }
 0x1e0   : > { %v1037_v34 = vmul.f32 %v14174_v19, %v585_v27  ;;  %v1039_v46 = vmul.f32 %v14175_v23, %v585_v27  ;;  %v1174_v31 = vmul.f32 %v14176_v25, %v589_v28  ;;  %v14178_v20 = vrot.slane %v8758_v1, %v8673_v14 }
 0x1e1   : > { %v1176_v13 = vmul.f32 %v14177_v32, %v589_v28  ;;  %v14179_v24 = vrot.slane %v8775_v9, %v8673_v14  ;;  %v14180_v26 = vrot.slane %v8741_v57, %v8673_v14  ;;  %v14181_v23 = vrot.slane %v8754_v0, %v8673_v14 }
 0x1e2   : > { %v1178_v41 = vmul.f32 %v14178_v20, %v589_v28  ;;  %v14183_v32 = vrot.slane %v8709_v33, %v8675_v15  ;;  %v14184_v20 = vrot.slane %v8762_v2, %v8673_v14 }
 0x1e3   : > { %v1180_v7 = vmul.f32 %v14179_v24, %v589_v28  ;;  %v1182_v19 = vmul.f32 %v14180_v26, %v589_v28  ;;  %v1184_v25 = vmul.f32 %v14181_v23, %v589_v28  ;;  %v14185_v24 = vrot.slane %v8779_v10, %v8673_v14 }
 0x1e4   : > { %v1041_v11 = vmul.f32 %v14183_v32, %v585_v27  ;;  %v1186_v21 = vmul.f32 %v14184_v20, %v589_v28  ;;  %v1190_v26 = vadd.f32 %v1174_v31, %v9634_v4  ;;  %v1192_v23 = vadd.f32 %v1176_v13, %v9660_v37 }
 0x1e5   : > { %v1188_v49 = vmul.f32 %v14185_v24, %v589_v28  ;;  %v1194_v17 = vadd.f32 %v1178_v41, %v1030_v42  ;;  %v1196_v30 = vadd.f32 %v1180_v7, %v1032_v43  ;;  %v1198_v59 = vadd.f32 %v1182_v19, %v1034_v55  ;;  %v595_v43 = vpop.f32.mrf.mxu0 }
 0x1e6   : > { %v1200_v47 = vadd.f32 %v1184_v25, %v1036_v35  ;;  %v1202_v33 = vadd.f32 %v1186_v21, %v1038_v40  ;;  %v14186_v27 = vrot.slane %v8738_v56, %v8675_v15  ;;  %v14187_v20 = vrot.slane %v8751_v63, %v8675_v15  ;;  %v9858_v25 = vpop.permute.xlu0 %1549 }
 0x1e7   : > { %v14188_v4 = vrot.slane %v8758_v1, %v8675_v15  ;;  %v14189_v37 = vrot.slane %v8775_v9, %v8675_v15  ;;  %v14190_v55 = vrot.slane %v8741_v57, %v8675_v15  ;;  %v14191_v56 = vrot.slane %v8754_v0, %v8675_v15 }
 0x1e8   : > { %v1175_v32 = vmul.f32 %v14186_v27, %v591_v29  ;;  %v1177_v22 = vmul.f32 %v14187_v20, %v591_v29  ;;  %v1204_v35 = vadd.f32 %v1188_v49, %v1040_v58  ;;  %v14192_v63 = vrot.slane %v8762_v2, %v8675_v15  ;;  %v9866_v20 = vpop.permute.xlu1 %1559 }
 0x1e9   : > { %v1179_v28 = vmul.f32 %v14188_v4, %v591_v29  ;;  %v1181_v42 = vmul.f32 %v14189_v37, %v591_v29  ;;  %v1183_v21 = vmul.f32 %v14190_v55, %v591_v29  ;;  %v1185_v40 = vmul.f32 %v14191_v56, %v591_v29 }
 0x1ea   : > { %v1187_v31 = vmul.f32 %v14192_v63, %v591_v29  ;;  %v14193_v1 = vrot.slane %v8779_v10, %v8675_v15  ;;  %v1191_v9 = vadd.f32 %v1175_v32, %v1027_v45  ;;  %v1193_v41 = vadd.f32 %v1177_v22, %v1029_v44 }
 0x1eb   : > { %v1195_v7 = vadd.f32 %v1179_v28, %v1031_v38  ;;  %v1197_v19 = vadd.f32 %v1181_v42, %v1033_v36  ;;  %v1199_v57 = vadd.f32 %v1183_v21, %v1035_v39  ;;  %v1201_v24 = vadd.f32 %v1185_v40, %v1037_v34  ;;  %v597_v34 = vpop.f32.mrf.mxu0 }
 0x1ec   : > { %v1189_v13 = vmul.f32 %v14193_v1, %v591_v29  ;;  %v1203_v0 = vadd.f32 %v1187_v31, %v1039_v46  ;;  %v14194_v49 = vrot.slane %v8812_v53, %v8673_v14  ;;  %v14195_v2 = vrot.slane %v8820_v12, %v8673_v14 }
 0x1ed   : > { %v14196_v10 = vrot.slane %v8830_v60, %v8673_v14  ;;  %v14197_v44 = vrot.slane %v8843_v51, %v8673_v14  ;;  %v14198_v36 = vrot.slane %v8815_v54, %v8673_v14  ;;  %v14199_v45 = vrot.slane %v8823_v48, %v8673_v14 }
 0x1ee   : > { %v1338_v58 = vmul.f32 %v14194_v49, %v595_v43  ;;  %v1340_v27 = vmul.f32 %v14195_v2, %v595_v43  ;;  %v9880_v46 = vadd.f32 %v1189_v13, %v1041_v11  ;;  %v14200_v32 = vrot.slane %v8834_v61, %v8673_v14 }
 0x1ef   : > { %v1342_v22 = vmul.f32 %v14196_v10, %v595_v43  ;;  %v1344_v38 = vmul.f32 %v14197_v44, %v595_v43  ;;  %v1346_v29 = vmul.f32 %v14198_v36, %v595_v43  ;;  %v1348_v39 = vmul.f32 %v14199_v45, %v595_v43 }
 0x1f0   : > { %v1350_v4 = vmul.f32 %v14200_v32, %v595_v43  ;;  %v14201_v28 = vrot.slane %v8847_v62, %v8673_v14  ;;  %v1354_v42 = vadd.f32 %v1338_v58, %v1190_v26  ;;  %v1356_v55 = vadd.f32 %v1340_v27, %v1192_v23  ;;  %v601_v23 = vpop.f32.mrf.mxu0  ;;  %v9916_v27 = vpop.permute.xlu0 %1564 }
 0x1f1   : > { %v1358_v21 = vadd.f32 %v1342_v22, %v1194_v17  ;;  %v1360_v56 = vadd.f32 %v1344_v38, %v1196_v30  ;;  %v1362_v40 = vadd.f32 %v1346_v29, %v1198_v59  ;;  %v1364_v63 = vadd.f32 %v1348_v39, %v1200_v47  ;;  %14210 = vst [vmem:[#allocation113_spill] sm:$0xff] %v9916_v27 }
 0x1f2   : > { %v1352_v37 = vmul.f32 %v14201_v28, %v595_v43  ;;  %v1366_v31 = vadd.f32 %v1350_v4, %v1202_v33  ;;  %v14202_v1 = vrot.slane %v8812_v53, %v8675_v15  ;;  %v14203_v13 = vrot.slane %v8820_v12, %v8675_v15  ;;  %v14219_v4 = vld [vmem:[#allocation15_spill] sm:$0xff] }
 0x1f3   : > { %v14204_v2 = vrot.slane %v8830_v60, %v8675_v15  ;;  %v14205_v26 = vrot.slane %v8843_v51, %v8675_v15  ;;  %v14206_v59 = vrot.slane %v8815_v54, %v8675_v15  ;;  %v14207_v53 = vrot.slane %v8823_v48, %v8675_v15  ;;  %v9918_v54 = vpop.permute.xlu1 %1569 }
 0x1f4   : > { %v1339_v11 = vmul.f32 %v14202_v1, %v597_v34  ;;  %v1341_v49 = vmul.f32 %v14203_v13, %v597_v34  ;;  %v1368_v33 = vadd.f32 %v1352_v37, %v1204_v35  ;;  %v14208_v12 = vrot.slane %v8834_v61, %v8675_v15  ;;  %14211 = vst [vmem:[#allocation114_spill] sm:$0xff] %v9918_v54 }
 0x1f5   : > { %v1343_v10 = vmul.f32 %v14204_v2, %v597_v34  ;;  %v1345_v17 = vmul.f32 %v14205_v26, %v597_v34  ;;  %v1347_v30 = vmul.f32 %v14206_v59, %v597_v34  ;;  %v1349_v47 = vmul.f32 %v14207_v53, %v597_v34  ;;  %v14221_v59 = vld [vmem:[#allocation112_spill] sm:$0xff] }
 0x1f6   : > { %v1351_v43 = vmul.f32 %v14208_v12, %v597_v34  ;;  %v14209_v60 = vrot.slane %v8847_v62, %v8675_v15  ;;  %v9914_v51 = vadd.f32 %v1339_v11, %v1191_v9  ;;  %v9920_v22 = vadd.f32 %v1341_v49, %v1193_v41 }
 0x1f7   : > { %v9922_v48 = vadd.f32 %v1343_v10, %v1195_v7  ;;  %v9924_v35 = vadd.f32 %v1345_v17, %v1197_v19  ;;  %v9926_v44 = vadd.f32 %v1347_v30, %v1199_v57  ;;  %v9928_v61 = vadd.f32 %v1349_v47, %v1201_v24  ;;  %v9962_v47 = vpop.permute.xlu0 %1574  ;;  %v9964_v12 = vpop.permute.xlu1 %1579 }
 0x1f8   : > { %v9912_v58 = vmul.f32 %v14209_v60, %v597_v34  ;;  %v9930_v38 = vadd.f32 %v1351_v43, %v1203_v0  ;;  %v14212_v62 = vrot.slane %v8826_v18, %v8673_v14  ;;  %v14213_v36 = vrot.slane %v8878_v16, %v8673_v14  ;;  %14222 = vst [vmem:[#allocation15_spill] sm:$0xff] %v9962_v47 }
 0x1f9   : > { %v14214_v41 = vrot.slane %v8885_v52, %v8673_v14  ;;  %v14215_v19 = vrot.slane %v8903_v6, %v8673_v14  ;;  %v14216_v24 = vrot.slane %v8839_v50, %v8673_v14  ;;  %v14217_v45 = vrot.slane %v8881_v5, %v8673_v14  ;;  %14223 = vst [vmem:[#allocation112_spill] sm:$0xff] %v9964_v12 }
 0x1fa   : > { %v1502_v9 = vmul.f32 %v14212_v62, %v601_v23  ;;  %v1504_v29 = vmul.f32 %v14213_v36, %v601_v23  ;;  %v14218_v34 = vrot.slane %v8889_v8, %v8673_v14  ;;  %v14220_v28 = vrot.slane %v14219_v4, %v8673_v14 }
 0x1fb   : > { %v1506_v7 = vmul.f32 %v14214_v41, %v601_v23  ;;  %v1508_v57 = vmul.f32 %v14215_v19, %v601_v23  ;;  %v1510_v0 = vmul.f32 %v14216_v24, %v601_v23  ;;  %v1512_v39 = vmul.f32 %v14217_v45, %v601_v23 }
 0x1fc   : > { %v1514_v32 = vmul.f32 %v14218_v34, %v601_v23  ;;  %v1516_v37 = vmul.f32 %v14220_v28, %v601_v23  ;;  %v1518_v1 = vadd.f32 %v1502_v9, %v1354_v42  ;;  %v1520_v11 = vadd.f32 %v1504_v29, %v1356_v55 }
 0x1fd   : > { %v1522_v13 = vadd.f32 %v1506_v7, %v1358_v21  ;;  %v1524_v49 = vadd.f32 %v1508_v57, %v1360_v56  ;;  %v1526_v2 = vadd.f32 %v1510_v0, %v1362_v40  ;;  %v1528_v10 = vadd.f32 %v1512_v39, %v1364_v63 }
 0x1fe   : > { %v1530_v26 = vadd.f32 %v1514_v32, %v1366_v31  ;;  %v1532_v17 = vadd.f32 %v1516_v37, %v1368_v33  ;;  %v9957_v30 = vadd.f32 %v14221_v59, %v1518_v1  ;;  %v9960_v53 = vadd.f32 %v9858_v25, %v1520_v11 }
 0x1ff   : > { %v9967_v23 = vadd.f32 %v9831_v3, %v1522_v13  ;;  %v9970_v42 = vadd.f32 %v9866_v20, %v1524_v49  ;;  %v9973_v55 = vadd.f32 %v9916_v27, %v1526_v2  ;;  %v9976_v21 = vadd.f32 %v9918_v54, %v1528_v10 }
 0x200   : > { %v9979_v56 = vadd.f32 %v9962_v47, %v1530_v26  ;;  %v9982_v40 = vadd.f32 %v9964_v12, %v1532_v17  ;;  %v1598_v63 = vrot.slane %v9957_v30, 4  ;;  %v1610_v31 = vrot.slane %v9960_v53, 4 }
 0x201   : > { %v1622_v33 = vrot.slane %v9967_v23, 4  ;;  %v1634_v43 = vrot.slane %v9970_v42, 4  ;;  %v1646_v60 = vrot.slane %v9973_v55, 4  ;;  %v1658_v62 = vrot.slane %v9976_v21, 4 }
 0x202   : > { %v1599_v9 = vmax.f32 %v9957_v30, %v1598_v63  ;;  %v1611_v36 = vmax.f32 %v9960_v53, %v1610_v31  ;;  %v1670_v29 = vrot.slane %v9979_v56, 4  ;;  %v1682_v41 = vrot.slane %v9982_v40, 4 }
 0x203   : > { %v1623_v7 = vmax.f32 %v9967_v23, %v1622_v33  ;;  %v1635_v19 = vmax.f32 %v9970_v42, %v1634_v43  ;;  %v1647_v57 = vmax.f32 %v9973_v55, %v1646_v60  ;;  %v1659_v24 = vmax.f32 %v9976_v21, %v1658_v62 }
 0x204   : > { %v1600_v0 = vrot.slane %v1599_v9, 2  ;;  %v1612_v45 = vrot.slane %v1611_v36, 2  ;;  %v1671_v39 = vmax.f32 %v9979_v56, %v1670_v29  ;;  %v1683_v34 = vmax.f32 %v9982_v40, %v1682_v41 }
 0x205   : > { %v1624_v32 = vrot.slane %v1623_v7, 2  ;;  %v1636_v28 = vrot.slane %v1635_v19, 2  ;;  %v1648_v37 = vrot.slane %v1647_v57, 2  ;;  %v1660_v1 = vrot.slane %v1659_v24, 2 }
 0x206   : > { %v1601_v11 = vmax.f32 %v1599_v9, %v1600_v0  ;;  %v1613_v13 = vmax.f32 %v1611_v36, %v1612_v45  ;;  %v1672_v49 = vrot.slane %v1671_v39, 2  ;;  %v1684_v2 = vrot.slane %v1683_v34, 2 }
 0x207   : > { %v1625_v10 = vmax.f32 %v1623_v7, %v1624_v32  ;;  %v1637_v26 = vmax.f32 %v1635_v19, %v1636_v28  ;;  %v1649_v17 = vmax.f32 %v1647_v57, %v1648_v37  ;;  %v1661_v63 = vmax.f32 %v1659_v24, %v1660_v1 }
 0x208   : > { %v1602_v31 = vrot.slane %v1601_v11, 1  ;;  %v1614_v33 = vrot.slane %v1613_v13, 1  ;;  %v1673_v43 = vmax.f32 %v1671_v39, %v1672_v49  ;;  %v1685_v60 = vmax.f32 %v1683_v34, %v1684_v2  ;;  %v603_v39 = vpop.f32.mrf.mxu0 }
 0x209   : > { %v1626_v62 = vrot.slane %v1625_v10, 1  ;;  %v1638_v29 = vrot.slane %v1637_v26, 1  ;;  %v1650_v14 = vrot.slane %v1649_v17, 1  ;;  %v1662_v41 = vrot.slane %v1661_v63, 1 }
 0x20a   : > { %v1603_v12 = vmax.f32 %v1601_v11, %v1602_v31  ;;  %v1615_v47 = vmax.f32 %v1613_v13, %v1614_v33  ;;  %v1674_v54 = vrot.slane %v1673_v43, 1  ;;  %v1686_v27 = vrot.slane %v1685_v60, 1 }
 0x20b   : > { %v1627_v9 = vmax.f32 %v1625_v10, %v1626_v62  ;;  %v1639_v36 = vmax.f32 %v1637_v26, %v1638_v29  ;;  %v1651_v0 = vmax.f32 %v1649_v17, %v1650_v14  ;;  %v1663_v45 = vmax.f32 %v1661_v63, %v1662_v41  ;;  %v14234_v62 = vld [vmem:[#allocation15_spill] sm:$0xff] }
 0x20c   : > { %v1675_v7 = vmax.f32 %v1673_v43, %v1674_v54  ;;  %v1687_v19 = vmax.f32 %v1685_v60, %v1686_v27  ;;  %v1694_v57 = vsub.f32 %v9957_v30, %v1603_v12  ;;  %v1696_v24 = vsub.f32 %v9960_v53, %v1615_v47 }
 0x20d   : > { %v1698_v34 = vsub.f32 %v9967_v23, %v1627_v9  ;;  %v1700_v32 = vsub.f32 %v9970_v42, %v1639_v36  ;;  %v1702_v28 = vsub.f32 %v9973_v55, %v1651_v0  ;;  %v1704_v37 = vsub.f32 %v9976_v21, %v1663_v45 }
 0x20e   : > { %v1706_v1 = vsub.f32 %v9979_v56, %v1675_v7  ;;  %v1708_v14 = vsub.f32 %v9982_v40, %v1687_v19  ;;  %v1710_v11 = vmul.f32 1.442695, %v1694_v57  ;;  %v1714_v54 = vmul.f32 1.442695, %v1696_v24 }
 0x20f   : > { %v1369_v27 = vadd.f32 %v9912_v58, %v9880_v46  ;;  %v1718_v30 = vmul.f32 1.442695, %v1698_v34  ;;  %v1722_v53 = vmul.f32 1.442695, %v1700_v32  ;;  %v14224_v47 = vrot.slane %v8826_v18, %v8675_v15 }
 0x210   : > { %7951 = vpow2.f32 %v1710_v11  ;;  %v1726_v23 = vmul.f32 1.442695, %v1702_v28  ;;  %v1730_v42 = vmul.f32 1.442695, %v1704_v37  ;;  %v1734_v55 = vmul.f32 1.442695, %v1706_v1 }
 0x211   : > { %v1503_v12 = vmul.f32 %v14224_v47, %v603_v39  ;;  %v10013_v21 = vmul.f32 1.442695, %v1708_v14  ;;  %v14225_v56 = vrot.slane %v8878_v16, %v8675_v15  ;;  %v14226_v13 = vrot.slane %v8885_v52, %v8675_v15 }
 0x212   : > { %v14227_v58 = vrot.slane %v8903_v6, %v8675_v15  ;;  %7953 = vpow2.f32 %v1714_v54  ;;  %v14228_v18 = vrot.slane %v8839_v50, %v8675_v15  ;;  %v14229_v10 = vrot.slane %v8881_v5, %v8675_v15 }
 0x213   : > { %v1505_v40 = vmul.f32 %v14225_v56, %v603_v39  ;;  %v1507_v46 = vmul.f32 %v14226_v13, %v603_v39  ;;  %v14230_v16 = vrot.slane %v8889_v8, %v8675_v15  ;;  %7955 = vpow2.f32 %v1718_v30 }
 0x214   : > { %v1509_v49 = vmul.f32 %v14227_v58, %v603_v39  ;;  %v1511_v2 = vmul.f32 %v14228_v18, %v603_v39  ;;  %v1513_v26 = vmul.f32 %v14229_v10, %v603_v39  ;;  %v14231_v52 = vrot.slane %v14219_v4, %v8675_v15 }
 0x215   : > { %v1515_v17 = vmul.f32 %v14230_v16, %v603_v39  ;;  %v1519_v6 = vadd.f32 %v1503_v12, %v9914_v51  ;;  %v1521_v31 = vadd.f32 %v1505_v40, %v9920_v22  ;;  %7957 = vpow2.f32 %v1722_v53 }
 0x216   : > { %v1517_v63 = vmul.f32 %v14231_v52, %v603_v39  ;;  %v1523_v50 = vadd.f32 %v1507_v46, %v9922_v48  ;;  %v1525_v33 = vadd.f32 %v1509_v49, %v9924_v35  ;;  %v1527_v5 = vadd.f32 %v1511_v2, %v9926_v44  ;;  %v14232_v35 = vld [vmem:[#allocation113_spill] sm:$0xff] }
 0x217   : > { %7959 = vpow2.f32 %v1726_v23  ;;  %v1529_v8 = vadd.f32 %v1513_v26, %v9928_v61  ;;  %v1531_v43 = vadd.f32 %v1515_v17, %v9930_v38  ;;  %v10044_v4 = vadd.f32 %v14221_v59, %v1519_v6  ;;  %v14233_v61 = vld [vmem:[#allocation114_spill] sm:$0xff]  ;;  %v14235_v59 = vld [vmem:[#allocation112_spill] sm:$0xff] }
 0x218   : > { %v1533_v60 = vadd.f32 %v1517_v63, %v1369_v27  ;;  %7961 = vpow2.f32 %v1730_v42  ;;  %v10047_v51 = vadd.f32 %v9858_v25, %v1521_v31  ;;  %v10050_v22 = vadd.f32 %v9831_v3, %v1523_v50 }
 0x219   : > { %7963 = vpow2.f32 %v1734_v55  ;;  %v10053_v48 = vadd.f32 %v9866_v20, %v1525_v33  ;;  %v10056_v44 = vadd.f32 %v14232_v35, %v1527_v5  ;;  %v10059_v38 = vadd.f32 %v14233_v61, %v1529_v8 }
 0x21a   : > { %v10062_v29 = vadd.f32 %v14234_v62, %v1531_v43  ;;  %v10065_v41 = vadd.f32 %v14235_v59, %v1533_v60  ;;  %v1604_v25 = vrot.slane %v10044_v4, 4  ;;  %v1616_v3 = vrot.slane %v10047_v51, 4  ;;  %v607_v62 = vpop.f32.mrf.mxu0 }
 0x21b   : > { %v1628_v9 = vrot.slane %v10050_v22, 4  ;;  %v1640_v20 = vrot.slane %v10053_v48, 4  ;;  %v1652_v36 = vrot.slane %v10056_v44, 4  ;;  %v1664_v0 = vrot.slane %v10059_v38, 4 }
 0x21c   : > { %v1605_v45 = vmax.f32 %v10044_v4, %v1604_v25  ;;  %v1617_v7 = vmax.f32 %v10047_v51, %v1616_v3  ;;  %v1676_v19 = vrot.slane %v10062_v29, 4  ;;  %v1688_v57 = vrot.slane %v10065_v41, 4 }
 0x21d   : > { %v1629_v24 = vmax.f32 %v10050_v22, %v1628_v9  ;;  %v1641_v39 = vmax.f32 %v10053_v48, %v1640_v20  ;;  %v1653_v34 = vmax.f32 %v10056_v44, %v1652_v36  ;;  %v1665_v32 = vmax.f32 %v10059_v38, %v1664_v0  ;;  %v10083_v11 = vpop.eup %7951 }
 0x21e   : > { %v1606_v28 = vrot.slane %v1605_v45, 2  ;;  %v1618_v37 = vrot.slane %v1617_v7, 2  ;;  %v1677_v1 = vmax.f32 %v10062_v29, %v1676_v19  ;;  %v1689_v14 = vmax.f32 %v10065_v41, %v1688_v57  ;;  %14236 = vst [vmem:[#allocation113_spill] sm:$0xff] %v10083_v11 }
 0x21f   : > { %v1630_v54 = vrot.slane %v1629_v24, 2  ;;  %v1642_v27 = vrot.slane %v1641_v39, 2  ;;  %v1654_v30 = vrot.slane %v1653_v34, 2  ;;  %v1666_v53 = vrot.slane %v1665_v32, 2  ;;  %v10085_v55 = vpop.eup %7953 }
 0x220   : > { %v1607_v47 = vmax.f32 %v1605_v45, %v1606_v28  ;;  %v1619_v12 = vmax.f32 %v1617_v7, %v1618_v37  ;;  %v1678_v23 = vrot.slane %v1677_v1, 2  ;;  %v1690_v42 = vrot.slane %v1689_v14, 2  ;;  %14237 = vst [vmem:[#allocation114_spill] sm:$0xff] %v10085_v55  ;;  %v10087_v58 = vpop.eup %7955  ;;  %v14244_v37 = vld [vmem:[#allocation13_spill] sm:$0xff] }
 0x221   : > { %v1631_v56 = vmax.f32 %v1629_v24, %v1630_v54  ;;  %v1643_v40 = vmax.f32 %v1641_v39, %v1642_v27  ;;  %v1655_v13 = vmax.f32 %v1653_v34, %v1654_v30  ;;  %v1667_v46 = vmax.f32 %v1665_v32, %v1666_v53  ;;  %14238 = vst [vmem:[#allocation15_spill] sm:$0xff] %v10087_v58  ;;  %v14248_v54 = vld [vmem:[#allocation21_spill] sm:$0xff]  ;;  %v14250_v30 = vld [vmem:[#allocation24_spill] sm:$0xff] }
 0x222   : > { %v1608_v49 = vrot.slane %v1607_v47, 1  ;;  %v1620_v18 = vrot.slane %v1619_v12, 1  ;;  %v1679_v2 = vmax.f32 %v1677_v1, %v1678_v23  ;;  %v1691_v10 = vmax.f32 %v1689_v14, %v1690_v42  ;;  %v10089_v26 = vpop.eup %7957 }
 0x223   : > { %14239 = vst [vmem:[#allocation112_spill] sm:$0xff] %v10089_v26  ;;  %v1632_v16 = vrot.slane %v1631_v56, 1  ;;  %v1644_v17 = vrot.slane %v1643_v40, 1  ;;  %v1656_v52 = vrot.slane %v1655_v13, 1  ;;  %v1668_v63 = vrot.slane %v1667_v46, 1 }
 0x224   : > { %v10091_v6 = vpop.eup %7959  ;;  %v1609_v31 = vmax.f32 %v1607_v47, %v1608_v49  ;;  %v1621_v50 = vmax.f32 %v1619_v12, %v1620_v18  ;;  %v1680_v33 = vrot.slane %v1679_v2, 1  ;;  %v1692_v5 = vrot.slane %v1691_v10, 1  ;;  %v14252_v12 = vld [vmem:[#allocation17_spill] sm:$0xff] }
 0x225   : > { %14240 = vst [vmem:[#allocation115_spill] sm:$0xff] %v10091_v6  ;;  %v10093_v8 = vpop.eup %7961  ;;  %v1633_v43 = vmax.f32 %v1631_v56, %v1632_v16  ;;  %v1645_v60 = vmax.f32 %v1643_v40, %v1644_v17  ;;  %v1657_v35 = vmax.f32 %v1655_v13, %v1656_v52  ;;  %v1669_v61 = vmax.f32 %v1667_v46, %v1668_v63  ;;  %v14254_v56 = vld [vmem:[#allocation20_spill] sm:$0xff]  ;;  %v14256_v46 = vld [vmem:[#allocation22_spill] sm:$0xff] }
 0x226   : > { %14241 = vst [vmem:[#allocation116_spill] sm:$0xff] %v10093_v8  ;;  %v10095_v59 = vpop.eup %7963  ;;  %v1681_v25 = vmax.f32 %v1679_v2, %v1680_v33  ;;  %v1693_v3 = vmax.f32 %v1691_v10, %v1692_v5  ;;  %v1695_v9 = vsub.f32 %v10044_v4, %v1609_v31  ;;  %v1697_v20 = vsub.f32 %v10047_v51, %v1621_v50  ;;  %v609_v51 = vpop.f32.mrf.mxu0  ;;  %v14258_v2 = vld [vmem:[#allocation25_spill] sm:$0xff] }
 0x227   : > { %14242 = vst [vmem:[#allocation117_spill] sm:$0xff] %v10095_v59  ;;  %v1699_v36 = vsub.f32 %v10050_v22, %v1633_v43  ;;  %v1701_v0 = vsub.f32 %v10053_v48, %v1645_v60  ;;  %v1703_v45 = vsub.f32 %v10056_v44, %v1657_v35  ;;  %v1705_v7 = vsub.f32 %v10059_v38, %v1669_v61  ;;  %v14243_v48 = vld [vmem:[#allocation16_spill] sm:$0xff] }
 0x228   : > { %v1707_v19 = vsub.f32 %v10062_v29, %v1681_v25  ;;  %v1709_v57 = vsub.f32 %v10065_v41, %v1693_v3  ;;  %v1712_v24 = vmul.f32 1.442695, %v1695_v9  ;;  %v1716_v39 = vmul.f32 1.442695, %v1697_v20  ;;  %v14246_v29 = vld [vmem:[#allocation19_spill] sm:$0xff]  ;;  %v613_v63 = vpop.f32.mrf.mxu0 }
 0x229   : > { %7965 = vpow2.f32 %v10013_v21  ;;  %v1720_v34 = vmul.f32 1.442695, %v1699_v36  ;;  %v1724_v4 = vmul.f32 1.442695, %v1701_v0  ;;  %v1728_v32 = vmul.f32 1.442695, %v1703_v45 }
 0x22a   : > { %7967 = vpow2.f32 %v1712_v24  ;;  %v1732_v22 = vmul.f32 1.442695, %v1705_v7  ;;  %v1736_v28 = vmul.f32 1.442695, %v1707_v19  ;;  %v14245_v44 = vrot.slane %v14243_v48, %v14244_v37  ;;  %v14268_v0 = vld [vmem:[#allocation18_spill] sm:$0xff] }
 0x22b   : > { %7969 = vpow2.f32 %v1716_v39  ;;  %v10109_v38 = vmul.f32 1.442695, %v1709_v57  ;;  %v14247_v41 = vrot.slane %v14246_v29, %v14244_v37  ;;  %v14249_v21 = vrot.slane %v14248_v54, %v14244_v37  ;;  %v14270_v19 = vld [vmem:[#allocation26_spill] sm:$0xff]  ;;  %v14272_v39 = vld [vmem:[#allocation28_spill] sm:$0xff] }
 0x22c   : > { %v2617_v1 = vmul.f32 %v14245_v44, %v607_v62  ;;  %7971 = vpow2.f32 %v1720_v34  ;;  %v14251_v53 = vrot.slane %v14250_v30, %v14244_v37  ;;  %v14253_v23 = vrot.slane %v14252_v12, %v14244_v37  ;;  %v14276_v44 = vld [vmem:[#allocation23_spill] sm:$0xff] }
 0x22d   : > { %v2619_v14 = vmul.f32 %v14247_v41, %v607_v62  ;;  %v2621_v27 = vmul.f32 %v14249_v21, %v607_v62  ;;  %v14255_v40 = vrot.slane %v14254_v56, %v14244_v37  ;;  %7973 = vpow2.f32 %v1724_v4  ;;  %v14278_v41 = vld [vmem:[#allocation27_spill] sm:$0xff] }
 0x22e   : > { %v2623_v47 = vmul.f32 %v14251_v53, %v607_v62  ;;  %v2625_v42 = vmul.f32 %v14253_v23, %v607_v62  ;;  %v14257_v49 = vrot.slane %v14256_v46, %v14244_v37  ;;  %v14259_v10 = vrot.slane %v14258_v2, %v14244_v37  ;;  %v10174_v53 = vpop.permute.xlu0 %3136 }
 0x22f   : > { %v2627_v13 = vmul.f32 %v14255_v40, %v607_v62  ;;  %v14260_v17 = vrot.slane %v14243_v48, %v8675_v15  ;;  %7975 = vpow2.f32 %v1728_v32  ;;  %v14261_v31 = vrot.slane %v14246_v29, %v8675_v15  ;;  %v14274_v32 = vld [vmem:[#allocation30_spill] sm:$0xff] }
 0x230   : > { %v2629_v18 = vmul.f32 %v14257_v49, %v607_v62  ;;  %v2631_v16 = vmul.f32 %v14259_v10, %v607_v62  ;;  %v14262_v33 = vrot.slane %v14248_v54, %v8675_v15  ;;  %v14263_v43 = vrot.slane %v14250_v30, %v8675_v15  ;;  %v615_v30 = vpop.f32.mrf.mxu0  ;;  %v10182_v10 = vpop.permute.xlu1 %3141 }
 0x231   : > { %v2618_v52 = vmul.f32 %v14260_v17, %v609_v51  ;;  %v2620_v50 = vmul.f32 %v14261_v31, %v609_v51  ;;  %7977 = vpow2.f32 %v1732_v22  ;;  %v14264_v35 = vrot.slane %v14252_v12, %v8675_v15  ;;  %v14280_v12 = vld [vmem:[#allocation29_spill] sm:$0xff] }
 0x232   : > { %v2622_v5 = vmul.f32 %v14262_v33, %v609_v51  ;;  %v2624_v60 = vmul.f32 %v14263_v43, %v609_v51  ;;  %v14265_v62 = vrot.slane %v14254_v56, %v8675_v15  ;;  %v14266_v3 = vrot.slane %v14256_v46, %v8675_v15 }
 0x233   : > { %v2626_v61 = vmul.f32 %v14264_v35, %v609_v51  ;;  %v14267_v20 = vrot.slane %v14258_v2, %v8675_v15  ;;  %v14269_v45 = vrot.slane %v14268_v0, %v14244_v37  ;;  %v14271_v57 = vrot.slane %v14270_v19, %v14244_v37 }
 0x234   : > { %v2628_v25 = vmul.f32 %v14265_v62, %v609_v51  ;;  %v2630_v9 = vmul.f32 %v14266_v3, %v609_v51  ;;  %v14273_v34 = vrot.slane %v14272_v39, %v14244_v37  ;;  %7979 = vpow2.f32 %v1736_v28  ;;  %v14282_v28 = vld [vmem:[#allocation31_spill] sm:$0xff] }
 0x235   : > { %v2632_v36 = vmul.f32 %v14267_v20, %v609_v51  ;;  %v2765_v7 = vmul.f32 %v14269_v45, %v613_v63  ;;  %v2767_v24 = vmul.f32 %v14271_v57, %v613_v63  ;;  %v14275_v22 = vrot.slane %v14274_v32, %v14244_v37 }
 0x236   : > { %v2769_v4 = vmul.f32 %v14273_v34, %v613_v63  ;;  %v14277_v51 = vrot.slane %v14276_v44, %v14244_v37  ;;  %v14279_v54 = vrot.slane %v14278_v41, %v14244_v37  ;;  %v14281_v23 = vrot.slane %v14280_v12, %v14244_v37 }
 0x237   : > { %v2771_v48 = vmul.f32 %v14275_v22, %v613_v63  ;;  %v14283_v40 = vrot.slane %v14282_v28, %v14244_v37  ;;  %v2781_v49 = vadd.f32 %v2765_v7, %v2617_v1  ;;  %v2783_v2 = vadd.f32 %v2767_v24, %v2619_v14 }
 0x238   : > { %v2773_v29 = vmul.f32 %v14277_v51, %v613_v63  ;;  %v2775_v21 = vmul.f32 %v14279_v54, %v613_v63  ;;  %v2777_v56 = vmul.f32 %v14281_v23, %v613_v63  ;;  %v2785_v17 = vadd.f32 %v2769_v4, %v2621_v27 }
 0x239   : > { %v2779_v46 = vmul.f32 %v14283_v40, %v613_v63  ;;  %v2787_v31 = vadd.f32 %v2771_v48, %v2623_v47  ;;  %v14284_v3 = vrot.slane %v14268_v0, %v8675_v15  ;;  %v14285_v45 = vrot.slane %v14270_v19, %v8675_v15  ;;  %v619_v63 = vpop.f32.mrf.mxu0  ;;  %v10202_v0 = vpop.eup %7965  ;;  %v14302_v40 = vld [vmem:[#allocation38_spill] sm:$0xff] }
 0x23a   : > { %v2789_v33 = vadd.f32 %v2773_v29, %v2625_v42  ;;  %v2791_v43 = vadd.f32 %v2775_v21, %v2627_v13  ;;  %v2793_v35 = vadd.f32 %v2777_v56, %v2629_v18  ;;  %v14286_v1 = vrot.slane %v14272_v39, %v8675_v15  ;;  %14290 = vst [vmem:[#allocation16_spill] sm:$0xff] %v10202_v0 }
 0x23b   : > { %v2795_v62 = vadd.f32 %v2779_v46, %v2631_v16  ;;  %v2766_v20 = vmul.f32 %v14284_v3, %v615_v30  ;;  %v2768_v57 = vmul.f32 %v14285_v45, %v615_v30  ;;  %v14287_v27 = vrot.slane %v14274_v32, %v8675_v15  ;;  %v10210_v32 = vpop.eup %7967  ;;  %v14304_v46 = vld [vmem:[#allocation33_spill] sm:$0xff]  ;;  %v14306_v45 = vld [vmem:[#allocation35_spill] sm:$0xff] }
 0x23c   : > { %v2770_v14 = vmul.f32 %v14286_v1, %v615_v30  ;;  %v14288_v42 = vrot.slane %v14276_v44, %v8675_v15  ;;  %v14289_v18 = vrot.slane %v14278_v41, %v8675_v15  ;;  %v14291_v7 = vrot.slane %v14280_v12, %v8675_v15  ;;  %14293 = vst [vmem:[#allocation19_spill] sm:$0xff] %v10210_v32  ;;  %v10212_v29 = vpop.eup %7969  ;;  %v10214_v41 = vpop.permute.xlu0 %3146  ;;  %v14295_v12 = vld [vmem:[#allocation32_spill] sm:$0xff] }
 0x23d   : > { %v2772_v47 = vmul.f32 %v14287_v27, %v615_v30  ;;  %v14292_v24 = vrot.slane %v14282_v28, %v8675_v15  ;;  %v2782_v34 = vadd.f32 %v2766_v20, %v2618_v52  ;;  %v2784_v4 = vadd.f32 %v2768_v57, %v2620_v50  ;;  %14294 = vst [vmem:[#allocation21_spill] sm:$0xff] %v10212_v29  ;;  %v14297_v28 = vld [vmem:[#allocation34_spill] sm:$0xff] }
 0x23e   : > { %v2774_v13 = vmul.f32 %v14288_v42, %v615_v30  ;;  %v2776_v16 = vmul.f32 %v14289_v18, %v615_v30  ;;  %v2778_v19 = vmul.f32 %v14291_v7, %v615_v30  ;;  %v2786_v22 = vadd.f32 %v2770_v14, %v2622_v5  ;;  %v10224_v5 = vpop.permute.xlu1 %3151  ;;  %v621_v14 = vpop.f32.mrf.mxu0  ;;  %v14311_v18 = vld [vmem:[#allocation39_spill] sm:$0xff] }
 0x23f   : > { %v2780_v39 = vmul.f32 %v14292_v24, %v615_v30  ;;  %v2788_v48 = vadd.f32 %v2772_v47, %v2624_v60  ;;  %v14296_v23 = vrot.slane %v14295_v12, %v14244_v37  ;;  %v14298_v52 = vrot.slane %v14297_v28, %v14244_v37  ;;  %v10222_v30 = vpop.eup %7971  ;;  %v14300_v60 = vld [vmem:[#allocation36_spill] sm:$0xff]  ;;  %v14309_v47 = vld [vmem:[#allocation37_spill] sm:$0xff] }
 0x240   : > { %v2790_v44 = vadd.f32 %v2774_v13, %v2626_v61  ;;  %v2792_v51 = vadd.f32 %v2776_v16, %v2628_v25  ;;  %v2794_v54 = vadd.f32 %v2778_v19, %v2630_v9  ;;  %14299 = vst [vmem:[#allocation24_spill] sm:$0xff] %v10222_v30  ;;  %v14301_v61 = vrot.slane %v14300_v60, %v14244_v37  ;;  %v10238_v27 = vpop.eup %7973 }
 0x241   : > { %v2796_v21 = vadd.f32 %v2780_v39, %v2632_v36  ;;  %v2929_v56 = vmul.f32 %v14296_v23, %v619_v63  ;;  %v2931_v50 = vmul.f32 %v14298_v52, %v619_v63  ;;  %v14303_v9 = vrot.slane %v14302_v40, %v14244_v37  ;;  %14308 = vst [vmem:[#allocation17_spill] sm:$0xff] %v10238_v27  ;;  %v10246_v39 = vpop.eup %7975 }
 0x242   : > { %v2933_v25 = vmul.f32 %v14301_v61, %v619_v63  ;;  %v14305_v3 = vrot.slane %v14304_v46, %v14244_v37  ;;  %v14307_v57 = vrot.slane %v14306_v45, %v14244_v37  ;;  %v14310_v42 = vrot.slane %v14309_v47, %v14244_v37  ;;  %14313 = vst [vmem:[#allocation20_spill] sm:$0xff] %v10246_v39 }
 0x243   : > { %v2935_v36 = vmul.f32 %v14303_v9, %v619_v63  ;;  %v14312_v16 = vrot.slane %v14311_v18, %v14244_v37  ;;  %v2945_v19 = vadd.f32 %v2929_v56, %v2781_v49  ;;  %v2947_v24 = vadd.f32 %v2931_v50, %v2783_v2 }
 0x244   : > { %v2937_v20 = vmul.f32 %v14305_v3, %v619_v63  ;;  %v2939_v1 = vmul.f32 %v14307_v57, %v619_v63  ;;  %v2941_v13 = vmul.f32 %v14310_v42, %v619_v63  ;;  %v2949_v23 = vadd.f32 %v2933_v25, %v2785_v17  ;;  %v10248_v3 = vpop.eup %7977 }
 0x245   : > { %v2943_v7 = vmul.f32 %v14312_v16, %v619_v63  ;;  %v2951_v52 = vadd.f32 %v2935_v36, %v2787_v31  ;;  %14314 = vst [vmem:[#allocation22_spill] sm:$0xff] %v10248_v3  ;;  %v14315_v59 = vrot.slane %v14295_v12, %v8675_v15  ;;  %v14316_v8 = vrot.slane %v14297_v28, %v8675_v15  ;;  %v10268_v12 = vpop.eup %7979  ;;  %v10282_v36 = vpop.permute.xlu1 %3161 }
 0x246   : > { %v2953_v61 = vadd.f32 %v2937_v20, %v2789_v33  ;;  %v2955_v9 = vadd.f32 %v2939_v1, %v2791_v43  ;;  %v2957_v57 = vadd.f32 %v2941_v13, %v2793_v35  ;;  %v14317_v49 = vrot.slane %v14300_v60, %v8675_v15  ;;  %14321 = vst [vmem:[#allocation25_spill] sm:$0xff] %v10268_v12 }
 0x247   : > { %v2959_v0 = vadd.f32 %v2943_v7, %v2795_v62  ;;  %v2930_v42 = vmul.f32 %v14315_v59, %v621_v14  ;;  %v2932_v63 = vmul.f32 %v14316_v8, %v621_v14  ;;  %v14318_v17 = vrot.slane %v14302_v40, %v8675_v15  ;;  %v625_v62 = vpop.f32.mrf.mxu0  ;;  %v10280_v40 = vpop.permute.xlu0 %3156  ;;  %14325 = vst [vmem:[#allocation26_spill] sm:$0xff] %v10282_v36 }
 0x248   : > { %v2934_v2 = vmul.f32 %v14317_v49, %v621_v14  ;;  %v14319_v33 = vrot.slane %v14304_v46, %v8675_v15  ;;  %v14320_v35 = vrot.slane %v14306_v45, %v8675_v15  ;;  %v14322_v8 = vrot.slane %v14309_v47, %v8675_v15  ;;  %14324 = vst [vmem:[#allocation18_spill] sm:$0xff] %v10280_v40 }
 0x249   : > { %v2936_v31 = vmul.f32 %v14318_v17, %v621_v14  ;;  %v14323_v28 = vrot.slane %v14311_v18, %v8675_v15  ;;  %v10276_v60 = vadd.f32 %v2930_v42, %v2782_v34  ;;  %v10278_v25 = vadd.f32 %v2932_v63, %v2784_v4  ;;  %v14326_v34 = vld [vmem:[#allocation40_spill] sm:$0xff]  ;;  %v14328_v18 = vld [vmem:[#allocation42_spill] sm:$0xff] }
 0x24a   : > { %v2938_v43 = vmul.f32 %v14319_v33, %v621_v14  ;;  %v2940_v59 = vmul.f32 %v14320_v35, %v621_v14  ;;  %v2942_v56 = vmul.f32 %v14322_v8, %v621_v14  ;;  %v10284_v46 = vadd.f32 %v2934_v2, %v2786_v22  ;;  %v14330_v22 = vld [vmem:[#allocation44_spill] sm:$0xff]  ;;  %v14336_v2 = vld [vmem:[#allocation43_spill] sm:$0xff]  ;;  %v14338_v33 = vld [vmem:[#allocation45_spill] sm:$0xff] }
 0x24b   : > { %v2944_v50 = vmul.f32 %v14323_v28, %v621_v14  ;;  %v10286_v20 = vadd.f32 %v2936_v31, %v2788_v48  ;;  %v14327_v4 = vrot.slane %v14326_v34, %v14244_v37  ;;  %v14329_v16 = vrot.slane %v14328_v18, %v14244_v37  ;;  %v10326_v39 = vpop.permute.xlu0 %3166 }
 0x24c   : > { %v10288_v45 = vadd.f32 %v2938_v43, %v2790_v44  ;;  %v10290_v1 = vadd.f32 %v2940_v59, %v2792_v51  ;;  %v10292_v47 = vadd.f32 %v2942_v56, %v2794_v54  ;;  %v14331_v48 = vrot.slane %v14330_v22, %v14244_v37  ;;  %v14332_v44 = vld [vmem:[#allocation46_spill] sm:$0xff]  ;;  %v14334_v54 = vld [vmem:[#allocation41_spill] sm:$0xff]  ;;  %v14340_v59 = vld [vmem:[#allocation47_spill] sm:$0xff]  ;;  %14342 = vst [vmem:[#allocation28_spill] sm:$0xff] %v10326_v39 }
 0x24d   : > { %v10294_v13 = vadd.f32 %v2944_v50, %v2796_v21  ;;  %v3093_v14 = vmul.f32 %v14327_v4, %v625_v62  ;;  %v3095_v7 = vmul.f32 %v14329_v16, %v625_v62  ;;  %v14333_v51 = vrot.slane %v14332_v44, %v14244_v37 }
 0x24e   : > { %v3097_v42 = vmul.f32 %v14331_v48, %v625_v62  ;;  %v14335_v21 = vrot.slane %v14334_v54, %v14244_v37  ;;  %v14337_v17 = vrot.slane %v14336_v2, %v14244_v37  ;;  %v14339_v43 = vrot.slane %v14338_v33, %v14244_v37 }
 0x24f   : > { %v3099_v63 = vmul.f32 %v14333_v51, %v625_v62  ;;  %v14341_v8 = vrot.slane %v14340_v59, %v14244_v37  ;;  %v3109_v28 = vadd.f32 %v3093_v14, %v2945_v19  ;;  %v3111_v50 = vadd.f32 %v3095_v7, %v2947_v24 }
 0x250   : > { %v3101_v49 = vmul.f32 %v14335_v21, %v625_v62  ;;  %v3103_v31 = vmul.f32 %v14337_v17, %v625_v62  ;;  %v3105_v35 = vmul.f32 %v14339_v43, %v625_v62  ;;  %v3113_v4 = vadd.f32 %v3097_v42, %v2949_v23  ;;  %v10328_v43 = vpop.permute.xlu1 %3171 }
 0x251   : > { %v3107_v56 = vmul.f32 %v14341_v8, %v625_v62  ;;  %v3115_v16 = vadd.f32 %v3099_v63, %v2951_v52  ;;  %v10321_v3 = vadd.f32 %v10174_v53, %v3109_v28  ;;  %v10324_v17 = vadd.f32 %v10182_v10, %v3111_v50  ;;  %14343 = vst [vmem:[#allocation30_spill] sm:$0xff] %v10328_v43 }
 0x252   : > { %v3117_v48 = vadd.f32 %v3101_v49, %v2953_v61  ;;  %v3119_v51 = vadd.f32 %v3103_v31, %v2955_v9  ;;  %v3121_v12 = vadd.f32 %v3105_v35, %v2957_v57  ;;  %v10331_v62 = vadd.f32 %v10214_v41, %v3113_v4 }
 0x253   : > { %v3123_v21 = vadd.f32 %v3107_v56, %v2959_v0  ;;  %v10334_v19 = vadd.f32 %v10224_v5, %v3115_v16  ;;  %v3190_v61 = vrot.slane %v10321_v3, 4  ;;  %v3202_v9 = vrot.slane %v10324_v17, 4 }
 0x254   : > { %v10337_v24 = vadd.f32 %v10280_v40, %v3117_v48  ;;  %v10340_v0 = vadd.f32 %v10282_v36, %v3119_v51  ;;  %v10343_v23 = vadd.f32 %v10326_v39, %v3121_v12  ;;  %v3214_v57 = vrot.slane %v10331_v62, 4 }
 0x255   : > { %v10346_v52 = vadd.f32 %v10328_v43, %v3123_v21  ;;  %v3226_v14 = vrot.slane %v10334_v19, 4  ;;  %v3191_v63 = vmax.f32 %v10321_v3, %v3190_v61  ;;  %v3203_v12 = vmax.f32 %v10324_v17, %v3202_v9 }
 0x256   : > { %v3238_v7 = vrot.slane %v10337_v24, 4  ;;  %v3250_v42 = vrot.slane %v10340_v0, 4  ;;  %v3262_v49 = vrot.slane %v10343_v23, 4  ;;  %v3215_v35 = vmax.f32 %v10331_v62, %v3214_v57 }
 0x257   : > { %v3274_v31 = vrot.slane %v10346_v52, 4  ;;  %v3227_v8 = vmax.f32 %v10334_v19, %v3226_v14  ;;  %v3192_v50 = vrot.slane %v3191_v63, 2  ;;  %v3204_v4 = vrot.slane %v3203_v12, 2 }
 0x258   : > { %v3239_v56 = vmax.f32 %v10337_v24, %v3238_v7  ;;  %v3251_v28 = vmax.f32 %v10340_v0, %v3250_v42  ;;  %v3263_v16 = vmax.f32 %v10343_v23, %v3262_v49  ;;  %v3216_v51 = vrot.slane %v3215_v35, 2 }
 0x259   : > { %v3275_v48 = vmax.f32 %v10346_v52, %v3274_v31  ;;  %v3228_v21 = vrot.slane %v3227_v8, 2  ;;  %v3193_v6 = vmax.f32 %v3191_v63, %v3192_v50  ;;  %v3205_v27 = vmax.f32 %v3203_v12, %v3204_v4 }
 0x25a   : > { %v3240_v61 = vrot.slane %v3239_v56, 2  ;;  %v3252_v9 = vrot.slane %v3251_v28, 2  ;;  %v3264_v30 = vrot.slane %v3263_v16, 2  ;;  %v3217_v29 = vmax.f32 %v3215_v35, %v3216_v51 }
 0x25b   : > { %v3276_v57 = vrot.slane %v3275_v48, 2  ;;  %v3229_v14 = vmax.f32 %v3227_v8, %v3228_v21  ;;  %v3194_v26 = vrot.slane %v3193_v6, 1  ;;  %v3206_v42 = vrot.slane %v3205_v27, 1 }
 0x25c   : > { %v3241_v32 = vmax.f32 %v3239_v56, %v3240_v61  ;;  %v3253_v7 = vmax.f32 %v3251_v28, %v3252_v9  ;;  %v3265_v58 = vmax.f32 %v3263_v16, %v3264_v30  ;;  %v3218_v11 = vrot.slane %v3217_v29, 1  ;;  %v627_v30 = vpop.f32.mrf.mxu0 }
 0x25d   : > { %v3277_v55 = vmax.f32 %v3275_v48, %v3276_v57  ;;  %v3230_v49 = vrot.slane %v3229_v14, 1  ;;  %v3195_v43 = vmax.f32 %v3193_v6, %v3194_v26  ;;  %v3207_v39 = vmax.f32 %v3205_v27, %v3206_v42 }
 0x25e   : > { %v3242_v37 = vrot.slane %v3241_v32, 1  ;;  %v3254_v31 = vrot.slane %v3253_v7, 1  ;;  %v3266_v36 = vrot.slane %v3265_v58, 1  ;;  %v3219_v63 = vmax.f32 %v3217_v29, %v3218_v11 }
 0x25f   : > { %v3278_v40 = vrot.slane %v3277_v55, 1  ;;  %v3231_v12 = vmax.f32 %v3229_v14, %v3230_v49  ;;  %v3286_v56 = vsub.f32 %v10321_v3, %v3195_v43  ;;  %v3288_v28 = vsub.f32 %v10324_v17, %v3207_v39 }
 0x260   : > { %v3243_v50 = vmax.f32 %v3241_v32, %v3242_v37  ;;  %v3255_v4 = vmax.f32 %v3253_v7, %v3254_v31  ;;  %v3267_v35 = vmax.f32 %v3265_v58, %v3266_v36  ;;  %v3290_v16 = vsub.f32 %v10331_v62, %v3219_v63 }
 0x261   : > { %v3279_v8 = vmax.f32 %v3277_v55, %v3278_v40  ;;  %v3292_v48 = vsub.f32 %v10334_v19, %v3231_v12  ;;  %v3302_v32 = vmul.f32 1.442695, %v3286_v56  ;;  %v3306_v58 = vmul.f32 1.442695, %v3288_v28 }
 0x262   : > { %v3294_v26 = vsub.f32 %v10337_v24, %v3243_v50  ;;  %v3296_v6 = vsub.f32 %v10340_v0, %v3255_v4  ;;  %v3298_v11 = vsub.f32 %v10343_v23, %v3267_v35  ;;  %7981 = vpow2.f32 %v10109_v38 }
 0x263   : > { %v3300_v37 = vsub.f32 %v10346_v52, %v3279_v8  ;;  %v3310_v55 = vmul.f32 1.442695, %v3290_v16  ;;  %v3314_v29 = vmul.f32 1.442695, %v3292_v48  ;;  %v14344_v27 = vrot.slane %v14326_v34, %v8675_v15 }
 0x264   : > { %7983 = vpow2.f32 %v3302_v32  ;;  %v3318_v3 = vmul.f32 1.442695, %v3294_v26  ;;  %v3322_v40 = vmul.f32 1.442695, %v3296_v6  ;;  %v3326_v36 = vmul.f32 1.442695, %v3298_v11 }
 0x265   : > { %v3094_v39 = vmul.f32 %v14344_v27, %v627_v30  ;;  %v10376_v17 = vmul.f32 1.442695, %v3300_v37  ;;  %v14345_v43 = vrot.slane %v14328_v18, %v8675_v15  ;;  %v14346_v19 = vrot.slane %v14330_v22, %v8675_v15 }
 0x266   : > { %v14347_v24 = vrot.slane %v14332_v44, %v8675_v15  ;;  %7985 = vpow2.f32 %v3306_v58  ;;  %v14348_v34 = vrot.slane %v14334_v54, %v8675_v15  ;;  %v14349_v52 = vrot.slane %v14336_v2, %v8675_v15 }
 0x267   : > { %v3096_v62 = vmul.f32 %v14345_v43, %v627_v30  ;;  %v3098_v38 = vmul.f32 %v14346_v19, %v627_v30  ;;  %v14350_v18 = vrot.slane %v14338_v33, %v8675_v15  ;;  %7987 = vpow2.f32 %v3310_v55 }
 0x268   : > { %v3100_v0 = vmul.f32 %v14347_v24, %v627_v30  ;;  %v3102_v23 = vmul.f32 %v14348_v34, %v627_v30  ;;  %v3104_v51 = vmul.f32 %v14349_v52, %v627_v30  ;;  %v14351_v22 = vrot.slane %v14340_v59, %v8675_v15 }
 0x269   : > { %v3106_v21 = vmul.f32 %v14350_v18, %v627_v30  ;;  %v3110_v44 = vadd.f32 %v3094_v39, %v10276_v60  ;;  %v3112_v9 = vadd.f32 %v3096_v62, %v10278_v25  ;;  %7989 = vpow2.f32 %v3314_v29 }
 0x26a   : > { %v3108_v61 = vmul.f32 %v14351_v22, %v627_v30  ;;  %v3114_v54 = vadd.f32 %v3098_v38, %v10284_v46  ;;  %v3116_v57 = vadd.f32 %v3100_v0, %v10286_v20  ;;  %v3118_v2 = vadd.f32 %v3102_v23, %v10288_v45  ;;  %v14352_v20 = vld [vmem:[#allocation18_spill] sm:$0xff] }
 0x26b   : > { %7991 = vpow2.f32 %v3318_v3  ;;  %v3120_v33 = vadd.f32 %v3104_v51, %v10290_v1  ;;  %v3122_v14 = vadd.f32 %v3106_v21, %v10292_v47  ;;  %v10408_v59 = vadd.f32 %v10174_v53, %v3110_v44  ;;  %v14353_v1 = vld [vmem:[#allocation26_spill] sm:$0xff] }
 0x26c   : > { %v3124_v7 = vadd.f32 %v3108_v61, %v10294_v13  ;;  %7993 = vpow2.f32 %v3322_v40  ;;  %v10411_v60 = vadd.f32 %v10182_v10, %v3112_v9  ;;  %v10414_v25 = vadd.f32 %v10214_v41, %v3114_v54  ;;  %v14354_v13 = vld [vmem:[#allocation28_spill] sm:$0xff]  ;;  %v14355_v53 = vld [vmem:[#allocation30_spill] sm:$0xff] }
 0x26d   : > { %7995 = vpow2.f32 %v3326_v36  ;;  %v10417_v46 = vadd.f32 %v10224_v5, %v3116_v57  ;;  %v10420_v45 = vadd.f32 %v14352_v20, %v3118_v2  ;;  %v10423_v47 = vadd.f32 %v14353_v1, %v3120_v33 }
 0x26e   : > { %v10426_v42 = vadd.f32 %v14354_v13, %v3122_v14  ;;  %v10429_v49 = vadd.f32 %v14355_v53, %v3124_v7  ;;  %v3196_v10 = vrot.slane %v10408_v59, 4  ;;  %v3208_v41 = vrot.slane %v10411_v60, 4  ;;  %v631_v53 = vpop.f32.mrf.mxu0 }
 0x26f   : > { %v3220_v31 = vrot.slane %v10414_v25, 4  ;;  %v3232_v5 = vrot.slane %v10417_v46, 4  ;;  %v3244_v63 = vrot.slane %v10420_v45, 4  ;;  %v3256_v12 = vrot.slane %v10423_v47, 4  ;;  %v10445_v48 = vpop.eup %7981 }
 0x270   : > { %v3197_v50 = vmax.f32 %v10408_v59, %v3196_v10  ;;  %v3209_v4 = vmax.f32 %v10411_v60, %v3208_v41  ;;  %v3268_v35 = vrot.slane %v10426_v42, 4  ;;  %v3280_v8 = vrot.slane %v10429_v49, 4  ;;  %14356 = vst [vmem:[#allocation23_spill] sm:$0xff] %v10445_v48 }
 0x271   : > { %v3221_v56 = vmax.f32 %v10414_v25, %v3220_v31  ;;  %v3233_v28 = vmax.f32 %v10417_v46, %v3232_v5  ;;  %v3245_v30 = vmax.f32 %v10420_v45, %v3244_v63  ;;  %v3257_v16 = vmax.f32 %v10423_v47, %v3256_v12  ;;  %v10449_v32 = vpop.eup %7983 }
 0x272   : > { %v3198_v26 = vrot.slane %v3197_v50, 2  ;;  %v3210_v6 = vrot.slane %v3209_v4, 2  ;;  %v3269_v11 = vmax.f32 %v10426_v42, %v3268_v35  ;;  %v3281_v37 = vmax.f32 %v10429_v49, %v3280_v8  ;;  %14357 = vst [vmem:[#allocation27_spill] sm:$0xff] %v10449_v32 }
 0x273   : > { %v3222_v58 = vrot.slane %v3221_v56, 2  ;;  %v3234_v55 = vrot.slane %v3233_v28, 2  ;;  %v3246_v29 = vrot.slane %v3245_v30, 2  ;;  %v3258_v27 = vrot.slane %v3257_v16, 2  ;;  %v10451_v43 = vpop.eup %7985 }
 0x274   : > { %v3199_v39 = vmax.f32 %v3197_v50, %v3198_v26  ;;  %v3211_v3 = vmax.f32 %v3209_v4, %v3210_v6  ;;  %v3270_v40 = vrot.slane %v3269_v11, 2  ;;  %v3282_v36 = vrot.slane %v3281_v37, 2  ;;  %14358 = vst [vmem:[#allocation29_spill] sm:$0xff] %v10451_v43  ;;  %v10453_v0 = vpop.eup %7987 }
 0x275   : > { %v3223_v62 = vmax.f32 %v3221_v56, %v3222_v58  ;;  %v3235_v19 = vmax.f32 %v3233_v28, %v3234_v55  ;;  %v3247_v38 = vmax.f32 %v3245_v30, %v3246_v29  ;;  %v3259_v24 = vmax.f32 %v3257_v16, %v3258_v27  ;;  %14359 = vst [vmem:[#allocation31_spill] sm:$0xff] %v10453_v0  ;;  %v14369_v55 = vld [vmem:[#allocation52_spill] sm:$0xff]  ;;  %v14371_v27 = vld [vmem:[#allocation54_spill] sm:$0xff] }
 0x276   : > { %v3200_v34 = vrot.slane %v3199_v39, 1  ;;  %v3212_v23 = vrot.slane %v3211_v3, 1  ;;  %v3271_v52 = vmax.f32 %v3269_v11, %v3270_v40  ;;  %v3283_v51 = vmax.f32 %v3281_v37, %v3282_v36  ;;  %v10455_v18 = vpop.eup %7989  ;;  %v14365_v11 = vld [vmem:[#allocation13_spill] sm:$0xff] }
 0x277   : > { %14360 = vst [vmem:[#allocation32_spill] sm:$0xff] %v10455_v18  ;;  %v3224_v21 = vrot.slane %v3223_v62, 1  ;;  %v3236_v22 = vrot.slane %v3235_v19, 1  ;;  %v3248_v61 = vrot.slane %v3247_v38, 1  ;;  %v3260_v44 = vrot.slane %v3259_v24, 1  ;;  %v14373_v40 = vld [vmem:[#allocation49_spill] sm:$0xff] }
 0x278   : > { %v10457_v9 = vpop.eup %7991  ;;  %v3201_v54 = vmax.f32 %v3199_v39, %v3200_v34  ;;  %v3213_v57 = vmax.f32 %v3211_v3, %v3212_v23  ;;  %v3272_v2 = vrot.slane %v3271_v52, 1  ;;  %v3284_v33 = vrot.slane %v3283_v51, 1  ;;  %v14377_v34 = vld [vmem:[#allocation53_spill] sm:$0xff] }
 0x279   : > { %14361 = vst [vmem:[#allocation34_spill] sm:$0xff] %v10457_v9  ;;  %v10459_v14 = vpop.eup %7993  ;;  %v3225_v7 = vmax.f32 %v3223_v62, %v3224_v21  ;;  %v3237_v20 = vmax.f32 %v3235_v19, %v3236_v22  ;;  %v3249_v1 = vmax.f32 %v3247_v38, %v3248_v61  ;;  %v3261_v13 = vmax.f32 %v3259_v24, %v3260_v44  ;;  %v14375_v19 = vld [vmem:[#allocation51_spill] sm:$0xff] }
 0x27a   : > { %14362 = vst [vmem:[#allocation36_spill] sm:$0xff] %v10459_v14  ;;  %v10461_v10 = vpop.eup %7995  ;;  %v3273_v41 = vmax.f32 %v3271_v52, %v3272_v2  ;;  %v3285_v31 = vmax.f32 %v3283_v51, %v3284_v33  ;;  %v3287_v5 = vsub.f32 %v10408_v59, %v3201_v54  ;;  %v3289_v63 = vsub.f32 %v10411_v60, %v3213_v57  ;;  %v633_v60 = vpop.f32.mrf.mxu0  ;;  %v14379_v51 = vld [vmem:[#allocation55_spill] sm:$0xff] }
 0x27b   : > { %14363 = vst [vmem:[#allocation38_spill] sm:$0xff] %v10461_v10  ;;  %v3291_v12 = vsub.f32 %v10414_v25, %v3225_v7  ;;  %v3293_v50 = vsub.f32 %v10417_v46, %v3237_v20  ;;  %v3295_v4 = vsub.f32 %v10420_v45, %v3249_v1  ;;  %v3297_v35 = vsub.f32 %v10423_v47, %v3261_v13  ;;  %v14364_v46 = vld [vmem:[#allocation48_spill] sm:$0xff] }
 0x27c   : > { %v3299_v8 = vsub.f32 %v10426_v42, %v3273_v41  ;;  %v3301_v56 = vsub.f32 %v10429_v49, %v3285_v31  ;;  %v3304_v28 = vmul.f32 1.442695, %v3287_v5  ;;  %v3308_v30 = vmul.f32 1.442695, %v3289_v63  ;;  %v14367_v42 = vld [vmem:[#allocation50_spill] sm:$0xff]  ;;  %v637_v54 = vpop.f32.mrf.mxu0 }
 0x27d   : > { %7997 = vpow2.f32 %v10376_v17  ;;  %v3312_v16 = vmul.f32 1.442695, %v3291_v12  ;;  %v3316_v59 = vmul.f32 1.442695, %v3293_v50  ;;  %v3320_v26 = vmul.f32 1.442695, %v3295_v4 }
 0x27e   : > { %7999 = vpow2.f32 %v3304_v28  ;;  %v3324_v25 = vmul.f32 1.442695, %v3297_v35  ;;  %v3328_v6 = vmul.f32 1.442695, %v3299_v8  ;;  %v14366_v45 = vrot.slane %v14364_v46, %v14365_v11  ;;  %v14389_v4 = vld [vmem:[#allocation56_spill] sm:$0xff] }
 0x27f   : > { %8001 = vpow2.f32 %v3308_v30  ;;  %v10475_v47 = vmul.f32 1.442695, %v3301_v56  ;;  %v14368_v49 = vrot.slane %v14367_v42, %v14365_v11  ;;  %v14370_v17 = vrot.slane %v14369_v55, %v14365_v11  ;;  %v14391_v56 = vld [vmem:[#allocation58_spill] sm:$0xff] }
 0x280   : > { %v4202_v37 = vmul.f32 %v14366_v45, %v631_v53  ;;  %8003 = vpow2.f32 %v3312_v16  ;;  %v14372_v39 = vrot.slane %v14371_v27, %v14365_v11  ;;  %v14374_v36 = vrot.slane %v14373_v40, %v14365_v11  ;;  %v14393_v16 = vld [vmem:[#allocation60_spill] sm:$0xff] }
 0x281   : > { %v4204_v58 = vmul.f32 %v14368_v49, %v631_v53  ;;  %v4206_v29 = vmul.f32 %v14370_v17, %v631_v53  ;;  %v14376_v38 = vrot.slane %v14375_v19, %v14365_v11  ;;  %8005 = vpow2.f32 %v3316_v59 }
 0x282   : > { %v4208_v3 = vmul.f32 %v14372_v39, %v631_v53  ;;  %v4210_v62 = vmul.f32 %v14374_v36, %v631_v53  ;;  %v14378_v23 = vrot.slane %v14377_v34, %v14365_v11  ;;  %v14380_v21 = vrot.slane %v14379_v51, %v14365_v11  ;;  %v639_v39 = vpop.f32.mrf.mxu0  ;;  %v14401_v36 = vld [vmem:[#allocation61_spill] sm:$0xff] }
 0x283   : > { %v4212_v24 = vmul.f32 %v14376_v38, %v631_v53  ;;  %v14381_v61 = vrot.slane %v14364_v46, %v8675_v15  ;;  %8007 = vpow2.f32 %v3320_v26  ;;  %v14382_v57 = vrot.slane %v14367_v42, %v8675_v15  ;;  %v14397_v42 = vld [vmem:[#allocation57_spill] sm:$0xff] }
 0x284   : > { %v4214_v52 = vmul.f32 %v14378_v23, %v631_v53  ;;  %v4216_v22 = vmul.f32 %v14380_v21, %v631_v53  ;;  %v14383_v33 = vrot.slane %v14369_v55, %v8675_v15  ;;  %v14384_v20 = vrot.slane %v14371_v27, %v8675_v15  ;;  %v14399_v55 = vld [vmem:[#allocation59_spill] sm:$0xff] }
 0x285   : > { %v4203_v44 = vmul.f32 %v14381_v61, %v633_v60  ;;  %v4205_v2 = vmul.f32 %v14382_v57, %v633_v60  ;;  %8009 = vpow2.f32 %v3324_v25  ;;  %v14385_v13 = vrot.slane %v14373_v40, %v8675_v15  ;;  %v14395_v25 = vld [vmem:[#allocation62_spill] sm:$0xff]  ;;  %v10540_v40 = vpop.permute.xlu0 %4721  ;;  %v10548_v61 = vpop.permute.xlu1 %4726 }
 0x286   : > { %v4207_v7 = vmul.f32 %v14383_v33, %v633_v60  ;;  %v4209_v1 = vmul.f32 %v14384_v20, %v633_v60  ;;  %v14386_v41 = vrot.slane %v14375_v19, %v8675_v15  ;;  %v14387_v5 = vrot.slane %v14377_v34, %v8675_v15 }
 0x287   : > { %v4211_v53 = vmul.f32 %v14385_v13, %v633_v60  ;;  %v14388_v12 = vrot.slane %v14379_v51, %v8675_v15  ;;  %v14390_v35 = vrot.slane %v14389_v4, %v14365_v11  ;;  %v14392_v28 = vrot.slane %v14391_v56, %v14365_v11 }
 0x288   : > { %v4213_v31 = vmul.f32 %v14386_v41, %v633_v60  ;;  %v4215_v63 = vmul.f32 %v14387_v5, %v633_v60  ;;  %v14394_v59 = vrot.slane %v14393_v16, %v14365_v11  ;;  %8011 = vpow2.f32 %v3328_v6  ;;  %v14403_v6 = vld [vmem:[#allocation63_spill] sm:$0xff] }
 0x289   : > { %v4217_v50 = vmul.f32 %v14388_v12, %v633_v60  ;;  %v4350_v8 = vmul.f32 %v14390_v35, %v637_v54  ;;  %v4352_v30 = vmul.f32 %v14392_v28, %v637_v54  ;;  %v14396_v46 = vrot.slane %v14395_v25, %v14365_v11 }
 0x28a   : > { %v4354_v26 = vmul.f32 %v14394_v59, %v637_v54  ;;  %v14398_v60 = vrot.slane %v14397_v42, %v14365_v11  ;;  %v14400_v17 = vrot.slane %v14399_v55, %v14365_v11  ;;  %v14402_v19 = vrot.slane %v14401_v36, %v14365_v11 }
 0x28b   : > { %v4356_v45 = vmul.f32 %v14396_v46, %v637_v54  ;;  %v14404_v34 = vrot.slane %v14403_v6, %v14365_v11  ;;  %v4366_v51 = vadd.f32 %v4350_v8, %v4202_v37  ;;  %v4368_v21 = vadd.f32 %v4352_v30, %v4204_v58 }
 0x28c   : > { %v4358_v49 = vmul.f32 %v14398_v60, %v637_v54  ;;  %v4360_v27 = vmul.f32 %v14400_v17, %v637_v54  ;;  %v4362_v38 = vmul.f32 %v14402_v19, %v637_v54  ;;  %v4370_v57 = vadd.f32 %v4354_v26, %v4206_v29  ;;  %v10580_v17 = vpop.permute.xlu0 %4731 }
 0x28d   : > { %v4364_v23 = vmul.f32 %v14404_v34, %v637_v54  ;;  %v4372_v33 = vadd.f32 %v4356_v45, %v4208_v3  ;;  %v14405_v12 = vrot.slane %v14389_v4, %v8675_v15  ;;  %v14406_v28 = vrot.slane %v14391_v56, %v8675_v15  ;;  %v643_v54 = vpop.f32.mrf.mxu0  ;;  %v10568_v4 = vpop.eup %7997 }
 0x28e   : > { %v4374_v20 = vadd.f32 %v4358_v49, %v4210_v62  ;;  %v4376_v13 = vadd.f32 %v4360_v27, %v4212_v24  ;;  %v4378_v41 = vadd.f32 %v4362_v38, %v4214_v52  ;;  %v14407_v37 = vrot.slane %v14393_v16, %v8675_v15  ;;  %14411 = vst [vmem:[#allocation33_spill] sm:$0xff] %v10568_v4  ;;  %v10576_v46 = vpop.eup %7999 }
 0x28f   : > { %v4380_v5 = vadd.f32 %v4364_v23, %v4216_v22  ;;  %v4351_v35 = vmul.f32 %v14405_v12, %v639_v39  ;;  %v4353_v59 = vmul.f32 %v14406_v28, %v639_v39  ;;  %v14408_v29 = vrot.slane %v14395_v25, %v8675_v15  ;;  %14414 = vst [vmem:[#allocation35_spill] sm:$0xff] %v10576_v46  ;;  %v14423_v23 = vld [vmem:[#allocation70_spill] sm:$0xff]  ;;  %v14425_v12 = vld [vmem:[#allocation65_spill] sm:$0xff] }
 0x290   : > { %v4355_v58 = vmul.f32 %v14407_v37, %v639_v39  ;;  %v14409_v62 = vrot.slane %v14397_v42, %v8675_v15  ;;  %v14410_v52 = vrot.slane %v14399_v55, %v8675_v15  ;;  %v14412_v8 = vrot.slane %v14401_v36, %v8675_v15  ;;  %v10578_v55 = vpop.eup %8001  ;;  %v14416_v36 = vld [vmem:[#allocation64_spill] sm:$0xff] }
 0x291   : > { %v4357_v3 = vmul.f32 %v14408_v29, %v639_v39  ;;  %v14413_v30 = vrot.slane %v14403_v6, %v8675_v15  ;;  %v4367_v26 = vadd.f32 %v4351_v35, %v4203_v44  ;;  %v4369_v25 = vadd.f32 %v4353_v59, %v4205_v2  ;;  %14415 = vst [vmem:[#allocation37_spill] sm:$0xff] %v10578_v55  ;;  %v14418_v6 = vld [vmem:[#allocation66_spill] sm:$0xff]  ;;  %v14427_v59 = vld [vmem:[#allocation67_spill] sm:$0xff]  ;;  %v645_v29 = vpop.f32.mrf.mxu0 }
 0x292   : > { %v4359_v24 = vmul.f32 %v14409_v62, %v639_v39  ;;  %v4361_v22 = vmul.f32 %v14410_v52, %v639_v39  ;;  %v4363_v56 = vmul.f32 %v14412_v8, %v639_v39  ;;  %v4371_v45 = vadd.f32 %v4355_v58, %v4207_v7  ;;  %v10590_v7 = vpop.permute.xlu1 %4736  ;;  %v14430_v62 = vld [vmem:[#allocation69_spill] sm:$0xff] }
 0x293   : > { %v4365_v16 = vmul.f32 %v14413_v30, %v639_v39  ;;  %v4373_v42 = vadd.f32 %v4357_v3, %v4209_v1  ;;  %v14417_v38 = vrot.slane %v14416_v36, %v14365_v11  ;;  %v14419_v44 = vrot.slane %v14418_v6, %v14365_v11  ;;  %v10588_v39 = vpop.eup %8003  ;;  %v14421_v1 = vld [vmem:[#allocation68_spill] sm:$0xff] }
 0x294   : > { %v4375_v60 = vadd.f32 %v4359_v24, %v4211_v53  ;;  %v4377_v49 = vadd.f32 %v4361_v22, %v4213_v31  ;;  %v4379_v27 = vadd.f32 %v4363_v56, %v4215_v63  ;;  %14420 = vst [vmem:[#allocation39_spill] sm:$0xff] %v10588_v39  ;;  %v14422_v53 = vrot.slane %v14421_v1, %v14365_v11  ;;  %v10604_v3 = vpop.eup %8005  ;;  %v14432_v22 = vld [vmem:[#allocation71_spill] sm:$0xff] }
 0x295   : > { %v4381_v19 = vadd.f32 %v4365_v16, %v4217_v50  ;;  %v4514_v34 = vmul.f32 %v14417_v38, %v643_v54  ;;  %v4516_v2 = vmul.f32 %v14419_v44, %v643_v54  ;;  %v14424_v63 = vrot.slane %v14423_v23, %v14365_v11  ;;  %14429 = vst [vmem:[#allocation40_spill] sm:$0xff] %v10604_v3  ;;  %v10612_v38 = vpop.eup %8007 }
 0x296   : > { %v4518_v31 = vmul.f32 %v14422_v53, %v643_v54  ;;  %v14426_v35 = vrot.slane %v14425_v12, %v14365_v11  ;;  %v14428_v37 = vrot.slane %v14427_v59, %v14365_v11  ;;  %v14431_v24 = vrot.slane %v14430_v62, %v14365_v11  ;;  %14434 = vst [vmem:[#allocation42_spill] sm:$0xff] %v10612_v38 }
 0x297   : > { %v4520_v50 = vmul.f32 %v14424_v63, %v643_v54  ;;  %v14433_v8 = vrot.slane %v14432_v22, %v14365_v11  ;;  %v4530_v30 = vadd.f32 %v4514_v34, %v4366_v51  ;;  %v4532_v16 = vadd.f32 %v4516_v2, %v4368_v21 }
 0x298   : > { %v4522_v28 = vmul.f32 %v14426_v35, %v643_v54  ;;  %v4524_v58 = vmul.f32 %v14428_v37, %v643_v54  ;;  %v4526_v52 = vmul.f32 %v14431_v24, %v643_v54  ;;  %v4534_v44 = vadd.f32 %v4518_v31, %v4370_v57  ;;  %v10614_v37 = vpop.eup %8009 }
 0x299   : > { %v4528_v56 = vmul.f32 %v14433_v8, %v643_v54  ;;  %v4536_v53 = vadd.f32 %v4520_v50, %v4372_v33  ;;  %14435 = vst [vmem:[#allocation44_spill] sm:$0xff] %v10614_v37  ;;  %v14436_v14 = vrot.slane %v14416_v36, %v8675_v15  ;;  %v14437_v48 = vrot.slane %v14418_v6, %v8675_v15  ;;  %v10634_v36 = vpop.eup %8011  ;;  %v10648_v50 = vpop.permute.xlu1 %4746 }
 0x29a   : > { %v4538_v63 = vadd.f32 %v4522_v28, %v4374_v20  ;;  %v4540_v35 = vadd.f32 %v4524_v58, %v4376_v13  ;;  %v4542_v4 = vadd.f32 %v4526_v52, %v4378_v41  ;;  %v14438_v51 = vrot.slane %v14421_v1, %v8675_v15  ;;  %14442 = vst [vmem:[#allocation46_spill] sm:$0xff] %v10634_v36 }
 0x29b   : > { %v4544_v10 = vadd.f32 %v4528_v56, %v4380_v5  ;;  %v4515_v24 = vmul.f32 %v14436_v14, %v645_v29  ;;  %v4517_v54 = vmul.f32 %v14437_v48, %v645_v29  ;;  %v14439_v57 = vrot.slane %v14423_v23, %v8675_v15  ;;  %v649_v5 = vpop.f32.mrf.mxu0  ;;  %v10646_v23 = vpop.permute.xlu0 %4741  ;;  %14446 = vst [vmem:[#allocation43_spill] sm:$0xff] %v10648_v50 }
 0x29c   : > { %v4519_v21 = vmul.f32 %v14438_v51, %v645_v29  ;;  %v14440_v20 = vrot.slane %v14425_v12, %v8675_v15  ;;  %v14441_v41 = vrot.slane %v14427_v59, %v8675_v15  ;;  %v14443_v48 = vrot.slane %v14430_v62, %v8675_v15  ;;  %14445 = vst [vmem:[#allocation41_spill] sm:$0xff] %v10646_v23 }
 0x29d   : > { %v4521_v33 = vmul.f32 %v14439_v57, %v645_v29  ;;  %v14444_v6 = vrot.slane %v14432_v22, %v8675_v15  ;;  %v10642_v1 = vadd.f32 %v4515_v24, %v4367_v26  ;;  %v10644_v31 = vadd.f32 %v4517_v54, %v4369_v25  ;;  %v14447_v26 = vld [vmem:[#allocation72_spill] sm:$0xff]  ;;  %v14449_v22 = vld [vmem:[#allocation74_spill] sm:$0xff] }
 0x29e   : > { %v4523_v13 = vmul.f32 %v14440_v20, %v645_v29  ;;  %v4525_v14 = vmul.f32 %v14441_v41, %v645_v29  ;;  %v4527_v34 = vmul.f32 %v14443_v48, %v645_v29  ;;  %v10650_v12 = vadd.f32 %v4519_v21, %v4371_v45  ;;  %v14451_v45 = vld [vmem:[#allocation76_spill] sm:$0xff]  ;;  %v14457_v21 = vld [vmem:[#allocation75_spill] sm:$0xff]  ;;  %v14459_v20 = vld [vmem:[#allocation77_spill] sm:$0xff] }
 0x29f   : > { %v4529_v2 = vmul.f32 %v14444_v6, %v645_v29  ;;  %v10652_v28 = vadd.f32 %v4521_v33, %v4373_v42  ;;  %v14448_v25 = vrot.slane %v14447_v26, %v14365_v11  ;;  %v14450_v8 = vrot.slane %v14449_v22, %v14365_v11  ;;  %v10692_v38 = vpop.permute.xlu0 %4751 }
 0x2a0   : > { %v10654_v59 = vadd.f32 %v4523_v13, %v4375_v60  ;;  %v10656_v58 = vadd.f32 %v4525_v14, %v4377_v49  ;;  %v10658_v62 = vadd.f32 %v4527_v34, %v4379_v27  ;;  %v14452_v42 = vrot.slane %v14451_v45, %v14365_v11  ;;  %v14453_v60 = vld [vmem:[#allocation78_spill] sm:$0xff]  ;;  %v14455_v27 = vld [vmem:[#allocation73_spill] sm:$0xff]  ;;  %v14461_v14 = vld [vmem:[#allocation79_spill] sm:$0xff]  ;;  %14463 = vst [vmem:[#allocation45_spill] sm:$0xff] %v10692_v38 }
 0x2a1   : > { %v10660_v52 = vadd.f32 %v4529_v2, %v4381_v19  ;;  %v4678_v29 = vmul.f32 %v14448_v25, %v649_v5  ;;  %v4680_v56 = vmul.f32 %v14450_v8, %v649_v5  ;;  %v14454_v49 = vrot.slane %v14453_v60, %v14365_v11 }
 0x2a2   : > { %v4682_v24 = vmul.f32 %v14452_v42, %v649_v5  ;;  %v14456_v19 = vrot.slane %v14455_v27, %v14365_v11  ;;  %v14458_v57 = vrot.slane %v14457_v21, %v14365_v11  ;;  %v14460_v13 = vrot.slane %v14459_v20, %v14365_v11 }
 0x2a3   : > { %v4684_v54 = vmul.f32 %v14454_v49, %v649_v5  ;;  %v14462_v48 = vrot.slane %v14461_v14, %v14365_v11  ;;  %v4694_v6 = vadd.f32 %v4678_v29, %v4530_v30  ;;  %v4696_v2 = vadd.f32 %v4680_v56, %v4532_v16 }
 0x2a4   : > { %v4686_v51 = vmul.f32 %v14456_v19, %v649_v5  ;;  %v4688_v33 = vmul.f32 %v14458_v57, %v649_v5  ;;  %v4690_v41 = vmul.f32 %v14460_v13, %v649_v5  ;;  %v4698_v25 = vadd.f32 %v4682_v24, %v4534_v44  ;;  %v10694_v13 = vpop.permute.xlu1 %4756 }
 0x2a5   : > { %v4692_v34 = vmul.f32 %v14462_v48, %v649_v5  ;;  %v4700_v8 = vadd.f32 %v4684_v54, %v4536_v53  ;;  %v10687_v37 = vadd.f32 %v10540_v40, %v4694_v6  ;;  %v10690_v57 = vadd.f32 %v10548_v61, %v4696_v2  ;;  %14464 = vst [vmem:[#allocation47_spill] sm:$0xff] %v10694_v13 }
 0x2a6   : > { %v4702_v42 = vadd.f32 %v4686_v51, %v4538_v63  ;;  %v4704_v49 = vadd.f32 %v4688_v33, %v4540_v35  ;;  %v4706_v36 = vadd.f32 %v4690_v41, %v4542_v4  ;;  %v10697_v5 = vadd.f32 %v10580_v17, %v4698_v25 }
 0x2a7   : > { %v4708_v19 = vadd.f32 %v4692_v34, %v4544_v10  ;;  %v10700_v30 = vadd.f32 %v10590_v7, %v4700_v8  ;;  %v4775_v53 = vrot.slane %v10687_v37, 4  ;;  %v4787_v63 = vrot.slane %v10690_v57, 4 }
 0x2a8   : > { %v10703_v16 = vadd.f32 %v10646_v23, %v4702_v42  ;;  %v10706_v10 = vadd.f32 %v10648_v50, %v4704_v49  ;;  %v10709_v4 = vadd.f32 %v10692_v38, %v4706_v36  ;;  %v4799_v35 = vrot.slane %v10697_v5, 4 }
 0x2a9   : > { %v10712_v44 = vadd.f32 %v10694_v13, %v4708_v19  ;;  %v4811_v29 = vrot.slane %v10700_v30, 4  ;;  %v4776_v54 = vmax.f32 %v10687_v37, %v4775_v53  ;;  %v4788_v36 = vmax.f32 %v10690_v57, %v4787_v63 }
 0x2aa   : > { %v4823_v56 = vrot.slane %v10703_v16, 4  ;;  %v4835_v24 = vrot.slane %v10706_v10, 4  ;;  %v4847_v51 = vrot.slane %v10709_v4, 4  ;;  %v4800_v41 = vmax.f32 %v10697_v5, %v4799_v35 }
 0x2ab   : > { %v4859_v33 = vrot.slane %v10712_v44, 4  ;;  %v4812_v48 = vmax.f32 %v10700_v30, %v4811_v29  ;;  %v4777_v2 = vrot.slane %v4776_v54, 2  ;;  %v4789_v25 = vrot.slane %v4788_v36, 2 }
 0x2ac   : > { %v4824_v34 = vmax.f32 %v10703_v16, %v4823_v56  ;;  %v4836_v6 = vmax.f32 %v10706_v10, %v4835_v24  ;;  %v4848_v8 = vmax.f32 %v10709_v4, %v4847_v51  ;;  %v4801_v49 = vrot.slane %v4800_v41, 2 }
 0x2ad   : > { %v4860_v42 = vmax.f32 %v10712_v44, %v4859_v33  ;;  %v4813_v19 = vrot.slane %v4812_v48, 2  ;;  %v4778_v3 = vmax.f32 %v4776_v54, %v4777_v2  ;;  %v4790_v39 = vmax.f32 %v4788_v36, %v4789_v25 }
 0x2ae   : > { %v4825_v53 = vrot.slane %v4824_v34, 2  ;;  %v4837_v63 = vrot.slane %v4836_v6, 2  ;;  %v4849_v55 = vrot.slane %v4848_v8, 2  ;;  %v4802_v46 = vmax.f32 %v4800_v41, %v4801_v49 }
 0x2af   : > { %v4861_v35 = vrot.slane %v4860_v42, 2  ;;  %v4814_v29 = vmax.f32 %v4812_v48, %v4813_v19  ;;  %v4779_v18 = vrot.slane %v4778_v3, 1  ;;  %v4791_v24 = vrot.slane %v4790_v39, 1 }
 0x2b0   : > { %v4826_v9 = vmax.f32 %v4824_v34, %v4825_v53  ;;  %v4838_v56 = vmax.f32 %v4836_v6, %v4837_v63  ;;  %v4850_v0 = vmax.f32 %v4848_v8, %v4849_v55  ;;  %v4803_v32 = vrot.slane %v4802_v46, 1  ;;  %v651_v55 = vpop.f32.mrf.mxu0 }
 0x2b1   : > { %v4862_v43 = vmax.f32 %v4860_v42, %v4861_v35  ;;  %v4815_v51 = vrot.slane %v4814_v29, 1  ;;  %v4780_v13 = vmax.f32 %v4778_v3, %v4779_v18  ;;  %v4792_v38 = vmax.f32 %v4790_v39, %v4791_v24 }
 0x2b2   : > { %v4827_v11 = vrot.slane %v4826_v9, 1  ;;  %v4839_v33 = vrot.slane %v4838_v56, 1  ;;  %v4851_v50 = vrot.slane %v4850_v0, 1  ;;  %v4804_v54 = vmax.f32 %v4802_v46, %v4803_v32 }
 0x2b3   : > { %v4863_v23 = vrot.slane %v4862_v43, 1  ;;  %v4816_v36 = vmax.f32 %v4814_v29, %v4815_v51  ;;  %v4871_v34 = vsub.f32 %v10687_v37, %v4780_v13  ;;  %v4873_v6 = vsub.f32 %v10690_v57, %v4792_v38 }
 0x2b4   : > { %v4828_v2 = vmax.f32 %v4826_v9, %v4827_v11  ;;  %v4840_v25 = vmax.f32 %v4838_v56, %v4839_v33  ;;  %v4852_v41 = vmax.f32 %v4850_v0, %v4851_v50  ;;  %v4875_v8 = vsub.f32 %v10697_v5, %v4804_v54 }
 0x2b5   : > { %v4864_v48 = vmax.f32 %v4862_v43, %v4863_v23  ;;  %v4877_v42 = vsub.f32 %v10700_v30, %v4816_v36  ;;  %v4887_v11 = vmul.f32 1.442695, %v4871_v34  ;;  %v4891_v0 = vmul.f32 1.442695, %v4873_v6 }
 0x2b6   : > { %v4879_v18 = vsub.f32 %v10703_v16, %v4828_v2  ;;  %v4881_v39 = vsub.f32 %v10706_v10, %v4840_v25  ;;  %v4883_v32 = vsub.f32 %v10709_v4, %v4852_v41  ;;  %8013 = vpow2.f32 %v10475_v47 }
 0x2b7   : > { %v4885_v9 = vsub.f32 %v10712_v44, %v4864_v48  ;;  %v4895_v43 = vmul.f32 1.442695, %v4875_v8  ;;  %v4899_v46 = vmul.f32 1.442695, %v4877_v42  ;;  %v14465_v3 = vrot.slane %v14447_v26, %v8675_v15 }
 0x2b8   : > { %8015 = vpow2.f32 %v4887_v11  ;;  %v4903_v37 = vmul.f32 1.442695, %v4879_v18  ;;  %v4907_v23 = vmul.f32 1.442695, %v4881_v39  ;;  %v4911_v50 = vmul.f32 1.442695, %v4883_v32 }
 0x2b9   : > { %v4679_v38 = vmul.f32 %v14465_v3, %v651_v55  ;;  %v10742_v57 = vmul.f32 1.442695, %v4885_v9  ;;  %v14466_v13 = vrot.slane %v14449_v22, %v8675_v15  ;;  %v14467_v30 = vrot.slane %v14451_v45, %v8675_v15 }
 0x2ba   : > { %v14468_v16 = vrot.slane %v14453_v60, %v8675_v15  ;;  %8017 = vpow2.f32 %v4891_v0  ;;  %v14469_v26 = vrot.slane %v14455_v27, %v8675_v15  ;;  %v14470_v44 = vrot.slane %v14457_v21, %v8675_v15 }
 0x2bb   : > { %v4681_v5 = vmul.f32 %v14466_v13, %v651_v55  ;;  %v4683_v47 = vmul.f32 %v14467_v30, %v651_v55  ;;  %v14471_v22 = vrot.slane %v14459_v20, %v8675_v15  ;;  %8019 = vpow2.f32 %v4895_v43 }
 0x2bc   : > { %v4685_v10 = vmul.f32 %v14468_v16, %v651_v55  ;;  %v4687_v4 = vmul.f32 %v14469_v26, %v651_v55  ;;  %v4689_v49 = vmul.f32 %v14470_v44, %v651_v55  ;;  %v14472_v45 = vrot.slane %v14461_v14, %v8675_v15 }
 0x2bd   : > { %v4691_v19 = vmul.f32 %v14471_v22, %v651_v55  ;;  %v4695_v60 = vadd.f32 %v4679_v38, %v10642_v1  ;;  %v4697_v63 = vadd.f32 %v4681_v5, %v10644_v31  ;;  %8021 = vpow2.f32 %v4899_v46 }
 0x2be   : > { %v4693_v53 = vmul.f32 %v14472_v45, %v651_v55  ;;  %v4699_v27 = vadd.f32 %v4683_v47, %v10650_v12  ;;  %v4701_v35 = vadd.f32 %v4685_v10, %v10652_v28  ;;  %v4703_v21 = vadd.f32 %v4687_v4, %v10654_v59  ;;  %v14473_v28 = vld [vmem:[#allocation41_spill] sm:$0xff] }
 0x2bf   : > { %8023 = vpow2.f32 %v4903_v37  ;;  %v4705_v20 = vadd.f32 %v4689_v49, %v10656_v58  ;;  %v4707_v29 = vadd.f32 %v4691_v19, %v10658_v62  ;;  %v10774_v14 = vadd.f32 %v10540_v40, %v4695_v60  ;;  %v14474_v58 = vld [vmem:[#allocation43_spill] sm:$0xff] }
 0x2c0   : > { %v4709_v56 = vadd.f32 %v4693_v53, %v10660_v52  ;;  %8025 = vpow2.f32 %v4907_v23  ;;  %v10777_v1 = vadd.f32 %v10548_v61, %v4697_v63  ;;  %v10780_v31 = vadd.f32 %v10580_v17, %v4699_v27  ;;  %v14475_v52 = vld [vmem:[#allocation45_spill] sm:$0xff]  ;;  %v14476_v40 = vld [vmem:[#allocation47_spill] sm:$0xff] }
 0x2c1   : > { %8027 = vpow2.f32 %v4911_v50  ;;  %v10783_v12 = vadd.f32 %v10590_v7, %v4701_v35  ;;  %v10786_v59 = vadd.f32 %v14473_v28, %v4703_v21  ;;  %v10789_v62 = vadd.f32 %v14474_v58, %v4705_v20 }
 0x2c2   : > { %v10792_v24 = vadd.f32 %v14475_v52, %v4707_v29  ;;  %v10795_v51 = vadd.f32 %v14476_v40, %v4709_v56  ;;  %v4781_v61 = vrot.slane %v10774_v14, 4  ;;  %v4793_v17 = vrot.slane %v10777_v1, 4  ;;  %v655_v40 = vpop.f32.mrf.mxu0 }
 0x2c3   : > { %v4805_v33 = vrot.slane %v10780_v31, 4  ;;  %v4817_v7 = vrot.slane %v10783_v12, 4  ;;  %v4829_v54 = vrot.slane %v10786_v59, 4  ;;  %v4841_v36 = vrot.slane %v10789_v62, 4  ;;  %v10811_v42 = vpop.eup %8013 }
 0x2c4   : > { %v4782_v2 = vmax.f32 %v10774_v14, %v4781_v61  ;;  %v4794_v25 = vmax.f32 %v10777_v1, %v4793_v17  ;;  %v4853_v41 = vrot.slane %v10792_v24, 4  ;;  %v4865_v48 = vrot.slane %v10795_v51, 4  ;;  %14477 = vst [vmem:[#allocation18_spill] sm:$0xff] %v10811_v42 }
 0x2c5   : > { %v4806_v34 = vmax.f32 %v10780_v31, %v4805_v33  ;;  %v4818_v6 = vmax.f32 %v10783_v12, %v4817_v7  ;;  %v4830_v55 = vmax.f32 %v10786_v59, %v4829_v54  ;;  %v4842_v8 = vmax.f32 %v10789_v62, %v4841_v36  ;;  %v10815_v11 = vpop.eup %8015 }
 0x2c6   : > { %v4783_v18 = vrot.slane %v4782_v2, 2  ;;  %v4795_v39 = vrot.slane %v4794_v25, 2  ;;  %v4854_v32 = vmax.f32 %v10792_v24, %v4853_v41  ;;  %v4866_v9 = vmax.f32 %v10795_v51, %v4865_v48  ;;  %14478 = vst [vmem:[#allocation26_spill] sm:$0xff] %v10815_v11 }
 0x2c7   : > { %v4807_v0 = vrot.slane %v4806_v34, 2  ;;  %v4819_v43 = vrot.slane %v4818_v6, 2  ;;  %v4831_v46 = vrot.slane %v4830_v55, 2  ;;  %v4843_v3 = vrot.slane %v4842_v8, 2  ;;  %v10817_v13 = vpop.eup %8017 }
 0x2c8   : > { %v4784_v38 = vmax.f32 %v4782_v2, %v4783_v18  ;;  %v4796_v37 = vmax.f32 %v4794_v25, %v4795_v39  ;;  %v4855_v23 = vrot.slane %v4854_v32, 2  ;;  %v4867_v50 = vrot.slane %v4866_v9, 2  ;;  %14479 = vst [vmem:[#allocation28_spill] sm:$0xff] %v10817_v13  ;;  %v10819_v10 = vpop.eup %8019 }
 0x2c9   : > { %v4808_v5 = vmax.f32 %v4806_v34, %v4807_v0  ;;  %v4820_v30 = vmax.f32 %v4818_v6, %v4819_v43  ;;  %v4832_v47 = vmax.f32 %v4830_v55, %v4831_v46  ;;  %v4844_v16 = vmax.f32 %v4842_v8, %v4843_v3  ;;  %14480 = vst [vmem:[#allocation30_spill] sm:$0xff] %v10819_v10  ;;  %v14490_v43 = vld [vmem:[#allocation84_spill] sm:$0xff]  ;;  %v14492_v3 = vld [vmem:[#allocation86_spill] sm:$0xff] }
 0x2ca   : > { %v4785_v26 = vrot.slane %v4784_v38, 1  ;;  %v4797_v4 = vrot.slane %v4796_v37, 1  ;;  %v4856_v44 = vmax.f32 %v4854_v32, %v4855_v23  ;;  %v4868_v49 = vmax.f32 %v4866_v9, %v4867_v50  ;;  %v10821_v22 = vpop.eup %8021  ;;  %v14486_v32 = vld [vmem:[#allocation13_spill] sm:$0xff] }
 0x2cb   : > { %14481 = vst [vmem:[#allocation48_spill] sm:$0xff] %v10821_v22  ;;  %v4809_v19 = vrot.slane %v4808_v5, 1  ;;  %v4821_v45 = vrot.slane %v4820_v30, 1  ;;  %v4833_v53 = vrot.slane %v4832_v47, 1  ;;  %v4845_v60 = vrot.slane %v4844_v16, 1  ;;  %v14494_v23 = vld [vmem:[#allocation81_spill] sm:$0xff] }
 0x2cc   : > { %v10823_v63 = vpop.eup %8023  ;;  %v4786_v27 = vmax.f32 %v4784_v38, %v4785_v26  ;;  %v4798_v35 = vmax.f32 %v4796_v37, %v4797_v4  ;;  %v4857_v21 = vrot.slane %v4856_v44, 1  ;;  %v4869_v20 = vrot.slane %v4868_v49, 1  ;;  %v14498_v26 = vld [vmem:[#allocation85_spill] sm:$0xff] }
 0x2cd   : > { %14482 = vst [vmem:[#allocation50_spill] sm:$0xff] %v10823_v63  ;;  %v10825_v29 = vpop.eup %8025  ;;  %v4810_v56 = vmax.f32 %v4808_v5, %v4809_v19  ;;  %v4822_v28 = vmax.f32 %v4820_v30, %v4821_v45  ;;  %v4834_v58 = vmax.f32 %v4832_v47, %v4833_v53  ;;  %v4846_v52 = vmax.f32 %v4844_v16, %v4845_v60  ;;  %v14496_v30 = vld [vmem:[#allocation83_spill] sm:$0xff] }
 0x2ce   : > { %14483 = vst [vmem:[#allocation52_spill] sm:$0xff] %v10825_v29  ;;  %v10827_v61 = vpop.eup %8027  ;;  %v4858_v17 = vmax.f32 %v4856_v44, %v4857_v21  ;;  %v4870_v33 = vmax.f32 %v4868_v49, %v4869_v20  ;;  %v4872_v7 = vsub.f32 %v10774_v14, %v4786_v27  ;;  %v4874_v54 = vsub.f32 %v10777_v1, %v4798_v35  ;;  %v657_v1 = vpop.f32.mrf.mxu0  ;;  %v14500_v49 = vld [vmem:[#allocation87_spill] sm:$0xff] }
 0x2cf   : > { %14484 = vst [vmem:[#allocation54_spill] sm:$0xff] %v10827_v61  ;;  %v4876_v36 = vsub.f32 %v10780_v31, %v4810_v56  ;;  %v4878_v2 = vsub.f32 %v10783_v12, %v4822_v28  ;;  %v4880_v25 = vsub.f32 %v10786_v59, %v4834_v58  ;;  %v4882_v41 = vsub.f32 %v10789_v62, %v4846_v52  ;;  %v14485_v12 = vld [vmem:[#allocation80_spill] sm:$0xff] }
 0x2d0   : > { %v4884_v48 = vsub.f32 %v10792_v24, %v4858_v17  ;;  %v4886_v34 = vsub.f32 %v10795_v51, %v4870_v33  ;;  %v4889_v6 = vmul.f32 1.442695, %v4872_v7  ;;  %v4893_v55 = vmul.f32 1.442695, %v4874_v54  ;;  %v14488_v24 = vld [vmem:[#allocation82_spill] sm:$0xff]  ;;  %v661_v27 = vpop.f32.mrf.mxu0 }
 0x2d1   : > { %8029 = vpow2.f32 %v10742_v57  ;;  %v4897_v8 = vmul.f32 1.442695, %v4876_v36  ;;  %v4901_v14 = vmul.f32 1.442695, %v4878_v2  ;;  %v4905_v18 = vmul.f32 1.442695, %v4880_v25 }
 0x2d2   : > { %8031 = vpow2.f32 %v4889_v6  ;;  %v4909_v31 = vmul.f32 1.442695, %v4882_v41  ;;  %v4913_v39 = vmul.f32 1.442695, %v4884_v48  ;;  %v14487_v59 = vrot.slane %v14485_v12, %v14486_v32  ;;  %v14510_v25 = vld [vmem:[#allocation88_spill] sm:$0xff] }
 0x2d3   : > { %8033 = vpow2.f32 %v4893_v55  ;;  %v10841_v62 = vmul.f32 1.442695, %v4886_v34  ;;  %v14489_v51 = vrot.slane %v14488_v24, %v14486_v32  ;;  %v14491_v57 = vrot.slane %v14490_v43, %v14486_v32  ;;  %v14512_v34 = vld [vmem:[#allocation90_spill] sm:$0xff] }
 0x2d4   : > { %v5787_v9 = vmul.f32 %v14487_v59, %v655_v40  ;;  %8035 = vpow2.f32 %v4897_v8  ;;  %v14493_v38 = vrot.slane %v14492_v3, %v14486_v32  ;;  %v14495_v50 = vrot.slane %v14494_v23, %v14486_v32  ;;  %v14514_v8 = vld [vmem:[#allocation92_spill] sm:$0xff] }
 0x2d5   : > { %v5789_v0 = vmul.f32 %v14489_v51, %v655_v40  ;;  %v5791_v46 = vmul.f32 %v14491_v57, %v655_v40  ;;  %v14497_v47 = vrot.slane %v14496_v30, %v14486_v32  ;;  %8037 = vpow2.f32 %v4901_v14 }
 0x2d6   : > { %v5793_v37 = vmul.f32 %v14493_v38, %v655_v40  ;;  %v5795_v5 = vmul.f32 %v14495_v50, %v655_v40  ;;  %v14499_v4 = vrot.slane %v14498_v26, %v14486_v32  ;;  %v14501_v19 = vrot.slane %v14500_v49, %v14486_v32  ;;  %v663_v38 = vpop.f32.mrf.mxu0  ;;  %v14522_v50 = vld [vmem:[#allocation93_spill] sm:$0xff] }
 0x2d7   : > { %v5797_v16 = vmul.f32 %v14497_v47, %v655_v40  ;;  %v14502_v53 = vrot.slane %v14485_v12, %v8675_v15  ;;  %8039 = vpow2.f32 %v4905_v18  ;;  %v14503_v35 = vrot.slane %v14488_v24, %v8675_v15  ;;  %v14518_v24 = vld [vmem:[#allocation89_spill] sm:$0xff] }
 0x2d8   : > { %v5799_v44 = vmul.f32 %v14499_v4, %v655_v40  ;;  %v5801_v45 = vmul.f32 %v14501_v19, %v655_v40  ;;  %v14504_v20 = vrot.slane %v14490_v43, %v8675_v15  ;;  %v14505_v28 = vrot.slane %v14492_v3, %v8675_v15  ;;  %v14520_v43 = vld [vmem:[#allocation91_spill] sm:$0xff] }
 0x2d9   : > { %v5788_v60 = vmul.f32 %v14502_v53, %v657_v1  ;;  %v5790_v21 = vmul.f32 %v14503_v35, %v657_v1  ;;  %8041 = vpow2.f32 %v4909_v31  ;;  %v14506_v52 = vrot.slane %v14494_v23, %v8675_v15  ;;  %v14516_v31 = vld [vmem:[#allocation94_spill] sm:$0xff]  ;;  %v10906_v23 = vpop.permute.xlu0 %6306  ;;  %v10914_v53 = vpop.permute.xlu1 %6311 }
 0x2da   : > { %v5792_v56 = vmul.f32 %v14504_v20, %v657_v1  ;;  %v5794_v58 = vmul.f32 %v14505_v28, %v657_v1  ;;  %v14507_v17 = vrot.slane %v14496_v30, %v8675_v15  ;;  %v14508_v7 = vrot.slane %v14498_v26, %v8675_v15 }
 0x2db   : > { %v5796_v40 = vmul.f32 %v14506_v52, %v657_v1  ;;  %v14509_v36 = vrot.slane %v14500_v49, %v8675_v15  ;;  %v14511_v41 = vrot.slane %v14510_v25, %v14486_v32  ;;  %v14513_v6 = vrot.slane %v14512_v34, %v14486_v32 }
 0x2dc   : > { %v5798_v33 = vmul.f32 %v14507_v17, %v657_v1  ;;  %v5800_v54 = vmul.f32 %v14508_v7, %v657_v1  ;;  %v14515_v14 = vrot.slane %v14514_v8, %v14486_v32  ;;  %8043 = vpow2.f32 %v4913_v39  ;;  %v14524_v39 = vld [vmem:[#allocation95_spill] sm:$0xff] }
 0x2dd   : > { %v5802_v2 = vmul.f32 %v14509_v36, %v657_v1  ;;  %v5935_v48 = vmul.f32 %v14511_v41, %v661_v27  ;;  %v5937_v55 = vmul.f32 %v14513_v6, %v661_v27  ;;  %v14517_v12 = vrot.slane %v14516_v31, %v14486_v32 }
 0x2de   : > { %v5939_v18 = vmul.f32 %v14515_v14, %v661_v27  ;;  %v14519_v1 = vrot.slane %v14518_v24, %v14486_v32  ;;  %v14521_v57 = vrot.slane %v14520_v43, %v14486_v32  ;;  %v14523_v30 = vrot.slane %v14522_v50, %v14486_v32 }
 0x2df   : > { %v5941_v59 = vmul.f32 %v14517_v12, %v661_v27  ;;  %v14525_v26 = vrot.slane %v14524_v39, %v14486_v32  ;;  %v5951_v49 = vadd.f32 %v5935_v48, %v5787_v9  ;;  %v5953_v19 = vadd.f32 %v5937_v55, %v5789_v0 }
 0x2e0   : > { %v5943_v51 = vmul.f32 %v14519_v1, %v661_v27  ;;  %v5945_v3 = vmul.f32 %v14521_v57, %v661_v27  ;;  %v5947_v47 = vmul.f32 %v14523_v30, %v661_v27  ;;  %v5955_v35 = vadd.f32 %v5939_v18, %v5791_v46  ;;  %v10946_v57 = vpop.permute.xlu0 %6316 }
 0x2e1   : > { %v5949_v4 = vmul.f32 %v14525_v26, %v661_v27  ;;  %v5957_v20 = vadd.f32 %v5941_v59, %v5793_v37  ;;  %v14526_v36 = vrot.slane %v14510_v25, %v8675_v15  ;;  %v14527_v6 = vrot.slane %v14512_v34, %v8675_v15  ;;  %v667_v27 = vpop.f32.mrf.mxu0  ;;  %v10934_v25 = vpop.eup %8029 }
 0x2e2   : > { %v5959_v28 = vadd.f32 %v5943_v51, %v5795_v5  ;;  %v5961_v52 = vadd.f32 %v5945_v3, %v5797_v16  ;;  %v5963_v17 = vadd.f32 %v5947_v47, %v5799_v44  ;;  %v14528_v9 = vrot.slane %v14514_v8, %v8675_v15  ;;  %14532 = vst [vmem:[#allocation49_spill] sm:$0xff] %v10934_v25  ;;  %v10942_v12 = vpop.eup %8031 }
 0x2e3   : > { %v5965_v7 = vadd.f32 %v5949_v4, %v5801_v45  ;;  %v5936_v41 = vmul.f32 %v14526_v36, %v663_v38  ;;  %v5938_v14 = vmul.f32 %v14527_v6, %v663_v38  ;;  %v14529_v46 = vrot.slane %v14516_v31, %v8675_v15  ;;  %14535 = vst [vmem:[#allocation51_spill] sm:$0xff] %v10942_v12  ;;  %v14544_v4 = vld [vmem:[#allocation102_spill] sm:$0xff]  ;;  %v14546_v36 = vld [vmem:[#allocation97_spill] sm:$0xff] }
 0x2e4   : > { %v5940_v0 = vmul.f32 %v14528_v9, %v663_v38  ;;  %v14530_v5 = vrot.slane %v14518_v24, %v8675_v15  ;;  %v14531_v44 = vrot.slane %v14520_v43, %v8675_v15  ;;  %v14533_v48 = vrot.slane %v14522_v50, %v8675_v15  ;;  %v10944_v43 = vpop.eup %8033  ;;  %v14537_v50 = vld [vmem:[#allocation96_spill] sm:$0xff] }
 0x2e5   : > { %v5942_v37 = vmul.f32 %v14529_v46, %v663_v38  ;;  %v14534_v55 = vrot.slane %v14524_v39, %v8675_v15  ;;  %v5952_v18 = vadd.f32 %v5936_v41, %v5788_v60  ;;  %v5954_v31 = vadd.f32 %v5938_v14, %v5790_v21  ;;  %14536 = vst [vmem:[#allocation53_spill] sm:$0xff] %v10944_v43  ;;  %v14539_v39 = vld [vmem:[#allocation98_spill] sm:$0xff]  ;;  %v14548_v14 = vld [vmem:[#allocation99_spill] sm:$0xff]  ;;  %v669_v46 = vpop.f32.mrf.mxu0 }
 0x2e6   : > { %v5944_v16 = vmul.f32 %v14530_v5, %v663_v38  ;;  %v5946_v45 = vmul.f32 %v14531_v44, %v663_v38  ;;  %v5948_v34 = vmul.f32 %v14533_v48, %v663_v38  ;;  %v5956_v59 = vadd.f32 %v5940_v0, %v5792_v56  ;;  %v10956_v56 = vpop.permute.xlu1 %6321  ;;  %v14551_v5 = vld [vmem:[#allocation101_spill] sm:$0xff] }
 0x2e7   : > { %v5950_v8 = vmul.f32 %v14534_v55, %v663_v38  ;;  %v5958_v24 = vadd.f32 %v5942_v37, %v5794_v58  ;;  %v14538_v47 = vrot.slane %v14537_v50, %v14486_v32  ;;  %v14540_v60 = vrot.slane %v14539_v39, %v14486_v32  ;;  %v10954_v38 = vpop.eup %8035  ;;  %v14542_v58 = vld [vmem:[#allocation100_spill] sm:$0xff] }
 0x2e8   : > { %v5960_v1 = vadd.f32 %v5944_v16, %v5796_v40  ;;  %v5962_v51 = vadd.f32 %v5946_v45, %v5798_v33  ;;  %v5964_v3 = vadd.f32 %v5948_v34, %v5800_v54  ;;  %14541 = vst [vmem:[#allocation55_spill] sm:$0xff] %v10954_v38  ;;  %v14543_v40 = vrot.slane %v14542_v58, %v14486_v32  ;;  %v10970_v37 = vpop.eup %8037  ;;  %v14553_v45 = vld [vmem:[#allocation103_spill] sm:$0xff] }
 0x2e9   : > { %v5966_v30 = vadd.f32 %v5950_v8, %v5802_v2  ;;  %v6099_v26 = vmul.f32 %v14538_v47, %v667_v27  ;;  %v6101_v21 = vmul.f32 %v14540_v60, %v667_v27  ;;  %v14545_v54 = vrot.slane %v14544_v4, %v14486_v32  ;;  %14550 = vst [vmem:[#allocation56_spill] sm:$0xff] %v10970_v37  ;;  %v10978_v47 = vpop.eup %8039 }
 0x2ea   : > { %v6103_v33 = vmul.f32 %v14543_v40, %v667_v27  ;;  %v14547_v41 = vrot.slane %v14546_v36, %v14486_v32  ;;  %v14549_v9 = vrot.slane %v14548_v14, %v14486_v32  ;;  %v14552_v16 = vrot.slane %v14551_v5, %v14486_v32  ;;  %14555 = vst [vmem:[#allocation58_spill] sm:$0xff] %v10978_v47 }
 0x2eb   : > { %v6105_v2 = vmul.f32 %v14545_v54, %v667_v27  ;;  %v14554_v48 = vrot.slane %v14553_v45, %v14486_v32  ;;  %v6115_v55 = vadd.f32 %v6099_v26, %v5951_v49  ;;  %v6117_v8 = vadd.f32 %v6101_v21, %v5953_v19 }
 0x2ec   : > { %v6107_v6 = vmul.f32 %v14547_v41, %v667_v27  ;;  %v6109_v0 = vmul.f32 %v14549_v9, %v667_v27  ;;  %v6111_v44 = vmul.f32 %v14552_v16, %v667_v27  ;;  %v6119_v60 = vadd.f32 %v6103_v33, %v5955_v35  ;;  %v10980_v9 = vpop.eup %8041 }
 0x2ed   : > { %v6113_v34 = vmul.f32 %v14554_v48, %v667_v27  ;;  %v6121_v40 = vadd.f32 %v6105_v2, %v5957_v20  ;;  %14556 = vst [vmem:[#allocation60_spill] sm:$0xff] %v10980_v9  ;;  %v14557_v29 = vrot.slane %v14537_v50, %v8675_v15  ;;  %v14558_v42 = vrot.slane %v14539_v39, %v8675_v15  ;;  %v11000_v50 = vpop.eup %8043  ;;  %v11014_v2 = vpop.permute.xlu1 %6331 }
 0x2ee   : > { %v6123_v54 = vadd.f32 %v6107_v6, %v5959_v28  ;;  %v6125_v41 = vadd.f32 %v6109_v0, %v5961_v52  ;;  %v6127_v25 = vadd.f32 %v6111_v44, %v5963_v17  ;;  %v14559_v49 = vrot.slane %v14542_v58, %v8675_v15  ;;  %14563 = vst [vmem:[#allocation62_spill] sm:$0xff] %v11000_v50 }
 0x2ef   : > { %v6129_v61 = vadd.f32 %v6113_v34, %v5965_v7  ;;  %v6100_v16 = vmul.f32 %v14557_v29, %v669_v46  ;;  %v6102_v27 = vmul.f32 %v14558_v42, %v669_v46  ;;  %v14560_v35 = vrot.slane %v14544_v4, %v8675_v15  ;;  %v673_v7 = vpop.f32.mrf.mxu0  ;;  %v11012_v4 = vpop.permute.xlu0 %6326  ;;  %14567 = vst [vmem:[#allocation59_spill] sm:$0xff] %v11014_v2 }
 0x2f0   : > { %v6104_v19 = vmul.f32 %v14559_v49, %v669_v46  ;;  %v14561_v28 = vrot.slane %v14546_v36, %v8675_v15  ;;  %v14562_v17 = vrot.slane %v14548_v14, %v8675_v15  ;;  %v14564_v42 = vrot.slane %v14551_v5, %v8675_v15  ;;  %14566 = vst [vmem:[#allocation57_spill] sm:$0xff] %v11012_v4 }
 0x2f1   : > { %v6106_v20 = vmul.f32 %v14560_v35, %v669_v46  ;;  %v14565_v39 = vrot.slane %v14553_v45, %v8675_v15  ;;  %v11008_v58 = vadd.f32 %v6100_v16, %v5952_v18  ;;  %v11010_v33 = vadd.f32 %v6102_v27, %v5954_v31  ;;  %v14568_v18 = vld [vmem:[#allocation104_spill] sm:$0xff]  ;;  %v14570_v45 = vld [vmem:[#allocation106_spill] sm:$0xff] }
 0x2f2   : > { %v6108_v52 = vmul.f32 %v14561_v28, %v669_v46  ;;  %v6110_v29 = vmul.f32 %v14562_v17, %v669_v46  ;;  %v6112_v26 = vmul.f32 %v14564_v42, %v669_v46  ;;  %v11016_v36 = vadd.f32 %v6104_v19, %v5956_v59  ;;  %v14572_v59 = vld [vmem:[#allocation108_spill] sm:$0xff]  ;;  %v14578_v19 = vld [vmem:[#allocation107_spill] sm:$0xff]  ;;  %v14580_v28 = vld [vmem:[#allocation109_spill] sm:$0xff] }
 0x2f3   : > { %v6114_v21 = vmul.f32 %v14565_v39, %v669_v46  ;;  %v11018_v6 = vadd.f32 %v6106_v20, %v5958_v24  ;;  %v14569_v31 = vrot.slane %v14568_v18, %v14486_v32  ;;  %v14571_v48 = vrot.slane %v14570_v45, %v14486_v32  ;;  %v11058_v47 = vpop.permute.xlu0 %6336 }
 0x2f4   : > { %v11020_v14 = vadd.f32 %v6108_v52, %v5960_v1  ;;  %v11022_v0 = vadd.f32 %v6110_v29, %v5962_v51  ;;  %v11024_v5 = vadd.f32 %v6112_v26, %v5964_v3  ;;  %v14573_v24 = vrot.slane %v14572_v59, %v14486_v32  ;;  %v14574_v1 = vld [vmem:[#allocation110_spill] sm:$0xff]  ;;  %v14576_v3 = vld [vmem:[#allocation105_spill] sm:$0xff]  ;;  %v14582_v29 = vld [vmem:[#allocation111_spill] sm:$0xff]  ;;  %14584 = vst [vmem:[#allocation61_spill] sm:$0xff] %v11058_v47 }
 0x2f5   : > { %v11026_v44 = vadd.f32 %v6114_v21, %v5966_v30  ;;  %v6263_v46 = vmul.f32 %v14569_v31, %v673_v7  ;;  %v6265_v34 = vmul.f32 %v14571_v48, %v673_v7  ;;  %v14575_v51 = vrot.slane %v14574_v1, %v14486_v32 }
 0x2f6   : > { %v6267_v16 = vmul.f32 %v14573_v24, %v673_v7  ;;  %v14577_v30 = vrot.slane %v14576_v3, %v14486_v32  ;;  %v14579_v35 = vrot.slane %v14578_v19, %v14486_v32  ;;  %v14581_v52 = vrot.slane %v14580_v28, %v14486_v32 }
 0x2f7   : > { %v6269_v27 = vmul.f32 %v14575_v51, %v673_v7  ;;  %v14583_v42 = vrot.slane %v14582_v29, %v14486_v32  ;;  %v6279_v39 = vadd.f32 %v6263_v46, %v6115_v55  ;;  %v6281_v21 = vadd.f32 %v6265_v34, %v6117_v8 }
 0x2f8   : > { %v6271_v49 = vmul.f32 %v14577_v30, %v673_v7  ;;  %v6273_v20 = vmul.f32 %v14579_v35, %v673_v7  ;;  %v6275_v17 = vmul.f32 %v14581_v52, %v673_v7  ;;  %v6283_v31 = vadd.f32 %v6267_v16, %v6119_v60  ;;  %v11060_v52 = vpop.permute.xlu1 %6341 }
 0x2f9   : > { %v6277_v26 = vmul.f32 %v14583_v42, %v673_v7  ;;  %v6285_v48 = vadd.f32 %v6269_v27, %v6121_v40  ;;  %v11053_v9 = vadd.f32 %v10906_v23, %v6279_v39  ;;  %v11056_v35 = vadd.f32 %v10914_v53, %v6281_v21  ;;  %14585 = vst [vmem:[#allocation63_spill] sm:$0xff] %v11060_v52 }
 0x2fa   : > { %v6287_v24 = vadd.f32 %v6271_v49, %v6123_v54  ;;  %v6289_v51 = vadd.f32 %v6273_v20, %v6125_v41  ;;  %v6291_v50 = vadd.f32 %v6275_v17, %v6127_v25  ;;  %v11063_v7 = vadd.f32 %v10946_v57, %v6283_v31 }
 0x2fb   : > { %v6293_v30 = vadd.f32 %v6277_v26, %v6129_v61  ;;  %v11066_v55 = vadd.f32 %v10956_v56, %v6285_v48  ;;  %v6360_v40 = vrot.slane %v11053_v9, 4  ;;  %v6372_v54 = vrot.slane %v11056_v35, 4 }
 0x2fc   : > { %v11069_v8 = vadd.f32 %v11012_v4, %v6287_v24  ;;  %v11072_v61 = vadd.f32 %v11014_v2, %v6289_v51  ;;  %v11075_v25 = vadd.f32 %v11058_v47, %v6291_v50  ;;  %v6384_v41 = vrot.slane %v11063_v7, 4 }
 0x2fd   : > { %v11078_v60 = vadd.f32 %v11060_v52, %v6293_v30  ;;  %v6396_v46 = vrot.slane %v11066_v55, 4  ;;  %v6361_v27 = vmax.f32 %v11053_v9, %v6360_v40  ;;  %v6373_v50 = vmax.f32 %v11056_v35, %v6372_v54 }
 0x2fe   : > { %v6408_v34 = vrot.slane %v11069_v8, 4  ;;  %v6420_v16 = vrot.slane %v11072_v61, 4  ;;  %v6432_v49 = vrot.slane %v11075_v25, 4  ;;  %v6385_v17 = vmax.f32 %v11063_v7, %v6384_v41 }
 0x2ff   : > { %v6444_v20 = vrot.slane %v11078_v60, 4  ;;  %v6397_v42 = vmax.f32 %v11066_v55, %v6396_v46  ;;  %v6362_v21 = vrot.slane %v6361_v27, 2  ;;  %v6374_v31 = vrot.slane %v6373_v50, 2 }
 0x300   : > { %v6409_v26 = vmax.f32 %v11069_v8, %v6408_v34  ;;  %v6421_v39 = vmax.f32 %v11072_v61, %v6420_v16  ;;  %v6433_v48 = vmax.f32 %v11075_v25, %v6432_v49  ;;  %v6386_v51 = vrot.slane %v6385_v17, 2 }
 0x301   : > { %v6445_v24 = vmax.f32 %v11078_v60, %v6444_v20  ;;  %v6398_v30 = vrot.slane %v6397_v42, 2  ;;  %v6363_v32 = vmax.f32 %v6361_v27, %v6362_v21  ;;  %v6375_v37 = vmax.f32 %v6373_v50, %v6374_v31 }
 0x302   : > { %v6410_v40 = vrot.slane %v6409_v26, 2  ;;  %v6422_v54 = vrot.slane %v6421_v39, 2  ;;  %v6434_v38 = vrot.slane %v6433_v48, 2  ;;  %v6387_v43 = vmax.f32 %v6385_v17, %v6386_v51 }
 0x303   : > { %v6446_v41 = vrot.slane %v6445_v24, 2  ;;  %v6399_v46 = vmax.f32 %v6397_v42, %v6398_v30  ;;  %v6364_v63 = vrot.slane %v6363_v32, 1  ;;  %v6376_v16 = vrot.slane %v6375_v37, 1 }
 0x304   : > { %v6411_v12 = vmax.f32 %v6409_v26, %v6410_v40  ;;  %v6423_v34 = vmax.f32 %v6421_v39, %v6422_v54  ;;  %v6435_v22 = vmax.f32 %v6433_v48, %v6434_v38  ;;  %v6388_v13 = vrot.slane %v6387_v43, 1  ;;  %v675_v38 = vpop.f32.mrf.mxu0 }
 0x305   : > { %v6447_v10 = vmax.f32 %v6445_v24, %v6446_v41  ;;  %v6400_v49 = vrot.slane %v6399_v46, 1  ;;  %v6365_v52 = vmax.f32 %v6363_v32, %v6364_v63  ;;  %v6377_v47 = vmax.f32 %v6375_v37, %v6376_v16 }
 0x306   : > { %v6412_v11 = vrot.slane %v6411_v12, 1  ;;  %v6424_v20 = vrot.slane %v6423_v34, 1  ;;  %v6436_v2 = vrot.slane %v6435_v22, 1  ;;  %v6389_v27 = vmax.f32 %v6387_v43, %v6388_v13 }
 0x307   : > { %v6448_v4 = vrot.slane %v6447_v10, 1  ;;  %v6401_v50 = vmax.f32 %v6399_v46, %v6400_v49  ;;  %v6456_v26 = vsub.f32 %v11053_v9, %v6365_v52  ;;  %v6458_v39 = vsub.f32 %v11056_v35, %v6377_v47 }
 0x308   : > { %v6413_v21 = vmax.f32 %v6411_v12, %v6412_v11  ;;  %v6425_v31 = vmax.f32 %v6423_v34, %v6424_v20  ;;  %v6437_v17 = vmax.f32 %v6435_v22, %v6436_v2  ;;  %v6460_v48 = vsub.f32 %v11063_v7, %v6389_v27 }
 0x309   : > { %v6449_v42 = vmax.f32 %v6447_v10, %v6448_v4  ;;  %v6462_v24 = vsub.f32 %v11066_v55, %v6401_v50  ;;  %v6472_v12 = vmul.f32 1.442695, %v6456_v26  ;;  %v6476_v22 = vmul.f32 1.442695, %v6458_v39 }
 0x30a   : > { %v6464_v63 = vsub.f32 %v11069_v8, %v6413_v21  ;;  %v6466_v32 = vsub.f32 %v11072_v61, %v6425_v31  ;;  %v6468_v13 = vsub.f32 %v11075_v25, %v6437_v17  ;;  %8045 = vpow2.f32 %v10841_v62 }
 0x30b   : > { %v6470_v11 = vsub.f32 %v11078_v60, %v6449_v42  ;;  %v6480_v10 = vmul.f32 1.442695, %v6460_v48  ;;  %v6484_v43 = vmul.f32 1.442695, %v6462_v24  ;;  %v14586_v37 = vrot.slane %v14568_v18, %v8675_v15 }
 0x30c   : > { %8047 = vpow2.f32 %v6472_v12  ;;  %v6488_v9 = vmul.f32 1.442695, %v6464_v63  ;;  %v6492_v4 = vmul.f32 1.442695, %v6466_v32  ;;  %v6496_v2 = vmul.f32 1.442695, %v6468_v13 }
 0x30d   : > { %v6264_v47 = vmul.f32 %v14586_v37, %v675_v38  ;;  %v11108_v35 = vmul.f32 1.442695, %v6470_v11  ;;  %v14587_v52 = vrot.slane %v14570_v45, %v8675_v15  ;;  %v14588_v55 = vrot.slane %v14572_v59, %v8675_v15 }
 0x30e   : > { %v14589_v8 = vrot.slane %v14574_v1, %v8675_v15  ;;  %8049 = vpow2.f32 %v6476_v22  ;;  %v14590_v18 = vrot.slane %v14576_v3, %v8675_v15  ;;  %v14591_v60 = vrot.slane %v14578_v19, %v8675_v15 }
 0x30f   : > { %v6266_v7 = vmul.f32 %v14587_v52, %v675_v38  ;;  %v6268_v62 = vmul.f32 %v14588_v55, %v675_v38  ;;  %v14592_v45 = vrot.slane %v14580_v28, %v8675_v15  ;;  %8051 = vpow2.f32 %v6480_v10 }
 0x310   : > { %v6270_v61 = vmul.f32 %v14589_v8, %v675_v38  ;;  %v6272_v25 = vmul.f32 %v14590_v18, %v675_v38  ;;  %v6274_v51 = vmul.f32 %v14591_v60, %v675_v38  ;;  %v14593_v59 = vrot.slane %v14582_v29, %v8675_v15 }
 0x311   : > { %v6276_v30 = vmul.f32 %v14592_v45, %v675_v38  ;;  %v6280_v1 = vadd.f32 %v6264_v47, %v11008_v58  ;;  %v6282_v54 = vadd.f32 %v6266_v7, %v11010_v33  ;;  %8053 = vpow2.f32 %v6484_v43 }
 0x312   : > { %v6278_v40 = vmul.f32 %v14593_v59, %v675_v38  ;;  %v6284_v3 = vadd.f32 %v6268_v62, %v11016_v36  ;;  %v6286_v41 = vadd.f32 %v6270_v61, %v11018_v6  ;;  %v6288_v19 = vadd.f32 %v6272_v25, %v11020_v14  ;;  %v14594_v6 = vld [vmem:[#allocation57_spill] sm:$0xff] }
 0x313   : > { %8055 = vpow2.f32 %v6488_v9  ;;  %v6290_v28 = vadd.f32 %v6274_v51, %v11022_v0  ;;  %v6292_v46 = vadd.f32 %v6276_v30, %v11024_v5  ;;  %v11140_v29 = vadd.f32 %v10906_v23, %v6280_v1  ;;  %v14595_v0 = vld [vmem:[#allocation59_spill] sm:$0xff] }
 0x314   : > { %v6294_v34 = vadd.f32 %v6278_v40, %v11026_v44  ;;  %8057 = vpow2.f32 %v6492_v4  ;;  %v11143_v58 = vadd.f32 %v10914_v53, %v6282_v54  ;;  %v11146_v33 = vadd.f32 %v10946_v57, %v6284_v3  ;;  %v14596_v44 = vld [vmem:[#allocation61_spill] sm:$0xff]  ;;  %v14597_v23 = vld [vmem:[#allocation63_spill] sm:$0xff] }
 0x315   : > { %8059 = vpow2.f32 %v6496_v2  ;;  %v11149_v36 = vadd.f32 %v10956_v56, %v6286_v41  ;;  %v11152_v14 = vadd.f32 %v14594_v6, %v6288_v19  ;;  %v11155_v5 = vadd.f32 %v14595_v0, %v6290_v28 }
 0x316   : > { %v11158_v16 = vadd.f32 %v14596_v44, %v6292_v46  ;;  %v11161_v49 = vadd.f32 %v14597_v23, %v6294_v34  ;;  %v6366_v53 = vrot.slane %v11140_v29, 4  ;;  %v6378_v57 = vrot.slane %v11143_v58, 4 }
 0x317   : > { %v6390_v20 = vrot.slane %v11146_v33, 4  ;;  %v6402_v56 = vrot.slane %v11149_v36, 4  ;;  %v6414_v27 = vrot.slane %v11152_v14, 4  ;;  %v6426_v50 = vrot.slane %v11155_v5, 4  ;;  %v11177_v24 = vpop.eup %8045 }
 0x318   : > { %v6367_v21 = vmax.f32 %v11140_v29, %v6366_v53  ;;  %v6379_v31 = vmax.f32 %v11143_v58, %v6378_v57  ;;  %v6438_v17 = vrot.slane %v11158_v16, 4  ;;  %v6450_v42 = vrot.slane %v11161_v49, 4  ;;  %14598 = vst [vmem:[#allocation64_spill] sm:$0xff] %v11177_v24 }
 0x319   : > { %v6391_v26 = vmax.f32 %v11146_v33, %v6390_v20  ;;  %v6403_v39 = vmax.f32 %v11149_v36, %v6402_v56  ;;  %v6415_v38 = vmax.f32 %v11152_v14, %v6414_v27  ;;  %v6427_v48 = vmax.f32 %v11155_v5, %v6426_v50  ;;  %v11181_v12 = vpop.eup %8047 }
 0x31a   : > { %v6368_v63 = vrot.slane %v6367_v21, 2  ;;  %v6380_v32 = vrot.slane %v6379_v31, 2  ;;  %v6439_v13 = vmax.f32 %v11158_v16, %v6438_v17  ;;  %v6451_v11 = vmax.f32 %v11161_v49, %v6450_v42  ;;  %14599 = vst [vmem:[#allocation66_spill] sm:$0xff] %v11181_v12 }
 0x31b   : > { %v6392_v22 = vrot.slane %v6391_v26, 2  ;;  %v6404_v10 = vrot.slane %v6403_v39, 2  ;;  %v6416_v43 = vrot.slane %v6415_v38, 2  ;;  %v6428_v37 = vrot.slane %v6427_v48, 2  ;;  %v11183_v52 = vpop.eup %8049 }
 0x31c   : > { %v6369_v47 = vmax.f32 %v6367_v21, %v6368_v63  ;;  %v6381_v9 = vmax.f32 %v6379_v31, %v6380_v32  ;;  %v6440_v4 = vrot.slane %v6439_v13, 2  ;;  %v6452_v2 = vrot.slane %v6451_v11, 2  ;;  %14600 = vst [vmem:[#allocation68_spill] sm:$0xff] %v11183_v52  ;;  %v11185_v61 = vpop.eup %8051  ;;  %v14607_v32 = vld [vmem:[#allocation114_spill] sm:$0xff] }
 0x31d   : > { %v6393_v7 = vmax.f32 %v6391_v26, %v6392_v22  ;;  %v6405_v55 = vmax.f32 %v6403_v39, %v6404_v10  ;;  %v6417_v62 = vmax.f32 %v6415_v38, %v6416_v43  ;;  %v6429_v8 = vmax.f32 %v6427_v48, %v6428_v37  ;;  %14601 = vst [vmem:[#allocation70_spill] sm:$0xff] %v11185_v61  ;;  %v14610_v22 = vld [vmem:[#allocation19_spill] sm:$0xff] }
 0x31e   : > { %v6370_v18 = vrot.slane %v6369_v47, 1  ;;  %v6382_v25 = vrot.slane %v6381_v9, 1  ;;  %v6441_v60 = vmax.f32 %v6439_v13, %v6440_v4  ;;  %v6453_v51 = vmax.f32 %v6451_v11, %v6452_v2  ;;  %v11187_v45 = vpop.eup %8053  ;;  %v14608_v13 = vld [vmem:[#allocation15_spill] sm:$0xff] }
 0x31f   : > { %14602 = vst [vmem:[#allocation65_spill] sm:$0xff] %v11187_v45  ;;  %v6394_v30 = vrot.slane %v6393_v7, 1  ;;  %v6406_v59 = vrot.slane %v6405_v55, 1  ;;  %v6418_v40 = vrot.slane %v6417_v62, 1  ;;  %v6430_v1 = vrot.slane %v6429_v8, 1 }
 0x320   : > { %v11189_v54 = vpop.eup %8055  ;;  %v6371_v3 = vmax.f32 %v6369_v47, %v6370_v18  ;;  %v6383_v41 = vmax.f32 %v6381_v9, %v6382_v25  ;;  %v6442_v19 = vrot.slane %v6441_v60, 1  ;;  %v6454_v28 = vrot.slane %v6453_v51, 1 }
 0x321   : > { %14603 = vst [vmem:[#allocation67_spill] sm:$0xff] %v11189_v54  ;;  %v11191_v46 = vpop.eup %8057  ;;  %v6395_v34 = vmax.f32 %v6393_v7, %v6394_v30  ;;  %v6407_v6 = vmax.f32 %v6405_v55, %v6406_v59  ;;  %v6419_v0 = vmax.f32 %v6417_v62, %v6418_v40  ;;  %v6431_v44 = vmax.f32 %v6429_v8, %v6430_v1 }
 0x322   : > { %14604 = vst [vmem:[#allocation69_spill] sm:$0xff] %v11191_v46  ;;  %v11193_v23 = vpop.eup %8059  ;;  %v6443_v53 = vmax.f32 %v6441_v60, %v6442_v19  ;;  %v6455_v57 = vmax.f32 %v6453_v51, %v6454_v28  ;;  %v6457_v20 = vsub.f32 %v11140_v29, %v6371_v3  ;;  %v6459_v56 = vsub.f32 %v11143_v58, %v6383_v41  ;;  %v14612_v41 = vld [vmem:[#allocation24_spill] sm:$0xff] }
 0x323   : > { %14605 = vst [vmem:[#allocation71_spill] sm:$0xff] %v11193_v23  ;;  %v6461_v27 = vsub.f32 %v11146_v33, %v6395_v34  ;;  %v6463_v50 = vsub.f32 %v11149_v36, %v6407_v6  ;;  %v6465_v21 = vsub.f32 %v11152_v14, %v6419_v0  ;;  %v6467_v31 = vsub.f32 %v11155_v5, %v6431_v44  ;;  %v14606_v36 = vld [vmem:[#allocation113_spill] sm:$0xff] }
 0x324   : > { %v6469_v17 = vsub.f32 %v11158_v16, %v6443_v53  ;;  %v6471_v42 = vsub.f32 %v11161_v49, %v6455_v57  ;;  %v6474_v26 = vmul.f32 1.442695, %v6457_v20  ;;  %v6478_v39 = vmul.f32 1.442695, %v6459_v56  ;;  %v14609_v49 = vld [vmem:[#allocation112_spill] sm:$0xff]  ;;  %v14613_v0 = vld [vmem:[#allocation17_spill] sm:$0xff] }
 0x325   : > { %8061 = vpow2.f32 %v11108_v35  ;;  %v6482_v38 = vmul.f32 1.442695, %v6461_v27  ;;  %v6486_v29 = vmul.f32 1.442695, %v6463_v50  ;;  %v6490_v58 = vmul.f32 1.442695, %v6465_v21 }
 0x326   : > { %8063 = vpow2.f32 %v6474_v26  ;;  %v6494_v48 = vmul.f32 1.442695, %v6467_v31  ;;  %v6498_v33 = vmul.f32 1.442695, %v6469_v17  ;;  %v11204_v63 = vmul.f32 1.442695, %v6471_v42 }
 0x327   : > { %v1742_v14 = vrot.slane %v14606_v36, 4  ;;  %v1754_v5 = vrot.slane %v14607_v32, 4  ;;  %v1766_v16 = vrot.slane %v14608_v13, 4  ;;  %8065 = vpow2.f32 %v6478_v39  ;;  %v14611_v35 = vld [vmem:[#allocation21_spill] sm:$0xff] }
 0x328   : > { %v1778_v11 = vrot.slane %v14609_v49, 4  ;;  %v1748_v10 = vrot.slane %v14610_v22, 4  ;;  %v1760_v43 = vrot.slane %v14611_v35, 4  ;;  %8067 = vpow2.f32 %v6482_v38 }
 0x329   : > { %v1743_v37 = vadd.f32 %v14606_v36, %v1742_v14  ;;  %v1755_v47 = vadd.f32 %v14607_v32, %v1754_v5  ;;  %v1767_v9 = vadd.f32 %v14608_v13, %v1766_v16  ;;  %8069 = vpow2.f32 %v6486_v29  ;;  %v14617_v14 = vld [vmem:[#allocation20_spill] sm:$0xff]  ;;  %v11228_v16 = vpop.f32.mrf.mxu0 }
 0x32a   : > { %v1779_v4 = vadd.f32 %v14609_v49, %v1778_v11  ;;  %v1749_v2 = vadd.f32 %v14610_v22, %v1748_v10  ;;  %v1761_v7 = vadd.f32 %v14611_v35, %v1760_v43  ;;  %8071 = vpow2.f32 %v6490_v58  ;;  %v14618_v10 = vld [vmem:[#allocation27_spill] sm:$0xff] }
 0x32b   : > { %v1744_v55 = vrot.slane %v1743_v37, 2  ;;  %v1756_v62 = vrot.slane %v1755_v47, 2  ;;  %v1768_v8 = vrot.slane %v1767_v9, 2  ;;  %8073 = vpow2.f32 %v6494_v48  ;;  %v14616_v48 = vld [vmem:[#allocation115_spill] sm:$0xff] }
 0x32c   : > { %v1780_v18 = vrot.slane %v1779_v4, 2  ;;  %v1750_v25 = vrot.slane %v1749_v2, 2  ;;  %v1762_v60 = vrot.slane %v1761_v7, 2  ;;  %8075 = vpow2.f32 %v6498_v33 }
 0x32d   : > { %v1745_v51 = vadd.f32 %v1744_v55, %v1743_v37  ;;  %v1757_v30 = vadd.f32 %v1756_v62, %v1755_v47  ;;  %v1769_v59 = vadd.f32 %v1768_v8, %v1767_v9  ;;  %v1772_v19 = vrot.slane %v14612_v41, 4  ;;  %v14619_v37 = vld [vmem:[#allocation29_spill] sm:$0xff] }
 0x32e   : > { %v1781_v40 = vadd.f32 %v1780_v18, %v1779_v4  ;;  %v1751_v1 = vadd.f32 %v1750_v25, %v1749_v2  ;;  %v1763_v3 = vadd.f32 %v1762_v60, %v1761_v7  ;;  %v1784_v44 = vrot.slane %v14613_v0, 4 }
 0x32f   : > { %v1746_v28 = vrot.slane %v1745_v51, 1  ;;  %v1758_v34 = vrot.slane %v1757_v30, 1  ;;  %v1770_v6 = vrot.slane %v1769_v59, 1  ;;  %v1773_v56 = vadd.f32 %v14612_v41, %v1772_v19 }
 0x330   : > { %v1782_v53 = vrot.slane %v1781_v40, 1  ;;  %v1752_v57 = vrot.slane %v1751_v1, 1  ;;  %v1764_v20 = vrot.slane %v1763_v3, 1  ;;  %v1785_v31 = vadd.f32 %v14613_v0, %v1784_v44 }
 0x331   : > { %v1747_v27 = vadd.f32 %v1746_v28, %v1745_v51  ;;  %v1759_v50 = vadd.f32 %v1758_v34, %v1757_v30  ;;  %v1771_v21 = vadd.f32 %v1770_v6, %v1769_v59  ;;  %v1774_v38 = vrot.slane %v1773_v56, 2 }
 0x332   : > { %v11222_v17 = vpop.eup %8061  ;;  %v1783_v42 = vadd.f32 %v1782_v53, %v1781_v40  ;;  %v1753_v26 = vadd.f32 %v1752_v57, %v1751_v1  ;;  %v1765_v39 = vadd.f32 %v1764_v20, %v1763_v3  ;;  %v1786_v58 = vrot.slane %v1785_v31, 2  ;;  %v11244_v40 = vpop.f32.mrf.mxu0  ;;  %v14625_v53 = vld [vmem:[#allocation31_spill] sm:$0xff] }
 0x333   : > { %14614 = vst [vmem:[#allocation72_spill] sm:$0xff] %v11222_v17  ;;  %v11224_v29 = vpop.eup %8063  ;;  %8077 = vrcp.f32 %v1747_v27  ;;  %v1790_v33 = vrot.slane %v14616_v48, 4  ;;  %v1796_v5 = vrot.slane %v14617_v14, 4  ;;  %v1775_v11 = vadd.f32 %v1774_v38, %v1773_v56 }
 0x334   : > { %14615 = vst [vmem:[#allocation74_spill] sm:$0xff] %v11224_v29  ;;  %8079 = vrcp.f32 %v1759_v50  ;;  %v3334_v43 = vrot.slane %v14618_v10, 4  ;;  %v3346_v47 = vrot.slane %v14619_v37, 4  ;;  %v11232_v9 = vpop.eup %8065  ;;  %v1787_v4 = vadd.f32 %v1786_v58, %v1785_v31  ;;  %v14627_v50 = vld [vmem:[#allocation32_spill] sm:$0xff] }
 0x335   : > { %14620 = vst [vmem:[#allocation76_spill] sm:$0xff] %v11232_v9  ;;  %8081 = vrcp.f32 %v1771_v21  ;;  %v1791_v2 = vadd.f32 %v14616_v48, %v1790_v33  ;;  %v1797_v7 = vadd.f32 %v14617_v14, %v1796_v5  ;;  %v11236_v55 = vpop.eup %8067  ;;  %v1776_v62 = vrot.slane %v1775_v11, 1  ;;  %v14628_v5 = vld [vmem:[#allocation34_spill] sm:$0xff] }
 0x336   : > { %14621 = vst [vmem:[#allocation78_spill] sm:$0xff] %v11236_v55  ;;  %8083 = vrcp.f32 %v1783_v42  ;;  %v3335_v8 = vadd.f32 %v14618_v10, %v3334_v43  ;;  %v3347_v18 = vadd.f32 %v14619_v37, %v3346_v47  ;;  %v11240_v25 = vpop.eup %8069  ;;  %v1788_v60 = vrot.slane %v1787_v4, 1 }
 0x337   : > { %14622 = vst [vmem:[#allocation73_spill] sm:$0xff] %v11240_v25  ;;  %8085 = vrcp.f32 %v1753_v26  ;;  %v1792_v51 = vrot.slane %v1791_v2, 2  ;;  %v1798_v30 = vrot.slane %v1797_v7, 2  ;;  %v11242_v59 = vpop.eup %8071  ;;  %v1777_v1 = vadd.f32 %v1776_v62, %v1775_v11 }
 0x338   : > { %14623 = vst [vmem:[#allocation75_spill] sm:$0xff] %v11242_v59  ;;  %8087 = vrcp.f32 %v1765_v39  ;;  %v3336_v3 = vrot.slane %v3335_v8, 2  ;;  %v3348_v19 = vrot.slane %v3347_v18, 2  ;;  %v11246_v28 = vpop.eup %8073  ;;  %v1789_v34 = vadd.f32 %v1788_v60, %v1787_v4  ;;  %v11253_v39 = vpop.f32.mrf.mxu0 }
 0x339   : > { %14624 = vst [vmem:[#allocation77_spill] sm:$0xff] %v11246_v28  ;;  %v1793_v6 = vadd.f32 %v1792_v51, %v1791_v2  ;;  %v1799_v44 = vadd.f32 %v1798_v30, %v1797_v7  ;;  %v3358_v57 = vrot.slane %v14625_v53, 4  ;;  %v11249_v20 = vpop.eup %8075  ;;  %8089 = vrcp.f32 %v1777_v1  ;;  %v14629_v2 = vld [vmem:[#allocation35_spill] sm:$0xff] }
 0x33a   : > { %14626 = vst [vmem:[#allocation79_spill] sm:$0xff] %v11249_v20  ;;  %v3337_v56 = vadd.f32 %v3336_v3, %v3335_v8  ;;  %v3349_v27 = vadd.f32 %v3348_v19, %v3347_v18  ;;  %v3370_v21 = vrot.slane %v14627_v50, 4  ;;  %8091 = vrcp.f32 %v1789_v34  ;;  %v11265_v1 = vpop.f32.mrf.mxu0 }
 0x33b   : > { %v1794_v31 = vrot.slane %v1793_v6, 1  ;;  %v1800_v42 = vrot.slane %v1799_v44, 1  ;;  %v3359_v26 = vadd.f32 %v14625_v53, %v3358_v57  ;;  %v3382_v11 = vrot.slane %v14628_v5, 4  ;;  %14630 = vst [vmem:[#allocation41_spill] sm:$0xff] %v11265_v1 }
 0x33c   : > { %v3338_v38 = vrot.slane %v3337_v56, 1  ;;  %v3350_v58 = vrot.slane %v3349_v27, 1  ;;  %v3371_v33 = vadd.f32 %v14627_v50, %v3370_v21  ;;  %v3340_v7 = vrot.slane %v14629_v2, 4 }
 0x33d   : > { %v1795_v43 = vadd.f32 %v1794_v31, %v1793_v6  ;;  %v1801_v47 = vadd.f32 %v1800_v42, %v1799_v44  ;;  %v3360_v4 = vrot.slane %v3359_v26, 2  ;;  %8093 = vpow2.f32 %v11204_v63  ;;  %v14631_v44 = vld [vmem:[#allocation37_spill] sm:$0xff] }
 0x33e   : > { %v3339_v62 = vadd.f32 %v3338_v38, %v3337_v56  ;;  %v3372_v8 = vrot.slane %v3371_v33, 2  ;;  %v3383_v18 = vadd.f32 %v14628_v5, %v3382_v11  ;;  %v11263_v51 = vadd.f32 %v14629_v2, %v3340_v7  ;;  %v14632_v56 = vld [vmem:[#allocation39_spill] sm:$0xff] }
 0x33f   : > { %8095 = vrcp.f32 %v1795_v43  ;;  %v11260_v60 = vadd.f32 %v3360_v4, %v3359_v26  ;;  %v3351_v6 = vadd.f32 %v3350_v58, %v3349_v27 }
 0x340   : > { %v8078_v30 = vpop.eup %8077  ;;  %8097 = vrcp.f32 %v1801_v47  ;;  %v11267_v3 = vadd.f32 %v3372_v8, %v3371_v33  ;;  %v3384_v19 = vrot.slane %v3383_v18, 2 }
 0x341   : > { %v8080_v34 = vpop.eup %8079  ;;  %v11270_v63 = vmul.f32 %v8078_v30, %v14606_v36  ;;  %8099 = vrcp.f32 %v3339_v62 }
 0x342   : > { %v8082_v31 = vpop.eup %8081  ;;  %v11275_v42 = vmul.f32 %v8080_v34, %v14607_v32  ;;  %v11296_v7 = vadd.f32 %v3384_v19, %v3383_v18  ;;  %8101 = vrcp.f32 %v3351_v6 }
 0x343   : > { %v8084_v33 = vpop.eup %8083  ;;  %v11280_v11 = vmul.f32 %v8082_v31, %v14608_v13  ;;  %v1870_v36 = vmul.f32 %v11270_v63, %v11228_v16  ;;  %v2023_v27 = vmul.f32 %v11270_v63, %v11253_v39  ;;  %v11294_v13 = vpop.f32.mrf.mxu0 }
 0x344   : > { %v8086_v43 = vpop.eup %8085  ;;  %v11288_v32 = vmul.f32 %v8084_v33, %v14609_v49  ;;  %v1872_v47 = vmul.f32 %v11275_v42, %v11228_v16  ;;  %v2025_v4 = vmul.f32 %v11275_v42, %v11253_v39  ;;  %14633 = vst [vmem:[#allocation43_spill] sm:$0xff] %v11294_v13  ;;  %v2169_v49 = vmul.f32 %v11270_v63, %v11294_v13 }
 0x345   : > { %v8088_v62 = vpop.eup %8087  ;;  %v11299_v8 = vmul.f32 %v8086_v43, %v14610_v22  ;;  %v2027_v30 = vmul.f32 %v11280_v11, %v11253_v39  ;;  %v11307_v34 = vmul.f32 %v11280_v11, %v11228_v16  ;;  %v1886_v31 = vrot.slane %v1870_v36, 4  ;;  %v11329_v26 = vpop.f32.mrf.mxu0 }
 0x346   : > { %v1898_v33 = vrot.slane %v1872_v47, 4  ;;  %v11310_v18 = vmul.f32 %v8088_v62, %v14611_v35  ;;  %v8090_v19 = vpop.eup %8089  ;;  %v11316_v43 = vmul.f32 %v11288_v32, %v11253_v39  ;;  %v2039_v21 = vrot.slane %v2023_v27, 4  ;;  %14634 = vst [vmem:[#allocation45_spill] sm:$0xff] %v11329_v26 }
 0x347   : > { %v1871_v22 = vmul.f32 %v11299_v8, %v11244_v40  ;;  %v2171_v6 = vmul.f32 %v11275_v42, %v11294_v13  ;;  %v8092_v57 = vpop.eup %8091  ;;  %v11322_v38 = vmul.f32 %v11288_v32, %v11228_v16  ;;  %v11325_v35 = vmul.f32 %v8090_v19, %v14612_v41  ;;  %v11361_v41 = vpop.f32.mrf.mxu0 }
 0x348   : > { %v1873_v62 = vmul.f32 %v11310_v18, %v11244_v40  ;;  %v2051_v58 = vrot.slane %v2025_v4, 4  ;;  %v11332_v15 = vmul.f32 %v8092_v57, %v14613_v0  ;;  %v11334_v28 = vadd.f32 %v2039_v21, %v2023_v27  ;;  %14636 = vst [vmem:[#allocation80_spill] sm:$0xff] %v11361_v41 }
 0x349   : > { %v1892_v20 = vrot.slane %v1871_v22, 4  ;;  %v2063_v17 = vrot.slane %v2027_v30, 4  ;;  %v11336_v23 = vadd.f32 %v1886_v31, %v1870_v36  ;;  %v11338_v46 = vadd.f32 %v1898_v33, %v1872_v47 }
 0x34a   : > { %v1904_v19 = vrot.slane %v1873_v62, 4  ;;  %v11341_v24 = vpop.eup %8093  ;;  %v11345_v59 = vmul.f32 %v11325_v35, %v11244_v40  ;;  %v11349_v0 = vmul.f32 %v11332_v15, %v11244_v40  ;;  %v11351_v57 = vadd.f32 %v2051_v58, %v2025_v4 }
 0x34b   : > { %14635 = vst [vmem:[#allocation47_spill] sm:$0xff] %v11341_v24  ;;  %v11354_v27 = vadd.f32 %v1892_v20, %v1871_v22  ;;  %v11357_v31 = vadd.f32 %v2063_v17, %v2027_v30  ;;  %v2024_v33 = vmul.f32 %v11299_v8, %v11265_v1  ;;  %v2026_v58 = vmul.f32 %v11310_v18, %v11265_v1 }
 0x34c   : > { %v8096_v36 = vpop.eup %8095  ;;  %v2028_v20 = vmul.f32 %v11325_v35, %v11265_v1  ;;  %v11372_v4 = vmul.f32 %v11332_v15, %v11265_v1  ;;  %v11374_v17 = vadd.f32 %v1904_v19, %v1873_v62  ;;  %v11395_v19 = vpop.f32.mrf.mxu0  ;;  %v2197_v47 = vrot.slane %v2171_v6, 4 }
 0x34d   : > { %v8098_v24 = vpop.eup %8097  ;;  %v11364_v25 = vmul.f32 %v8096_v36, %v14616_v48  ;;  %v2045_v22 = vrot.slane %v2024_v33, 4  ;;  %v2173_v48 = vmul.f32 %v11280_v11, %v11294_v13  ;;  %v2057_v55 = vrot.slane %v2026_v58, 4  ;;  %14639 = vst [vmem:[#allocation86_spill] sm:$0xff] %v11395_v19 }
 0x34e   : > { %14637 = vst [vmem:[#allocation82_spill] sm:$0xff] %v11372_v4  ;;  %v11377_v30 = vmul.f32 %v8098_v24, %v14617_v14  ;;  %v11381_v36 = vpop.eup %8099  ;;  %v2069_v9 = vrot.slane %v2028_v20, 4  ;;  %v11393_v24 = vmul.f32 %v11288_v32, %v11294_v13  ;;  %v2185_v14 = vrot.slane %v2169_v49, 4 }
 0x34f   : > { %v11387_v29 = vmul.f32 %v11364_v25, %v11253_v39  ;;  %v11389_v62 = vadd.f32 %v2045_v22, %v2024_v33  ;;  %v11397_v54 = vadd.f32 %v2057_v55, %v2026_v58  ;;  %v2209_v45 = vrot.slane %v2173_v48, 4  ;;  %v8102_v61 = vpop.eup %8101 }
 0x350   : > { %14638 = vst [vmem:[#allocation84_spill] sm:$0xff] %v11393_v24  ;;  %v11402_v52 = vmul.f32 %v11377_v30, %v11265_v1  ;;  %v11406_v33 = vmul.f32 %v11364_v25, %v11294_v13  ;;  %v11408_v22 = vadd.f32 %v2185_v14, %v2169_v49  ;;  %v2170_v12 = vmul.f32 %v11299_v8, %v11329_v26  ;;  %v11425_v14 = vpop.f32.mrf.mxu0 }
 0x351   : > { %14640 = vst [vmem:[#allocation81_spill] sm:$0xff] %v11397_v54  ;;  %v11413_v58 = vadd.f32 %v2069_v9, %v2028_v20  ;;  %v11415_v21 = vadd.f32 %v2197_v47, %v2171_v6  ;;  %v2172_v4 = vmul.f32 %v11310_v18, %v11329_v26  ;;  %v11420_v1 = vadd.f32 %v2209_v45, %v2173_v48 }
 0x352   : > { %14641 = vst [vmem:[#allocation83_spill] sm:$0xff] %v11402_v52  ;;  %14642 = vst [vmem:[#allocation85_spill] sm:$0xff] %v11406_v33  ;;  %v2174_v49 = vmul.f32 %v11325_v35, %v11329_v26  ;;  %v11429_v9 = vmul.f32 %v11332_v15, %v11329_v26  ;;  %v2191_v6 = vrot.slane %v2170_v12, 4  ;;  %v2315_v20 = vmul.f32 %v11270_v63, %v11361_v41 }
 0x353   : > { %14643 = vst [vmem:[#allocation87_spill] sm:$0xff] %v11408_v22  ;;  %14644 = vst [vmem:[#allocation88_spill] sm:$0xff] %v11413_v58  ;;  %v2203_v47 = vrot.slane %v2172_v4, 4  ;;  %v2317_v48 = vmul.f32 %v11275_v42, %v11361_v41  ;;  %v2319_v33 = vmul.f32 %v11280_v11, %v11361_v41  ;;  %v11441_v24 = vmul.f32 %v11377_v30, %v11329_v26  ;;  %v11451_v58 = vpop.f32.mrf.mxu0 }
 0x354   : > { %14645 = vst [vmem:[#allocation90_spill] sm:$0xff] %v11415_v21  ;;  %14646 = vst [vmem:[#allocation92_spill] sm:$0xff] %v11420_v1  ;;  %v2215_v45 = vrot.slane %v2174_v49, 4  ;;  %v11443_v1 = vadd.f32 %v2191_v6, %v2170_v12  ;;  %v11449_v63 = vmul.f32 %v11288_v32, %v11361_v41  ;;  %v2331_v52 = vrot.slane %v2315_v20, 4 }
 0x355   : > { %14647 = vst [vmem:[#allocation94_spill] sm:$0xff] %v11425_v14  ;;  %14648 = vst [vmem:[#allocation89_spill] sm:$0xff] %v11429_v9  ;;  %v11445_v13 = vadd.f32 %v2203_v47, %v2172_v4  ;;  %v2343_v22 = vrot.slane %v2317_v48, 4  ;;  %v2355_v42 = vrot.slane %v2319_v33, 4  ;;  %v2316_v12 = vmul.f32 %v11299_v8, %v11395_v19 }
 0x356   : > { %14649 = vst [vmem:[#allocation91_spill] sm:$0xff] %v11441_v24  ;;  %14650 = vst [vmem:[#allocation93_spill] sm:$0xff] %v11443_v1  ;;  %v11453_v11 = vadd.f32 %v2215_v45, %v2174_v49  ;;  %v11458_v24 = vmul.f32 %v11364_v25, %v11361_v41  ;;  %v11463_v32 = vadd.f32 %v2331_v52, %v2315_v20  ;;  %v3386_v4 = vrot.slane %v11296_v7, 1 }
 0x357   : > { %14651 = vst [vmem:[#allocation95_spill] sm:$0xff] %v11445_v13  ;;  %14652 = vst [vmem:[#allocation96_spill] sm:$0xff] %v11449_v63  ;;  %v11465_v6 = vadd.f32 %v2343_v22, %v2317_v48  ;;  %v2318_v47 = vmul.f32 %v11310_v18, %v11395_v19  ;;  %v2320_v45 = vmul.f32 %v11325_v35, %v11395_v19  ;;  %v14660_v22 = vrot.slane %v11260_v60, 1  ;;  %v11482_v18 = vpop.f32.mrf.mxu0  ;;  %v14671_v35 = vld [vmem:[#allocation42_spill] sm:$0xff] }
 0x358   : > { %14653 = vst [vmem:[#allocation98_spill] sm:$0xff] %v11451_v58  ;;  %14654 = vst [vmem:[#allocation100_spill] sm:$0xff] %v11453_v11  ;;  %v11474_v55 = vmul.f32 %v11332_v15, %v11395_v19  ;;  %v11476_v8 = vadd.f32 %v2355_v42, %v2319_v33  ;;  %v11488_v15 = vmul.f32 %v11377_v30, %v11395_v19  ;;  %v14663_v33 = vrot.slane %v11267_v3, 1 }
 0x359   : > { %14655 = vst [vmem:[#allocation102_spill] sm:$0xff] %v11458_v24  ;;  %14656 = vst [vmem:[#allocation97_spill] sm:$0xff] %v11463_v32  ;;  %v2337_v24 = vrot.slane %v2316_v12, 4  ;;  %v2349_v20 = vrot.slane %v2318_v47, 4  ;;  %v3363_v48 = vadd.f32 %v14660_v22, %v11260_v60  ;;  %v11498_v60 = vmul.f32 %v11381_v36, %v14618_v10  ;;  %v11512_v10 = vpop.f32.mrf.mxu0 }
 0x35a   : > { %14657 = vst [vmem:[#allocation99_spill] sm:$0xff] %v11465_v6  ;;  %14658 = vst [vmem:[#allocation101_spill] sm:$0xff] %v11474_v55  ;;  %v3375_v42 = vadd.f32 %v14663_v33, %v11267_v3  ;;  %v2361_v22 = vrot.slane %v2320_v45, 4  ;;  %v11502_v49 = vmul.f32 %v8102_v61, %v14619_v37  ;;  %v3387_v3 = vadd.f32 %v3386_v4, %v11296_v7  ;;  %v14670_v4 = vld [vmem:[#allocation40_spill] sm:$0xff] }
 0x35b   : > { %14659 = vst [vmem:[#allocation103_spill] sm:$0xff] %v11476_v8  ;;  %14661 = vst [vmem:[#allocation104_spill] sm:$0xff] %v11482_v18  ;;  %v11493_v52 = vadd.f32 %v2337_v24, %v2316_v12  ;;  %8103 = vrcp.f32 %v3363_v48  ;;  %v3462_v24 = vmul.f32 %v11498_v60, %v11425_v14  ;;  %v14666_v12 = vrot.slane %v11263_v51, 2  ;;  %v11529_v32 = vpop.f32.mrf.mxu0 }
 0x35c   : > { %14662 = vst [vmem:[#allocation106_spill] sm:$0xff] %v11488_v15  ;;  %8105 = vrcp.f32 %v3375_v42  ;;  %v11504_v15 = vadd.f32 %v2349_v20, %v2318_v47  ;;  %14667 = vst [vmem:[#allocation105_spill] sm:$0xff] %v11512_v10  ;;  %v3464_v36 = vmul.f32 %v11502_v49, %v11425_v14  ;;  %v14668_v33 = vrot.slane %v14631_v44, 4 }
 0x35d   : > { %14664 = vst [vmem:[#allocation108_spill] sm:$0xff] %v11493_v52  ;;  %v3343_v48 = vadd.f32 %v14666_v12, %v11263_v51  ;;  %v14669_v37 = vrot.slane %v14632_v56, 4  ;;  %v3376_v47 = vrot.slane %v14670_v4, 4  ;;  %8107 = vrcp.f32 %v3387_v3  ;;  %14672 = vst [vmem:[#allocation107_spill] sm:$0xff] %v11529_v32 }
 0x35e   : > { %14665 = vst [vmem:[#allocation110_spill] sm:$0xff] %v11504_v15  ;;  %v3353_v61 = vadd.f32 %v14631_v44, %v14668_v33  ;;  %v3478_v20 = vrot.slane %v3462_v24, 4  ;;  %v3388_v51 = vrot.slane %v14671_v35, 4  ;;  %v3490_v12 = vrot.slane %v3464_v36, 4 }
 0x35f   : > { %v3365_v7 = vadd.f32 %v14632_v56, %v14669_v37  ;;  %v3344_v42 = vrot.slane %v3343_v48, 1  ;;  %v3377_v63 = vadd.f32 %v14670_v4, %v3376_v47  ;;  %v3608_v37 = vmul.f32 %v11498_v60, %v11482_v18 }
 0x360   : > { %v3354_v55 = vrot.slane %v3353_v61, 2  ;;  %v3389_v33 = vadd.f32 %v14671_v35, %v3388_v51  ;;  %v11531_v3 = vadd.f32 %v2361_v22, %v2320_v45  ;;  %v11533_v13 = vadd.f32 %v3478_v20, %v3462_v24 }
 0x361   : > { %v3366_v19 = vrot.slane %v3365_v7, 2  ;;  %v3345_v6 = vadd.f32 %v3344_v42, %v3343_v48  ;;  %v3378_v11 = vrot.slane %v3377_v63, 2  ;;  %v3610_v47 = vmul.f32 %v11502_v49, %v11482_v18 }
 0x362   : > { %14673 = vst [vmem:[#allocation109_spill] sm:$0xff] %v11531_v3  ;;  %v3355_v41 = vadd.f32 %v3354_v55, %v3353_v61  ;;  %14674 = vst [vmem:[#allocation111_spill] sm:$0xff] %v11533_v13  ;;  %v3390_v1 = vrot.slane %v3389_v33, 2  ;;  %v11537_v48 = vadd.f32 %v3490_v12, %v3464_v36  ;;  %v3624_v26 = vrot.slane %v3608_v37, 4 }
 0x363   : > { %v3367_v9 = vadd.f32 %v3366_v19, %v3365_v7  ;;  %8109 = vrcp.f32 %v3345_v6  ;;  %v3379_v8 = vadd.f32 %v3378_v11, %v3377_v63  ;;  %v3636_v21 = vrot.slane %v3610_v47, 4  ;;  %v11541_v19 = vpop.f32.mrf.mxu0 }
 0x364   : > { %14675 = vst [vmem:[#allocation57_spill] sm:$0xff] %v11537_v48  ;;  %v3356_v42 = vrot.slane %v3355_v41, 1  ;;  %v3391_v52 = vadd.f32 %v3390_v1, %v3389_v33  ;;  %v3754_v55 = vmul.f32 %v11498_v60, %v11529_v32  ;;  %14676 = vst [vmem:[#allocation59_spill] sm:$0xff] %v11541_v19  ;;  %v3756_v6 = vmul.f32 %v11502_v49, %v11529_v32 }
 0x365   : > { %v3368_v51 = vrot.slane %v3367_v9, 1  ;;  %v3380_v24 = vrot.slane %v3379_v8, 1  ;;  %v11548_v12 = vadd.f32 %v3624_v26, %v3608_v37  ;;  %v11554_v61 = vadd.f32 %v3636_v21, %v3610_v47 }
 0x366   : > { %v3357_v45 = vadd.f32 %v3356_v42, %v3355_v41  ;;  %v3392_v7 = vrot.slane %v3391_v52, 1  ;;  %v3770_v63 = vrot.slane %v3754_v55, 4  ;;  %v3782_v42 = vrot.slane %v3756_v6, 4 }
 0x367   : > { %v3369_v22 = vadd.f32 %v3368_v51, %v3367_v9  ;;  %v3381_v20 = vadd.f32 %v3380_v24, %v3379_v8  ;;  %14677 = vst [vmem:[#allocation61_spill] sm:$0xff] %v11548_v12  ;;  %v11551_v51 = vpop.f32.mrf.mxu0  ;;  %14679 = vst [vmem:[#allocation113_spill] sm:$0xff] %v11554_v61 }
 0x368   : > { %v8104_v1 = vpop.eup %8103  ;;  %8111 = vrcp.f32 %v3357_v45  ;;  %v3393_v9 = vadd.f32 %v3392_v7, %v3391_v52  ;;  %14678 = vst [vmem:[#allocation63_spill] sm:$0xff] %v11551_v51  ;;  %v11556_v13 = vadd.f32 %v3770_v63, %v3754_v55  ;;  %v3900_v21 = vmul.f32 %v11498_v60, %v11551_v51 }
 0x369   : > { %v8106_v33 = vpop.eup %8105  ;;  %v3450_v41 = vmul.f32 %v8104_v1, %v14625_v53  ;;  %8113 = vrcp.f32 %v3369_v22  ;;  %v11573_v24 = vadd.f32 %v3782_v42, %v3756_v6  ;;  %v3902_v1 = vmul.f32 %v11502_v49, %v11551_v51 }
 0x36a   : > { %v3452_v36 = vmul.f32 %v8106_v33, %v14627_v50  ;;  %8115 = vrcp.f32 %v3381_v20  ;;  %14680 = vst [vmem:[#allocation114_spill] sm:$0xff] %v11556_v13  ;;  %v8108_v53 = vpop.eup %8107 }
 0x36b   : > { %v3466_v8 = vmul.f32 %v3450_v41, %v11425_v14  ;;  %8117 = vrcp.f32 %v3393_v9  ;;  %v3612_v26 = vmul.f32 %v3450_v41, %v11482_v18  ;;  %v3758_v37 = vmul.f32 %v3450_v41, %v11529_v32  ;;  %14684 = vst [vmem:[#allocation21_spill] sm:$0xff] %v11573_v24 }
 0x36c   : > { %v11562_v52 = vmul.f32 %v3452_v36, %v11425_v14  ;;  %v11565_v45 = vmul.f32 %v3452_v36, %v11482_v18  ;;  %v11568_v50 = vmul.f32 %v3452_v36, %v11529_v32  ;;  %v3454_v47 = vmul.f32 %v8108_v53, %v14628_v5 }
 0x36d   : > { %v3502_v55 = vrot.slane %v3466_v8, 4  ;;  %v3648_v22 = vrot.slane %v3612_v26, 4  ;;  %v3794_v60 = vrot.slane %v3758_v37, 4  ;;  %v3904_v5 = vmul.f32 %v3450_v41, %v11551_v51 }
 0x36e   : > { %14681 = vst [vmem:[#allocation15_spill] sm:$0xff] %v11562_v52  ;;  %14682 = vst [vmem:[#allocation112_spill] sm:$0xff] %v11565_v45  ;;  %v11580_v33 = vmul.f32 %v3454_v47, %v11425_v14  ;;  %v11587_v6 = vmul.f32 %v3454_v47, %v11482_v18  ;;  %v11597_v63 = vmul.f32 %v3454_v47, %v11529_v32  ;;  %v3928_v7 = vrot.slane %v3902_v1, 4  ;;  %v14696_v45 = vld [vmem:[#allocation46_spill] sm:$0xff] }
 0x36f   : > { %14683 = vst [vmem:[#allocation19_spill] sm:$0xff] %v11568_v50  ;;  %v11584_v11 = vadd.f32 %v3502_v55, %v3466_v8  ;;  %v11589_v42 = vadd.f32 %v3648_v22, %v3612_v26  ;;  %v11602_v8 = vmul.f32 %v3452_v36, %v11551_v51  ;;  %v3916_v55 = vrot.slane %v3900_v21, 4  ;;  %v14691_v26 = vld [vmem:[#allocation44_spill] sm:$0xff] }
 0x370   : > { %14685 = vst [vmem:[#allocation24_spill] sm:$0xff] %v11580_v33  ;;  %v8110_v53 = vpop.eup %8109  ;;  %14687 = vst [vmem:[#allocation115_spill] sm:$0xff] %v11587_v6  ;;  %v3400_v22 = vrot.slane %v14691_v26, 4  ;;  %v11611_v9 = vadd.f32 %v3794_v60, %v3758_v37  ;;  %v11614_v41 = vmul.f32 %v3454_v47, %v11551_v51  ;;  %v11618_v50 = vadd.f32 %v3928_v7, %v3902_v1 }
 0x371   : > { %14686 = vst [vmem:[#allocation17_spill] sm:$0xff] %v11584_v11  ;;  %14688 = vst [vmem:[#allocation20_spill] sm:$0xff] %v11589_v42  ;;  %v11594_v20 = vmul.f32 %v8110_v53, %v14629_v2  ;;  %v11616_v36 = vadd.f32 %v3916_v55, %v3900_v21  ;;  %v3412_v42 = vrot.slane %v14696_v45, 4 }
 0x372   : > { %14689 = vst [vmem:[#allocation27_spill] sm:$0xff] %v11597_v63  ;;  %14690 = vst [vmem:[#allocation29_spill] sm:$0xff] %v11602_v8  ;;  %v3940_v63 = vrot.slane %v3904_v5, 4  ;;  %v3401_v6 = vadd.f32 %v14691_v26, %v3400_v22 }
 0x373   : > { %v3463_v49 = vmul.f32 %v11594_v20, %v11451_v58  ;;  %v3609_v2 = vmul.f32 %v11594_v20, %v11512_v10  ;;  %v3755_v53 = vmul.f32 %v11594_v20, %v11541_v19  ;;  %14692 = vst [vmem:[#allocation31_spill] sm:$0xff] %v11611_v9  ;;  %14693 = vst [vmem:[#allocation32_spill] sm:$0xff] %v11614_v41 }
 0x374   : > { %14694 = vst [vmem:[#allocation34_spill] sm:$0xff] %v11616_v36  ;;  %14695 = vst [vmem:[#allocation35_spill] sm:$0xff] %v11618_v50  ;;  %v11623_v37 = vadd.f32 %v3940_v63, %v3904_v5 }
 0x375   : > { %v8112_v24 = vpop.eup %8111  ;;  %v3484_v13 = vrot.slane %v3463_v49, 4  ;;  %v3630_v32 = vrot.slane %v3609_v2, 4  ;;  %v3776_v18 = vrot.slane %v3755_v53, 4 }
 0x376   : > { %v8114_v61 = vpop.eup %8113  ;;  %v3449_v12 = vmul.f32 %v8112_v24, %v14631_v44  ;;  %14697 = vst [vmem:[#allocation37_spill] sm:$0xff] %v11623_v37 }
 0x377   : > { %v8116_v60 = vpop.eup %8115  ;;  %v3451_v21 = vmul.f32 %v8114_v61, %v14632_v56  ;;  %v11627_v7 = vadd.f32 %v3484_v13, %v3463_v49  ;;  %v11634_v24 = vadd.f32 %v3630_v32, %v3609_v2  ;;  %v3402_v13 = vrot.slane %v3401_v6, 2 }
 0x378   : > { %v8118_v22 = vpop.eup %8117  ;;  %v3453_v41 = vmul.f32 %v8116_v60, %v14670_v4  ;;  %v3465_v51 = vmul.f32 %v3449_v12, %v11451_v58  ;;  %v3611_v44 = vmul.f32 %v3449_v12, %v11512_v10  ;;  %v11645_v4 = vadd.f32 %v3776_v18, %v3755_v53  ;;  %v11662_v60 = vpop.f32.mrf.mxu0 }
 0x379   : > { %14698 = vst [vmem:[#allocation39_spill] sm:$0xff] %v11627_v7  ;;  %14699 = vst [vmem:[#allocation40_spill] sm:$0xff] %v11634_v24  ;;  %v3455_v63 = vmul.f32 %v8118_v22, %v14671_v35  ;;  %v3467_v5 = vmul.f32 %v3451_v21, %v11451_v58  ;;  %v3613_v56 = vmul.f32 %v3451_v21, %v11512_v10 }
 0x37a   : > { %v11640_v61 = vmul.f32 %v3453_v41, %v11451_v58  ;;  %v3496_v49 = vrot.slane %v3465_v51, 4  ;;  %v11643_v47 = vmul.f32 %v3453_v41, %v11512_v10  ;;  %14702 = vst [vmem:[#allocation46_spill] sm:$0xff] %v11645_v4  ;;  %v3642_v2 = vrot.slane %v3611_v44, 4 }
 0x37b   : > { %v3508_v32 = vrot.slane %v3467_v5, 4  ;;  %v3757_v35 = vmul.f32 %v3449_v12, %v11541_v19  ;;  %v11650_v22 = vmul.f32 %v3455_v63, %v11451_v58  ;;  %v3654_v8 = vrot.slane %v3613_v56, 4 }
 0x37c   : > { %14700 = vst [vmem:[#allocation42_spill] sm:$0xff] %v11640_v61  ;;  %14701 = vst [vmem:[#allocation44_spill] sm:$0xff] %v11643_v47  ;;  %v11652_v55 = vadd.f32 %v3496_v49, %v3465_v51  ;;  %v11657_v50 = vmul.f32 %v3455_v63, %v11512_v10  ;;  %v11659_v18 = vadd.f32 %v3642_v2, %v3611_v44 }
 0x37d   : > { %14703 = vst [vmem:[#allocation118_spill] sm:$0xff] %v11650_v22  ;;  %v3759_v53 = vmul.f32 %v3451_v21, %v11541_v19  ;;  %v11665_v9 = vadd.f32 %v3508_v32, %v3467_v5  ;;  %v11669_v49 = vmul.f32 %v3453_v41, %v11541_v19  ;;  %v11671_v1 = vadd.f32 %v3654_v8, %v3613_v56 }
 0x37e   : > { %14704 = vst [vmem:[#allocation119_spill] sm:$0xff] %v11652_v55  ;;  %14705 = vst [vmem:[#allocation120_spill] sm:$0xff] %v11657_v50  ;;  %v11674_v37 = vmul.f32 %v3455_v63, %v11541_v19  ;;  %v3788_v2 = vrot.slane %v3757_v35, 4  ;;  %v3403_v50 = vadd.f32 %v3402_v13, %v3401_v6  ;;  %v3413_v24 = vadd.f32 %v14696_v45, %v3412_v42 }
 0x37f   : > { %14706 = vst [vmem:[#allocation121_spill] sm:$0xff] %v11659_v18  ;;  %14707 = vst [vmem:[#allocation122_spill] sm:$0xff] %v11665_v9  ;;  %v3901_v5 = vmul.f32 %v11594_v20, %v11662_v60  ;;  %v3903_v32 = vmul.f32 %v3449_v12, %v11662_v60  ;;  %v3800_v36 = vrot.slane %v3759_v53, 4  ;;  %v3905_v8 = vmul.f32 %v3451_v21, %v11662_v60  ;;  %v14713_v21 = vld [vmem:[#allocation26_spill] sm:$0xff] }
 0x380   : > { %14708 = vst [vmem:[#allocation123_spill] sm:$0xff] %v11669_v49  ;;  %14709 = vst [vmem:[#allocation124_spill] sm:$0xff] %v11671_v1  ;;  %v3907_v56 = vmul.f32 %v3453_v41, %v11662_v60  ;;  %v3404_v19 = vrot.slane %v3403_v50, 1  ;;  %v3909_v44 = vmul.f32 %v3455_v63, %v11662_v60  ;;  %v11685_v6 = vadd.f32 %v3788_v2, %v3757_v35 }
 0x381   : > { %14710 = vst [vmem:[#allocation125_spill] sm:$0xff] %v11674_v37  ;;  %v3414_v37 = vrot.slane %v3413_v24, 2  ;;  %v3922_v4 = vrot.slane %v3901_v5, 4  ;;  %v3934_v42 = vrot.slane %v3903_v32, 4  ;;  %v3946_v13 = vrot.slane %v3905_v8, 4 }
 0x382   : > { %14711 = vst [vmem:[#allocation126_spill] sm:$0xff] %v11685_v6  ;;  %v3958_v47 = vrot.slane %v3907_v56, 4  ;;  %v3405_v20 = vadd.f32 %v3404_v19, %v3403_v50  ;;  %v3970_v10 = vrot.slane %v3909_v44, 4  ;;  %v4919_v41 = vrot.slane %v14713_v21, 4 }
 0x383   : > { %v3415_v1 = vadd.f32 %v3414_v37, %v3413_v24  ;;  %v3923_v12 = vadd.f32 %v3922_v4, %v3901_v5  ;;  %v3935_v51 = vadd.f32 %v3934_v42, %v3903_v32  ;;  %v3947_v18 = vadd.f32 %v3946_v13, %v3905_v8  ;;  %v14716_v24 = vld [vmem:[#allocation28_spill] sm:$0xff]  ;;  %v14717_v4 = vld [vmem:[#allocation30_spill] sm:$0xff]  ;;  %v14720_v8 = vld [vmem:[#allocation51_spill] sm:$0xff] }
 0x384   : > { %v11687_v14 = vadd.f32 %v3958_v47, %v3907_v56  ;;  %8119 = vrcp.f32 %v3405_v20  ;;  %v11692_v2 = vadd.f32 %v3800_v36, %v3759_v53  ;;  %v4920_v19 = vadd.f32 %v14713_v21, %v4919_v41  ;;  %v14718_v42 = vld [vmem:[#allocation48_spill] sm:$0xff] }
 0x385   : > { %v3416_v61 = vrot.slane %v3415_v1, 1  ;;  %v3924_v63 = vrot.slane %v3923_v12, 2  ;;  %v3936_v9 = vrot.slane %v3935_v51, 2  ;;  %v11695_v37 = vadd.f32 %v3970_v10, %v3909_v44  ;;  %v14719_v44 = vld [vmem:[#allocation50_spill] sm:$0xff] }
 0x386   : > { %14712 = vst [vmem:[#allocation127_spill] sm:$0xff] %v11687_v14  ;;  %14714 = vst [vmem:[#allocation26_spill] sm:$0xff] %v11692_v2  ;;  %v4931_v47 = vrot.slane %v14716_v24, 4  ;;  %v4943_v5 = vrot.slane %v14717_v4, 4  ;;  %v3948_v32 = vrot.slane %v3947_v18, 2  ;;  %v4921_v56 = vrot.slane %v4920_v19, 2 }
 0x387   : > { %v3417_v50 = vadd.f32 %v3416_v61, %v3415_v1  ;;  %14715 = vst [vmem:[#allocation128_spill] sm:$0xff] %v11695_v37  ;;  %v4955_v13 = vrot.slane %v14718_v42, 4  ;;  %v11701_v20 = vadd.f32 %v3924_v63, %v3923_v12  ;;  %v11703_v36 = vadd.f32 %v3936_v9, %v3935_v51  ;;  %v14721_v14 = vld [vmem:[#allocation53_spill] sm:$0xff]  ;;  %v14722_v51 = vld [vmem:[#allocation55_spill] sm:$0xff] }
 0x388   : > { %v4932_v53 = vadd.f32 %v14716_v24, %v4931_v47  ;;  %v4944_v1 = vadd.f32 %v14717_v4, %v4943_v5  ;;  %v4922_v10 = vadd.f32 %v4921_v56, %v4920_v19  ;;  %v4967_v41 = vrot.slane %v14719_v44, 4 }
 0x389   : > { %8121 = vrcp.f32 %v3417_v50  ;;  %v4956_v61 = vadd.f32 %v14718_v42, %v4955_v13  ;;  %v4925_v37 = vrot.slane %v14720_v8, 4  ;;  %v4937_v49 = vrot.slane %v14721_v14, 4 }
 0x38a   : > { %v4933_v22 = vrot.slane %v4932_v53, 2  ;;  %v4945_v35 = vrot.slane %v4944_v1, 2  ;;  %v4923_v12 = vrot.slane %v4922_v10, 1  ;;  %v4968_v9 = vadd.f32 %v14719_v44, %v4967_v41 }
 0x38b   : > { %v4957_v63 = vrot.slane %v4956_v61, 2  ;;  %v4949_v47 = vrot.slane %v14722_v51, 4  ;;  %v4926_v19 = vadd.f32 %v14720_v8, %v4925_v37  ;;  %v4938_v50 = vadd.f32 %v14721_v14, %v4937_v49 }
 0x38c   : > { %v4934_v2 = vadd.f32 %v4933_v22, %v4932_v53  ;;  %v4946_v5 = vadd.f32 %v4945_v35, %v4944_v1  ;;  %v4924_v56 = vadd.f32 %v4923_v12, %v4922_v10  ;;  %v4969_v6 = vrot.slane %v4968_v9, 2 }
 0x38d   : > { %v4958_v13 = vadd.f32 %v4957_v63, %v4956_v61  ;;  %v4950_v55 = vadd.f32 %v14722_v51, %v4949_v47  ;;  %v4927_v33 = vrot.slane %v4926_v19, 2  ;;  %v4939_v52 = vrot.slane %v4938_v50, 2  ;;  %v14723_v61 = vld [vmem:[#allocation56_spill] sm:$0xff] }
 0x38e   : > { %v4935_v7 = vrot.slane %v4934_v2, 1  ;;  %v4947_v58 = vrot.slane %v4946_v5, 1  ;;  %v4970_v48 = vadd.f32 %v4969_v6, %v4968_v9  ;;  %8123 = vrcp.f32 %v4924_v56 }
 0x38f   : > { %v4959_v11 = vrot.slane %v4958_v13, 1  ;;  %v4951_v41 = vrot.slane %v4950_v55, 2  ;;  %v4928_v35 = vadd.f32 %v4927_v33, %v4926_v19  ;;  %v4940_v53 = vadd.f32 %v4939_v52, %v4938_v50  ;;  %v14727_v50 = vld [vmem:[#allocation117_spill] sm:$0xff] }
 0x390   : > { %v4936_v3 = vadd.f32 %v4935_v7, %v4934_v2  ;;  %v4948_v22 = vadd.f32 %v4947_v58, %v4946_v5  ;;  %v4971_v49 = vrot.slane %v4970_v48, 1  ;;  %v4961_v12 = vrot.slane %v14723_v61, 4 }
 0x391   : > { %v8120_v37 = vpop.eup %8119  ;;  %v4960_v1 = vadd.f32 %v4959_v11, %v4958_v13  ;;  %v4952_v10 = vadd.f32 %v4951_v41, %v4950_v55  ;;  %v11717_v63 = vadd.f32 %v3948_v32, %v3947_v18  ;;  %v4929_v47 = vrot.slane %v4928_v35, 1  ;;  %v14725_v55 = vld [vmem:[#allocation58_spill] sm:$0xff]  ;;  %v14726_v32 = vld [vmem:[#allocation116_spill] sm:$0xff] }
 0x392   : > { %8125 = vrcp.f32 %v4936_v3  ;;  %v4941_v15 = vrot.slane %v4940_v53, 1  ;;  %v4972_v54 = vadd.f32 %v4971_v49, %v4970_v48  ;;  %v4962_v9 = vadd.f32 %v14723_v61, %v4961_v12  ;;  %v14729_v13 = vld [vmem:[#allocation16_spill] sm:$0xff] }
 0x393   : > { %14724 = vst [vmem:[#allocation28_spill] sm:$0xff] %v11717_v63  ;;  %8127 = vrcp.f32 %v4948_v22  ;;  %v4953_v6 = vrot.slane %v4952_v10, 1  ;;  %v11721_v58 = vmul.f32 %v8120_v37, %v14691_v26  ;;  %v4930_v52 = vadd.f32 %v4929_v47, %v4928_v35 }
 0x394   : > { %8129 = vrcp.f32 %v4960_v1  ;;  %v4942_v11 = vadd.f32 %v4941_v15, %v4940_v53  ;;  %v4963_v7 = vrot.slane %v4962_v9, 2  ;;  %v4973_v18 = vrot.slane %v14725_v55, 4 }
 0x395   : > { %8131 = vrcp.f32 %v4972_v54  ;;  %v4954_v33 = vadd.f32 %v4953_v6, %v4952_v10  ;;  %v1802_v5 = vrot.slane %v14726_v32, 4  ;;  %v1814_v56 = vrot.slane %v14727_v50, 4 }
 0x396   : > { %v8122_v2 = vpop.eup %8121  ;;  %8133 = vrcp.f32 %v4930_v52  ;;  %v4964_v19 = vadd.f32 %v4963_v7, %v4962_v9  ;;  %v4974_v26 = vadd.f32 %v14725_v55, %v4973_v18  ;;  %v11731_v54 = vmul.f32 %v11721_v58, %v11662_v60 }
 0x397   : > { %8135 = vrcp.f32 %v4942_v11  ;;  %v1803_v15 = vadd.f32 %v14726_v32, %v1802_v5  ;;  %v1826_v41 = vrot.slane %v14729_v13, 4  ;;  %v11736_v22 = vmul.f32 %v8122_v2, %v14696_v45 }
 0x398   : > { %14728 = vst [vmem:[#allocation30_spill] sm:$0xff] %v11731_v54  ;;  %8137 = vrcp.f32 %v4954_v33  ;;  %v4965_v35 = vrot.slane %v4964_v19, 1  ;;  %v4975_v53 = vrot.slane %v4974_v26, 2  ;;  %v1815_v37 = vadd.f32 %v14727_v50, %v1814_v56 }
 0x399   : > { %v1804_v1 = vrot.slane %v1803_v15, 2  ;;  %v1827_v49 = vadd.f32 %v14729_v13, %v1826_v41  ;;  %v1888_v10 = vrot.slane %v11336_v23, 2  ;;  %v1900_v12 = vrot.slane %v11338_v46, 2 }
 0x39a   : > { %v4966_v47 = vadd.f32 %v4965_v35, %v4964_v19  ;;  %v4976_v6 = vadd.f32 %v4975_v53, %v4974_v26  ;;  %v1816_v9 = vrot.slane %v1815_v37, 2  ;;  %v14730_v52 = vrot.slane %v11307_v34, 4  ;;  %v11751_v26 = vpop.f32.mrf.mxu1 }
 0x39b   : > { %v8124_v45 = vpop.eup %8123  ;;  %v1805_v33 = vadd.f32 %v1804_v1, %v1803_v15  ;;  %v1828_v7 = vrot.slane %v1827_v49, 2  ;;  %v1889_v18 = vadd.f32 %v1888_v10, %v11336_v23  ;;  %v1901_v2 = vadd.f32 %v1900_v12, %v11338_v46  ;;  %14731 = vst [vmem:[#allocation48_spill] sm:$0xff] %v11751_v26 }
 0x39c   : > { %v1911_v11 = vadd.f32 %v14730_v52, %v11307_v34  ;;  %v11748_v5 = vmul.f32 %v8124_v45, %v14713_v21  ;;  %v4977_v56 = vrot.slane %v4976_v6, 1  ;;  %8139 = vrcp.f32 %v4966_v47 }
 0x39d   : > { %v1817_v41 = vadd.f32 %v1816_v9, %v1815_v37  ;;  %v1806_v35 = vrot.slane %v1805_v33, 1  ;;  %v1829_v53 = vadd.f32 %v1828_v7, %v1827_v49  ;;  %v1890_v34 = vrot.slane %v1889_v18, 1 }
 0x39e   : > { %v5047_v15 = vmul.f32 %v11748_v5, %v11751_v26  ;;  %v4978_v23 = vadd.f32 %v4977_v56, %v4976_v6  ;;  %v1902_v46 = vrot.slane %v1901_v2, 1  ;;  %v1912_v47 = vrot.slane %v1911_v11, 2 }
 0x39f   : > { %v8126_v52 = vpop.eup %8125  ;;  %v1818_v1 = vrot.slane %v1817_v41, 1  ;;  %v1807_v12 = vadd.f32 %v1806_v35, %v1805_v33  ;;  %v1830_v37 = vrot.slane %v1829_v53, 1 }
 0x3a0   : > { %v8128_v10 = vpop.eup %8127  ;;  %v11756_v21 = vmul.f32 %v8126_v52, %v14716_v24  ;;  %v5063_v49 = vrot.slane %v5047_v15, 4  ;;  %8141 = vrcp.f32 %v4978_v23 }
 0x3a1   : > { %v8130_v9 = vpop.eup %8129  ;;  %v11759_v45 = vmul.f32 %v8128_v10, %v14717_v4  ;;  %v1819_v7 = vadd.f32 %v1818_v1, %v1817_v41  ;;  %v1831_v56 = vadd.f32 %v1830_v37, %v1829_v53  ;;  %8143 = vrcp.f32 %v1807_v12 }
 0x3a2   : > { %v8132_v19 = vpop.eup %8131  ;;  %v11762_v48 = vmul.f32 %v8130_v9, %v14718_v42  ;;  %v5049_v6 = vmul.f32 %v11756_v21, %v11751_v26  ;;  %v11771_v35 = vadd.f32 %v5063_v49, %v5047_v15  ;;  %v11775_v42 = vmul.f32 %v11736_v22, %v11662_v60 }
 0x3a3   : > { %v8134_v24 = vpop.eup %8133  ;;  %v11767_v33 = vmul.f32 %v8132_v19, %v14719_v44  ;;  %v5051_v4 = vmul.f32 %v11759_v45, %v11751_v26  ;;  %8145 = vrcp.f32 %v1819_v7  ;;  %v11784_v19 = vpop.f32.mrf.mxu1  ;;  %v1878_v1 = vmul.f32 %v11364_v25, %v11228_v16 }
 0x3a4   : > { %14732 = vst [vmem:[#allocation50_spill] sm:$0xff] %v11771_v35  ;;  %v8136_v41 = vpop.eup %8135  ;;  %14733 = vst [vmem:[#allocation51_spill] sm:$0xff] %v11775_v42  ;;  %v5075_v52 = vrot.slane %v5049_v6, 4  ;;  %v11778_v23 = vmul.f32 %v8134_v24, %v14720_v8  ;;  %8147 = vrcp.f32 %v1831_v56  ;;  %v11782_v44 = vmul.f32 %v11762_v48, %v11751_v26 }
 0x3a5   : > { %v8138_v53 = vpop.eup %8137  ;;  %14735 = vst [vmem:[#allocation55_spill] sm:$0xff] %v11784_v19  ;;  %v11787_v15 = vmul.f32 %v8136_v41, %v14721_v14  ;;  %v1891_v10 = vadd.f32 %v1890_v34, %v1889_v18  ;;  %v11793_v12 = vmul.f32 %v11767_v33, %v11751_v26  ;;  %v5087_v49 = vrot.slane %v5051_v4, 4 }
 0x3a6   : > { %14734 = vst [vmem:[#allocation53_spill] sm:$0xff] %v11782_v44  ;;  %v11797_v37 = vmul.f32 %v8138_v53, %v14722_v51  ;;  %v5048_v9 = vmul.f32 %v11778_v23, %v11784_v19  ;;  %v1903_v7 = vadd.f32 %v1902_v46, %v1901_v2  ;;  %v1913_v56 = vadd.f32 %v1912_v47, %v1911_v11 }
 0x3a7   : > { %14736 = vst [vmem:[#allocation56_spill] sm:$0xff] %v11793_v12  ;;  %v5050_v14 = vmul.f32 %v11787_v15, %v11784_v19  ;;  %v11803_v25 = vadd.f32 %v5075_v52, %v5049_v6  ;;  %v1922_v24 = vrot.slane %v11322_v38, 4  ;;  %v1934_v53 = vrot.slane %v1878_v1, 4 }
 0x3a8   : > { %v5052_v18 = vmul.f32 %v11797_v37, %v11784_v19  ;;  %v5069_v34 = vrot.slane %v5048_v9, 4  ;;  %v1914_v51 = vrot.slane %v1913_v56, 1  ;;  %v1999_v11 = vsel %vm1998_vm0, %v1903_v7, %v1891_v10 }
 0x3a9   : > { %14737 = vst [vmem:[#allocation58_spill] sm:$0xff] %v11803_v25  ;;  %v5081_v41 = vrot.slane %v5050_v14, 4  ;;  %v8140_v8 = vpop.eup %8139  ;;  %v1923_v12 = vadd.f32 %v1922_v24, %v11322_v38  ;;  %v1935_v6 = vadd.f32 %v1934_v53, %v1878_v1  ;;  %v11817_v52 = vadd.f32 %v5087_v49, %v5051_v4  ;;  %v11833_v24 = vpop.f32.mrf.mxu1 }
 0x3aa   : > { %v11808_v3 = vadd.f32 %v5069_v34, %v5048_v9  ;;  %v5093_v26 = vrot.slane %v5052_v18, 4  ;;  %v11813_v2 = vmul.f32 %v8140_v8, %v14723_v61  ;;  %v1915_v47 = vadd.f32 %v1914_v51, %v1913_v56  ;;  %14743 = vst [vmem:[#allocation131_spill] sm:$0xff] %v11833_v24 }
 0x3ab   : > { %v11815_v46 = vadd.f32 %v5081_v41, %v5050_v14  ;;  %14740 = vst [vmem:[#allocation16_spill] sm:$0xff] %v11817_v52  ;;  %v1924_v42 = vrot.slane %v1923_v12, 2  ;;  %v1936_v61 = vrot.slane %v1935_v6, 2 }
 0x3ac   : > { %14738 = vst [vmem:[#allocation116_spill] sm:$0xff] %v11808_v3  ;;  %v11823_v38 = vmul.f32 %v11813_v2, %v11784_v19  ;;  %v11827_v7 = vadd.f32 %v5093_v26, %v5052_v18  ;;  %v2001_v1 = vsel %vm2000_vm1, %v1915_v47, %v1999_v11  ;;  %v5195_v47 = vmul.f32 %v11756_v21, %v11833_v24 }
 0x3ad   : > { %14739 = vst [vmem:[#allocation117_spill] sm:$0xff] %v11815_v46  ;;  %v8142_v8 = vpop.eup %8141  ;;  %v1925_v4 = vadd.f32 %v1924_v42, %v1923_v12  ;;  %v1937_v34 = vadd.f32 %v1936_v61, %v1935_v6  ;;  %v5193_v42 = vmul.f32 %v11748_v5, %v11833_v24 }
 0x3ae   : > { %14741 = vst [vmem:[#allocation129_spill] sm:$0xff] %v11823_v38  ;;  %14742 = vst [vmem:[#allocation130_spill] sm:$0xff] %v11827_v7  ;;  %v8144_v49 = vpop.eup %8143  ;;  %v11831_v56 = vmul.f32 %v8142_v8, %v14725_v55  ;;  %v5197_v8 = vmul.f32 %v11759_v45, %v11833_v24  ;;  %v14751_v7 = vld [vmem:[#allocation25_spill] sm:$0xff] }
 0x3af   : > { %v11837_v53 = vmul.f32 %v8144_v49, %v14726_v32  ;;  %v1926_v26 = vrot.slane %v1925_v4, 1  ;;  %v1938_v11 = vrot.slane %v1937_v34, 1 }
 0x3b0   : > { %v8146_v41 = vpop.eup %8145  ;;  %v11843_v55 = vmul.f32 %v11831_v56, %v11784_v19 }
 0x3b1   : > { %v8148_v12 = vpop.eup %8147  ;;  %v11846_v18 = vmul.f32 %v8146_v41, %v14727_v50  ;;  %v1880_v32 = vmul.f32 %v11837_v53, %v11228_v16  ;;  %v1927_v61 = vadd.f32 %v1926_v26, %v1925_v4  ;;  %v1939_v51 = vadd.f32 %v1938_v11, %v1937_v34 }
 0x3b2   : > { %14744 = vst [vmem:[#allocation132_spill] sm:$0xff] %v11843_v55  ;;  %v11851_v6 = vmul.f32 %v8148_v12, %v14729_v13  ;;  %v11861_v50 = vmul.f32 %v11762_v48, %v11833_v24  ;;  %v11865_v41 = vmul.f32 %v11767_v33, %v11833_v24  ;;  %v5209_v26 = vrot.slane %v5193_v42, 4 }
 0x3b3   : > { %v1882_v49 = vmul.f32 %v11846_v18, %v11228_v16  ;;  %v1946_v12 = vrot.slane %v1880_v32, 4  ;;  %v2003_v4 = vsel %vm2002_vm2, %v1927_v61, %v2001_v1  ;;  %v5221_v34 = vrot.slane %v5195_v47, 4  ;;  %v14750_v1 = vld [vmem:[#allocation22_spill] sm:$0xff] }
 0x3b4   : > { %14745 = vst [vmem:[#allocation133_spill] sm:$0xff] %v11861_v50  ;;  %14746 = vst [vmem:[#allocation134_spill] sm:$0xff] %v11865_v41  ;;  %v1884_v13 = vmul.f32 %v11851_v6, %v11228_v16  ;;  %v2005_v10 = vsel %vm2004_vm3, %v1939_v51, %v2003_v4  ;;  %v5233_v11 = vrot.slane %v5197_v8, 4  ;;  %v11871_v19 = vadd.f32 %v5209_v26, %v5193_v42  ;;  %v14752_v41 = vld [vmem:[#allocation23_spill] sm:$0xff] }
 0x3b5   : > { %v1958_v14 = vrot.slane %v1882_v49, 4  ;;  %v1947_v35 = vadd.f32 %v1946_v12, %v1880_v32  ;;  %v11874_v16 = vadd.f32 %v5221_v34, %v5195_v47  ;;  %v1808_v61 = vrot.slane %v14750_v1, 4 }
 0x3b6   : > { %v1970_v9 = vrot.slane %v1884_v13, 4  ;;  %14747 = vst [vmem:[#allocation135_spill] sm:$0xff] %v11871_v19  ;;  %v11876_v55 = vadd.f32 %v5233_v11, %v5197_v8  ;;  %v1820_v32 = vrot.slane %v14751_v7, 4  ;;  %v1879_v34 = vmul.f32 %v11377_v30, %v11244_v40 }
 0x3b7   : > { %v1959_v24 = vadd.f32 %v1958_v14, %v1882_v49  ;;  %14748 = vst [vmem:[#allocation136_spill] sm:$0xff] %v11874_v16  ;;  %v1948_v38 = vrot.slane %v1947_v35, 2  ;;  %v1809_v26 = vadd.f32 %v14750_v1, %v1808_v61  ;;  %v1832_v14 = vrot.slane %v14752_v41, 4 }
 0x3b8   : > { %14749 = vst [vmem:[#allocation137_spill] sm:$0xff] %v11876_v55  ;;  %v1971_v51 = vadd.f32 %v1970_v9, %v1884_v13  ;;  %v1821_v8 = vadd.f32 %v14751_v7, %v1820_v32  ;;  %v1894_v4 = vrot.slane %v11354_v27, 2  ;;  %v1906_v61 = vrot.slane %v11374_v17, 2 }
 0x3b9   : > { %v1960_v12 = vrot.slane %v1959_v24, 2  ;;  %v1949_v49 = vadd.f32 %v1948_v38, %v1947_v35  ;;  %v1810_v9 = vrot.slane %v1809_v26, 2  ;;  %v1833_v13 = vadd.f32 %v14752_v41, %v1832_v14 }
 0x3ba   : > { %v1972_v47 = vrot.slane %v1971_v51, 2  ;;  %v1822_v42 = vrot.slane %v1821_v8, 2  ;;  %v1895_v38 = vadd.f32 %v1894_v4, %v11354_v27  ;;  %v1907_v30 = vadd.f32 %v1906_v61, %v11374_v17 }
 0x3bb   : > { %v1961_v11 = vadd.f32 %v1960_v12, %v1959_v24  ;;  %v1950_v50 = vrot.slane %v1949_v49, 1  ;;  %v1811_v19 = vadd.f32 %v1810_v9, %v1809_v26  ;;  %v1834_v35 = vrot.slane %v1833_v13, 2 }
 0x3bc   : > { %v1973_v55 = vadd.f32 %v1972_v47, %v1971_v51  ;;  %v1823_v3 = vadd.f32 %v1822_v42, %v1821_v8  ;;  %v1896_v44 = vrot.slane %v1895_v38, 1  ;;  %v1908_v25 = vrot.slane %v1907_v30, 1 }
 0x3bd   : > { %v1962_v16 = vrot.slane %v1961_v11, 1  ;;  %v1951_v32 = vadd.f32 %v1950_v50, %v1949_v49  ;;  %v1812_v12 = vrot.slane %v1811_v19, 1  ;;  %v1835_v14 = vadd.f32 %v1834_v35, %v1833_v13 }
 0x3be   : > { %v1974_v46 = vrot.slane %v1973_v55, 1  ;;  %v1824_v47 = vrot.slane %v1823_v3, 1  ;;  %v1897_v63 = vadd.f32 %v1896_v44, %v1895_v38  ;;  %v1909_v4 = vadd.f32 %v1908_v25, %v1907_v30 }
 0x3bf   : > { %v1963_v24 = vadd.f32 %v1962_v16, %v1961_v11  ;;  %v2007_v51 = vsel %vm2006_vm4, %v1951_v32, %v2005_v10  ;;  %v1813_v26 = vadd.f32 %v1812_v12, %v1811_v19  ;;  %v1836_v9 = vrot.slane %v1835_v14, 1 }
 0x3c0   : > { %v1975_v52 = vadd.f32 %v1974_v46, %v1973_v55  ;;  %v1825_v50 = vadd.f32 %v1824_v47, %v1823_v3  ;;  %v14753_v17 = vrot.slane %v11345_v59, 4  ;;  %v1928_v46 = vrot.slane %v11349_v0, 4  ;;  %v11899_v55 = vpop.f32.mrf.mxu1 }
 0x3c1   : > { %v2009_v54 = vsel %vm2008_vm5, %v1963_v24, %v2007_v51  ;;  %v1837_v42 = vadd.f32 %v1836_v9, %v1835_v14  ;;  %8149 = vrcp.f32 %v1813_v26  ;;  %v1940_v10 = vrot.slane %v1879_v34, 4 }
 0x3c2   : > { %v2011_v27 = vsel %vm2010_vm6, %v1975_v52, %v2009_v54  ;;  %v1917_v16 = vadd.f32 %v14753_v17, %v11345_v59  ;;  %8151 = vrcp.f32 %v1825_v50  ;;  %v2012_v44 = vsel %vm1998_vm0, %v1909_v4, %v1897_v63 }
 0x3c3   : > { %7248 = vxpose.xlu0.b32.start [1/16] %v2011_v27, 128  ;;  %v5194_v3 = vmul.f32 %v11778_v23, %v11899_v55  ;;  %8153 = vrcp.f32 %v1837_v42  ;;  %v1929_v54 = vadd.f32 %v1928_v46, %v11349_v0  ;;  %v1941_v25 = vadd.f32 %v1940_v10, %v1879_v34 }
 0x3c4   : > { %v1918_v19 = vrot.slane %v1917_v16, 2  ;;  %v5196_v59 = vmul.f32 %v11787_v15, %v11899_v55  ;;  %v5198_v49 = vmul.f32 %v11797_v37, %v11899_v55  ;;  %v11911_v8 = vmul.f32 %v11813_v2, %v11899_v55 }
 0x3c5   : > { %v11915_v63 = vmul.f32 %v11831_v56, %v11899_v55  ;;  %v1930_v11 = vrot.slane %v1929_v54, 2  ;;  %v1942_v13 = vrot.slane %v1941_v25, 2  ;;  %v5215_v61 = vrot.slane %v5194_v3, 4 }
 0x3c6   : > { %v1919_v52 = vadd.f32 %v1918_v19, %v1917_v16  ;;  %v5227_v0 = vrot.slane %v5196_v59, 4  ;;  %v5239_v35 = vrot.slane %v5198_v49, 4  ;;  %v2033_v32 = vmul.f32 %v11837_v53, %v11253_v39 }
 0x3c7   : > { %v1931_v30 = vadd.f32 %v1930_v11, %v1929_v54  ;;  %v1943_v24 = vadd.f32 %v1942_v13, %v1941_v25  ;;  %v11920_v12 = vadd.f32 %v5215_v61, %v5194_v3  ;;  %v2035_v26 = vmul.f32 %v11846_v18, %v11253_v39 }
 0x3c8   : > { %v1920_v34 = vrot.slane %v1919_v52, 1  ;;  %v11922_v14 = vadd.f32 %v5227_v0, %v5196_v59  ;;  %v11924_v47 = vadd.f32 %v5239_v35, %v5198_v49  ;;  %v2037_v9 = vmul.f32 %v11851_v6, %v11253_v39 }
 0x3c9   : > { %v1932_v27 = vrot.slane %v1931_v30, 1  ;;  %v1944_v50 = vrot.slane %v1943_v24, 1  ;;  %v14754_v42 = vrot.slane %v11334_v28, 2  ;;  %v14755_v10 = vrot.slane %v11351_v57, 2 }
 0x3ca   : > { %v1921_v51 = vadd.f32 %v1920_v34, %v1919_v52  ;;  %v2065_v3 = vrot.slane %v11357_v31, 2  ;;  %v14756_v25 = vrot.slane %v11316_v43, 4  ;;  %v2087_v52 = vrot.slane %v11387_v29, 4 }
 0x3cb   : > { %v2042_v46 = vadd.f32 %v14754_v42, %v11334_v28  ;;  %v2054_v19 = vadd.f32 %v14755_v10, %v11351_v57  ;;  %v1933_v54 = vadd.f32 %v1932_v27, %v1931_v30  ;;  %v1945_v39 = vadd.f32 %v1944_v50, %v1943_v24 }
 0x3cc   : > { %v2013_v16 = vsel %vm2000_vm1, %v1921_v51, %v2012_v44  ;;  %v2076_v59 = vadd.f32 %v14756_v25, %v11316_v43  ;;  %v2066_v11 = vadd.f32 %v2065_v3, %v11357_v31  ;;  %v2099_v13 = vrot.slane %v2033_v32, 4 }
 0x3cd   : > { %v2043_v49 = vrot.slane %v2042_v46, 1  ;;  %v2055_v44 = vrot.slane %v2054_v19, 1  ;;  %v2014_v28 = vsel %vm2002_vm2, %v1933_v54, %v2013_v16  ;;  %v2088_v57 = vadd.f32 %v2087_v52, %v11387_v29 }
 0x3ce   : > { %v2077_v61 = vrot.slane %v2076_v59, 2  ;;  %v2111_v0 = vrot.slane %v2035_v26, 4  ;;  %v8150_v34 = vpop.eup %8149  ;;  %v11948_v35 = vsel %vm2004_vm3, %v1945_v39, %v2014_v28  ;;  %v2067_v43 = vrot.slane %v2066_v11, 1 }
 0x3cf   : > { %v2044_v30 = vadd.f32 %v2043_v49, %v2042_v46  ;;  %v2056_v24 = vadd.f32 %v2055_v44, %v2054_v19  ;;  %v8152_v51 = vpop.eup %8151  ;;  %v11951_v27 = vmul.f32 %v8150_v34, %v14750_v1  ;;  %v2089_v31 = vrot.slane %v2088_v57, 2 }
 0x3d0   : > { %v2078_v50 = vadd.f32 %v2077_v61, %v2076_v59  ;;  %v2100_v42 = vadd.f32 %v2099_v13, %v2033_v32  ;;  %v8154_v10 = vpop.eup %8153  ;;  %v11954_v16 = vmul.f32 %v8152_v51, %v14751_v7  ;;  %v2068_v29 = vadd.f32 %v2067_v43, %v2066_v11 }
 0x3d1   : > { %v2112_v3 = vadd.f32 %v2111_v0, %v2035_v26  ;;  %v2123_v54 = vrot.slane %v2037_v9, 4  ;;  %v11957_v39 = vmul.f32 %v8154_v10, %v14752_v41  ;;  %v1881_v46 = vmul.f32 %v11951_v27, %v11244_v40 }
 0x3d2   : > { %v2079_v19 = vrot.slane %v2078_v50, 1  ;;  %v2090_v25 = vadd.f32 %v2089_v31, %v2088_v57  ;;  %v1883_v1 = vmul.f32 %v11954_v16, %v11244_v40  ;;  %v2101_v59 = vrot.slane %v2100_v42, 2 }
 0x3d3   : > { %v2113_v32 = vrot.slane %v2112_v3, 2  ;;  %v2124_v52 = vadd.f32 %v2123_v54, %v2037_v9  ;;  %v1885_v7 = vmul.f32 %v11957_v39, %v11244_v40  ;;  %v1952_v49 = vrot.slane %v1881_v46, 4  ;;  %v11966_v9 = vpop.f32.mrf.mxu1 }
 0x3d4   : > { %v2080_v26 = vadd.f32 %v2079_v19, %v2078_v50  ;;  %v2091_v44 = vrot.slane %v2090_v25, 1  ;;  %v1964_v11 = vrot.slane %v1883_v1, 4  ;;  %v2102_v41 = vadd.f32 %v2101_v59, %v2100_v42 }
 0x3d5   : > { %v2114_v13 = vadd.f32 %v2113_v32, %v2112_v3  ;;  %v2125_v28 = vrot.slane %v2124_v52, 2  ;;  %v1953_v61 = vadd.f32 %v1952_v49, %v1881_v46  ;;  %v1976_v0 = vrot.slane %v1885_v7, 4 }
 0x3d6   : > { %v2092_v34 = vadd.f32 %v2091_v44, %v2090_v25  ;;  %v2151_v57 = vsel %vm1998_vm0, %v2056_v24, %v2044_v30  ;;  %v1965_v43 = vadd.f32 %v1964_v11, %v1883_v1  ;;  %v2103_v51 = vrot.slane %v2102_v41, 1 }
 0x3d7   : > { %v2115_v31 = vrot.slane %v2114_v13, 1  ;;  %v2126_v10 = vadd.f32 %v2125_v28, %v2124_v52  ;;  %v1954_v54 = vrot.slane %v1953_v61, 2  ;;  %v1977_v40 = vadd.f32 %v1976_v0, %v1885_v7 }
 0x3d8   : > { %v2152_v50 = vsel %vm2000_vm1, %v2068_v29, %v2151_v57  ;;  %v5339_v42 = vmul.f32 %v11748_v5, %v11966_v9  ;;  %v1966_v3 = vrot.slane %v1965_v43, 2  ;;  %v2104_v19 = vadd.f32 %v2103_v51, %v2102_v41 }
 0x3d9   : > { %v2116_v46 = vadd.f32 %v2115_v31, %v2114_v13  ;;  %v2127_v59 = vrot.slane %v2126_v10, 1  ;;  %v1955_v25 = vadd.f32 %v1954_v54, %v1953_v61  ;;  %v1978_v32 = vrot.slane %v1977_v40, 2 }
 0x3da   : > { %v2153_v30 = vsel %vm2002_vm2, %v2080_v26, %v2152_v50  ;;  %v5341_v24 = vmul.f32 %v11756_v21, %v11966_v9  ;;  %v1967_v1 = vadd.f32 %v1966_v3, %v1965_v43  ;;  %v5343_v29 = vmul.f32 %v11759_v45, %v11966_v9 }
 0x3db   : > { %v2128_v52 = vadd.f32 %v2127_v59, %v2126_v10  ;;  %v2154_v7 = vsel %vm2004_vm3, %v2092_v34, %v2153_v30  ;;  %v1956_v49 = vrot.slane %v1955_v25, 1  ;;  %v1979_v44 = vadd.f32 %v1978_v32, %v1977_v40 }
 0x3dc   : > { %v2155_v11 = vsel %vm2006_vm4, %v2104_v19, %v2154_v7  ;;  %v11980_v41 = vmul.f32 %v11762_v48, %v11966_v9  ;;  %v1968_v13 = vrot.slane %v1967_v1, 1  ;;  %v11985_v28 = vmul.f32 %v11767_v33, %v11966_v9  ;;  %v14759_v19 = vld [vmem:[#allocation41_spill] sm:$0xff] }
 0x3dd   : > { %v2156_v26 = vsel %vm2008_vm5, %v2116_v46, %v2155_v11  ;;  %v5355_v61 = vrot.slane %v5339_v42, 4  ;;  %v1957_v0 = vadd.f32 %v1956_v49, %v1955_v25  ;;  %v1980_v34 = vrot.slane %v1979_v44, 1  ;;  %v14762_v7 = vld [vmem:[#allocation81_spill] sm:$0xff] }
 0x3de   : > { %14757 = vst [vmem:[#allocation22_spill] sm:$0xff] %v11980_v41  ;;  %14758 = vst [vmem:[#allocation25_spill] sm:$0xff] %v11985_v28  ;;  %v2157_v57 = vsel %vm2010_vm6, %v2128_v52, %v2156_v26  ;;  %v5367_v43 = vrot.slane %v5341_v24, 4  ;;  %v1969_v51 = vadd.f32 %v1968_v13, %v1967_v1  ;;  %v5379_v10 = vrot.slane %v5343_v29, 4  ;;  %v14765_v13 = vld [vmem:[#allocation82_spill] sm:$0xff] }
 0x3df   : > { %7249 = vxpose.xlu0.b32.cont [2/16] %v2157_v57, 128  ;;  %v11988_v31 = vadd.f32 %v5355_v61, %v5339_v42  ;;  %v1981_v40 = vadd.f32 %v1980_v34, %v1979_v44  ;;  %v2016_v50 = vsel %vm2006_vm4, %v1957_v0, %v11948_v35  ;;  %v2034_v46 = vmul.f32 %v11951_v27, %v14759_v19  ;;  %v14764_v44 = vld [vmem:[#allocation88_spill] sm:$0xff]  ;;  %v14767_v0 = vld [vmem:[#allocation83_spill] sm:$0xff] }
 0x3e0   : > { %v11993_v3 = vadd.f32 %v5367_v43, %v5341_v24  ;;  %v2017_v59 = vsel %vm2008_vm5, %v1969_v51, %v2016_v50  ;;  %v11999_v32 = vadd.f32 %v5379_v10, %v5343_v29  ;;  %v2036_v42 = vmul.f32 %v11954_v16, %v14759_v19 }
 0x3e1   : > { %v2018_v30 = vsel %vm2010_vm6, %v1981_v40, %v2017_v59  ;;  %v2038_v35 = vmul.f32 %v11957_v39, %v14759_v19  ;;  %v14761_v24 = vrot.slane %v11389_v62, 2  ;;  %v14763_v49 = vrot.slane %v14762_v7, 2 }
 0x3e2   : > { %14760 = vst [vmem:[#allocation23_spill] sm:$0xff] %v11999_v32  ;;  %7280 = vxpose.xlu1.b32.start [1/16] %v2018_v30, 128  ;;  %v2071_v11 = vrot.slane %v14764_v44, 2  ;;  %v14766_v26 = vrot.slane %v14765_v13, 4  ;;  %v2093_v34 = vrot.slane %v14767_v0, 4  ;;  %v2105_v43 = vrot.slane %v2034_v46, 4 }
 0x3e3   : > { %v2048_v52 = vadd.f32 %v14761_v24, %v11389_v62  ;;  %v2060_v29 = vadd.f32 %v14763_v49, %v14762_v7  ;;  %v2117_v51 = vrot.slane %v2036_v42, 4  ;;  %v2129_v10 = vrot.slane %v2038_v35, 4 }
 0x3e4   : > { %v2082_v61 = vadd.f32 %v14766_v26, %v14765_v13  ;;  %v2072_v62 = vadd.f32 %v2071_v11, %v14764_v44  ;;  %v2094_v19 = vadd.f32 %v2093_v34, %v14767_v0  ;;  %v2106_v30 = vadd.f32 %v2105_v43, %v2034_v46  ;;  %v12020_v26 = vpop.f32.mrf.mxu1 }
 0x3e5   : > { %v2049_v57 = vrot.slane %v2048_v52, 1  ;;  %v2061_v40 = vrot.slane %v2060_v29, 1  ;;  %v2118_v24 = vadd.f32 %v2117_v51, %v2036_v42  ;;  %v2130_v7 = vadd.f32 %v2129_v10, %v2038_v35  ;;  %14768 = vst [vmem:[#allocation41_spill] sm:$0xff] %v12020_v26 }
 0x3e6   : > { %v2083_v50 = vrot.slane %v2082_v61, 2  ;;  %v2073_v54 = vrot.slane %v2072_v62, 1  ;;  %v2095_v13 = vrot.slane %v2094_v19, 2  ;;  %v2107_v25 = vrot.slane %v2106_v30, 2 }
 0x3e7   : > { %v2050_v59 = vadd.f32 %v2049_v57, %v2048_v52  ;;  %v2062_v49 = vadd.f32 %v2061_v40, %v2060_v29  ;;  %v2119_v38 = vrot.slane %v2118_v24, 2  ;;  %v2131_v17 = vrot.slane %v2130_v7, 2 }
 0x3e8   : > { %v2084_v1 = vadd.f32 %v2083_v50, %v2082_v61  ;;  %v5340_v4 = vmul.f32 %v11778_v23, %v12020_v26  ;;  %v2074_v44 = vadd.f32 %v2073_v54, %v2072_v62  ;;  %v2096_v28 = vadd.f32 %v2095_v13, %v2094_v19  ;;  %v14773_v13 = vld [vmem:[#allocation43_spill] sm:$0xff] }
 0x3e9   : > { %v2158_v52 = vsel %vm1998_vm0, %v2062_v49, %v2050_v59  ;;  %v2108_v46 = vadd.f32 %v2107_v25, %v2106_v30  ;;  %v2120_v42 = vadd.f32 %v2119_v38, %v2118_v24  ;;  %v2132_v35 = vadd.f32 %v2131_v17, %v2130_v7 }
 0x3ea   : > { %v2085_v11 = vrot.slane %v2084_v1, 1  ;;  %v5342_v29 = vmul.f32 %v11787_v15, %v12020_v26  ;;  %v2097_v0 = vrot.slane %v2096_v28, 1  ;;  %v2159_v34 = vsel %vm2000_vm1, %v2074_v44, %v2158_v52 }
 0x3eb   : > { %v5344_v57 = vmul.f32 %v11797_v37, %v12020_v26  ;;  %v2109_v43 = vrot.slane %v2108_v46, 1  ;;  %v2121_v51 = vrot.slane %v2120_v42, 1  ;;  %v2133_v54 = vrot.slane %v2132_v35, 1 }
 0x3ec   : > { %v2086_v61 = vadd.f32 %v2085_v11, %v2084_v1  ;;  %v12032_v10 = vmul.f32 %v11813_v2, %v12020_v26  ;;  %v2098_v25 = vadd.f32 %v2097_v0, %v2096_v28  ;;  %v12037_v17 = vmul.f32 %v11831_v56, %v12020_v26 }
 0x3ed   : > { %v5361_v1 = vrot.slane %v5340_v4, 4  ;;  %v2110_v40 = vadd.f32 %v2109_v43, %v2108_v46  ;;  %v2122_v62 = vadd.f32 %v2121_v51, %v2120_v42  ;;  %v2134_v50 = vadd.f32 %v2133_v54, %v2132_v35  ;;  %v14777_v43 = vld [vmem:[#allocation90_spill] sm:$0xff] }
 0x3ee   : > { %14769 = vst [vmem:[#allocation81_spill] sm:$0xff] %v12032_v10  ;;  %v2160_v38 = vsel %vm2002_vm2, %v2086_v61, %v2159_v34  ;;  %14770 = vst [vmem:[#allocation88_spill] sm:$0xff] %v12037_v17  ;;  %v5373_v19 = vrot.slane %v5342_v29, 4  ;;  %v5385_v24 = vrot.slane %v5344_v57, 4  ;;  %v2179_v44 = vmul.f32 %v11837_v53, %v14773_v13  ;;  %v14775_v61 = vld [vmem:[#allocation87_spill] sm:$0xff] }
 0x3ef   : > { %v2161_v59 = vsel %vm2004_vm3, %v2098_v25, %v2160_v38  ;;  %v12040_v30 = vadd.f32 %v5361_v1, %v5340_v4  ;;  %v2181_v11 = vmul.f32 %v11846_v18, %v14773_v13  ;;  %v2183_v4 = vmul.f32 %v11851_v6, %v14773_v13  ;;  %v14779_v25 = vld [vmem:[#allocation92_spill] sm:$0xff] }
 0x3f0   : > { %v2162_v28 = vsel %vm2006_vm4, %v2110_v40, %v2161_v59  ;;  %v12044_v49 = vadd.f32 %v5373_v19, %v5342_v29  ;;  %v12052_v42 = vadd.f32 %v5385_v24, %v5344_v57  ;;  %v14776_v0 = vrot.slane %v14775_v61, 2  ;;  %v14780_v57 = vld [vmem:[#allocation84_spill] sm:$0xff] }
 0x3f1   : > { %14771 = vst [vmem:[#allocation82_spill] sm:$0xff] %v12040_v30  ;;  %v2163_v52 = vsel %vm2008_vm5, %v2122_v62, %v2162_v28  ;;  %v14778_v51 = vrot.slane %v14777_v43, 2  ;;  %v2211_v38 = vrot.slane %v14779_v25, 2  ;;  %v14781_v1 = vrot.slane %v14780_v57, 4  ;;  %v14782_v62 = vld [vmem:[#allocation85_spill] sm:$0xff] }
 0x3f2   : > { %14772 = vst [vmem:[#allocation83_spill] sm:$0xff] %v12044_v49  ;;  %14774 = vst [vmem:[#allocation43_spill] sm:$0xff] %v12052_v42  ;;  %v2164_v35 = vsel %vm2010_vm6, %v2134_v50, %v2163_v52  ;;  %v2188_v34 = vadd.f32 %v14776_v0, %v14775_v61  ;;  %v2233_v19 = vrot.slane %v14782_v62, 4  ;;  %v2245_v50 = vrot.slane %v2179_v44, 4 }
 0x3f3   : > { %v2200_v54 = vadd.f32 %v14778_v51, %v14777_v43  ;;  %7281 = vxpose.xlu1.b32.cont [2/16] %v2164_v35, 128  ;;  %v2222_v40 = vadd.f32 %v14781_v1, %v14780_v57  ;;  %v2257_v28 = vrot.slane %v2181_v11, 4  ;;  %v2269_v13 = vrot.slane %v2183_v4, 4  ;;  %v12071_v35 = vpop.f32.mrf.mxu1 }
 0x3f4   : > { %v2189_v59 = vrot.slane %v2188_v34, 1  ;;  %v2212_v52 = vadd.f32 %v2211_v38, %v14779_v25  ;;  %v2234_v0 = vadd.f32 %v2233_v19, %v14782_v62  ;;  %v2246_v43 = vadd.f32 %v2245_v50, %v2179_v44  ;;  %14783 = vst [vmem:[#allocation87_spill] sm:$0xff] %v12071_v35 }
 0x3f5   : > { %v2201_v24 = vrot.slane %v2200_v54, 1  ;;  %v2223_v61 = vrot.slane %v2222_v40, 2  ;;  %v2258_v29 = vadd.f32 %v2257_v28, %v2181_v11  ;;  %v2270_v46 = vadd.f32 %v2269_v13, %v2183_v4 }
 0x3f6   : > { %v2190_v51 = vadd.f32 %v2189_v59, %v2188_v34  ;;  %v2213_v57 = vrot.slane %v2212_v52, 1  ;;  %v2235_v17 = vrot.slane %v2234_v0, 2  ;;  %v2247_v10 = vrot.slane %v2246_v43, 2 }
 0x3f7   : > { %v2202_v7 = vadd.f32 %v2201_v24, %v2200_v54  ;;  %v2224_v1 = vadd.f32 %v2223_v61, %v2222_v40  ;;  %v2259_v42 = vrot.slane %v2258_v29, 2  ;;  %v2271_v49 = vrot.slane %v2270_v46, 2  ;;  %v14787_v61 = vld [vmem:[#allocation45_spill] sm:$0xff] }
 0x3f8   : > { %v5485_v25 = vmul.f32 %v11748_v5, %v12071_v35  ;;  %v2214_v38 = vadd.f32 %v2213_v57, %v2212_v52  ;;  %v2236_v44 = vadd.f32 %v2235_v17, %v2234_v0  ;;  %v2248_v19 = vadd.f32 %v2247_v10, %v2246_v43 }
 0x3f9   : > { %v2297_v30 = vsel %vm1998_vm0, %v2202_v7, %v2190_v51  ;;  %v2225_v62 = vrot.slane %v2224_v1, 1  ;;  %v2260_v50 = vadd.f32 %v2259_v42, %v2258_v29  ;;  %v2272_v34 = vadd.f32 %v2271_v49, %v2270_v46 }
 0x3fa   : > { %v5487_v11 = vmul.f32 %v11756_v21, %v12071_v35  ;;  %v5489_v4 = vmul.f32 %v11759_v45, %v12071_v35  ;;  %v2237_v40 = vrot.slane %v2236_v44, 1  ;;  %v2249_v59 = vrot.slane %v2248_v19, 1 }
 0x3fb   : > { %v2226_v54 = vadd.f32 %v2225_v62, %v2224_v1  ;;  %v2298_v7 = vsel %vm2000_vm1, %v2214_v38, %v2297_v30  ;;  %v2261_v24 = vrot.slane %v2260_v50, 1  ;;  %v2273_v28 = vrot.slane %v2272_v34, 1  ;;  %v14790_v62 = vld [vmem:[#allocation93_spill] sm:$0xff] }
 0x3fc   : > { %v12083_v5 = vmul.f32 %v11762_v48, %v12071_v35  ;;  %v12087_v10 = vmul.f32 %v11767_v33, %v12071_v35  ;;  %v2238_v17 = vadd.f32 %v2237_v40, %v2236_v44  ;;  %v2250_v21 = vadd.f32 %v2249_v59, %v2248_v19  ;;  %v14794_v40 = vld [vmem:[#allocation100_spill] sm:$0xff] }
 0x3fd   : > { %v2299_v49 = vsel %vm2002_vm2, %v2226_v54, %v2298_v7  ;;  %v5501_v45 = vrot.slane %v5485_v25, 4  ;;  %v2262_v46 = vadd.f32 %v2261_v24, %v2260_v50  ;;  %v2274_v42 = vadd.f32 %v2273_v28, %v2272_v34  ;;  %v14795_v24 = vld [vmem:[#allocation89_spill] sm:$0xff] }
 0x3fe   : > { %14784 = vst [vmem:[#allocation90_spill] sm:$0xff] %v12083_v5  ;;  %14785 = vst [vmem:[#allocation92_spill] sm:$0xff] %v12087_v10  ;;  %v5513_v29 = vrot.slane %v5487_v11, 4  ;;  %v5525_v13 = vrot.slane %v5489_v4, 4  ;;  %v2300_v30 = vsel %vm2004_vm3, %v2238_v17, %v2299_v49  ;;  %v2180_v0 = vmul.f32 %v11951_v27, %v14787_v61 }
 0x3ff   : > { %v12091_v52 = vadd.f32 %v5501_v45, %v5485_v25  ;;  %v2301_v33 = vsel %vm2006_vm4, %v2250_v21, %v2300_v30  ;;  %v2182_v57 = vmul.f32 %v11954_v16, %v14787_v61  ;;  %v2184_v25 = vmul.f32 %v11957_v39, %v14787_v61  ;;  %v14797_v21 = vld [vmem:[#allocation91_spill] sm:$0xff]  ;;  %v12121_v30 = vpop.f32.mrf.mxu1 }
 0x400   : > { %v12097_v43 = vadd.f32 %v5513_v29, %v5487_v11  ;;  %v12099_v51 = vadd.f32 %v5525_v13, %v5489_v4  ;;  %v2302_v1 = vsel %vm2008_vm5, %v2262_v46, %v2301_v33  ;;  %v14791_v44 = vrot.slane %v14790_v62, 2  ;;  %v14792_v11 = vld [vmem:[#allocation95_spill] sm:$0xff]  ;;  %14798 = vst [vmem:[#allocation93_spill] sm:$0xff] %v12121_v30 }
 0x401   : > { %14786 = vst [vmem:[#allocation84_spill] sm:$0xff] %v12091_v52  ;;  %v2303_v50 = vsel %vm2010_vm6, %v2274_v42, %v2302_v1  ;;  %v14793_v4 = vrot.slane %v14792_v11, 2  ;;  %v2217_v59 = vrot.slane %v14794_v40, 2  ;;  %v14796_v28 = vrot.slane %v14795_v24, 4 }
 0x402   : > { %14788 = vst [vmem:[#allocation85_spill] sm:$0xff] %v12097_v43  ;;  %14789 = vst [vmem:[#allocation45_spill] sm:$0xff] %v12099_v51  ;;  %v2194_v19 = vadd.f32 %v14791_v44, %v14790_v62  ;;  %7250 = vxpose.xlu0.b32.cont [3/16] %v2303_v50, 128  ;;  %v2239_v49 = vrot.slane %v14797_v21, 4  ;;  %v2251_v45 = vrot.slane %v2180_v0, 4  ;;  %v2263_v29 = vrot.slane %v2182_v57, 4 }
 0x403   : > { %v2206_v54 = vadd.f32 %v14793_v4, %v14792_v11  ;;  %v2228_v17 = vadd.f32 %v14796_v28, %v14795_v24  ;;  %v2218_v42 = vadd.f32 %v2217_v59, %v14794_v40  ;;  %v2275_v13 = vrot.slane %v2184_v25, 4 }
 0x404   : > { %v2195_v7 = vrot.slane %v2194_v19, 1  ;;  %v2240_v1 = vadd.f32 %v2239_v49, %v14797_v21  ;;  %v2252_v62 = vadd.f32 %v2251_v45, %v2180_v0  ;;  %v2264_v11 = vadd.f32 %v2263_v29, %v2182_v57 }
 0x405   : > { %v2207_v46 = vrot.slane %v2206_v54, 1  ;;  %v2229_v33 = vrot.slane %v2228_v17, 2  ;;  %v2219_v50 = vrot.slane %v2218_v42, 1  ;;  %v2276_v4 = vadd.f32 %v2275_v13, %v2184_v25 }
 0x406   : > { %v2196_v61 = vadd.f32 %v2195_v7, %v2194_v19  ;;  %v2241_v28 = vrot.slane %v2240_v1, 2  ;;  %v2253_v48 = vrot.slane %v2252_v62, 2  ;;  %v5486_v34 = vmul.f32 %v11778_v23, %v12121_v30 }
 0x407   : > { %v2208_v44 = vadd.f32 %v2207_v46, %v2206_v54  ;;  %v2230_v24 = vadd.f32 %v2229_v33, %v2228_v17  ;;  %v2220_v40 = vadd.f32 %v2219_v50, %v2218_v42  ;;  %v2265_v59 = vrot.slane %v2264_v11, 2  ;;  %v14803_v50 = vld [vmem:[#allocation80_spill] sm:$0xff] }
 0x408   : > { %v2277_v38 = vrot.slane %v2276_v4, 2  ;;  %v2242_v7 = vadd.f32 %v2241_v28, %v2240_v1  ;;  %v2254_v5 = vadd.f32 %v2253_v48, %v2252_v62  ;;  %v5488_v0 = vmul.f32 %v11787_v15, %v12121_v30 }
 0x409   : > { %v2304_v10 = vsel %vm1998_vm0, %v2208_v44, %v2196_v61  ;;  %v2231_v19 = vrot.slane %v2230_v24, 1  ;;  %v2266_v54 = vadd.f32 %v2265_v59, %v2264_v11  ;;  %v5490_v17 = vmul.f32 %v11797_v37, %v12121_v30  ;;  %v14805_v59 = vld [vmem:[#allocation97_spill] sm:$0xff] }
 0x40a   : > { %v2278_v57 = vadd.f32 %v2277_v38, %v2276_v4  ;;  %v2305_v25 = vsel %vm2000_vm1, %v2220_v40, %v2304_v10  ;;  %v2243_v23 = vrot.slane %v2242_v7, 1  ;;  %v2255_v49 = vrot.slane %v2254_v5, 1 }
 0x40b   : > { %v2232_v21 = vadd.f32 %v2231_v19, %v2230_v24  ;;  %v12134_v45 = vmul.f32 %v11813_v2, %v12121_v30  ;;  %v2267_v46 = vrot.slane %v2266_v54, 1  ;;  %v12138_v48 = vmul.f32 %v11831_v56, %v12121_v30 }
 0x40c   : > { %v2279_v42 = vrot.slane %v2278_v57, 1  ;;  %v5507_v15 = vrot.slane %v5486_v34, 4  ;;  %v2244_v38 = vadd.f32 %v2243_v23, %v2242_v7  ;;  %v2256_v29 = vadd.f32 %v2255_v49, %v2254_v5 }
 0x40d   : > { %14799 = vst [vmem:[#allocation95_spill] sm:$0xff] %v12134_v45  ;;  %14800 = vst [vmem:[#allocation100_spill] sm:$0xff] %v12138_v48  ;;  %v2306_v10 = vsel %vm2002_vm2, %v2232_v21, %v2305_v25  ;;  %v5519_v13 = vrot.slane %v5488_v0, 4  ;;  %v2268_v37 = vadd.f32 %v2267_v46, %v2266_v54  ;;  %v5531_v1 = vrot.slane %v5490_v17, 4  ;;  %v14809_v25 = vld [vmem:[#allocation103_spill] sm:$0xff]  ;;  %v14812_v46 = vld [vmem:[#allocation102_spill] sm:$0xff] }
 0x40e   : > { %v2280_v61 = vadd.f32 %v2279_v42, %v2278_v57  ;;  %v12141_v33 = vadd.f32 %v5507_v15, %v5486_v34  ;;  %v2307_v2 = vsel %vm2004_vm3, %v2244_v38, %v2306_v10  ;;  %v2325_v56 = vmul.f32 %v11837_v53, %v14803_v50 }
 0x40f   : > { %v12144_v62 = vadd.f32 %v5519_v13, %v5488_v0  ;;  %v2308_v11 = vsel %vm2006_vm4, %v2256_v29, %v2307_v2  ;;  %v12151_v4 = vadd.f32 %v5531_v1, %v5490_v17  ;;  %v2327_v34 = vmul.f32 %v11846_v18, %v14803_v50  ;;  %v14807_v0 = vld [vmem:[#allocation99_spill] sm:$0xff]  ;;  %v14810_v18 = vld [vmem:[#allocation96_spill] sm:$0xff] }
 0x410   : > { %14801 = vst [vmem:[#allocation89_spill] sm:$0xff] %v12141_v33  ;;  %v2309_v24 = vsel %vm2008_vm5, %v2268_v37, %v2308_v11  ;;  %v2329_v40 = vmul.f32 %v11851_v6, %v14803_v50  ;;  %v14806_v19 = vrot.slane %v14805_v59, 2  ;;  %v14808_v54 = vrot.slane %v14807_v0, 2 }
 0x411   : > { %14802 = vst [vmem:[#allocation91_spill] sm:$0xff] %v12144_v62  ;;  %14804 = vst [vmem:[#allocation80_spill] sm:$0xff] %v12151_v4  ;;  %v2310_v7 = vsel %vm2010_vm6, %v2280_v61, %v2309_v24  ;;  %v2357_v17 = vrot.slane %v14809_v25, 2  ;;  %v14811_v21 = vrot.slane %v14810_v18, 4  ;;  %v2379_v6 = vrot.slane %v14812_v46, 4 }
 0x412   : > { %v2334_v53 = vadd.f32 %v14806_v19, %v14805_v59  ;;  %v2346_v57 = vadd.f32 %v14808_v54, %v14807_v0  ;;  %7282 = vxpose.xlu1.b32.cont [3/16] %v2310_v7, 128  ;;  %v2391_v42 = vrot.slane %v2325_v56, 4  ;;  %v2403_v15 = vrot.slane %v2327_v34, 4  ;;  %v14813_v54 = vld [vmem:[#allocation66_spill] sm:$0xff] }
 0x413   : > { %v2368_v23 = vadd.f32 %v14811_v21, %v14810_v18  ;;  %v2358_v29 = vadd.f32 %v2357_v17, %v14809_v25  ;;  %v2415_v13 = vrot.slane %v2329_v40, 4  ;;  %v2380_v61 = vadd.f32 %v2379_v6, %v14812_v46 }
 0x414   : > { %v2335_v49 = vrot.slane %v2334_v53, 1  ;;  %v2347_v38 = vrot.slane %v2346_v57, 1  ;;  %v2392_v1 = vadd.f32 %v2391_v42, %v2325_v56  ;;  %v2404_v2 = vadd.f32 %v2403_v15, %v2327_v34 }
 0x415   : > { %v2369_v10 = vrot.slane %v2368_v23, 2  ;;  %v2359_v11 = vrot.slane %v2358_v29, 1  ;;  %v2416_v59 = vadd.f32 %v2415_v13, %v2329_v40  ;;  %v2381_v19 = vrot.slane %v2380_v61, 2  ;;  %v14814_v40 = vld [vmem:[#allocation68_spill] sm:$0xff] }
 0x416   : > { %v2336_v37 = vadd.f32 %v2335_v49, %v2334_v53  ;;  %v2348_v50 = vadd.f32 %v2347_v38, %v2346_v57  ;;  %v2393_v7 = vrot.slane %v2392_v1, 2  ;;  %v2405_v0 = vrot.slane %v2404_v2, 2 }
 0x417   : > { %v2370_v24 = vadd.f32 %v2369_v10, %v2368_v23  ;;  %v6504_v18 = vrot.slane %v14813_v54, 4  ;;  %v2360_v21 = vadd.f32 %v2359_v11, %v2358_v29  ;;  %v2417_v28 = vrot.slane %v2416_v59, 2 }
 0x418   : > { %v2443_v25 = vsel %vm1998_vm0, %v2348_v50, %v2336_v37  ;;  %v2382_v17 = vadd.f32 %v2381_v19, %v2380_v61  ;;  %v2394_v53 = vadd.f32 %v2393_v7, %v2392_v1  ;;  %v2406_v49 = vadd.f32 %v2405_v0, %v2404_v2  ;;  %v14815_v37 = vld [vmem:[#allocation70_spill] sm:$0xff] }
 0x419   : > { %v2371_v44 = vrot.slane %v2370_v24, 1  ;;  %v6505_v56 = vadd.f32 %v14813_v54, %v6504_v18  ;;  %v2418_v57 = vadd.f32 %v2417_v28, %v2416_v59  ;;  %v2444_v23 = vsel %vm2000_vm1, %v2360_v21, %v2443_v25  ;;  %v14816_v59 = vld [vmem:[#allocation65_spill] sm:$0xff]  ;;  %v14817_v18 = vld [vmem:[#allocation67_spill] sm:$0xff]  ;;  %v14818_v25 = vld [vmem:[#allocation86_spill] sm:$0xff] }
 0x41a   : > { %v6516_v46 = vrot.slane %v14814_v40, 4  ;;  %v2383_v6 = vrot.slane %v2382_v17, 1  ;;  %v2395_v42 = vrot.slane %v2394_v53, 1  ;;  %v2407_v15 = vrot.slane %v2406_v49, 1 }
 0x41b   : > { %v2372_v34 = vadd.f32 %v2371_v44, %v2370_v24  ;;  %v6506_v38 = vrot.slane %v6505_v56, 2  ;;  %v2419_v29 = vrot.slane %v2418_v57, 1  ;;  %v6528_v61 = vrot.slane %v14815_v37, 4 }
 0x41c   : > { %v6517_v13 = vadd.f32 %v14814_v40, %v6516_v46  ;;  %v2384_v1 = vadd.f32 %v2383_v6, %v2382_v17  ;;  %v2396_v2 = vadd.f32 %v2395_v42, %v2394_v53  ;;  %v2408_v50 = vadd.f32 %v2407_v15, %v2406_v49 }
 0x41d   : > { %v2445_v10 = vsel %vm2002_vm2, %v2372_v34, %v2444_v23  ;;  %v6507_v44 = vadd.f32 %v6506_v38, %v6505_v56  ;;  %v2420_v28 = vadd.f32 %v2419_v29, %v2418_v57  ;;  %v6529_v24 = vadd.f32 %v14815_v37, %v6528_v61 }
 0x41e   : > { %v6518_v11 = vrot.slane %v6517_v13, 2  ;;  %v6540_v19 = vrot.slane %v14816_v59, 4  ;;  %v2446_v7 = vsel %vm2004_vm3, %v2384_v1, %v2445_v10  ;;  %v6552_v21 = vrot.slane %v14817_v18, 4 }
 0x41f   : > { %v6508_v0 = vrot.slane %v6507_v44, 1  ;;  %v2326_v34 = vmul.f32 %v11951_v27, %v14818_v25  ;;  %v2447_v23 = vsel %vm2006_vm4, %v2396_v2, %v2446_v7  ;;  %v6530_v53 = vrot.slane %v6529_v24, 2  ;;  %v14823_v7 = vld [vmem:[#allocation109_spill] sm:$0xff] }
 0x420   : > { %v6519_v17 = vadd.f32 %v6518_v11, %v6517_v13  ;;  %v6541_v49 = vadd.f32 %v14816_v59, %v6540_v19  ;;  %v2448_v56 = vsel %vm2008_vm5, %v2408_v50, %v2447_v23  ;;  %v6553_v46 = vadd.f32 %v14817_v18, %v6552_v21  ;;  %v14819_v13 = vld [vmem:[#allocation108_spill] sm:$0xff]  ;;  %v14821_v11 = vld [vmem:[#allocation110_spill] sm:$0xff]  ;;  %v14824_v21 = vld [vmem:[#allocation101_spill] sm:$0xff] }
 0x421   : > { %v6509_v57 = vadd.f32 %v6508_v0, %v6507_v44  ;;  %v2328_v6 = vmul.f32 %v11954_v16, %v14818_v25  ;;  %v2449_v42 = vsel %vm2010_vm6, %v2420_v28, %v2448_v56  ;;  %v6531_v38 = vadd.f32 %v6530_v53, %v6529_v24 }
 0x422   : > { %v6520_v15 = vrot.slane %v6519_v17, 1  ;;  %v6542_v29 = vrot.slane %v6541_v49, 2  ;;  %7251 = vxpose.xlu0.b32.cont [4/16] %v2449_v42, 128  ;;  %v6554_v27 = vrot.slane %v6553_v46, 2  ;;  %v2330_v10 = vmul.f32 %v11957_v39, %v14818_v25 }
 0x423   : > { %8155 = vrcp.f32 %v6509_v57  ;;  %v14820_v61 = vrot.slane %v14819_v13, 2  ;;  %v6532_v50 = vrot.slane %v6531_v38, 1  ;;  %v14822_v16 = vrot.slane %v14821_v11, 2 }
 0x424   : > { %v6521_v2 = vadd.f32 %v6520_v15, %v6519_v17  ;;  %v6543_v44 = vadd.f32 %v6542_v29, %v6541_v49  ;;  %v6555_v19 = vadd.f32 %v6554_v27, %v6553_v46  ;;  %v2363_v0 = vrot.slane %v14823_v7, 2  ;;  %v14826_v46 = vld [vmem:[#allocation106_spill] sm:$0xff] }
 0x425   : > { %v2340_v1 = vadd.f32 %v14820_v61, %v14819_v13  ;;  %v2352_v28 = vadd.f32 %v14822_v16, %v14821_v11  ;;  %v14825_v23 = vrot.slane %v14824_v21, 4  ;;  %v6533_v39 = vadd.f32 %v6532_v50, %v6531_v38 }
 0x426   : > { %v6544_v25 = vrot.slane %v6543_v44, 1  ;;  %8157 = vrcp.f32 %v6521_v2  ;;  %v6556_v57 = vrot.slane %v6555_v19, 1  ;;  %v2364_v49 = vadd.f32 %v2363_v0, %v14823_v7 }
 0x427   : > { %v2341_v24 = vrot.slane %v2340_v1, 1  ;;  %v2374_v53 = vadd.f32 %v14825_v23, %v14824_v21  ;;  %v2353_v56 = vrot.slane %v2352_v28, 1  ;;  %8159 = vrcp.f32 %v6533_v39 }
 0x428   : > { %v6545_v15 = vadd.f32 %v6544_v25, %v6543_v44  ;;  %v2385_v27 = vrot.slane %v14826_v46, 4  ;;  %v6557_v13 = vadd.f32 %v6556_v57, %v6555_v19  ;;  %v2365_v61 = vrot.slane %v2364_v49, 1 }
 0x429   : > { %v2342_v17 = vadd.f32 %v2341_v24, %v2340_v1  ;;  %v2375_v42 = vrot.slane %v2374_v53, 2  ;;  %v2354_v29 = vadd.f32 %v2353_v56, %v2352_v28  ;;  %v2397_v16 = vrot.slane %v2326_v34, 4 }
 0x42a   : > { %8161 = vrcp.f32 %v6545_v15  ;;  %v2386_v38 = vadd.f32 %v2385_v27, %v14826_v46  ;;  %v2409_v50 = vrot.slane %v2328_v6, 4  ;;  %v2421_v2 = vrot.slane %v2330_v10, 4  ;;  %v14828_v15 = vld [vmem:[#allocation76_spill] sm:$0xff] }
 0x42b   : > { %v2376_v11 = vadd.f32 %v2375_v42, %v2374_v53  ;;  %8163 = vrcp.f32 %v6557_v13  ;;  %v2366_v21 = vadd.f32 %v2365_v61, %v2364_v49  ;;  %v2398_v24 = vadd.f32 %v2397_v16, %v2326_v34  ;;  %v14827_v53 = vld [vmem:[#allocation74_spill] sm:$0xff] }
 0x42c   : > { %v2387_v7 = vrot.slane %v2386_v38, 2  ;;  %v2410_v0 = vadd.f32 %v2409_v50, %v2328_v6  ;;  %v2422_v44 = vadd.f32 %v2421_v2, %v2330_v10  ;;  %v2450_v28 = vsel %vm1998_vm0, %v2354_v29, %v2342_v17  ;;  %v14829_v6 = vld [vmem:[#allocation78_spill] sm:$0xff] }
 0x42d   : > { %v2377_v1 = vrot.slane %v2376_v11, 1  ;;  %v2399_v39 = vrot.slane %v2398_v24, 2  ;;  %v2451_v19 = vsel %vm2000_vm1, %v2366_v21, %v2450_v28  ;;  %v6510_v25 = vrot.slane %v14827_v53, 4  ;;  %v12221_v21 = vpop.f32.mrf.mxu1 }
 0x42e   : > { %v2388_v56 = vadd.f32 %v2387_v7, %v2386_v38  ;;  %v2411_v57 = vrot.slane %v2410_v0, 2  ;;  %v2423_v42 = vrot.slane %v2422_v44, 2  ;;  %v6522_v46 = vrot.slane %v14828_v15, 4  ;;  %14830 = vst [vmem:[#allocation97_spill] sm:$0xff] %v12221_v21 }
 0x42f   : > { %v2378_v23 = vadd.f32 %v2377_v1, %v2376_v11  ;;  %v2400_v27 = vadd.f32 %v2399_v39, %v2398_v24  ;;  %v6511_v34 = vadd.f32 %v14827_v53, %v6510_v25  ;;  %v6534_v10 = vrot.slane %v14829_v6, 4 }
 0x430   : > { %v8156_v13 = vpop.eup %8155  ;;  %v2389_v17 = vrot.slane %v2388_v56, 1  ;;  %v2412_v29 = vadd.f32 %v2411_v57, %v2410_v0  ;;  %v2424_v61 = vadd.f32 %v2423_v42, %v2422_v44  ;;  %v6523_v11 = vadd.f32 %v14828_v15, %v6522_v46 }
 0x431   : > { %v2452_v49 = vsel %vm2002_vm2, %v2378_v23, %v2451_v19  ;;  %v12218_v16 = vmul.f32 %v8156_v13, %v14813_v54  ;;  %v2401_v38 = vrot.slane %v2400_v27, 1  ;;  %v6512_v50 = vrot.slane %v6511_v34, 2 }
 0x432   : > { %v6535_v2 = vadd.f32 %v14829_v6, %v6534_v10  ;;  %v2390_v1 = vadd.f32 %v2389_v17, %v2388_v56  ;;  %v2413_v24 = vrot.slane %v2412_v29, 1  ;;  %v2425_v7 = vrot.slane %v2424_v61, 1 }
 0x433   : > { %v6524_v28 = vrot.slane %v6523_v11, 2  ;;  %v8158_v23 = vpop.eup %8157  ;;  %v6632_v0 = vmul.f32 %v12218_v16, %v12221_v21  ;;  %v2402_v44 = vadd.f32 %v2401_v38, %v2400_v27  ;;  %v6513_v39 = vadd.f32 %v6512_v50, %v6511_v34 }
 0x434   : > { %v6536_v19 = vrot.slane %v6535_v2, 2  ;;  %v12226_v54 = vmul.f32 %v8158_v23, %v14814_v40  ;;  %v2414_v25 = vadd.f32 %v2413_v24, %v2412_v29  ;;  %v2426_v57 = vadd.f32 %v2425_v7, %v2424_v61  ;;  %v8160_v46 = vpop.eup %8159 }
 0x435   : > { %v2453_v42 = vsel %vm2004_vm3, %v2390_v1, %v2452_v49  ;;  %v6648_v10 = vrot.slane %v6632_v0, 4  ;;  %v6514_v13 = vrot.slane %v6513_v39, 1  ;;  %v6525_v17 = vadd.f32 %v6524_v28, %v6523_v11 }
 0x436   : > { %v2454_v56 = vsel %vm2006_vm4, %v2402_v44, %v2453_v42  ;;  %v12231_v5 = vmul.f32 %v8160_v46, %v14815_v37  ;;  %v6634_v27 = vmul.f32 %v12226_v54, %v12221_v21  ;;  %v6537_v40 = vadd.f32 %v6536_v19, %v6535_v2  ;;  %v14836_v42 = vld [vmem:[#allocation75_spill] sm:$0xff] }
 0x437   : > { %v2455_v34 = vsel %vm2008_vm5, %v2414_v25, %v2454_v56  ;;  %v8162_v38 = vpop.eup %8161  ;;  %v12236_v29 = vadd.f32 %v6648_v10, %v6632_v0  ;;  %v6515_v61 = vadd.f32 %v6514_v13, %v6513_v39  ;;  %v6526_v50 = vrot.slane %v6525_v17, 1  ;;  %v14832_v0 = vld [vmem:[#allocation73_spill] sm:$0xff] }
 0x438   : > { %v2456_v49 = vsel %vm2010_vm6, %v2426_v57, %v2455_v34  ;;  %v8164_v1 = vpop.eup %8163  ;;  %v12240_v24 = vmul.f32 %v8162_v38, %v14816_v59  ;;  %v6636_v37 = vmul.f32 %v12231_v5, %v12221_v21  ;;  %v6660_v11 = vrot.slane %v6634_v27, 4  ;;  %v14838_v34 = vld [vmem:[#allocation36_spill] sm:$0xff]  ;;  %v14839_v38 = vld [vmem:[#allocation38_spill] sm:$0xff] }
 0x439   : > { %14831 = vst [vmem:[#allocation99_spill] sm:$0xff] %v12236_v29  ;;  %7283 = vxpose.xlu1.b32.cont [4/16] %v2456_v49, 128  ;;  %v6538_v7 = vrot.slane %v6537_v40, 1  ;;  %v12245_v28 = vmul.f32 %v8164_v1, %v14817_v18  ;;  %v6527_v23 = vadd.f32 %v6526_v50, %v6525_v17  ;;  %v6546_v44 = vrot.slane %v14832_v0, 4  ;;  %v14840_v50 = vld [vmem:[#allocation33_spill] sm:$0xff] }
 0x43a   : > { %v12251_v39 = vmul.f32 %v12240_v24, %v12221_v21  ;;  %v12253_v59 = vadd.f32 %v6660_v11, %v6634_v27  ;;  %v6672_v19 = vrot.slane %v6636_v37, 4  ;;  %v6558_v46 = vrot.slane %v14836_v42, 4  ;;  %v14841_v11 = vld [vmem:[#allocation111_spill] sm:$0xff] }
 0x43b   : > { %v6539_v25 = vadd.f32 %v6538_v7, %v6537_v40  ;;  %v12257_v57 = vmul.f32 %v12245_v28, %v12221_v21  ;;  %v6547_v18 = vadd.f32 %v14832_v0, %v6546_v44  ;;  %8165 = vrcp.f32 %v6515_v61  ;;  %v14843_v44 = vld [vmem:[#allocation57_spill] sm:$0xff] }
 0x43c   : > { %14833 = vst [vmem:[#allocation103_spill] sm:$0xff] %v12251_v39  ;;  %14834 = vst [vmem:[#allocation96_spill] sm:$0xff] %v12253_v59  ;;  %v12262_v56 = vadd.f32 %v6672_v19, %v6636_v37  ;;  %8167 = vrcp.f32 %v6527_v23  ;;  %v6559_v27 = vadd.f32 %v14836_v42, %v6558_v46  ;;  %v3394_v40 = vrot.slane %v14838_v34, 4  ;;  %v14845_v46 = vld [vmem:[#allocation17_spill] sm:$0xff] }
 0x43d   : > { %14835 = vst [vmem:[#allocation102_spill] sm:$0xff] %v12257_v57  ;;  %v6548_v17 = vrot.slane %v6547_v18, 2  ;;  %8169 = vrcp.f32 %v6539_v25  ;;  %v3406_v49 = vrot.slane %v14839_v38, 4  ;;  %v3418_v1 = vrot.slane %v14840_v50, 4 }
 0x43e   : > { %14837 = vst [vmem:[#allocation66_spill] sm:$0xff] %v12262_v56  ;;  %v14842_v61 = vrot.slane %v14841_v11, 2  ;;  %v14844_v37 = vrot.slane %v14843_v44, 2  ;;  %v6560_v23 = vrot.slane %v6559_v27, 2  ;;  %v3395_v10 = vadd.f32 %v14838_v34, %v3394_v40 }
 0x43f   : > { %v6549_v13 = vadd.f32 %v6548_v17, %v6547_v18  ;;  %v3504_v25 = vrot.slane %v14845_v46, 2  ;;  %v3407_v2 = vadd.f32 %v14839_v38, %v3406_v49  ;;  %v3419_v21 = vadd.f32 %v14840_v50, %v3418_v1  ;;  %v14847_v1 = vld [vmem:[#allocation15_spill] sm:$0xff] }
 0x440   : > { %v3481_v7 = vadd.f32 %v14842_v61, %v14841_v11  ;;  %v3493_v19 = vadd.f32 %v14844_v37, %v14843_v44  ;;  %v6561_v59 = vadd.f32 %v6560_v23, %v6559_v27  ;;  %v3396_v29 = vrot.slane %v3395_v10, 2  ;;  %v12280_v61 = vpop.f32.mrf.mxu1  ;;  %v14849_v27 = vld [vmem:[#allocation24_spill] sm:$0xff] }
 0x441   : > { %v6550_v56 = vrot.slane %v6549_v13, 1  ;;  %v3505_v11 = vadd.f32 %v3504_v25, %v14845_v46  ;;  %14846 = vst [vmem:[#allocation68_spill] sm:$0xff] %v12280_v61  ;;  %v3408_v44 = vrot.slane %v3407_v2, 2  ;;  %v3420_v18 = vrot.slane %v3419_v21, 2 }
 0x442   : > { %v3482_v57 = vrot.slane %v3481_v7, 1  ;;  %v3494_v39 = vrot.slane %v3493_v19, 1  ;;  %v6562_v48 = vrot.slane %v6561_v59, 1  ;;  %v3397_v45 = vadd.f32 %v3396_v29, %v3395_v10 }
 0x443   : > { %v6551_v40 = vadd.f32 %v6550_v56, %v6549_v13  ;;  %v3506_v4 = vrot.slane %v3505_v11, 1  ;;  %v3409_v49 = vadd.f32 %v3408_v44, %v3407_v2  ;;  %v3421_v62 = vadd.f32 %v3420_v18, %v3419_v21  ;;  %v12287_v56 = vpop.f32.mrf.mxu1 }
 0x444   : > { %v3483_v17 = vadd.f32 %v3482_v57, %v3481_v7  ;;  %v3495_v37 = vadd.f32 %v3494_v39, %v3493_v19  ;;  %v14848_v33 = vrot.slane %v14847_v1, 4  ;;  %v3526_v23 = vrot.slane %v14849_v27, 4  ;;  %14850 = vst [vmem:[#allocation70_spill] sm:$0xff] %v12287_v56 }
 0x445   : > { %v6563_v51 = vadd.f32 %v6562_v48, %v6561_v59  ;;  %8171 = vrcp.f32 %v6551_v40  ;;  %v3398_v46 = vrot.slane %v3397_v45, 1  ;;  %v3507_v25 = vadd.f32 %v3506_v4, %v3505_v11 }
 0x446   : > { %v3515_v30 = vadd.f32 %v14848_v33, %v14847_v1  ;;  %v3410_v43 = vrot.slane %v3409_v49, 1  ;;  %v3422_v52 = vrot.slane %v3421_v62, 1  ;;  %v3527_v39 = vadd.f32 %v3526_v23, %v14849_v27 }
 0x447   : > { %8173 = vrcp.f32 %v6563_v51  ;;  %v3399_v29 = vadd.f32 %v3398_v46, %v3397_v45  ;;  %v3590_v21 = vsel %vm1998_vm0, %v3495_v37, %v3483_v17  ;;  %v6778_v33 = vmul.f32 %v12218_v16, %v12287_v56 }
 0x448   : > { %v3516_v57 = vrot.slane %v3515_v30, 2  ;;  %v8166_v2 = vpop.eup %8165  ;;  %v3411_v10 = vadd.f32 %v3410_v43, %v3409_v49  ;;  %v3423_v48 = vadd.f32 %v3422_v52, %v3421_v62  ;;  %v3528_v13 = vrot.slane %v3527_v39, 2 }
 0x449   : > { %v8168_v4 = vpop.eup %8167  ;;  %v12293_v7 = vmul.f32 %v8166_v2, %v14827_v53  ;;  %8175 = vrcp.f32 %v3399_v29  ;;  %v3591_v19 = vsel %vm2000_vm1, %v3507_v25, %v3590_v21  ;;  %v6780_v51 = vmul.f32 %v12226_v54, %v12287_v56 }
 0x44a   : > { %v3517_v59 = vadd.f32 %v3516_v57, %v3515_v30  ;;  %v8170_v45 = vpop.eup %8169  ;;  %v12299_v11 = vmul.f32 %v8168_v4, %v14828_v15  ;;  %8177 = vrcp.f32 %v3411_v10  ;;  %v3529_v43 = vadd.f32 %v3528_v13, %v3527_v39 }
 0x44b   : > { %v12302_v52 = vmul.f32 %v8170_v45, %v14829_v6  ;;  %v6633_v30 = vmul.f32 %v12293_v7, %v12280_v61  ;;  %8179 = vrcp.f32 %v3423_v48  ;;  %v6782_v62 = vmul.f32 %v12231_v5, %v12287_v56  ;;  %v14866_v48 = vld [vmem:[#allocation42_spill] sm:$0xff] }
 0x44c   : > { %v3518_v44 = vrot.slane %v3517_v59, 1  ;;  %v6635_v53 = vmul.f32 %v12299_v11, %v12280_v61  ;;  %v3530_v17 = vrot.slane %v3529_v43, 1  ;;  %v12312_v15 = vmul.f32 %v12240_v24, %v12287_v56 }
 0x44d   : > { %v6637_v6 = vmul.f32 %v12302_v52, %v12280_v61  ;;  %v6654_v37 = vrot.slane %v6633_v30, 4  ;;  %v12318_v40 = vmul.f32 %v12245_v28, %v12287_v56  ;;  %v6794_v49 = vrot.slane %v6778_v33, 4 }
 0x44e   : > { %v3519_v18 = vadd.f32 %v3518_v44, %v3517_v59  ;;  %14851 = vst [vmem:[#allocation65_spill] sm:$0xff] %v12312_v15  ;;  %v6666_v1 = vrot.slane %v6635_v53, 4  ;;  %v3531_v27 = vadd.f32 %v3530_v17, %v3529_v43  ;;  %v6806_v46 = vrot.slane %v6780_v51, 4  ;;  %v14859_v43 = vld [vmem:[#allocation18_spill] sm:$0xff] }
 0x44f   : > { %14852 = vst [vmem:[#allocation67_spill] sm:$0xff] %v12318_v40  ;;  %v12321_v25 = vadd.f32 %v6654_v37, %v6633_v30  ;;  %v6678_v57 = vrot.slane %v6637_v6, 4  ;;  %v12323_v39 = vadd.f32 %v6794_v49, %v6778_v33  ;;  %v6818_v29 = vrot.slane %v6782_v62, 4  ;;  %v14863_v49 = vld [vmem:[#allocation119_spill] sm:$0xff]  ;;  %v14868_v44 = vld [vmem:[#allocation118_spill] sm:$0xff] }
 0x450   : > { %v3592_v23 = vsel %vm2002_vm2, %v3519_v18, %v3591_v19  ;;  %v12325_v21 = vadd.f32 %v6666_v1, %v6635_v53  ;;  %v12330_v10 = vadd.f32 %v6806_v46, %v6780_v51  ;;  %v3424_v30 = vrot.slane %v14859_v43, 4  ;;  %v14860_v53 = vld [vmem:[#allocation98_spill] sm:$0xff] }
 0x451   : > { %14853 = vst [vmem:[#allocation86_spill] sm:$0xff] %v12321_v25  ;;  %14854 = vst [vmem:[#allocation108_spill] sm:$0xff] %v12323_v39  ;;  %v12328_v2 = vsel %vm2004_vm3, %v3531_v27, %v3592_v23  ;;  %v12334_v13 = vadd.f32 %v6678_v57, %v6637_v6  ;;  %v12337_v19 = vadd.f32 %v6818_v29, %v6782_v62  ;;  %v14861_v6 = vld [vmem:[#allocation39_spill] sm:$0xff]  ;;  %v14864_v1 = vrot.slane %v14863_v49, 2  ;;  %v14865_v57 = vld [vmem:[#allocation122_spill] sm:$0xff] }
 0x452   : > { %14855 = vst [vmem:[#allocation110_spill] sm:$0xff] %v12325_v21  ;;  %14856 = vst [vmem:[#allocation109_spill] sm:$0xff] %v12330_v10  ;;  %v8172_v33 = vpop.eup %8171  ;;  %v3473_v51 = vmul.f32 %v11721_v58, %v14860_v53  ;;  %v3475_v17 = vmul.f32 %v11736_v22, %v14860_v53  ;;  %v14862_v62 = vrot.slane %v14861_v6, 2  ;;  %v3425_v46 = vadd.f32 %v14859_v43, %v3424_v30 }
 0x453   : > { %14857 = vst [vmem:[#allocation101_spill] sm:$0xff] %v12334_v13  ;;  %14858 = vst [vmem:[#allocation106_spill] sm:$0xff] %v12337_v19  ;;  %v12345_v18 = vmul.f32 %v8172_v33, %v14832_v0  ;;  %v3499_v27 = vadd.f32 %v14864_v1, %v14863_v49  ;;  %v3510_v29 = vrot.slane %v14865_v57, 2  ;;  %v14867_v0 = vrot.slane %v14866_v48, 4 }
 0x454   : > { %v3487_v37 = vadd.f32 %v14862_v62, %v14861_v6  ;;  %v8174_v23 = vpop.eup %8173  ;;  %v3532_v4 = vrot.slane %v14868_v44, 4  ;;  %v3426_v59 = vrot.slane %v3425_v46, 2 }
 0x455   : > { %v3521_v33 = vadd.f32 %v14867_v0, %v14866_v48  ;;  %v12362_v45 = vmul.f32 %v8174_v23, %v14836_v42  ;;  %v12366_v6 = vmul.f32 %v12345_v18, %v12280_v61  ;;  %v3500_v49 = vrot.slane %v3499_v27, 1 }
 0x456   : > { %v3488_v62 = vrot.slane %v3487_v37, 1  ;;  %v8176_v1 = vpop.eup %8175  ;;  %v3511_v30 = vadd.f32 %v3510_v29, %v14865_v57  ;;  %v3533_v15 = vadd.f32 %v3532_v4, %v14868_v44  ;;  %v3427_v39 = vadd.f32 %v3426_v59, %v3425_v46  ;;  %v14871_v44 = vld [vmem:[#allocation94_spill] sm:$0xff] }
 0x457   : > { %14869 = vst [vmem:[#allocation74_spill] sm:$0xff] %v12366_v6  ;;  %v3522_v40 = vrot.slane %v3521_v33, 2  ;;  %v8178_v19 = vpop.eup %8177  ;;  %v12372_v48 = vmul.f32 %v12362_v45, %v12280_v61  ;;  %v12376_v23 = vmul.f32 %v8176_v1, %v14838_v34  ;;  %v3501_v57 = vadd.f32 %v3500_v49, %v3499_v27 }
 0x458   : > { %v3489_v0 = vadd.f32 %v3488_v62, %v3487_v37  ;;  %v8180_v10 = vpop.eup %8179  ;;  %v12379_v56 = vmul.f32 %v8178_v19, %v14839_v38  ;;  %v3512_v29 = vrot.slane %v3511_v30, 1  ;;  %v3534_v13 = vrot.slane %v3533_v15, 2 }
 0x459   : > { %14870 = vst [vmem:[#allocation76_spill] sm:$0xff] %v12372_v48  ;;  %v12382_v4 = vmul.f32 %v8180_v10, %v14840_v50  ;;  %v3472_v61 = vmul.f32 %v12376_v23, %v14871_v44  ;;  %v3523_v48 = vadd.f32 %v3522_v40, %v3521_v33  ;;  %v3428_v1 = vrot.slane %v3427_v39, 1 }
 0x45a   : > { %v3474_v34 = vmul.f32 %v12379_v56, %v14871_v44  ;;  %v3513_v37 = vadd.f32 %v3512_v29, %v3511_v30  ;;  %v3544_v62 = vrot.slane %v3473_v51, 4  ;;  %v3535_v27 = vadd.f32 %v3534_v13, %v3533_v15  ;;  %v12392_v13 = vpop.f32.mrf.mxu1 }
 0x45b   : > { %v3476_v38 = vmul.f32 %v12382_v4, %v14871_v44  ;;  %v3538_v59 = vrot.slane %v3472_v61, 4  ;;  %v3524_v19 = vrot.slane %v3523_v48, 1  ;;  %v3429_v50 = vadd.f32 %v3428_v1, %v3427_v39 }
 0x45c   : > { %v3550_v46 = vrot.slane %v3474_v34, 4  ;;  %v3545_v10 = vadd.f32 %v3544_v62, %v3473_v51  ;;  %v3556_v49 = vrot.slane %v3475_v17, 4  ;;  %v3536_v33 = vrot.slane %v3535_v27, 1 }
 0x45d   : > { %v3539_v42 = vadd.f32 %v3538_v59, %v3472_v61  ;;  %v3562_v6 = vrot.slane %v3476_v38, 4  ;;  %v3525_v40 = vadd.f32 %v3524_v19, %v3523_v48  ;;  %8181 = vrcp.f32 %v3429_v50 }
 0x45e   : > { %v3551_v21 = vadd.f32 %v3550_v46, %v3474_v34  ;;  %v3546_v25 = vrot.slane %v3545_v10, 2  ;;  %v3557_v35 = vadd.f32 %v3556_v49, %v3475_v17  ;;  %v3537_v26 = vadd.f32 %v3536_v33, %v3535_v27 }
 0x45f   : > { %v3540_v30 = vrot.slane %v3539_v42, 2  ;;  %v3563_v29 = vadd.f32 %v3562_v6, %v3476_v38  ;;  %v3597_v44 = vsel %vm1998_vm0, %v3501_v57, %v3489_v0  ;;  %v6779_v34 = vmul.f32 %v12293_v7, %v12392_v13 }
 0x460   : > { %v3552_v41 = vrot.slane %v3551_v21, 2  ;;  %v3547_v32 = vadd.f32 %v3546_v25, %v3545_v10  ;;  %v3558_v15 = vrot.slane %v3557_v35, 2  ;;  %v3598_v39 = vsel %vm2000_vm1, %v3513_v37, %v3597_v44 }
 0x461   : > { %v3541_v61 = vadd.f32 %v3540_v30, %v3539_v42  ;;  %v3564_v51 = vrot.slane %v3563_v29, 2  ;;  %v3599_v48 = vsel %vm2002_vm2, %v3525_v40, %v3598_v39  ;;  %v6781_v25 = vmul.f32 %v12299_v11, %v12392_v13 }
 0x462   : > { %v3553_v17 = vadd.f32 %v3552_v41, %v3551_v21  ;;  %v3548_v1 = vrot.slane %v3547_v32, 1  ;;  %v3559_v6 = vadd.f32 %v3558_v15, %v3557_v35  ;;  %v3600_v62 = vsel %vm2004_vm3, %v3537_v26, %v3599_v48  ;;  %v14876_v48 = vld [vmem:[#allocation104_spill] sm:$0xff] }
 0x463   : > { %v3542_v0 = vrot.slane %v3541_v61, 1  ;;  %v3565_v57 = vadd.f32 %v3564_v51, %v3563_v29  ;;  %v6783_v37 = vmul.f32 %v12302_v52, %v12392_v13  ;;  %v12404_v19 = vmul.f32 %v12345_v18, %v12392_v13 }
 0x464   : > { %v3554_v42 = vrot.slane %v3553_v17, 1  ;;  %v3549_v38 = vadd.f32 %v3548_v1, %v3547_v32  ;;  %v3560_v59 = vrot.slane %v3559_v6, 1  ;;  %v12408_v26 = vmul.f32 %v12362_v45, %v12392_v13 }
 0x465   : > { %14872 = vst [vmem:[#allocation78_spill] sm:$0xff] %v12404_v19  ;;  %v3543_v41 = vadd.f32 %v3542_v0, %v3541_v61  ;;  %v3566_v21 = vrot.slane %v3565_v57, 1  ;;  %v6800_v35 = vrot.slane %v6779_v34, 4  ;;  %v6812_v10 = vrot.slane %v6781_v25, 4 }
 0x466   : > { %14873 = vst [vmem:[#allocation73_spill] sm:$0xff] %v12408_v26  ;;  %v3555_v27 = vadd.f32 %v3554_v42, %v3553_v17  ;;  %v3561_v46 = vadd.f32 %v3560_v59, %v3559_v6  ;;  %v3601_v50 = vsel %vm2006_vm4, %v3549_v38, %v3600_v62  ;;  %v6824_v33 = vrot.slane %v6783_v37, 4  ;;  %v14877_v6 = vld [vmem:[#allocation61_spill] sm:$0xff]  ;;  %v14881_v38 = vld [vmem:[#allocation20_spill] sm:$0xff] }
 0x467   : > { %v3567_v49 = vadd.f32 %v3566_v21, %v3565_v57  ;;  %v3594_v32 = vsel %vm2006_vm4, %v3543_v41, %v12328_v2  ;;  %v12413_v40 = vadd.f32 %v6800_v35, %v6779_v34  ;;  %v12419_v44 = vadd.f32 %v6812_v10, %v6781_v25  ;;  %v14879_v25 = vld [vmem:[#allocation113_spill] sm:$0xff]  ;;  %v14882_v41 = vld [vmem:[#allocation112_spill] sm:$0xff] }
 0x468   : > { %v3595_v30 = vsel %vm2008_vm5, %v3555_v27, %v3594_v32  ;;  %v12417_v29 = vsel %vm2008_vm5, %v3561_v46, %v3601_v50  ;;  %v12424_v51 = vadd.f32 %v6824_v33, %v6783_v37  ;;  %v3618_v2 = vmul.f32 %v12376_v23, %v14876_v48  ;;  %v14884_v27 = vld [vmem:[#allocation115_spill] sm:$0xff] }
 0x469   : > { %14874 = vst [vmem:[#allocation75_spill] sm:$0xff] %v12419_v44  ;;  %v3596_v39 = vsel %vm2010_vm6, %v3567_v49, %v3595_v30  ;;  %v3620_v17 = vmul.f32 %v12379_v56, %v14876_v48  ;;  %v3622_v1 = vmul.f32 %v12382_v4, %v14876_v48  ;;  %v14878_v62 = vrot.slane %v14877_v6, 2 }
 0x46a   : > { %14875 = vst [vmem:[#allocation36_spill] sm:$0xff] %v12424_v51  ;;  %7252 = vxpose.xlu0.b32.cont [5/16] %v3596_v39, 128  ;;  %v8182_v57 = vpop.eup %8181  ;;  %v14880_v37 = vrot.slane %v14879_v25, 2  ;;  %v3650_v59 = vrot.slane %v14881_v38, 2  ;;  %v14883_v21 = vrot.slane %v14882_v41, 4  ;;  %v3672_v46 = vrot.slane %v14884_v27, 4 }
 0x46b   : > { %v3627_v0 = vadd.f32 %v14878_v62, %v14877_v6  ;;  %v12445_v50 = vmul.f32 %v8182_v57, %v14859_v43  ;;  %v3684_v49 = vrot.slane %v3618_v2, 4  ;;  %v3696_v32 = vrot.slane %v3620_v17, 4 }
 0x46c   : > { %v3639_v42 = vadd.f32 %v14880_v37, %v14879_v25  ;;  %v3661_v35 = vadd.f32 %v14883_v21, %v14882_v41  ;;  %v3651_v30 = vadd.f32 %v3650_v59, %v14881_v38  ;;  %v3673_v48 = vadd.f32 %v3672_v46, %v14884_v27 }
 0x46d   : > { %v3628_v10 = vrot.slane %v3627_v0, 1  ;;  %v3477_v6 = vmul.f32 %v12445_v50, %v14860_v53  ;;  %v3685_v25 = vadd.f32 %v3684_v49, %v3618_v2  ;;  %v3697_v37 = vadd.f32 %v3696_v32, %v3620_v17 }
 0x46e   : > { %v3640_v33 = vrot.slane %v3639_v42, 1  ;;  %v3662_v39 = vrot.slane %v3661_v35, 2  ;;  %v3652_v21 = vrot.slane %v3651_v30, 1  ;;  %v3674_v43 = vrot.slane %v3673_v48, 2 }
 0x46f   : > { %v3629_v62 = vadd.f32 %v3628_v10, %v3627_v0  ;;  %v3568_v57 = vrot.slane %v3477_v6, 4  ;;  %v3686_v34 = vrot.slane %v3685_v25, 2  ;;  %v3698_v61 = vrot.slane %v3697_v37, 2  ;;  %v12452_v0 = vpop.f32.mrf.mxu1 }
 0x470   : > { %v3641_v41 = vadd.f32 %v3640_v33, %v3639_v42  ;;  %v3663_v15 = vadd.f32 %v3662_v39, %v3661_v35  ;;  %v3708_v26 = vrot.slane %v3622_v1, 4  ;;  %v3653_v19 = vadd.f32 %v3652_v21, %v3651_v30 }
 0x471   : > { %v3675_v38 = vadd.f32 %v3674_v43, %v3673_v48  ;;  %v3569_v27 = vadd.f32 %v3568_v57, %v3477_v6  ;;  %v3687_v46 = vadd.f32 %v3686_v34, %v3685_v25  ;;  %v3699_v44 = vadd.f32 %v3698_v61, %v3697_v37 }
 0x472   : > { %v3664_v51 = vrot.slane %v3663_v15, 1  ;;  %v3736_v59 = vsel %vm1998_vm0, %v3641_v41, %v3629_v62  ;;  %v3709_v53 = vadd.f32 %v3708_v26, %v3622_v1  ;;  %v6924_v35 = vmul.f32 %v12218_v16, %v12452_v0 }
 0x473   : > { %v3676_v17 = vrot.slane %v3675_v38, 1  ;;  %v3737_v42 = vsel %vm2000_vm1, %v3653_v19, %v3736_v59  ;;  %v3570_v10 = vrot.slane %v3569_v27, 2  ;;  %v3688_v49 = vrot.slane %v3687_v46, 1 }
 0x474   : > { %v3665_v2 = vadd.f32 %v3664_v51, %v3663_v15  ;;  %v3700_v32 = vrot.slane %v3699_v44, 1  ;;  %v3710_v33 = vrot.slane %v3709_v53, 2  ;;  %v6926_v61 = vmul.f32 %v12226_v54, %v12452_v0 }
 0x475   : > { %v3677_v30 = vadd.f32 %v3676_v17, %v3675_v38  ;;  %v6928_v26 = vmul.f32 %v12231_v5, %v12452_v0  ;;  %v3571_v15 = vadd.f32 %v3570_v10, %v3569_v27  ;;  %v3689_v51 = vadd.f32 %v3688_v49, %v3687_v46 }
 0x476   : > { %v3738_v39 = vsel %vm2002_vm2, %v3665_v2, %v3737_v42  ;;  %v3701_v34 = vadd.f32 %v3700_v32, %v3699_v44  ;;  %v3711_v19 = vadd.f32 %v3710_v33, %v3709_v53  ;;  %v12465_v48 = vmul.f32 %v12240_v24, %v12452_v0  ;;  %v14888_v53 = vld [vmem:[#allocation105_spill] sm:$0xff] }
 0x477   : > { %v3739_v1 = vsel %vm2004_vm3, %v3677_v30, %v3738_v39  ;;  %v12469_v6 = vmul.f32 %v12245_v28, %v12452_v0  ;;  %v6940_v62 = vrot.slane %v6924_v35, 4  ;;  %v3572_v25 = vrot.slane %v3571_v15, 1  ;;  %v14890_v30 = vld [vmem:[#allocation40_spill] sm:$0xff] }
 0x478   : > { %14885 = vst [vmem:[#allocation38_spill] sm:$0xff] %v12465_v48  ;;  %v3712_v37 = vrot.slane %v3711_v19, 1  ;;  %v3740_v41 = vsel %vm2006_vm4, %v3689_v51, %v3739_v1  ;;  %v6952_v21 = vrot.slane %v6926_v61, 4  ;;  %v6964_v57 = vrot.slane %v6928_v26, 4  ;;  %v14895_v1 = vld [vmem:[#allocation44_spill] sm:$0xff] }
 0x479   : > { %14886 = vst [vmem:[#allocation33_spill] sm:$0xff] %v12469_v6  ;;  %v3741_v43 = vsel %vm2008_vm5, %v3701_v34, %v3740_v41  ;;  %v12473_v44 = vadd.f32 %v6940_v62, %v6924_v35  ;;  %v3573_v59 = vadd.f32 %v3572_v25, %v3571_v15  ;;  %v3619_v2 = vmul.f32 %v11721_v58, %v14888_v53  ;;  %v14894_v34 = vld [vmem:[#allocation124_spill] sm:$0xff] }
 0x47a   : > { %v3713_v27 = vadd.f32 %v3712_v37, %v3711_v19  ;;  %v12476_v46 = vadd.f32 %v6952_v21, %v6926_v61  ;;  %v12481_v42 = vadd.f32 %v6964_v57, %v6928_v26  ;;  %v3621_v10 = vmul.f32 %v11736_v22, %v14888_v53  ;;  %v14892_v26 = vld [vmem:[#allocation121_spill] sm:$0xff]  ;;  %v14897_v25 = vld [vmem:[#allocation120_spill] sm:$0xff] }
 0x47b   : > { %v3623_v35 = vmul.f32 %v12445_v50, %v14888_v53  ;;  %v3603_v49 = vsel %vm2010_vm6, %v3573_v59, %v12417_v29  ;;  %v14891_v39 = vrot.slane %v14890_v30, 2  ;;  %v14893_v15 = vrot.slane %v14892_v26, 2 }
 0x47c   : > { %14887 = vst [vmem:[#allocation111_spill] sm:$0xff] %v12476_v46  ;;  %14889 = vst [vmem:[#allocation57_spill] sm:$0xff] %v12481_v42  ;;  %v3742_v32 = vsel %vm2010_vm6, %v3713_v27, %v3741_v43  ;;  %7284 = vxpose.xlu1.b32.cont [5/16] %v3603_v49, 128  ;;  %v3656_v19 = vrot.slane %v14894_v34, 2  ;;  %v14896_v62 = vrot.slane %v14895_v1, 4  ;;  %v3678_v37 = vrot.slane %v14897_v25, 4 }
 0x47d   : > { %v3633_v61 = vadd.f32 %v14891_v39, %v14890_v30  ;;  %7253 = vxpose.xlu0.b32.cont [6/16] %v3742_v32, 128  ;;  %v3645_v51 = vadd.f32 %v14893_v15, %v14892_v26  ;;  %v3690_v21 = vrot.slane %v3619_v2, 4  ;;  %v3702_v43 = vrot.slane %v3621_v10, 4 }
 0x47e   : > { %v3667_v29 = vadd.f32 %v14896_v62, %v14895_v1  ;;  %v3714_v57 = vrot.slane %v3623_v35, 4  ;;  %v3657_v27 = vadd.f32 %v3656_v19, %v14894_v34  ;;  %v3679_v49 = vadd.f32 %v3678_v37, %v14897_v25  ;;  %v12504_v62 = vpop.f32.mrf.mxu1 }
 0x47f   : > { %v3634_v41 = vrot.slane %v3633_v61, 1  ;;  %v3646_v59 = vrot.slane %v3645_v51, 1  ;;  %v3691_v30 = vadd.f32 %v3690_v21, %v3619_v2  ;;  %v3703_v39 = vadd.f32 %v3702_v43, %v3621_v10 }
 0x480   : > { %v3668_v53 = vrot.slane %v3667_v29, 2  ;;  %v3715_v26 = vadd.f32 %v3714_v57, %v3623_v35  ;;  %v3658_v38 = vrot.slane %v3657_v27, 1  ;;  %v3680_v1 = vrot.slane %v3679_v49, 2 }
 0x481   : > { %v3635_v32 = vadd.f32 %v3634_v41, %v3633_v61  ;;  %v3647_v15 = vadd.f32 %v3646_v59, %v3645_v51  ;;  %v3692_v17 = vrot.slane %v3691_v30, 2  ;;  %v3704_v6 = vrot.slane %v3703_v39, 2 }
 0x482   : > { %v3669_v33 = vadd.f32 %v3668_v53, %v3667_v29  ;;  %v3716_v48 = vrot.slane %v3715_v26, 2  ;;  %v6925_v42 = vmul.f32 %v12293_v7, %v12504_v62  ;;  %v3659_v34 = vadd.f32 %v3658_v38, %v3657_v27 }
 0x483   : > { %v3681_v46 = vadd.f32 %v3680_v1, %v3679_v49  ;;  %v3743_v61 = vsel %vm1998_vm0, %v3647_v15, %v3635_v32  ;;  %v3693_v2 = vadd.f32 %v3692_v17, %v3691_v30  ;;  %v3705_v10 = vadd.f32 %v3704_v6, %v3703_v39  ;;  %v14902_v1 = vld [vmem:[#allocation107_spill] sm:$0xff] }
 0x484   : > { %v3670_v19 = vrot.slane %v3669_v33, 1  ;;  %v3717_v35 = vadd.f32 %v3716_v48, %v3715_v26  ;;  %v6927_v51 = vmul.f32 %v12299_v11, %v12504_v62  ;;  %v3744_v37 = vsel %vm2000_vm1, %v3659_v34, %v3743_v61 }
 0x485   : > { %v3682_v25 = vrot.slane %v3681_v46, 1  ;;  %v6929_v41 = vmul.f32 %v12302_v52, %v12504_v62  ;;  %v3694_v21 = vrot.slane %v3693_v2, 1  ;;  %v3706_v43 = vrot.slane %v3705_v10, 1 }
 0x486   : > { %v3671_v29 = vadd.f32 %v3670_v19, %v3669_v33  ;;  %v3718_v38 = vrot.slane %v3717_v35, 1  ;;  %v12516_v57 = vmul.f32 %v12345_v18, %v12504_v62  ;;  %v12521_v6 = vmul.f32 %v12362_v45, %v12504_v62 }
 0x487   : > { %v3683_v17 = vadd.f32 %v3682_v25, %v3681_v46  ;;  %v6946_v33 = vrot.slane %v6925_v42, 4  ;;  %v3695_v59 = vadd.f32 %v3694_v21, %v3693_v2  ;;  %v3707_v27 = vadd.f32 %v3706_v43, %v3705_v10  ;;  %v14906_v21 = vld [vmem:[#allocation21_spill] sm:$0xff] }
 0x488   : > { %14898 = vst [vmem:[#allocation17_spill] sm:$0xff] %v12516_v57  ;;  %v3745_v48 = vsel %vm2002_vm2, %v3671_v29, %v3744_v37  ;;  %14899 = vst [vmem:[#allocation15_spill] sm:$0xff] %v12521_v6  ;;  %v3719_v53 = vadd.f32 %v3718_v38, %v3717_v35  ;;  %v6958_v49 = vrot.slane %v6927_v51, 4  ;;  %v6970_v39 = vrot.slane %v6929_v41, 4  ;;  %v14904_v29 = vld [vmem:[#allocation114_spill] sm:$0xff] }
 0x489   : > { %v3746_v32 = vsel %vm2004_vm3, %v3683_v17, %v3745_v48  ;;  %v12524_v30 = vadd.f32 %v6946_v33, %v6925_v42  ;;  %v3764_v34 = vmul.f32 %v12376_v23, %v14902_v1  ;;  %v3766_v19 = vmul.f32 %v12379_v56, %v14902_v1  ;;  %v14908_v17 = vld [vmem:[#allocation31_spill] sm:$0xff] }
 0x48a   : > { %v3747_v46 = vsel %vm2006_vm4, %v3695_v59, %v3746_v32  ;;  %v12528_v15 = vadd.f32 %v6958_v49, %v6927_v51  ;;  %v12536_v10 = vadd.f32 %v6970_v39, %v6929_v41  ;;  %v3768_v42 = vmul.f32 %v12382_v4, %v14902_v1  ;;  %v14909_v41 = vld [vmem:[#allocation19_spill] sm:$0xff] }
 0x48b   : > { %14900 = vst [vmem:[#allocation24_spill] sm:$0xff] %v12524_v30  ;;  %v3748_v61 = vsel %vm2008_vm5, %v3707_v27, %v3747_v46  ;;  %v14905_v25 = vrot.slane %v14904_v29, 2  ;;  %v14907_v43 = vrot.slane %v14906_v21, 2  ;;  %v3796_v48 = vrot.slane %v14908_v17, 2  ;;  %v14911_v27 = vld [vmem:[#allocation27_spill] sm:$0xff] }
 0x48c   : > { %14901 = vst [vmem:[#allocation18_spill] sm:$0xff] %v12528_v15  ;;  %14903 = vst [vmem:[#allocation98_spill] sm:$0xff] %v12536_v10  ;;  %v3749_v35 = vsel %vm2010_vm6, %v3719_v53, %v3748_v61  ;;  %v14910_v33 = vrot.slane %v14909_v41, 4  ;;  %v3818_v49 = vrot.slane %v14911_v27, 4  ;;  %v3830_v53 = vrot.slane %v3764_v34, 4 }
 0x48d   : > { %v3773_v37 = vadd.f32 %v14905_v25, %v14904_v29  ;;  %v3785_v38 = vadd.f32 %v14907_v43, %v14906_v21  ;;  %7285 = vxpose.xlu1.b32.cont [6/16] %v3749_v35, 128  ;;  %v3842_v46 = vrot.slane %v3766_v19, 4  ;;  %v3854_v1 = vrot.slane %v3768_v42, 4  ;;  %v12555_v35 = vpop.f32.mrf.mxu1 }
 0x48e   : > { %v3807_v59 = vadd.f32 %v14910_v33, %v14909_v41  ;;  %v3797_v61 = vadd.f32 %v3796_v48, %v14908_v17  ;;  %v3819_v25 = vadd.f32 %v3818_v49, %v14911_v27  ;;  %v3831_v21 = vadd.f32 %v3830_v53, %v3764_v34 }
 0x48f   : > { %v3774_v32 = vrot.slane %v3773_v37, 1  ;;  %v3786_v39 = vrot.slane %v3785_v38, 1  ;;  %v3843_v51 = vadd.f32 %v3842_v46, %v3766_v19  ;;  %v3855_v2 = vadd.f32 %v3854_v1, %v3768_v42 }
 0x490   : > { %v3808_v29 = vrot.slane %v3807_v59, 2  ;;  %v3798_v41 = vrot.slane %v3797_v61, 1  ;;  %v3820_v6 = vrot.slane %v3819_v25, 2  ;;  %v3832_v57 = vrot.slane %v3831_v21, 2 }
 0x491   : > { %v3775_v43 = vadd.f32 %v3774_v32, %v3773_v37  ;;  %v3787_v26 = vadd.f32 %v3786_v39, %v3785_v38  ;;  %v3844_v10 = vrot.slane %v3843_v51, 2  ;;  %v3856_v15 = vrot.slane %v3855_v2, 2 }
 0x492   : > { %v3809_v33 = vadd.f32 %v3808_v29, %v3807_v59  ;;  %v7070_v17 = vmul.f32 %v12218_v16, %v12555_v35  ;;  %v3799_v48 = vadd.f32 %v3798_v41, %v3797_v61  ;;  %v3821_v34 = vadd.f32 %v3820_v6, %v3819_v25  ;;  %v14912_v29 = vld [vmem:[#allocation59_spill] sm:$0xff] }
 0x493   : > { %v3882_v30 = vsel %vm1998_vm0, %v3787_v26, %v3775_v43  ;;  %v3833_v49 = vadd.f32 %v3832_v57, %v3831_v21  ;;  %v3845_v53 = vadd.f32 %v3844_v10, %v3843_v51  ;;  %v3857_v37 = vadd.f32 %v3856_v15, %v3855_v2 }
 0x494   : > { %v3810_v27 = vrot.slane %v3809_v33, 1  ;;  %v7072_v19 = vmul.f32 %v12226_v54, %v12555_v35  ;;  %v7074_v42 = vmul.f32 %v12231_v5, %v12555_v35  ;;  %v3822_v59 = vrot.slane %v3821_v34, 1 }
 0x495   : > { %v3834_v32 = vrot.slane %v3833_v49, 1  ;;  %v3883_v26 = vsel %vm2000_vm1, %v3799_v48, %v3882_v30  ;;  %v3846_v39 = vrot.slane %v3845_v53, 1  ;;  %v3858_v46 = vrot.slane %v3857_v37, 1 }
 0x496   : > { %v3811_v38 = vadd.f32 %v3810_v27, %v3809_v33  ;;  %v12567_v16 = vmul.f32 %v12240_v24, %v12555_v35  ;;  %v12571_v57 = vmul.f32 %v12245_v28, %v12555_v35  ;;  %v3823_v6 = vadd.f32 %v3822_v59, %v3821_v34  ;;  %v14913_v27 = vld [vmem:[#allocation46_spill] sm:$0xff] }
 0x497   : > { %v3835_v54 = vadd.f32 %v3834_v32, %v3833_v49  ;;  %v7086_v5 = vrot.slane %v7070_v17, 4  ;;  %v3847_v2 = vadd.f32 %v3846_v39, %v3845_v53  ;;  %v3859_v10 = vadd.f32 %v3858_v46, %v3857_v37  ;;  %v14915_v37 = vld [vmem:[#allocation126_spill] sm:$0xff]  ;;  %v14918_v32 = vld [vmem:[#allocation123_spill] sm:$0xff]  ;;  %v14920_v46 = vld [vmem:[#allocation125_spill] sm:$0xff] }
 0x498   : > { %v3884_v15 = vsel %vm2002_vm2, %v3811_v38, %v3883_v26  ;;  %v7098_v51 = vrot.slane %v7072_v19, 4  ;;  %v7110_v1 = vrot.slane %v7074_v42, 4  ;;  %v3765_v25 = vmul.f32 %v11721_v58, %v14912_v29 }
 0x499   : > { %v3885_v30 = vsel %vm2004_vm3, %v3823_v6, %v3884_v15  ;;  %v12575_v61 = vadd.f32 %v7086_v5, %v7070_v17  ;;  %v3767_v41 = vmul.f32 %v11736_v22, %v14912_v29  ;;  %v3769_v17 = vmul.f32 %v12445_v50, %v14912_v29  ;;  %v14917_v22 = vld [vmem:[#allocation26_spill] sm:$0xff] }
 0x49a   : > { %v3886_v28 = vsel %vm2006_vm4, %v3835_v54, %v3885_v30  ;;  %v12581_v21 = vadd.f32 %v7098_v51, %v7072_v19  ;;  %v12583_v43 = vadd.f32 %v7110_v1, %v7074_v42  ;;  %v14914_v34 = vrot.slane %v14913_v27, 2  ;;  %v12605_v51 = vpop.f32.mrf.mxu1 }
 0x49b   : > { %v3887_v33 = vsel %vm2008_vm5, %v3847_v2, %v3886_v28  ;;  %v14916_v19 = vrot.slane %v14915_v37, 2  ;;  %v3802_v38 = vrot.slane %v14917_v22, 2  ;;  %v14919_v26 = vrot.slane %v14918_v32, 4 }
 0x49c   : > { %v3779_v58 = vadd.f32 %v14914_v34, %v14913_v27  ;;  %v3888_v49 = vsel %vm2010_vm6, %v3859_v10, %v3887_v33  ;;  %v3824_v6 = vrot.slane %v14920_v46, 4  ;;  %v3836_v54 = vrot.slane %v3765_v25, 4 }
 0x49d   : > { %v3791_v42 = vadd.f32 %v14916_v19, %v14915_v37  ;;  %7254 = vxpose.xlu0.b32.cont [7/16] %v3888_v49, 128  ;;  %v3813_v39 = vadd.f32 %v14919_v26, %v14918_v32  ;;  %v3803_v5 = vadd.f32 %v3802_v38, %v14917_v22  ;;  %v3848_v2 = vrot.slane %v3767_v41, 4 }
 0x49e   : > { %v3780_v59 = vrot.slane %v3779_v58, 1  ;;  %v3860_v10 = vrot.slane %v3769_v17, 4  ;;  %v3825_v29 = vadd.f32 %v3824_v6, %v14920_v46  ;;  %v3837_v28 = vadd.f32 %v3836_v54, %v3765_v25 }
 0x49f   : > { %v3792_v15 = vrot.slane %v3791_v42, 1  ;;  %v3814_v30 = vrot.slane %v3813_v39, 2  ;;  %v3804_v27 = vrot.slane %v3803_v5, 1  ;;  %v3849_v34 = vadd.f32 %v3848_v2, %v3767_v41 }
 0x4a0   : > { %v3781_v1 = vadd.f32 %v3780_v59, %v3779_v58  ;;  %v3861_v49 = vadd.f32 %v3860_v10, %v3769_v17  ;;  %v3826_v19 = vrot.slane %v3825_v29, 2  ;;  %v3838_v32 = vrot.slane %v3837_v28, 2 }
 0x4a1   : > { %v3793_v33 = vadd.f32 %v3792_v15, %v3791_v42  ;;  %v3815_v37 = vadd.f32 %v3814_v30, %v3813_v39  ;;  %v7071_v26 = vmul.f32 %v12293_v7, %v12605_v51  ;;  %v3805_v22 = vadd.f32 %v3804_v27, %v3803_v5 }
 0x4a2   : > { %v3850_v38 = vrot.slane %v3849_v34, 2  ;;  %v3862_v24 = vrot.slane %v3861_v49, 2  ;;  %v3827_v59 = vadd.f32 %v3826_v19, %v3825_v29  ;;  %v3839_v48 = vadd.f32 %v3838_v32, %v3837_v28 }
 0x4a3   : > { %v3889_v53 = vsel %vm1998_vm0, %v3793_v33, %v3781_v1  ;;  %v3816_v58 = vrot.slane %v3815_v37, 1  ;;  %v7073_v25 = vmul.f32 %v12299_v11, %v12605_v51  ;;  %v7075_v39 = vmul.f32 %v12302_v52, %v12605_v51 }
 0x4a4   : > { %v3851_v42 = vadd.f32 %v3850_v38, %v3849_v34  ;;  %v3863_v41 = vadd.f32 %v3862_v24, %v3861_v49  ;;  %v3890_v17 = vsel %vm2000_vm1, %v3805_v22, %v3889_v53  ;;  %v3828_v7 = vrot.slane %v3827_v59, 1  ;;  %v14924_v34 = vld [vmem:[#allocation63_spill] sm:$0xff]  ;;  %v14926_v38 = vld [vmem:[#allocation34_spill] sm:$0xff] }
 0x4a5   : > { %v3817_v46 = vadd.f32 %v3816_v58, %v3815_v37  ;;  %v3840_v6 = vrot.slane %v3839_v48, 1  ;;  %v12618_v54 = vmul.f32 %v12345_v18, %v12605_v51  ;;  %v12622_v2 = vmul.f32 %v12362_v45, %v12605_v51 }
 0x4a6   : > { %v3852_v15 = vrot.slane %v3851_v42, 1  ;;  %v3864_v5 = vrot.slane %v3863_v41, 1  ;;  %v7092_v11 = vrot.slane %v7071_v26, 4  ;;  %v3829_v24 = vadd.f32 %v3828_v7, %v3827_v59 }
 0x4a7   : > { %14921 = vst [vmem:[#allocation39_spill] sm:$0xff] %v12618_v54  ;;  %14922 = vst [vmem:[#allocation119_spill] sm:$0xff] %v12622_v2  ;;  %v3841_v10 = vadd.f32 %v3840_v6, %v3839_v48  ;;  %v3891_v53 = vsel %vm2002_vm2, %v3817_v46, %v3890_v17  ;;  %v7104_v1 = vrot.slane %v7073_v25, 4  ;;  %v7116_v28 = vrot.slane %v7075_v39, 4  ;;  %v14930_v17 = vld [vmem:[#allocation37_spill] sm:$0xff] }
 0x4a8   : > { %v3853_v52 = vadd.f32 %v3852_v15, %v3851_v42  ;;  %v3865_v30 = vadd.f32 %v3864_v5, %v3863_v41  ;;  %v12625_v29 = vadd.f32 %v7092_v11, %v7071_v26  ;;  %v3892_v18 = vsel %vm2004_vm3, %v3829_v24, %v3891_v53  ;;  %v14933_v15 = vld [vmem:[#allocation32_spill] sm:$0xff] }
 0x4a9   : > { %v12628_v33 = vadd.f32 %v7104_v1, %v7073_v25  ;;  %v3910_v45 = vmul.f32 %v12376_v23, %v14924_v34  ;;  %v3893_v49 = vsel %vm2006_vm4, %v3841_v10, %v3892_v18  ;;  %v12635_v37 = vadd.f32 %v7116_v28, %v7075_v39  ;;  %v14928_v25 = vld [vmem:[#allocation35_spill] sm:$0xff] }
 0x4aa   : > { %v3912_v19 = vmul.f32 %v12379_v56, %v14924_v34  ;;  %v3894_v32 = vsel %vm2008_vm5, %v3853_v52, %v3893_v49  ;;  %v3914_v22 = vmul.f32 %v12382_v4, %v14924_v34  ;;  %v14927_v58 = vrot.slane %v14926_v38, 2  ;;  %v14931_v56 = vld [vmem:[#allocation29_spill] sm:$0xff] }
 0x4ab   : > { %14923 = vst [vmem:[#allocation122_spill] sm:$0xff] %v12628_v33  ;;  %14925 = vst [vmem:[#allocation42_spill] sm:$0xff] %v12635_v37  ;;  %v3895_v59 = vsel %vm2010_vm6, %v3865_v30, %v3894_v32  ;;  %v14929_v42 = vrot.slane %v14928_v25, 2  ;;  %v3942_v39 = vrot.slane %v14930_v17, 2  ;;  %v14932_v46 = vrot.slane %v14931_v56, 4 }
 0x4ac   : > { %v3919_v23 = vadd.f32 %v14927_v58, %v14926_v38  ;;  %7286 = vxpose.xlu1.b32.cont [7/16] %v3895_v59, 128  ;;  %v3964_v4 = vrot.slane %v14933_v15, 4  ;;  %v3976_v5 = vrot.slane %v3910_v45, 4  ;;  %v3988_v11 = vrot.slane %v3912_v19, 4 }
 0x4ad   : > { %v3931_v41 = vadd.f32 %v14929_v42, %v14928_v25  ;;  %v3953_v7 = vadd.f32 %v14932_v46, %v14931_v56  ;;  %v3943_v10 = vadd.f32 %v3942_v39, %v14930_v17  ;;  %v4000_v1 = vrot.slane %v3914_v22, 4 }
 0x4ae   : > { %v3920_v6 = vrot.slane %v3919_v23, 1  ;;  %v3965_v30 = vadd.f32 %v3964_v4, %v14933_v15  ;;  %v3977_v28 = vadd.f32 %v3976_v5, %v3910_v45  ;;  %v3989_v18 = vadd.f32 %v3988_v11, %v3912_v19 }
 0x4af   : > { %v3932_v24 = vrot.slane %v3931_v41, 1  ;;  %v3954_v53 = vrot.slane %v3953_v7, 2  ;;  %v3944_v49 = vrot.slane %v3943_v10, 1  ;;  %v4001_v38 = vadd.f32 %v4000_v1, %v3914_v22 }
 0x4b0   : > { %v3921_v52 = vadd.f32 %v3920_v6, %v3919_v23  ;;  %v3966_v58 = vrot.slane %v3965_v30, 2  ;;  %v3978_v59 = vrot.slane %v3977_v28, 2  ;;  %v3990_v25 = vrot.slane %v3989_v18, 2 }
 0x4b1   : > { %v3933_v34 = vadd.f32 %v3932_v24, %v3931_v41  ;;  %v3955_v32 = vadd.f32 %v3954_v53, %v3953_v7  ;;  %v3915_v42 = vmul.f32 %v12445_v50, %v11662_v60  ;;  %v3945_v56 = vadd.f32 %v3944_v49, %v3943_v10  ;;  %v14936_v24 = vld [vmem:[#allocation28_spill] sm:$0xff] }
 0x4b2   : > { %v4002_v17 = vrot.slane %v4001_v38, 2  ;;  %v3967_v23 = vadd.f32 %v3966_v58, %v3965_v30  ;;  %v3979_v6 = vadd.f32 %v3978_v59, %v3977_v28  ;;  %v3991_v15 = vadd.f32 %v3990_v25, %v3989_v18  ;;  %v14939_v28 = vld [vmem:[#allocation128_spill] sm:$0xff]  ;;  %v14940_v25 = vld [vmem:[#allocation30_spill] sm:$0xff] }
 0x4b3   : > { %v3956_v46 = vrot.slane %v3955_v32, 1  ;;  %v4028_v39 = vsel %vm1998_vm0, %v3933_v34, %v3921_v52  ;;  %v14934_v45 = vrot.slane %v11701_v20, 1  ;;  %v14935_v4 = vrot.slane %v11703_v36, 1  ;;  %v14937_v52 = vld [vmem:[#allocation127_spill] sm:$0xff] }
 0x4b4   : > { %v4003_v22 = vadd.f32 %v4002_v17, %v4001_v38  ;;  %v4029_v7 = vsel %vm2000_vm1, %v3945_v56, %v4028_v39  ;;  %v3968_v50 = vrot.slane %v3967_v23, 1  ;;  %v3980_v5 = vrot.slane %v3979_v6, 1  ;;  %v14942_v39 = vld [vmem:[#allocation51_spill] sm:$0xff] }
 0x4b5   : > { %v3927_v19 = vadd.f32 %v14934_v45, %v11701_v20  ;;  %v3957_v41 = vadd.f32 %v3956_v46, %v3955_v32  ;;  %v3939_v60 = vadd.f32 %v14935_v4, %v11703_v36  ;;  %v3992_v11 = vrot.slane %v3991_v15, 1 }
 0x4b6   : > { %v3950_v10 = vrot.slane %v14936_v24, 1  ;;  %v4004_v53 = vrot.slane %v4003_v22, 1  ;;  %v14938_v30 = vrot.slane %v14937_v52, 2  ;;  %v3972_v18 = vrot.slane %v14939_v28, 2 }
 0x4b7   : > { %v4030_v1 = vsel %vm2002_vm2, %v3957_v41, %v4029_v7  ;;  %v3969_v34 = vadd.f32 %v3968_v50, %v3967_v23  ;;  %v3981_v49 = vadd.f32 %v3980_v5, %v3979_v6  ;;  %v3993_v32 = vadd.f32 %v3992_v11, %v3991_v15 }
 0x4b8   : > { %v3961_v20 = vadd.f32 %v14938_v30, %v14937_v52  ;;  %v3951_v38 = vadd.f32 %v3950_v10, %v14936_v24  ;;  %v4005_v36 = vadd.f32 %v4004_v53, %v4003_v22  ;;  %v3973_v59 = vadd.f32 %v3972_v18, %v14939_v28  ;;  %v14943_v52 = vld [vmem:[#allocation52_spill] sm:$0xff] }
 0x4b9   : > { %v14941_v56 = vrot.slane %v14940_v25, 4  ;;  %v4031_v17 = vsel %vm2004_vm3, %v3969_v34, %v4030_v1  ;;  %v3994_v45 = vrot.slane %v14942_v39, 4  ;;  %v4006_v41 = vrot.slane %v3915_v42, 4 }
 0x4ba   : > { %v3962_v58 = vrot.slane %v3961_v20, 1  ;;  %v4035_v7 = vsel %vm1998_vm0, %v3939_v60, %v3927_v19  ;;  %v4032_v23 = vsel %vm2006_vm4, %v3981_v49, %v4031_v17  ;;  %v3974_v15 = vrot.slane %v3973_v59, 1  ;;  %v14945_v49 = vld [vmem:[#allocation49_spill] sm:$0xff] }
 0x4bb   : > { %v3983_v46 = vadd.f32 %v14941_v56, %v14940_v25  ;;  %v4033_v22 = vsel %vm2008_vm5, %v3993_v32, %v4032_v23  ;;  %v3995_v50 = vadd.f32 %v3994_v45, %v14942_v39  ;;  %v4007_v5 = vadd.f32 %v4006_v41, %v3915_v42  ;;  %v14946_v32 = vld [vmem:[#allocation50_spill] sm:$0xff] }
 0x4bc   : > { %v3963_v6 = vadd.f32 %v3962_v58, %v3961_v20  ;;  %v4036_v11 = vsel %vm2000_vm1, %v3951_v38, %v4035_v7  ;;  %v4034_v24 = vsel %vm2010_vm6, %v4005_v36, %v4033_v22  ;;  %v3975_v10 = vadd.f32 %v3974_v15, %v3973_v59  ;;  %v14944_v20 = vld [vmem:[#allocation54_spill] sm:$0xff] }
 0x4bd   : > { %v3984_v4 = vrot.slane %v3983_v46, 2  ;;  %7255 = vxpose.xlu0.b32.cont [8/16] %v4034_v24, 128  ;;  %v3996_v19 = vrot.slane %v3995_v50, 2  ;;  %v4008_v60 = vrot.slane %v4007_v5, 2  ;;  %v4979_v30 = vrot.slane %v14943_v52, 4  ;;  %v14948_v45 = vld [vmem:[#allocation58_spill] sm:$0xff] }
 0x4be   : > { %v4037_v1 = vsel %vm2002_vm2, %v3963_v6, %v4036_v11  ;;  %v4991_v28 = vrot.slane %v14944_v20, 4  ;;  %v5003_v42 = vrot.slane %v14945_v49, 4  ;;  %v14947_v38 = vrot.slane %v14946_v32, 2 }
 0x4bf   : > { %v3985_v53 = vadd.f32 %v3984_v4, %v3983_v46  ;;  %v4038_v34 = vsel %vm2004_vm3, %v3975_v10, %v4037_v1  ;;  %v3997_v58 = vadd.f32 %v3996_v19, %v3995_v50  ;;  %v4009_v59 = vadd.f32 %v4008_v60, %v4007_v5 }
 0x4c0   : > { %v5066_v36 = vadd.f32 %v14947_v38, %v14946_v32  ;;  %v4980_v25 = vadd.f32 %v14943_v52, %v4979_v30  ;;  %v4992_v56 = vadd.f32 %v14944_v20, %v4991_v28  ;;  %v5004_v17 = vadd.f32 %v14945_v49, %v5003_v42  ;;  %v14950_v30 = vld [vmem:[#allocation16_spill] sm:$0xff] }
 0x4c1   : > { %v3986_v18 = vrot.slane %v3985_v53, 1  ;;  %v14949_v41 = vrot.slane %v14948_v45, 2  ;;  %v3998_v23 = vrot.slane %v3997_v58, 1  ;;  %v4010_v6 = vrot.slane %v4009_v59, 1 }
 0x4c2   : > { %v5067_v39 = vrot.slane %v5066_v36, 1  ;;  %v4981_v15 = vrot.slane %v4980_v25, 2  ;;  %v4993_v4 = vrot.slane %v4992_v56, 2  ;;  %v5005_v50 = vrot.slane %v5004_v17, 2 }
 0x4c3   : > { %v3987_v46 = vadd.f32 %v3986_v18, %v3985_v53  ;;  %v5078_v7 = vadd.f32 %v14949_v41, %v14948_v45  ;;  %v3999_v24 = vadd.f32 %v3998_v23, %v3997_v58  ;;  %v4011_v10 = vadd.f32 %v4010_v6, %v4009_v59  ;;  %v14951_v18 = vld [vmem:[#allocation53_spill] sm:$0xff] }
 0x4c4   : > { %v5068_v5 = vadd.f32 %v5067_v39, %v5066_v36  ;;  %v4982_v1 = vadd.f32 %v4981_v15, %v4980_v25  ;;  %v4994_v53 = vadd.f32 %v4993_v4, %v4992_v56  ;;  %v5006_v19 = vadd.f32 %v5005_v50, %v5004_v17  ;;  %v14954_v4 = vld [vmem:[#allocation60_spill] sm:$0xff] }
 0x4c5   : > { %v4039_v22 = vsel %vm2006_vm4, %v3987_v46, %v4038_v34  ;;  %v5079_v11 = vrot.slane %v5078_v7, 1  ;;  %v5089_v28 = vrot.slane %v14950_v30, 2  ;;  %v14952_v42 = vrot.slane %v14951_v18, 4  ;;  %v14953_v34 = vld [vmem:[#allocation56_spill] sm:$0xff] }
 0x4c6   : > { %v4040_v38 = vsel %vm2008_vm5, %v3999_v24, %v4039_v22  ;;  %v4983_v45 = vrot.slane %v4982_v1, 1  ;;  %v4995_v41 = vrot.slane %v4994_v53, 1  ;;  %v5111_v46 = vrot.slane %v14953_v34, 4 }
 0x4c7   : > { %v5080_v60 = vadd.f32 %v5079_v11, %v5078_v7  ;;  %v5100_v32 = vadd.f32 %v14952_v42, %v14951_v18  ;;  %v4041_v36 = vsel %vm2010_vm6, %v4011_v10, %v4040_v38  ;;  %v5007_v58 = vrot.slane %v5006_v19, 1  ;;  %v14955_v11 = vld [vmem:[#allocation62_spill] sm:$0xff]  ;;  %v14956_v10 = vld [vmem:[#allocation64_spill] sm:$0xff] }
 0x4c8   : > { %v5090_v59 = vadd.f32 %v5089_v28, %v14950_v30  ;;  %7287 = vxpose.xlu1.b32.cont [8/16] %v4041_v36, 128  ;;  %v4984_v56 = vadd.f32 %v4983_v45, %v4982_v1  ;;  %v4996_v17 = vadd.f32 %v4995_v41, %v4994_v53  ;;  %v5112_v39 = vadd.f32 %v5111_v46, %v14953_v34  ;;  %v14957_v38 = vld [vmem:[#allocation116_spill] sm:$0xff] }
 0x4c9   : > { %v5101_v25 = vrot.slane %v5100_v32, 2  ;;  %v5175_v7 = vsel %vm1998_vm0, %v5080_v60, %v5068_v5  ;;  %v5008_v23 = vadd.f32 %v5007_v58, %v5006_v19  ;;  %v4985_v22 = vrot.slane %v14954_v4, 4  ;;  %v14959_v58 = vld [vmem:[#allocation117_spill] sm:$0xff] }
 0x4ca   : > { %v5091_v6 = vrot.slane %v5090_v59, 1  ;;  %8183 = vrcp.f32 %v4984_v56  ;;  %v5113_v50 = vrot.slane %v5112_v39, 2  ;;  %v4997_v24 = vrot.slane %v14955_v11, 4 }
 0x4cb   : > { %v5102_v15 = vadd.f32 %v5101_v25, %v5100_v32  ;;  %v5009_v18 = vrot.slane %v14956_v10, 4  ;;  %8185 = vrcp.f32 %v4996_v17  ;;  %v4986_v1 = vadd.f32 %v14954_v4, %v4985_v22 }
 0x4cc   : > { %v5092_v30 = vadd.f32 %v5091_v6, %v5090_v59  ;;  %8187 = vrcp.f32 %v5008_v23  ;;  %v5114_v53 = vadd.f32 %v5113_v50, %v5112_v39  ;;  %v4998_v5 = vadd.f32 %v14955_v11, %v4997_v24  ;;  %v14961_v23 = vld [vmem:[#allocation130_spill] sm:$0xff] }
 0x4cd   : > { %v5103_v28 = vrot.slane %v5102_v15, 1  ;;  %v5010_v19 = vadd.f32 %v14956_v10, %v5009_v18  ;;  %v4987_v32 = vrot.slane %v4986_v1, 2  ;;  %v14958_v45 = vrot.slane %v14957_v38, 2 }
 0x4ce   : > { %v5176_v42 = vsel %vm2000_vm1, %v5092_v30, %v5175_v7  ;;  %v5115_v34 = vrot.slane %v5114_v53, 1  ;;  %v4999_v46 = vrot.slane %v4998_v5, 2  ;;  %v14960_v59 = vrot.slane %v14959_v58, 2 }
 0x4cf   : > { %v5104_v60 = vadd.f32 %v5103_v28, %v5102_v15  ;;  %v5072_v41 = vadd.f32 %v14958_v45, %v14957_v38  ;;  %v5011_v36 = vrot.slane %v5010_v19, 2  ;;  %v4988_v17 = vadd.f32 %v4987_v32, %v4986_v1  ;;  %v14962_v28 = vld [vmem:[#allocation129_spill] sm:$0xff] }
 0x4d0   : > { %v5084_v25 = vadd.f32 %v14960_v59, %v14959_v58  ;;  %v5095_v6 = vrot.slane %v14961_v23, 2  ;;  %v5116_v15 = vadd.f32 %v5115_v34, %v5114_v53  ;;  %v5000_v7 = vadd.f32 %v4999_v46, %v4998_v5  ;;  %v14964_v5 = vld [vmem:[#allocation132_spill] sm:$0xff] }
 0x4d1   : > { %v5177_v56 = vsel %vm2002_vm2, %v5104_v60, %v5176_v42  ;;  %v5073_v39 = vrot.slane %v5072_v41, 1  ;;  %v5012_v22 = vadd.f32 %v5011_v36, %v5010_v19  ;;  %v4989_v24 = vrot.slane %v4988_v17, 1  ;;  %v14965_v36 = vld [vmem:[#allocation135_spill] sm:$0xff] }
 0x4d2   : > { %v5085_v50 = vrot.slane %v5084_v25, 1  ;;  %v5096_v30 = vadd.f32 %v5095_v6, %v14961_v23  ;;  %v14963_v38 = vrot.slane %v14962_v28, 4  ;;  %v12731_v58 = vsel %vm2004_vm3, %v5116_v15, %v5177_v56 }
 0x4d3   : > { %v5074_v18 = vadd.f32 %v5073_v39, %v5072_v41  ;;  %v5001_v60 = vrot.slane %v5000_v7, 1  ;;  %v5013_v1 = vrot.slane %v5012_v22, 1  ;;  %v4990_v32 = vadd.f32 %v4989_v24, %v4988_v17  ;;  %v14967_v17 = vld [vmem:[#allocation136_spill] sm:$0xff] }
 0x4d4   : > { %v5106_v45 = vadd.f32 %v14963_v38, %v14962_v28  ;;  %v5086_v42 = vadd.f32 %v5085_v50, %v5084_v25  ;;  %v5097_v59 = vrot.slane %v5096_v30, 1  ;;  %v5117_v19 = vrot.slane %v14964_v5, 4  ;;  %v14969_v28 = vld [vmem:[#allocation137_spill] sm:$0xff] }
 0x4d5   : > { %v5002_v34 = vadd.f32 %v5001_v60, %v5000_v7  ;;  %v5014_v46 = vadd.f32 %v5013_v1, %v5012_v22  ;;  %v14966_v39 = vrot.slane %v14965_v36, 2  ;;  %8189 = vrcp.f32 %v4990_v32 }
 0x4d6   : > { %v5107_v53 = vrot.slane %v5106_v45, 2  ;;  %v5182_v41 = vsel %vm1998_vm0, %v5086_v42, %v5074_v18  ;;  %v5098_v6 = vadd.f32 %v5097_v59, %v5096_v30  ;;  %v5118_v15 = vadd.f32 %v5117_v19, %v14964_v5 }
 0x4d7   : > { %v5212_v23 = vadd.f32 %v14966_v39, %v14965_v36  ;;  %8191 = vrcp.f32 %v5002_v34  ;;  %v14968_v50 = vrot.slane %v14967_v17, 2  ;;  %v5235_v7 = vrot.slane %v14969_v28, 2  ;;  %v8184_v22 = vpop.eup %8183  ;;  %v14970_v34 = vld [vmem:[#allocation133_spill] sm:$0xff] }
 0x4d8   : > { %v5108_v56 = vadd.f32 %v5107_v53, %v5106_v45  ;;  %8193 = vrcp.f32 %v5014_v46  ;;  %v5119_v38 = vrot.slane %v5118_v15, 2  ;;  %v5183_v60 = vsel %vm2000_vm1, %v5098_v6, %v5182_v41  ;;  %v8186_v1 = vpop.eup %8185 }
 0x4d9   : > { %v5213_v25 = vrot.slane %v5212_v23, 1  ;;  %v5224_v24 = vadd.f32 %v14968_v50, %v14967_v17  ;;  %v12745_v30 = vmul.f32 %v8184_v22, %v14943_v52  ;;  %v5236_v32 = vadd.f32 %v5235_v7, %v14969_v28  ;;  %v8188_v59 = vpop.eup %8187  ;;  %v14972_v52 = vld [vmem:[#allocation48_spill] sm:$0xff] }
 0x4da   : > { %v5109_v18 = vrot.slane %v5108_v56, 1  ;;  %v12751_v53 = vmul.f32 %v8186_v1, %v14944_v20  ;;  %v5120_v19 = vadd.f32 %v5119_v38, %v5118_v15  ;;  %v14971_v46 = vrot.slane %v14970_v34, 4  ;;  %v14974_v38 = vld [vmem:[#allocation134_spill] sm:$0xff] }
 0x4db   : > { %v12747_v45 = vadd.f32 %v5213_v25, %v5212_v23  ;;  %v5225_v42 = vrot.slane %v5224_v24, 1  ;;  %v12757_v41 = vmul.f32 %v8188_v59, %v14945_v49  ;;  %v5057_v39 = vmul.f32 %v12745_v30, %v14972_v52  ;;  %v14973_v23 = vld [vmem:[#allocation131_spill] sm:$0xff] }
 0x4dc   : > { %v5110_v5 = vadd.f32 %v5109_v18, %v5108_v56  ;;  %v5246_v36 = vadd.f32 %v14971_v46, %v14970_v34  ;;  %v5203_v6 = vmul.f32 %v12745_v30, %v14973_v23  ;;  %v5059_v20 = vmul.f32 %v12751_v53, %v14972_v52 }
 0x4dd   : > { %v12763_v25 = vadd.f32 %v5225_v42, %v5224_v24  ;;  %v5121_v56 = vrot.slane %v5120_v19, 1  ;;  %v5205_v17 = vmul.f32 %v12751_v53, %v14973_v23  ;;  %v5061_v49 = vmul.f32 %v12757_v41, %v14972_v52 }
 0x4de   : > { %v5184_v15 = vsel %vm2002_vm2, %v5110_v5, %v5183_v60  ;;  %v5123_v50 = vrot.slane %v5057_v39, 4  ;;  %v5207_v28 = vmul.f32 %v12757_v41, %v14973_v23  ;;  %v5237_v7 = vrot.slane %v5236_v32, 1 }
 0x4df   : > { %v5135_v22 = vrot.slane %v5059_v20, 4  ;;  %v5122_v24 = vadd.f32 %v5121_v56, %v5120_v19  ;;  %v5247_v18 = vrot.slane %v5246_v36, 2  ;;  %v5257_v1 = vrot.slane %v14974_v38, 4 }
 0x4e0   : > { %v5124_v42 = vadd.f32 %v5123_v50, %v5057_v39  ;;  %v5147_v59 = vrot.slane %v5061_v49, 4  ;;  %v5238_v34 = vadd.f32 %v5237_v7, %v5236_v32  ;;  %v5269_v60 = vrot.slane %v5203_v6, 4 }
 0x4e1   : > { %v5136_v5 = vadd.f32 %v5135_v22, %v5059_v20  ;;  %v12776_v46 = vsel %vm2004_vm3, %v5122_v24, %v5184_v15  ;;  %v5248_v27 = vadd.f32 %v5247_v18, %v5246_v36  ;;  %v5258_v52 = vadd.f32 %v5257_v1, %v14974_v38 }
 0x4e2   : > { %v5125_v26 = vrot.slane %v5124_v42, 2  ;;  %v5148_v48 = vadd.f32 %v5147_v59, %v5061_v49  ;;  %v5270_v23 = vadd.f32 %v5269_v60, %v5203_v6  ;;  %v5281_v2 = vrot.slane %v5205_v17, 4  ;;  %v8190_v33 = vpop.eup %8189 }
 0x4e3   : > { %v5137_v54 = vrot.slane %v5136_v5, 2  ;;  %v5249_v19 = vrot.slane %v5248_v27, 1  ;;  %v5259_v56 = vrot.slane %v5258_v52, 2  ;;  %v5293_v37 = vrot.slane %v5207_v28, 4 }
 0x4e4   : > { %v5126_v39 = vadd.f32 %v5125_v26, %v5124_v42  ;;  %v5149_v50 = vrot.slane %v5148_v48, 2  ;;  %v5271_v32 = vrot.slane %v5270_v23, 2  ;;  %v5282_v7 = vadd.f32 %v5281_v2, %v5205_v17  ;;  %v8192_v20 = vpop.eup %8191  ;;  %v14975_v42 = vld [vmem:[#allocation55_spill] sm:$0xff] }
 0x4e5   : > { %v5138_v22 = vadd.f32 %v5137_v54, %v5136_v5  ;;  %v12780_v15 = vmul.f32 %v8190_v33, %v14954_v4  ;;  %v5250_v36 = vadd.f32 %v5249_v19, %v5248_v27  ;;  %v5260_v24 = vadd.f32 %v5259_v56, %v5258_v52  ;;  %v8194_v18 = vpop.eup %8193 }
 0x4e6   : > { %v5127_v49 = vrot.slane %v5126_v39, 1  ;;  %v5150_v6 = vadd.f32 %v5149_v50, %v5148_v48  ;;  %v12783_v38 = vmul.f32 %v8192_v20, %v14955_v11  ;;  %v5272_v1 = vadd.f32 %v5271_v32, %v5270_v23 }
 0x4e7   : > { %v5139_v59 = vrot.slane %v5138_v22, 1  ;;  %v12786_v26 = vmul.f32 %v8194_v18, %v14956_v10  ;;  %v5058_v2 = vmul.f32 %v12780_v15, %v14975_v42  ;;  %v5261_v54 = vrot.slane %v5260_v24, 1 }
 0x4e8   : > { %v5128_v17 = vadd.f32 %v5127_v49, %v5126_v39  ;;  %v5151_v33 = vrot.slane %v5150_v6, 1  ;;  %v5060_v27 = vmul.f32 %v12783_v38, %v14975_v42  ;;  %v5273_v4 = vrot.slane %v5272_v1, 1 }
 0x4e9   : > { %v5140_v60 = vadd.f32 %v5139_v59, %v5138_v22  ;;  %v5062_v48 = vmul.f32 %v12786_v26, %v14975_v42  ;;  %v5129_v11 = vrot.slane %v5058_v2, 4  ;;  %v5262_v5 = vadd.f32 %v5261_v54, %v5260_v24 }
 0x4ea   : > { %v5152_v52 = vadd.f32 %v5151_v33, %v5150_v6  ;;  %v5179_v10 = vsel %vm2006_vm4, %v5128_v17, %v12731_v58  ;;  %v5141_v23 = vrot.slane %v5060_v27, 4  ;;  %v5274_v19 = vadd.f32 %v5273_v4, %v5272_v1 }
 0x4eb   : > { %v5180_v56 = vsel %vm2008_vm5, %v5140_v60, %v5179_v10  ;;  %v5130_v39 = vadd.f32 %v5129_v11, %v5058_v2  ;;  %v5153_v50 = vrot.slane %v5062_v48, 4  ;;  %v5283_v32 = vrot.slane %v5282_v7, 2 }
 0x4ec   : > { %v5181_v20 = vsel %vm2010_vm6, %v5152_v52, %v5180_v56  ;;  %v5142_v18 = vadd.f32 %v5141_v23, %v5060_v27  ;;  %v5294_v22 = vadd.f32 %v5293_v37, %v5207_v28  ;;  %v5321_v49 = vsel %vm1998_vm0, %v12763_v25, %v12747_v45 }
 0x4ed   : > { %7256 = vxpose.xlu0.b32.cont [9/16] %v5181_v20, 128  ;;  %v5131_v24 = vrot.slane %v5130_v39, 2  ;;  %v5154_v6 = vadd.f32 %v5153_v50, %v5062_v48  ;;  %v5284_v59 = vadd.f32 %v5283_v32, %v5282_v7  ;;  %v5322_v58 = vsel %vm2000_vm1, %v5238_v34, %v5321_v49 }
 0x4ee   : > { %v5143_v1 = vrot.slane %v5142_v18, 2  ;;  %v5295_v42 = vrot.slane %v5294_v22, 2  ;;  %v5323_v2 = vsel %vm2002_vm2, %v5250_v36, %v5322_v58  ;;  %v5204_v54 = vmul.f32 %v12780_v15, %v11899_v55 }
 0x4ef   : > { %v5132_v17 = vadd.f32 %v5131_v24, %v5130_v39  ;;  %v5155_v33 = vrot.slane %v5154_v6, 2  ;;  %v5285_v37 = vrot.slane %v5284_v59, 1  ;;  %v5324_v28 = vsel %vm2004_vm3, %v5262_v5, %v5323_v2 }
 0x4f0   : > { %v5144_v27 = vadd.f32 %v5143_v1, %v5142_v18  ;;  %v5296_v45 = vadd.f32 %v5295_v42, %v5294_v22  ;;  %v5325_v25 = vsel %vm2006_vm4, %v5274_v19, %v5324_v28  ;;  %v5206_v7 = vmul.f32 %v12783_v38, %v11899_v55 }
 0x4f1   : > { %v5133_v34 = vrot.slane %v5132_v17, 1  ;;  %v5156_v4 = vadd.f32 %v5155_v33, %v5154_v6  ;;  %v5286_v60 = vadd.f32 %v5285_v37, %v5284_v59  ;;  %v5208_v36 = vmul.f32 %v12786_v26, %v11899_v55 }
 0x4f2   : > { %v5145_v48 = vrot.slane %v5144_v27, 1  ;;  %v5297_v11 = vrot.slane %v5296_v45, 1  ;;  %v14976_v52 = vrot.slane %v11920_v12, 2  ;;  %v14977_v5 = vrot.slane %v11922_v14, 2 }
 0x4f3   : > { %v5134_v19 = vadd.f32 %v5133_v34, %v5132_v17  ;;  %v5157_v56 = vrot.slane %v5156_v4, 1  ;;  %v5326_v39 = vsel %vm2008_vm5, %v5286_v60, %v5325_v25  ;;  %v5241_v50 = vrot.slane %v11924_v47, 2 }
 0x4f4   : > { %v5218_v10 = vadd.f32 %v14976_v52, %v11920_v12  ;;  %v5230_v23 = vadd.f32 %v14977_v5, %v11922_v14  ;;  %v5146_v32 = vadd.f32 %v5145_v48, %v5144_v27  ;;  %v5298_v20 = vadd.f32 %v5297_v11, %v5296_v45 }
 0x4f5   : > { %v5158_v22 = vadd.f32 %v5157_v56, %v5156_v4  ;;  %v5186_v49 = vsel %vm2006_vm4, %v5134_v19, %v12776_v46  ;;  %v5242_v12 = vadd.f32 %v5241_v50, %v11924_v47  ;;  %v14978_v24 = vrot.slane %v11911_v8, 4 }
 0x4f6   : > { %v5219_v18 = vrot.slane %v5218_v10, 1  ;;  %v5231_v55 = vrot.slane %v5230_v23, 1  ;;  %v5187_v6 = vsel %vm2008_vm5, %v5146_v32, %v5186_v49  ;;  %v5327_v59 = vsel %vm2010_vm6, %v5298_v20, %v5326_v39  ;;  %v14981_v32 = vld [vmem:[#allocation23_spill] sm:$0xff] }
 0x4f7   : > { %v5252_v14 = vadd.f32 %v14978_v24, %v11911_v8  ;;  %v5188_v42 = vsel %vm2010_vm6, %v5158_v22, %v5187_v6  ;;  %7257 = vxpose.xlu0.b32.cont [10/16] %v5327_v59, 128  ;;  %v5243_v2 = vrot.slane %v5242_v12, 1  ;;  %v5263_v33 = vrot.slane %v11915_v63, 4 }
 0x4f8   : > { %v5220_v58 = vadd.f32 %v5219_v18, %v5218_v10  ;;  %v5232_v1 = vadd.f32 %v5231_v55, %v5230_v23  ;;  %7288 = vxpose.xlu1.b32.cont [9/16] %v5188_v42, 128  ;;  %v5275_v46 = vrot.slane %v5204_v54, 4  ;;  %v5287_v47 = vrot.slane %v5206_v7, 4 }
 0x4f9   : > { %v5253_v17 = vrot.slane %v5252_v14, 2  ;;  %v5299_v37 = vrot.slane %v5208_v36, 4  ;;  %v5244_v8 = vadd.f32 %v5243_v2, %v5242_v12  ;;  %v5264_v45 = vadd.f32 %v5263_v33, %v11915_v63 }
 0x4fa   : > { %v5328_v28 = vsel %vm1998_vm0, %v5232_v1, %v5220_v58  ;;  %v5349_v25 = vmul.f32 %v12745_v30, %v11966_v9  ;;  %v5276_v34 = vadd.f32 %v5275_v46, %v5204_v54  ;;  %v5288_v4 = vadd.f32 %v5287_v47, %v5206_v7 }
 0x4fb   : > { %v5254_v27 = vadd.f32 %v5253_v17, %v5252_v14  ;;  %v5300_v60 = vadd.f32 %v5299_v37, %v5208_v36  ;;  %v5351_v48 = vmul.f32 %v12751_v53, %v11966_v9  ;;  %v5265_v52 = vrot.slane %v5264_v45, 2 }
 0x4fc   : > { %v5329_v10 = vsel %vm2000_vm1, %v5244_v8, %v5328_v28  ;;  %v5353_v5 = vmul.f32 %v12757_v41, %v11966_v9  ;;  %v5277_v23 = vrot.slane %v5276_v34, 2  ;;  %v5289_v19 = vrot.slane %v5288_v4, 2  ;;  %v14984_v28 = vld [vmem:[#allocation25_spill] sm:$0xff] }
 0x4fd   : > { %v5255_v11 = vrot.slane %v5254_v27, 1  ;;  %v5301_v56 = vrot.slane %v5300_v60, 2  ;;  %v14979_v63 = vrot.slane %v11988_v31, 2  ;;  %v5266_v7 = vadd.f32 %v5265_v52, %v5264_v45 }
 0x4fe   : > { %v14980_v36 = vrot.slane %v11993_v3, 2  ;;  %v5381_v20 = vrot.slane %v14981_v32, 2  ;;  %v5278_v18 = vadd.f32 %v5277_v23, %v5276_v34  ;;  %v5290_v55 = vadd.f32 %v5289_v19, %v5288_v4 }
 0x4ff   : > { %v5358_v39 = vadd.f32 %v14979_v63, %v11988_v31  ;;  %v5256_v54 = vadd.f32 %v5255_v11, %v5254_v27  ;;  %v5302_v22 = vadd.f32 %v5301_v56, %v5300_v60  ;;  %v5267_v9 = vrot.slane %v5266_v7, 1 }
 0x500   : > { %v5370_v50 = vadd.f32 %v14980_v36, %v11993_v3  ;;  %v5382_v14 = vadd.f32 %v5381_v20, %v14981_v32  ;;  %v5279_v6 = vrot.slane %v5278_v18, 1  ;;  %v5291_v31 = vrot.slane %v5290_v55, 1  ;;  %v14982_v3 = vld [vmem:[#allocation22_spill] sm:$0xff] }
 0x501   : > { %v5359_v49 = vrot.slane %v5358_v39, 1  ;;  %v5330_v12 = vsel %vm2002_vm2, %v5256_v54, %v5329_v10  ;;  %v5303_v59 = vrot.slane %v5302_v22, 1  ;;  %v5268_v1 = vadd.f32 %v5267_v9, %v5266_v7 }
 0x502   : > { %v5371_v24 = vrot.slane %v5370_v50, 1  ;;  %v5383_v2 = vrot.slane %v5382_v14, 1  ;;  %v14983_v17 = vrot.slane %v14982_v3, 4  ;;  %v5280_v46 = vadd.f32 %v5279_v6, %v5278_v18  ;;  %v14985_v18 = vld [vmem:[#allocation41_spill] sm:$0xff] }
 0x503   : > { %v5360_v58 = vadd.f32 %v5359_v49, %v5358_v39  ;;  %v5292_v47 = vadd.f32 %v5291_v31, %v5290_v55  ;;  %v5304_v37 = vadd.f32 %v5303_v59, %v5302_v22  ;;  %v5403_v8 = vrot.slane %v14984_v28, 4 }
 0x504   : > { %v5372_v42 = vadd.f32 %v5371_v24, %v5370_v50  ;;  %v5392_v33 = vadd.f32 %v14983_v17, %v14982_v3  ;;  %v5331_v27 = vsel %vm2004_vm3, %v5268_v1, %v5330_v12  ;;  %v5384_v45 = vadd.f32 %v5383_v2, %v5382_v14  ;;  %v14988_v1 = vld [vmem:[#allocation83_spill] sm:$0xff] }
 0x505   : > { %v5415_v4 = vrot.slane %v5349_v25, 4  ;;  %v5332_v60 = vsel %vm2006_vm4, %v5280_v46, %v5331_v27  ;;  %v5404_v11 = vadd.f32 %v5403_v8, %v14984_v28  ;;  %v5427_v52 = vrot.slane %v5351_v48, 4  ;;  %v14990_v46 = vld [vmem:[#allocation43_spill] sm:$0xff] }
 0x506   : > { %v5393_v34 = vrot.slane %v5392_v33, 2  ;;  %v5439_v10 = vrot.slane %v5353_v5, 4  ;;  %v5333_v23 = vsel %vm2008_vm5, %v5292_v47, %v5332_v60  ;;  %v5467_v63 = vsel %vm1998_vm0, %v5372_v42, %v5360_v58  ;;  %v14991_v60 = vld [vmem:[#allocation81_spill] sm:$0xff] }
 0x507   : > { %v5416_v56 = vadd.f32 %v5415_v4, %v5349_v25  ;;  %v5334_v39 = vsel %vm2010_vm6, %v5304_v37, %v5333_v23  ;;  %v5405_v54 = vrot.slane %v5404_v11, 2  ;;  %v5428_v7 = vadd.f32 %v5427_v52, %v5351_v48 }
 0x508   : > { %v5394_v19 = vadd.f32 %v5393_v34, %v5392_v33  ;;  %v5440_v36 = vadd.f32 %v5439_v10, %v5353_v5  ;;  %7289 = vxpose.xlu1.b32.cont [10/16] %v5334_v39, 128  ;;  %v5468_v20 = vsel %vm2000_vm1, %v5384_v45, %v5467_v63  ;;  %v5350_v55 = vmul.f32 %v12780_v15, %v14985_v18  ;;  %v14986_v5 = vld [vmem:[#allocation82_spill] sm:$0xff] }
 0x509   : > { %v5417_v32 = vrot.slane %v5416_v56, 2  ;;  %v5406_v22 = vadd.f32 %v5405_v54, %v5404_v11  ;;  %v5429_v49 = vrot.slane %v5428_v7, 2  ;;  %v5352_v25 = vmul.f32 %v12783_v38, %v14985_v18 }
 0x50a   : > { %v5395_v50 = vrot.slane %v5394_v19, 1  ;;  %v5441_v9 = vrot.slane %v5440_v36, 2  ;;  %v5354_v48 = vmul.f32 %v12786_v26, %v14985_v18  ;;  %v14987_v14 = vrot.slane %v14986_v5, 2 }
 0x50b   : > { %v5418_v24 = vadd.f32 %v5417_v32, %v5416_v56  ;;  %v5407_v31 = vrot.slane %v5406_v22, 1  ;;  %v5430_v59 = vadd.f32 %v5429_v49, %v5428_v7  ;;  %v14989_v42 = vrot.slane %v14988_v1, 2  ;;  %v14993_v7 = vld [vmem:[#allocation88_spill] sm:$0xff] }
 0x50c   : > { %v5396_v12 = vadd.f32 %v5395_v50, %v5394_v19  ;;  %v5364_v6 = vadd.f32 %v14987_v14, %v14986_v5  ;;  %v5442_v58 = vadd.f32 %v5441_v9, %v5440_v36  ;;  %v5387_v47 = vrot.slane %v14990_v46, 2 }
 0x50d   : > { %v5376_v2 = vadd.f32 %v14989_v42, %v14988_v1  ;;  %v5419_v3 = vrot.slane %v5418_v24, 1  ;;  %v5408_v37 = vadd.f32 %v5407_v31, %v5406_v22  ;;  %v5431_v28 = vrot.slane %v5430_v59, 1  ;;  %v14994_v1 = vld [vmem:[#allocation87_spill] sm:$0xff] }
 0x50e   : > { %v5469_v17 = vsel %vm2002_vm2, %v5396_v12, %v5468_v20  ;;  %v5365_v33 = vrot.slane %v5364_v6, 1  ;;  %v5443_v8 = vrot.slane %v5442_v58, 1  ;;  %v5388_v4 = vadd.f32 %v5387_v47, %v14990_v46 }
 0x50f   : > { %v5377_v27 = vrot.slane %v5376_v2, 1  ;;  %v5420_v45 = vadd.f32 %v5419_v3, %v5418_v24  ;;  %v14992_v11 = vrot.slane %v14991_v60, 4  ;;  %v5432_v10 = vadd.f32 %v5431_v28, %v5430_v59 }
 0x510   : > { %v5366_v34 = vadd.f32 %v5365_v33, %v5364_v6  ;;  %v5444_v23 = vadd.f32 %v5443_v8, %v5442_v58  ;;  %v5470_v19 = vsel %vm2004_vm3, %v5408_v37, %v5469_v17  ;;  %v5389_v39 = vrot.slane %v5388_v4, 1 }
 0x511   : > { %v5398_v52 = vadd.f32 %v14992_v11, %v14991_v60  ;;  %v5378_v56 = vadd.f32 %v5377_v27, %v5376_v2  ;;  %v5471_v63 = vsel %vm2006_vm4, %v5420_v45, %v5470_v19  ;;  %v5409_v36 = vrot.slane %v14993_v7, 4  ;;  %v14997_v45 = vld [vmem:[#allocation85_spill] sm:$0xff] }
 0x512   : > { %v5472_v50 = vsel %vm2008_vm5, %v5432_v10, %v5471_v63  ;;  %v5421_v32 = vrot.slane %v5350_v55, 4  ;;  %v5433_v20 = vrot.slane %v5352_v25, 4  ;;  %v5445_v18 = vrot.slane %v5354_v48, 4  ;;  %v14999_v11 = vld [vmem:[#allocation45_spill] sm:$0xff] }
 0x513   : > { %v5399_v54 = vrot.slane %v5398_v52, 2  ;;  %v5473_v22 = vsel %vm2010_vm6, %v5444_v23, %v5472_v50  ;;  %v5390_v49 = vadd.f32 %v5389_v39, %v5388_v4  ;;  %v5410_v12 = vadd.f32 %v5409_v36, %v14993_v7 }
 0x514   : > { %7258 = vxpose.xlu0.b32.cont [11/16] %v5473_v22, 128  ;;  %v5422_v24 = vadd.f32 %v5421_v32, %v5350_v55  ;;  %v5434_v5 = vadd.f32 %v5433_v20, %v5352_v25  ;;  %v5446_v14 = vadd.f32 %v5445_v18, %v5354_v48  ;;  %v5474_v6 = vsel %vm1998_vm0, %v5378_v56, %v5366_v34  ;;  %v14995_v25 = vld [vmem:[#allocation84_spill] sm:$0xff] }
 0x515   : > { %v5400_v9 = vadd.f32 %v5399_v54, %v5398_v52  ;;  %v5411_v59 = vrot.slane %v5410_v12, 2  ;;  %v5475_v58 = vsel %vm2000_vm1, %v5390_v49, %v5474_v6  ;;  %v5495_v42 = vmul.f32 %v12745_v30, %v14994_v1  ;;  %v15000_v54 = vld [vmem:[#allocation90_spill] sm:$0xff] }
 0x516   : > { %v5423_v2 = vrot.slane %v5422_v24, 2  ;;  %v5435_v3 = vrot.slane %v5434_v5, 2  ;;  %v5447_v17 = vrot.slane %v5446_v14, 2  ;;  %v5497_v33 = vmul.f32 %v12751_v53, %v14994_v1 }
 0x517   : > { %v5401_v31 = vrot.slane %v5400_v9, 1  ;;  %v5412_v47 = vadd.f32 %v5411_v59, %v5410_v12  ;;  %v5499_v55 = vmul.f32 %v12757_v41, %v14994_v1  ;;  %v14996_v48 = vrot.slane %v14995_v25, 2  ;;  %v15002_v12 = vld [vmem:[#allocation92_spill] sm:$0xff] }
 0x518   : > { %v5424_v28 = vadd.f32 %v5423_v2, %v5422_v24  ;;  %v5436_v8 = vadd.f32 %v5435_v3, %v5434_v5  ;;  %v5448_v27 = vadd.f32 %v5447_v17, %v5446_v14  ;;  %v14998_v30 = vrot.slane %v14997_v45, 2 }
 0x519   : > { %v5402_v46 = vadd.f32 %v5401_v31, %v5400_v9  ;;  %v5504_v37 = vadd.f32 %v14996_v48, %v14995_v25  ;;  %v5413_v4 = vrot.slane %v5412_v47, 1  ;;  %v5527_v52 = vrot.slane %v14999_v11, 2 }
 0x51a   : > { %v5516_v34 = vadd.f32 %v14998_v30, %v14997_v45  ;;  %v5425_v10 = vrot.slane %v5424_v28, 1  ;;  %v5437_v23 = vrot.slane %v5436_v8, 1  ;;  %v5449_v41 = vrot.slane %v5448_v27, 1 }
 0x51b   : > { %v5476_v60 = vsel %vm2002_vm2, %v5402_v46, %v5475_v58  ;;  %v5505_v53 = vrot.slane %v5504_v37, 1  ;;  %v5414_v56 = vadd.f32 %v5413_v4, %v5412_v47  ;;  %v5528_v39 = vadd.f32 %v5527_v52, %v14999_v11  ;;  %v15004_v52 = vld [vmem:[#allocation89_spill] sm:$0xff] }
 0x51c   : > { %v5517_v19 = vrot.slane %v5516_v34, 1  ;;  %v15001_v7 = vrot.slane %v15000_v54, 4  ;;  %v5426_v50 = vadd.f32 %v5425_v10, %v5424_v28  ;;  %v5438_v32 = vadd.f32 %v5437_v23, %v5436_v8  ;;  %v15003_v28 = vld [vmem:[#allocation93_spill] sm:$0xff] }
 0x51d   : > { %v5506_v63 = vadd.f32 %v5505_v53, %v5504_v37  ;;  %v5450_v20 = vadd.f32 %v5449_v41, %v5448_v27  ;;  %v5477_v22 = vsel %vm2004_vm3, %v5414_v56, %v5476_v60  ;;  %v5529_v49 = vrot.slane %v5528_v39, 1 }
 0x51e   : > { %v5538_v36 = vadd.f32 %v15001_v7, %v15000_v54  ;;  %v5518_v18 = vadd.f32 %v5517_v19, %v5516_v34  ;;  %v5549_v24 = vrot.slane %v15002_v12, 4  ;;  %v5478_v5 = vsel %vm2006_vm4, %v5426_v50, %v5477_v22  ;;  %v15006_v19 = vld [vmem:[#allocation91_spill] sm:$0xff] }
 0x51f   : > { %v5561_v14 = vrot.slane %v5495_v42, 4  ;;  %v5573_v6 = vrot.slane %v5497_v33, 4  ;;  %v5585_v31 = vrot.slane %v5499_v55, 4  ;;  %v5479_v59 = vsel %vm2008_vm5, %v5438_v32, %v5478_v5 }
 0x520   : > { %v5539_v9 = vrot.slane %v5538_v36, 2  ;;  %v5530_v58 = vadd.f32 %v5529_v49, %v5528_v39  ;;  %v5550_v2 = vadd.f32 %v5549_v24, %v15002_v12  ;;  %v5480_v3 = vsel %vm2010_vm6, %v5450_v20, %v5479_v59  ;;  %v15008_v39 = vld [vmem:[#allocation80_spill] sm:$0xff] }
 0x521   : > { %v5562_v17 = vadd.f32 %v5561_v14, %v5495_v42  ;;  %v5574_v46 = vadd.f32 %v5573_v6, %v5497_v33  ;;  %v5586_v47 = vadd.f32 %v5585_v31, %v5499_v55  ;;  %7290 = vxpose.xlu1.b32.cont [11/16] %v5480_v3, 128  ;;  %v5613_v37 = vsel %vm1998_vm0, %v5518_v18, %v5506_v63  ;;  %v15009_v18 = vld [vmem:[#allocation95_spill] sm:$0xff]  ;;  %v7343_v14 = vld [vmem:[%s13513_s2 + $0xf8] sm:$0xff]  ;;  %v7341_v31 = vld [vmem:[%s13513_s2 + $0xe8] sm:$0xff] }
 0x522   : > { %v5540_v1 = vadd.f32 %v5539_v9, %v5538_v36  ;;  %v5551_v48 = vrot.slane %v5550_v2, 2  ;;  %v5496_v8 = vmul.f32 %v12780_v15, %v15003_v28  ;;  %v5614_v34 = vsel %vm2000_vm1, %v5530_v58, %v5613_v37  ;;  %v7342_v6 = vld [vmem:[%s13513_s2 + $0xf0] sm:$0xff]  ;;  %7356 = vmatprep.subr.mxu1 %v7343_v14  ;;  %v7340_v3 = vld [vmem:[%s13513_s2 + $0xe0] sm:$0xff]  ;;  %v7339_v37 = vld [vmem:[%s13513_s2 + $0xd8] sm:$0xff] }
 0x523   : > { %v5563_v27 = vrot.slane %v5562_v17, 2  ;;  %v5575_v45 = vrot.slane %v5574_v46, 2  ;;  %v5587_v30 = vrot.slane %v5586_v47, 2  ;;  %v5498_v42 = vmul.f32 %v12783_v38, %v15003_v28  ;;  %7357 = vmatpush1.msra.mxu1 %v7342_v6  ;;  %v7332_v14 = vld [vmem:[%s13513_s2 + $0xa0] sm:$0xff] }
 0x524   : > { %v5541_v25 = vrot.slane %v5540_v1, 1  ;;  %v5552_v60 = vadd.f32 %v5551_v48, %v5550_v2  ;;  %v5500_v33 = vmul.f32 %v12786_v26, %v15003_v28  ;;  %v15005_v10 = vrot.slane %v15004_v52, 2  ;;  %7358 = vmatprep.subr.mxu1 %v7341_v31 }
 0x525   : > { %v5564_v55 = vadd.f32 %v5563_v27, %v5562_v17  ;;  %v5576_v53 = vadd.f32 %v5575_v45, %v5574_v46  ;;  %v5588_v11 = vadd.f32 %v5587_v30, %v5586_v47  ;;  %v15007_v56 = vrot.slane %v15006_v19, 2  ;;  %v15011_v46 = vld [vmem:[#allocation100_spill] sm:$0xff]  ;;  %7359 = vmatpush1.msra.mxu1 %v7340_v3 }
 0x526   : > { %v5542_v4 = vadd.f32 %v5541_v25, %v5540_v1  ;;  %v5510_v15 = vadd.f32 %v15005_v10, %v15004_v52  ;;  %v5553_v23 = vrot.slane %v5552_v60, 1  ;;  %v5533_v54 = vrot.slane %v15008_v39, 2  ;;  %7360 = vmatprep.subr.mxu1 %v7339_v37 }
 0x527   : > { %v5522_v63 = vadd.f32 %v15007_v56, %v15006_v19  ;;  %v5565_v38 = vrot.slane %v5564_v55, 1  ;;  %v5577_v7 = vrot.slane %v5576_v53, 1  ;;  %v5589_v36 = vrot.slane %v5588_v11, 1  ;;  %v7336_v19 = vld [vmem:[%s13513_s2 + $0xc0] sm:$0xff] }
 0x528   : > { %v5615_v41 = vsel %vm2002_vm2, %v5542_v4, %v5614_v34  ;;  %v5511_v26 = vrot.slane %v5510_v15, 1  ;;  %v5554_v50 = vadd.f32 %v5553_v23, %v5552_v60  ;;  %v5534_v20 = vadd.f32 %v5533_v54, %v15008_v39  ;;  %v7338_v34 = vld [vmem:[%s13513_s2 + $0xd0] sm:$0xff]  ;;  %v15012_v23 = vld [vmem:[#allocation69_spill] sm:$0xff]  ;;  %v7335_v39 = vld [vmem:[%s13513_s2 + $0xb8] sm:$0xff] }
 0x529   : > { %v5523_v32 = vrot.slane %v5522_v63, 1  ;;  %v15010_v22 = vrot.slane %v15009_v18, 4  ;;  %v5566_v9 = vadd.f32 %v5565_v38, %v5564_v55  ;;  %v5578_v12 = vadd.f32 %v5577_v7, %v5576_v53  ;;  %7361 = vmatpush1.msra.mxu1 %v7338_v34  ;;  %v15013_v7 = vld [vmem:[#allocation71_spill] sm:$0xff] }
 0x52a   : > { %v5590_v24 = vadd.f32 %v5589_v36, %v5588_v11  ;;  %v5512_v5 = vadd.f32 %v5511_v26, %v5510_v15  ;;  %v5616_v59 = vsel %vm2004_vm3, %v5554_v50, %v5615_v41  ;;  %v5535_v1 = vrot.slane %v5534_v20, 1  ;;  %v7337_v11 = vld [vmem:[%s13513_s2 + $0xc8] sm:$0xff]  ;;  %v7334_v26 = vld [vmem:[%s13513_s2 + $0xb0] sm:$0xff] }
 0x52b   : > { %v5544_v49 = vadd.f32 %v15010_v22, %v15009_v18  ;;  %v5524_v58 = vadd.f32 %v5523_v32, %v5522_v63  ;;  %v5617_v17 = vsel %vm2006_vm4, %v5566_v9, %v5616_v59  ;;  %v5555_v47 = vrot.slane %v15011_v46, 4  ;;  %7362 = vmatprep.subr.mxu1 %v7337_v11  ;;  %v15014_v18 = vld [vmem:[#allocation72_spill] sm:$0xff] }
 0x52c   : > { %v5567_v25 = vrot.slane %v5496_v8, 4  ;;  %v5579_v48 = vrot.slane %v5498_v42, 4  ;;  %v5618_v28 = vsel %vm2008_vm5, %v5578_v12, %v5617_v17  ;;  %v5536_v27 = vadd.f32 %v5535_v1, %v5534_v20  ;;  %7363 = vmatpush1.msra.mxu1 %v7336_v19  ;;  %v7331_v1 = vld [vmem:[%s13513_s2 + $0x98] sm:$0xff]  ;;  %v15019_v19 = vld [vmem:[#allocation66_spill] sm:$0xff] }
 0x52d   : > { %v5545_v2 = vrot.slane %v5544_v49, 2  ;;  %v5591_v30 = vrot.slane %v5500_v33, 4  ;;  %v5619_v4 = vsel %vm2010_vm6, %v5590_v24, %v5618_v28  ;;  %v5556_v60 = vadd.f32 %v5555_v47, %v15011_v46  ;;  %7364 = vmatprep.subr.mxu1 %v7335_v39  ;;  %v15015_v46 = vld [vmem:[#allocation99_spill] sm:$0xff] }
 0x52e   : > { %v5568_v55 = vadd.f32 %v5567_v25, %v5496_v8  ;;  %v5580_v53 = vadd.f32 %v5579_v48, %v5498_v42  ;;  %7259 = vxpose.xlu0.b32.cont [12/16] %v5619_v4, 128  ;;  %v5620_v15 = vsel %vm1998_vm0, %v5524_v58, %v5512_v5  ;;  %v6564_v41 = vrot.slane %v15012_v23, 4  ;;  %7365 = vmatpush1.msra.mxu1 %v7334_v26  ;;  %v7330_v48 = vld [vmem:[%s13513_s2 + $0x90] sm:$0xff] }
 0x52f   : > { %v5546_v45 = vadd.f32 %v5545_v2, %v5544_v49  ;;  %v5592_v10 = vadd.f32 %v5591_v30, %v5500_v33  ;;  %v5557_v56 = vrot.slane %v5556_v60, 2  ;;  %v5621_v63 = vsel %vm2000_vm1, %v5536_v27, %v5620_v15  ;;  %v7333_v49 = vld [vmem:[%s13513_s2 + $0xa8] sm:$0xff] }
 0x530   : > { %v5569_v8 = vrot.slane %v5568_v55, 2  ;;  %v5581_v42 = vrot.slane %v5580_v53, 2  ;;  %v6565_v38 = vadd.f32 %v15012_v23, %v6564_v41  ;;  %v6576_v36 = vrot.slane %v15013_v7, 4  ;;  %7366 = vmatprep.subr.mxu1 %v7333_v49  ;;  %v7329_v30 = vld [vmem:[%s13513_s2 + $0x88] sm:$0xff]  ;;  %v15020_v49 = vld [vmem:[#allocation103_spill] sm:$0xff] }
 0x531   : > { %v5547_v52 = vrot.slane %v5546_v45, 1  ;;  %v5593_v54 = vrot.slane %v5592_v10, 2  ;;  %v5558_v50 = vadd.f32 %v5557_v56, %v5556_v60  ;;  %v6588_v22 = vrot.slane %v15014_v18, 4  ;;  %7367 = vmatpush1.msra.mxu1 %v7332_v14 }
 0x532   : > { %v5570_v32 = vadd.f32 %v5569_v8, %v5568_v55  ;;  %v5582_v20 = vadd.f32 %v5581_v42, %v5580_v53  ;;  %v6566_v24 = vrot.slane %v6565_v38, 2  ;;  %v6577_v5 = vadd.f32 %v15013_v7, %v6576_v36  ;;  %7368 = vmatprep.subr.mxu1 %v7331_v1  ;;  %v7328_v53 = vld [vmem:[%s13513_s2 + $0x80] sm:$0xff]  ;;  %v7327_v8 = vld [vmem:[%s13513_s2 + $0x78] sm:$0xff] }
 0x533   : > { %v5548_v33 = vadd.f32 %v5547_v52, %v5546_v45  ;;  %v5594_v9 = vadd.f32 %v5593_v54, %v5592_v10  ;;  %v5559_v6 = vrot.slane %v5558_v50, 1  ;;  %v6589_v58 = vadd.f32 %v15014_v18, %v6588_v22  ;;  %v15017_v10 = vld [vmem:[#allocation96_spill] sm:$0xff]  ;;  %7369 = vmatpush1.msra.mxu1 %v7330_v48  ;;  %v7326_v54 = vld [vmem:[%s13513_s2 + $0x70] sm:$0xff] }
 0x534   : > { %v5571_v31 = vrot.slane %v5570_v32, 1  ;;  %v5583_v59 = vrot.slane %v5582_v20, 1  ;;  %v6567_v3 = vadd.f32 %v6566_v24, %v6565_v38  ;;  %v6578_v17 = vrot.slane %v6577_v5, 2  ;;  %7370 = vmatprep.subr.mxu1 %v7329_v30  ;;  %v7324_v24 = vld [vmem:[%s13513_s2 + $0x60] sm:$0xff] }
 0x535   : > { %v5622_v12 = vsel %vm2002_vm2, %v5548_v33, %v5621_v63  ;;  %v5595_v2 = vrot.slane %v5594_v9, 1  ;;  %v15016_v47 = vrot.slane %v15015_v46, 2  ;;  %v5560_v37 = vadd.f32 %v5559_v6, %v5558_v50  ;;  %7371 = vmatpush1.msra.mxu1 %v7328_v53 }
 0x536   : > { %v5572_v28 = vadd.f32 %v5571_v31, %v5570_v32  ;;  %v5584_v27 = vadd.f32 %v5583_v59, %v5582_v20  ;;  %v6590_v45 = vrot.slane %v6589_v58, 2  ;;  %v6568_v4 = vrot.slane %v6567_v3, 1  ;;  %v7325_v32 = vld [vmem:[%s13513_s2 + $0x68] sm:$0xff]  ;;  %7372 = vmatprep.subr.mxu1 %v7327_v8 }
 0x537   : > { %v6651_v25 = vadd.f32 %v15016_v47, %v15015_v46  ;;  %v5596_v34 = vadd.f32 %v5595_v2, %v5594_v9  ;;  %v6579_v60 = vadd.f32 %v6578_v17, %v6577_v5  ;;  %v5623_v11 = vsel %vm2004_vm3, %v5560_v37, %v5622_v12  ;;  %v15022_v31 = vld [vmem:[#allocation102_spill] sm:$0xff]  ;;  %7373 = vmatpush1.msra.mxu1 %v7326_v54  ;;  %v15023_v2 = vld [vmem:[#allocation77_spill] sm:$0xff]  ;;  %v15024_v17 = vld [vmem:[#allocation79_spill] sm:$0xff] }
 0x538   : > { %v6591_v52 = vadd.f32 %v6590_v45, %v6589_v58  ;;  %v15018_v15 = vrot.slane %v15017_v10, 2  ;;  %v6674_v56 = vrot.slane %v15019_v19, 2  ;;  %v5624_v42 = vsel %vm2006_vm4, %v5572_v28, %v5623_v11  ;;  %v7323_v58 = vld [vmem:[%s13513_s2 + $0x58] sm:$0xff]  ;;  %7374 = vmatprep.subr.mxu1 %v7325_v32  ;;  %v7322_v47 = vld [vmem:[%s13513_s2 + $0x50] sm:$0xff]  ;;  %v7321_v28 = vld [vmem:[%s13513_s2 + $0x48] sm:$0xff] }
 0x539   : > { %v6652_v55 = vrot.slane %v6651_v25, 1  ;;  %v6569_v63 = vadd.f32 %v6568_v4, %v6567_v3  ;;  %v6580_v39 = vrot.slane %v6579_v60, 1  ;;  %v5625_v38 = vsel %vm2008_vm5, %v5584_v27, %v5624_v42  ;;  %7375 = vmatpush1.msra.mxu1 %v7324_v24  ;;  %v15026_v11 = vld [vmem:[#allocation86_spill] sm:$0xff] }
 0x53a   : > { %v6663_v41 = vadd.f32 %v15018_v15, %v15017_v10  ;;  %v6592_v36 = vrot.slane %v6591_v52, 1  ;;  %v6675_v50 = vadd.f32 %v6674_v56, %v15019_v19  ;;  %v5626_v20 = vsel %vm2010_vm6, %v5596_v34, %v5625_v38  ;;  %v15025_v34 = vld [vmem:[#allocation47_spill] sm:$0xff]  ;;  %7376 = vmatprep.subr.mxu1 %v7323_v58  ;;  %v15028_v15 = vld [vmem:[#allocation110_spill] sm:$0xff]  ;;  %v7319_v56 = vld [vmem:[%s13513_s2 + $0x38] sm:$0xff] }
 0x53b   : > { %v6653_v33 = vadd.f32 %v6652_v55, %v6651_v25  ;;  %v6581_v22 = vadd.f32 %v6580_v39, %v6579_v60  ;;  %8195 = vrcp.f32 %v6569_v63  ;;  %v15021_v9 = vrot.slane %v15020_v49, 4  ;;  %7291 = vxpose.xlu1.b32.cont [12/16] %v5626_v20, 128  ;;  %v7320_v60 = vld [vmem:[%s13513_s2 + $0x40] sm:$0xff]  ;;  %7377 = vmatpush1.msra.mxu1 %v7322_v47  ;;  %v7317_v32 = vld [vmem:[%s13513_s2 + $0x28] sm:$0xff] }
 0x53c   : > { %v6664_v26 = vrot.slane %v6663_v41, 1  ;;  %v6593_v5 = vadd.f32 %v6592_v36, %v6591_v52  ;;  %v6676_v6 = vrot.slane %v6675_v50, 1  ;;  %v6696_v59 = vrot.slane %v15022_v31, 4  ;;  %7378 = vmatprep.subr.mxu1 %v7321_v28 }
 0x53d   : > { %v6685_v12 = vadd.f32 %v15021_v9, %v15020_v49  ;;  %8197 = vrcp.f32 %v6581_v22  ;;  %v6570_v3 = vrot.slane %v15023_v2, 4  ;;  %v6582_v46 = vrot.slane %v15024_v17, 4  ;;  %7379 = vmatpush1.msra.mxu1 %v7320_v60 }
 0x53e   : > { %v6665_v14 = vadd.f32 %v6664_v26, %v6663_v41  ;;  %8199 = vrcp.f32 %v6593_v5  ;;  %v6677_v25 = vadd.f32 %v6676_v6, %v6675_v50  ;;  %v6697_v48 = vadd.f32 %v6696_v59, %v15022_v31  ;;  %v15030_v26 = vld [vmem:[#allocation101_spill] sm:$0xff]  ;;  %7380 = vmatprep.subr.mxu1 %v7319_v56  ;;  %v7315_v31 = vld [vmem:[%s13513_s2 + $0x18] sm:$0xff] }
 0x53f   : > { %v6686_v1 = vrot.slane %v6685_v12, 2  ;;  %v6571_v45 = vadd.f32 %v15023_v2, %v6570_v3  ;;  %v6583_v30 = vadd.f32 %v15024_v17, %v6582_v46  ;;  %v6594_v4 = vrot.slane %v15025_v34, 4  ;;  %v7314_v46 = vld [vmem:[%s13513_s2 + $0x10] sm:$0xff] }
 0x540   : > { %v6760_v37 = vsel %vm1998_vm0, %v6665_v14, %v6653_v33  ;;  %v6698_v55 = vrot.slane %v6697_v48, 2  ;;  %v15027_v52 = vrot.slane %v15026_v11, 2  ;;  %v15029_v41 = vrot.slane %v15028_v15, 2  ;;  %v7318_v33 = vld [vmem:[%s13513_s2 + $0x30] sm:$0xff] }
 0x541   : > { %v6687_v27 = vadd.f32 %v6686_v1, %v6685_v12  ;;  %v6761_v53 = vsel %vm2000_vm1, %v6677_v25, %v6760_v37  ;;  %v6572_v42 = vrot.slane %v6571_v45, 2  ;;  %v6584_v63 = vrot.slane %v6583_v30, 2  ;;  %v7316_v12 = vld [vmem:[%s13513_s2 + $0x20] sm:$0xff]  ;;  %7381 = vmatpush1.msra.mxu1 %v7318_v33 }
 0x542   : > { %v6657_v10 = vadd.f32 %v15027_v52, %v15026_v11  ;;  %v6669_v19 = vadd.f32 %v15029_v41, %v15028_v15  ;;  %v6595_v39 = vadd.f32 %v15025_v34, %v6594_v4  ;;  %v6699_v54 = vadd.f32 %v6698_v55, %v6697_v48  ;;  %7382 = vmatprep.subr.mxu1 %v7317_v32  ;;  %v15031_v48 = vld [vmem:[#allocation74_spill] sm:$0xff]  ;;  %v7312_v11 = vld [vmem:[%s13513_s2] sm:$0xff] }
 0x543   : > { %v6688_v8 = vrot.slane %v6687_v27, 1  ;;  %v6680_v50 = vrot.slane %v15030_v26, 2  ;;  %v6573_v22 = vadd.f32 %v6572_v42, %v6571_v45  ;;  %v6585_v49 = vadd.f32 %v6584_v63, %v6583_v30  ;;  %7383 = vmatpush1.msra.mxu1 %v7316_v12  ;;  %v7313_v30 = vld [vmem:[%s13513_s2 + $0x8] sm:$0xff]  ;;  %v15034_v42 = vld [vmem:[#allocation108_spill] sm:$0xff] }
 0x544   : > { %v6658_v38 = vrot.slane %v6657_v10, 1  ;;  %v6670_v36 = vrot.slane %v6669_v19, 1  ;;  %v6596_v9 = vrot.slane %v6595_v39, 2  ;;  %v6700_v24 = vrot.slane %v6699_v54, 1  ;;  %7384 = vmatprep.subr.mxu1 %v7315_v31 }
 0x545   : > { %v6689_v20 = vadd.f32 %v6688_v8, %v6687_v27  ;;  %v6681_v6 = vadd.f32 %v6680_v50, %v15030_v26  ;;  %v6574_v58 = vrot.slane %v6573_v22, 1  ;;  %v6586_v1 = vrot.slane %v6585_v49, 1  ;;  %v15033_v27 = vld [vmem:[#allocation76_spill] sm:$0xff]  ;;  %7385 = vmatpush1.msra.mxu1 %v7314_v46 }
 0x546   : > { %v6659_v5 = vadd.f32 %v6658_v38, %v6657_v10  ;;  %v6671_v14 = vadd.f32 %v6670_v36, %v6669_v19  ;;  %v6597_v3 = vadd.f32 %v6596_v9, %v6595_v39  ;;  %v6701_v47 = vadd.f32 %v6700_v24, %v6699_v54  ;;  %7386 = vmatprep.subr.mxu1 %v7313_v30 }
 0x547   : > { %v6762_v59 = vsel %vm2002_vm2, %v6689_v20, %v6761_v53  ;;  %v6682_v25 = vrot.slane %v6681_v6, 1  ;;  %v15032_v37 = vrot.slane %v15031_v48, 4  ;;  %v6702_v45 = vrot.slane %v15033_v27, 4  ;;  %7387 = vmatpush1.msra.mxu1 %v7312_v11  ;;  %v15037_v20 = vld [vmem:[#allocation70_spill] sm:$0xff] }
 0x548   : > { %v6575_v4 = vadd.f32 %v6574_v58, %v6573_v22  ;;  %v6587_v60 = vadd.f32 %v6586_v1, %v6585_v49  ;;  %v6598_v55 = vrot.slane %v6597_v3, 1  ;;  %v6767_v53 = vsel %vm1998_vm0, %v6671_v14, %v6659_v5  ;;  %v8196_v52 = vpop.eup %8195 }
 0x549   : > { %v6691_v28 = vadd.f32 %v15032_v37, %v15031_v48  ;;  %v13079_v10 = vsel %vm2004_vm3, %v6701_v47, %v6762_v59  ;;  %v6683_v15 = vadd.f32 %v6682_v25, %v6681_v6  ;;  %v6703_v19 = vadd.f32 %v6702_v45, %v15033_v27  ;;  %v15038_v6 = vld [vmem:[#allocation109_spill] sm:$0xff]  ;;  %v15040_v45 = vld [vmem:[#allocation106_spill] sm:$0xff] }
 0x54a   : > { %v13083_v56 = vmul.f32 %v8196_v52, %v15012_v23  ;;  %v6599_v8 = vadd.f32 %v6598_v55, %v6597_v3  ;;  %8201 = vrcp.f32 %v6575_v4  ;;  %v15035_v63 = vrot.slane %v15034_v42, 2  ;;  %v8198_v33 = vpop.eup %8197  ;;  %v15036_v23 = vld [vmem:[#allocation97_spill] sm:$0xff] }
 0x54b   : > { %v6692_v41 = vrot.slane %v6691_v28, 2  ;;  %8203 = vrcp.f32 %v6587_v60  ;;  %v6704_v38 = vrot.slane %v6703_v19, 2  ;;  %v6768_v36 = vsel %vm2000_vm1, %v6683_v15, %v6767_v53  ;;  %v8200_v26 = vpop.eup %8199  ;;  %v15041_v53 = vld [vmem:[#allocation65_spill] sm:$0xff] }
 0x54c   : > { %v6797_v39 = vadd.f32 %v15035_v63, %v15034_v42  ;;  %v13090_v50 = vmul.f32 %v8198_v33, %v15013_v7  ;;  %v6642_v32 = vmul.f32 %v13083_v56, %v15036_v23  ;;  %8205 = vrcp.f32 %v6599_v8  ;;  %v15043_v8 = vld [vmem:[#allocation67_spill] sm:$0xff] }
 0x54d   : > { %v6693_v54 = vadd.f32 %v6692_v41, %v6691_v28  ;;  %v6788_v22 = vmul.f32 %v13083_v56, %v15037_v20  ;;  %v13097_v49 = vmul.f32 %v8200_v26, %v15014_v18  ;;  %v6705_v12 = vadd.f32 %v6704_v38, %v6703_v19 }
 0x54e   : > { %v6798_v24 = vrot.slane %v6797_v39, 1  ;;  %v6644_v5 = vmul.f32 %v13090_v50, %v15036_v23  ;;  %v6708_v14 = vrot.slane %v6642_v32, 4  ;;  %v6790_v7 = vmul.f32 %v13090_v50, %v15037_v20 }
 0x54f   : > { %v6694_v9 = vrot.slane %v6693_v54, 1  ;;  %v15039_v31 = vrot.slane %v15038_v6, 2  ;;  %v6646_v58 = vmul.f32 %v13097_v49, %v15036_v23  ;;  %v6706_v18 = vrot.slane %v6705_v12, 1 }
 0x550   : > { %v13110_v3 = vmul.f32 %v13097_v49, %v15037_v20  ;;  %v6709_v46 = vadd.f32 %v6708_v14, %v6642_v32  ;;  %v6720_v47 = vrot.slane %v6644_v5, 4  ;;  %v13112_v25 = vadd.f32 %v6798_v24, %v6797_v39 }
 0x551   : > { %v6809_v59 = vadd.f32 %v15039_v31, %v15038_v6  ;;  %v6695_v1 = vadd.f32 %v6694_v9, %v6693_v54  ;;  %v6732_v37 = vrot.slane %v6646_v58, 4  ;;  %v6707_v28 = vadd.f32 %v6706_v18, %v6705_v12 }
 0x552   : > { %v6820_v30 = vrot.slane %v15040_v45, 2  ;;  %v6710_v4 = vrot.slane %v6709_v46, 2  ;;  %v6721_v60 = vadd.f32 %v6720_v47, %v6644_v5  ;;  %v15042_v11 = vrot.slane %v15041_v53, 4 }
 0x553   : > { %v6810_v48 = vrot.slane %v6809_v59, 1  ;;  %v6769_v27 = vsel %vm2002_vm2, %v6695_v1, %v6768_v36  ;;  %v6733_v15 = vadd.f32 %v6732_v37, %v6646_v58  ;;  %v6842_v42 = vrot.slane %v15043_v8, 4 }
 0x554   : > { %v6831_v52 = vadd.f32 %v15042_v11, %v15041_v53  ;;  %v13120_v41 = vsel %vm2004_vm3, %v6707_v28, %v6769_v27  ;;  %v6821_v19 = vadd.f32 %v6820_v30, %v15040_v45  ;;  %v6711_v63 = vadd.f32 %v6710_v4, %v6709_v46  ;;  %v15044_v30 = vld [vmem:[#allocation68_spill] sm:$0xff] }
 0x555   : > { %v6811_v55 = vadd.f32 %v6810_v48, %v6809_v59  ;;  %v6722_v39 = vrot.slane %v6721_v60, 2  ;;  %v6854_v54 = vrot.slane %v6788_v22, 4  ;;  %v6734_v38 = vrot.slane %v6733_v15, 2 }
 0x556   : > { %v6832_v33 = vrot.slane %v6831_v52, 2  ;;  %v6822_v36 = vrot.slane %v6821_v19, 1  ;;  %v6843_v26 = vadd.f32 %v6842_v42, %v15043_v8  ;;  %v6866_v23 = vrot.slane %v6790_v7, 4 }
 0x557   : > { %v6712_v32 = vrot.slane %v6711_v63, 1  ;;  %v6723_v20 = vadd.f32 %v6722_v39, %v6721_v60  ;;  %v6855_v12 = vadd.f32 %v6854_v54, %v6788_v22  ;;  %v8202_v24 = vpop.eup %8201  ;;  %v6735_v5 = vadd.f32 %v6734_v38, %v6733_v15 }
 0x558   : > { %v6833_v9 = vadd.f32 %v6832_v33, %v6831_v52  ;;  %v6823_v14 = vadd.f32 %v6822_v36, %v6821_v19  ;;  %v6844_v6 = vrot.slane %v6843_v26, 2  ;;  %v6867_v31 = vadd.f32 %v6866_v23, %v6790_v7  ;;  %v8204_v59 = vpop.eup %8203 }
 0x559   : > { %v6713_v58 = vadd.f32 %v6712_v32, %v6711_v63  ;;  %v6724_v1 = vrot.slane %v6723_v20, 1  ;;  %v13126_v18 = vmul.f32 %v8202_v24, %v15023_v2  ;;  %v8206_v47 = vpop.eup %8205  ;;  %v6736_v48 = vrot.slane %v6735_v5, 1 }
 0x55a   : > { %v6834_v46 = vrot.slane %v6833_v9, 1  ;;  %v13129_v37 = vmul.f32 %v8204_v59, %v15024_v17  ;;  %v6845_v28 = vadd.f32 %v6844_v6, %v6843_v26  ;;  %v6856_v27 = vrot.slane %v6855_v12, 2 }
 0x55b   : > { %v6725_v22 = vadd.f32 %v6724_v1, %v6723_v20  ;;  %v6764_v45 = vsel %vm2006_vm4, %v6713_v58, %v13079_v10  ;;  %v13134_v7 = vmul.f32 %v8206_v47, %v15025_v34  ;;  %v6643_v4 = vmul.f32 %v13126_v18, %v15044_v30 }
 0x55c   : > { %v6737_v2 = vadd.f32 %v6736_v48, %v6735_v5  ;;  %v6645_v60 = vmul.f32 %v13129_v37, %v15044_v30  ;;  %v6835_v53 = vadd.f32 %v6834_v46, %v6833_v9  ;;  %v6846_v11 = vrot.slane %v6845_v28, 1 }
 0x55d   : > { %v6765_v17 = vsel %vm2008_vm5, %v6725_v22, %v6764_v45  ;;  %v6647_v52 = vmul.f32 %v13134_v7, %v15044_v30  ;;  %v6714_v15 = vrot.slane %v6643_v4, 4  ;;  %v6857_v19 = vadd.f32 %v6856_v27, %v6855_v12 }
 0x55e   : > { %v6766_v10 = vsel %vm2010_vm6, %v6737_v2, %v6765_v17  ;;  %v6726_v34 = vrot.slane %v6645_v60, 4  ;;  %v6847_v8 = vadd.f32 %v6846_v11, %v6845_v28  ;;  %v6868_v42 = vrot.slane %v6867_v31, 2  ;;  %v15046_v2 = vld [vmem:[#allocation75_spill] sm:$0xff] }
 0x55f   : > { %7260 = vxpose.xlu0.b32.cont [13/16] %v6766_v10, 128  ;;  %v6715_v63 = vadd.f32 %v6714_v15, %v6643_v4  ;;  %v6738_v39 = vrot.slane %v6647_v52, 4  ;;  %v6858_v33 = vrot.slane %v6857_v19, 1  ;;  %v6878_v54 = vrot.slane %v13110_v3, 4 }
 0x560   : > { %v6727_v38 = vadd.f32 %v6726_v34, %v6645_v60  ;;  %v6869_v36 = vadd.f32 %v6868_v42, %v6867_v31  ;;  %v6906_v26 = vsel %vm1998_vm0, %v6811_v55, %v13112_v25  ;;  %v6789_v23 = vmul.f32 %v13126_v18, %v12392_v13 }
 0x561   : > { %v6716_v32 = vrot.slane %v6715_v63, 2  ;;  %v6739_v20 = vadd.f32 %v6738_v39, %v6647_v52  ;;  %v6859_v9 = vadd.f32 %v6858_v33, %v6857_v19  ;;  %v6879_v12 = vadd.f32 %v6878_v54, %v13110_v3 }
 0x562   : > { %v6728_v24 = vrot.slane %v6727_v38, 2  ;;  %v6870_v5 = vrot.slane %v6869_v36, 1  ;;  %v6907_v6 = vsel %vm2000_vm1, %v6823_v14, %v6906_v26  ;;  %v6791_v59 = vmul.f32 %v13129_v37, %v12392_v13 }
 0x563   : > { %v6717_v58 = vadd.f32 %v6716_v32, %v6715_v63  ;;  %v6740_v31 = vrot.slane %v6739_v20, 2  ;;  %v6880_v1 = vrot.slane %v6879_v12, 2  ;;  %v6908_v25 = vsel %vm2002_vm2, %v6835_v53, %v6907_v6 }
 0x564   : > { %v6729_v55 = vadd.f32 %v6728_v24, %v6727_v38  ;;  %v6871_v46 = vadd.f32 %v6870_v5, %v6869_v36  ;;  %v6909_v47 = vsel %vm2004_vm3, %v6847_v8, %v6908_v25  ;;  %v6793_v48 = vmul.f32 %v13134_v7, %v12392_v13  ;;  %v15048_v13 = vld [vmem:[#allocation36_spill] sm:$0xff]  ;;  %v15049_v8 = vld [vmem:[#allocation78_spill] sm:$0xff]  ;;  %v15051_v24 = vld [vmem:[#allocation73_spill] sm:$0xff] }
 0x565   : > { %v6718_v3 = vrot.slane %v6717_v58, 1  ;;  %v6741_v28 = vadd.f32 %v6740_v31, %v6739_v20  ;;  %v6881_v27 = vadd.f32 %v6880_v1, %v6879_v12  ;;  %v6910_v14 = vsel %vm2006_vm4, %v6859_v9, %v6909_v47 }
 0x566   : > { %v6730_v22 = vrot.slane %v6729_v55, 1  ;;  %v6911_v45 = vsel %vm2008_vm5, %v6871_v46, %v6910_v14  ;;  %v15045_v30 = vrot.slane %v12413_v40, 2  ;;  %v15047_v60 = vrot.slane %v15046_v2, 2 }
 0x567   : > { %v6719_v11 = vadd.f32 %v6718_v3, %v6717_v58  ;;  %v6742_v17 = vrot.slane %v6741_v28, 1  ;;  %v6882_v52 = vrot.slane %v6881_v27, 1  ;;  %v6826_v15 = vrot.slane %v15048_v13, 2 }
 0x568   : > { %v6803_v4 = vadd.f32 %v15045_v30, %v12413_v40  ;;  %v6815_v53 = vadd.f32 %v15047_v60, %v15046_v2  ;;  %v6731_v19 = vadd.f32 %v6730_v22, %v6729_v55  ;;  %v15050_v42 = vrot.slane %v15049_v8, 4 }
 0x569   : > { %v6743_v39 = vadd.f32 %v6742_v17, %v6741_v28  ;;  %v6771_v40 = vsel %vm2006_vm4, %v6719_v11, %v13120_v41  ;;  %v6883_v33 = vadd.f32 %v6882_v52, %v6881_v27  ;;  %v6827_v54 = vadd.f32 %v6826_v15, %v15048_v13  ;;  %v15055_v13 = vld [vmem:[#allocation57_spill] sm:$0xff] }
 0x56a   : > { %v6804_v10 = vrot.slane %v6803_v4, 1  ;;  %v6816_v34 = vrot.slane %v6815_v53, 1  ;;  %v6837_v63 = vadd.f32 %v15050_v42, %v15049_v8  ;;  %v6772_v38 = vsel %vm2008_vm5, %v6731_v19, %v6771_v40 }
 0x56b   : > { %v6773_v20 = vsel %vm2010_vm6, %v6743_v39, %v6772_v38  ;;  %v6912_v9 = vsel %vm2010_vm6, %v6883_v33, %v6911_v45  ;;  %v6828_v12 = vrot.slane %v6827_v54, 1  ;;  %v6848_v5 = vrot.slane %v15051_v24, 4 }
 0x56c   : > { %v6805_v36 = vadd.f32 %v6804_v10, %v6803_v4  ;;  %v6817_v26 = vadd.f32 %v6816_v34, %v6815_v53  ;;  %v6838_v32 = vrot.slane %v6837_v63, 2  ;;  %7292 = vxpose.xlu1.b32.cont [13/16] %v6773_v20, 128  ;;  %7261 = vxpose.xlu0.b32.cont [14/16] %v6912_v9, 128  ;;  %v6860_v58 = vrot.slane %v6789_v23, 4 }
 0x56d   : > { %v6872_v41 = vrot.slane %v6791_v59, 4  ;;  %v6884_v31 = vrot.slane %v6793_v48, 4  ;;  %v6829_v1 = vadd.f32 %v6828_v12, %v6827_v54  ;;  %v6849_v25 = vadd.f32 %v6848_v5, %v15051_v24 }
 0x56e   : > { %v6839_v6 = vadd.f32 %v6838_v32, %v6837_v63  ;;  %v6913_v55 = vsel %vm1998_vm0, %v6817_v26, %v6805_v36  ;;  %v6934_v46 = vmul.f32 %v13083_v56, %v12452_v0  ;;  %v6861_v3 = vadd.f32 %v6860_v58, %v6789_v23 }
 0x56f   : > { %v6873_v28 = vadd.f32 %v6872_v41, %v6791_v59  ;;  %v6885_v27 = vadd.f32 %v6884_v31, %v6793_v48  ;;  %v6850_v14 = vrot.slane %v6849_v25, 2  ;;  %v6914_v22 = vsel %vm2000_vm1, %v6829_v1, %v6913_v55  ;;  %v15053_v59 = vld [vmem:[#allocation111_spill] sm:$0xff]  ;;  %v15058_v31 = vld [vmem:[#allocation33_spill] sm:$0xff] }
 0x570   : > { %v6840_v47 = vrot.slane %v6839_v6, 1  ;;  %v6936_v45 = vmul.f32 %v13090_v50, %v12452_v0  ;;  %v6938_v30 = vmul.f32 %v13097_v49, %v12452_v0  ;;  %v6862_v2 = vrot.slane %v6861_v3, 2 }
 0x571   : > { %v6874_v60 = vrot.slane %v6873_v28, 2  ;;  %v6886_v53 = vrot.slane %v6885_v27, 2  ;;  %v6851_v11 = vadd.f32 %v6850_v14, %v6849_v25  ;;  %v15052_v17 = vrot.slane %v12473_v44, 2 }
 0x572   : > { %v6841_v4 = vadd.f32 %v6840_v47, %v6839_v6  ;;  %v15054_v48 = vrot.slane %v15053_v59, 2  ;;  %v6966_v15 = vrot.slane %v15055_v13, 2  ;;  %v6863_v19 = vadd.f32 %v6862_v2, %v6861_v3 }
 0x573   : > { %v6943_v23 = vadd.f32 %v15052_v17, %v12473_v44  ;;  %v6875_v10 = vadd.f32 %v6874_v60, %v6873_v28  ;;  %v6887_v34 = vadd.f32 %v6886_v53, %v6885_v27  ;;  %v6852_v8 = vrot.slane %v6851_v11, 1  ;;  %v15056_v44 = vld [vmem:[#allocation38_spill] sm:$0xff] }
 0x574   : > { %v6955_v52 = vadd.f32 %v15054_v48, %v15053_v59  ;;  %v6915_v0 = vsel %vm2002_vm2, %v6841_v4, %v6914_v22  ;;  %v6967_v39 = vadd.f32 %v6966_v15, %v15055_v13  ;;  %v6864_v40 = vrot.slane %v6863_v19, 1 }
 0x575   : > { %v6944_v42 = vrot.slane %v6943_v23, 1  ;;  %v6876_v33 = vrot.slane %v6875_v10, 1  ;;  %v6888_v54 = vrot.slane %v6887_v34, 1  ;;  %v15057_v38 = vrot.slane %v15056_v44, 4 }
 0x576   : > { %v6956_v63 = vrot.slane %v6955_v52, 1  ;;  %v6853_v26 = vadd.f32 %v6852_v8, %v6851_v11  ;;  %v6968_v9 = vrot.slane %v6967_v39, 1  ;;  %v6865_v12 = vadd.f32 %v6864_v40, %v6863_v19 }
 0x577   : > { %v6977_v36 = vadd.f32 %v15057_v38, %v15056_v44  ;;  %v6945_v32 = vadd.f32 %v6944_v42, %v6943_v23  ;;  %v6877_v24 = vadd.f32 %v6876_v33, %v6875_v10  ;;  %v6889_v5 = vadd.f32 %v6888_v54, %v6887_v34 }
 0x578   : > { %v6957_v20 = vadd.f32 %v6956_v63, %v6955_v52  ;;  %v6916_v58 = vsel %vm2004_vm3, %v6853_v26, %v6915_v0  ;;  %v6969_v41 = vadd.f32 %v6968_v9, %v6967_v39  ;;  %v6988_v1 = vrot.slane %v15058_v31, 4  ;;  %v15061_v39 = vld [vmem:[#allocation18_spill] sm:$0xff]  ;;  %v15064_v9 = vld [vmem:[#allocation17_spill] sm:$0xff] }
 0x579   : > { %v6978_v6 = vrot.slane %v6977_v36, 2  ;;  %v7000_v25 = vrot.slane %v6934_v46, 4  ;;  %v6917_v55 = vsel %vm2006_vm4, %v6865_v12, %v6916_v58  ;;  %v7012_v3 = vrot.slane %v6936_v45, 4 }
 0x57a   : > { %v7024_v28 = vrot.slane %v6938_v30, 4  ;;  %v6918_v27 = vsel %vm2008_vm5, %v6877_v24, %v6917_v55  ;;  %v6989_v14 = vadd.f32 %v6988_v1, %v15058_v31  ;;  %v7052_v4 = vsel %vm1998_vm0, %v6957_v20, %v6945_v32 }
 0x57b   : > { %v6979_v47 = vadd.f32 %v6978_v6, %v6977_v36  ;;  %v7001_v22 = vadd.f32 %v7000_v25, %v6934_v46  ;;  %v6919_v2 = vsel %vm2010_vm6, %v6889_v5, %v6918_v27  ;;  %v7013_v53 = vadd.f32 %v7012_v3, %v6936_v45  ;;  %v15063_v36 = vld [vmem:[#allocation98_spill] sm:$0xff] }
 0x57c   : > { %v7025_v11 = vadd.f32 %v7024_v28, %v6938_v30  ;;  %7293 = vxpose.xlu1.b32.cont [14/16] %v6919_v2, 128  ;;  %v6990_v17 = vrot.slane %v6989_v14, 2  ;;  %v7053_v59 = vsel %vm2000_vm1, %v6969_v41, %v7052_v4  ;;  %v6935_v48 = vmul.f32 %v13126_v18, %v12504_v62  ;;  %v15059_v30 = vld [vmem:[#allocation24_spill] sm:$0xff]  ;;  %v15066_v28 = vld [vmem:[#allocation15_spill] sm:$0xff] }
 0x57d   : > { %v6980_v60 = vrot.slane %v6979_v47, 1  ;;  %v7002_v23 = vrot.slane %v7001_v22, 2  ;;  %v7014_v13 = vrot.slane %v7013_v53, 2  ;;  %v6937_v46 = vmul.f32 %v13129_v37, %v12504_v62 }
 0x57e   : > { %v7026_v15 = vrot.slane %v7025_v11, 2  ;;  %v6991_v19 = vadd.f32 %v6990_v17, %v6989_v14  ;;  %v6939_v45 = vmul.f32 %v13134_v7, %v12504_v62  ;;  %v15060_v34 = vrot.slane %v15059_v30, 2 }
 0x57f   : > { %v6981_v52 = vadd.f32 %v6980_v60, %v6979_v47  ;;  %v7003_v10 = vadd.f32 %v7002_v23, %v7001_v22  ;;  %v7015_v8 = vadd.f32 %v7014_v13, %v7013_v53  ;;  %v15062_v40 = vrot.slane %v15061_v39, 2 }
 0x580   : > { %v6949_v0 = vadd.f32 %v15060_v34, %v15059_v30  ;;  %v7027_v42 = vadd.f32 %v7026_v15, %v7025_v11  ;;  %v6992_v54 = vrot.slane %v6991_v19, 1  ;;  %v6972_v26 = vrot.slane %v15063_v36, 2 }
 0x581   : > { %v7054_v63 = vsel %vm2002_vm2, %v6981_v52, %v7053_v59  ;;  %v6961_v33 = vadd.f32 %v15062_v40, %v15061_v39  ;;  %v7004_v44 = vrot.slane %v7003_v10, 1  ;;  %v7016_v32 = vrot.slane %v7015_v8, 1 }
 0x582   : > { %v6950_v38 = vrot.slane %v6949_v0, 1  ;;  %v7028_v20 = vrot.slane %v7027_v42, 1  ;;  %v15065_v12 = vrot.slane %v15064_v9, 4  ;;  %v6993_v5 = vadd.f32 %v6992_v54, %v6991_v19 }
 0x583   : > { %v6962_v62 = vrot.slane %v6961_v33, 1  ;;  %v7005_v6 = vadd.f32 %v7004_v44, %v7003_v10  ;;  %v6973_v41 = vadd.f32 %v6972_v26, %v15063_v36  ;;  %v7017_v31 = vadd.f32 %v7016_v32, %v7015_v8 }
 0x584   : > { %v6983_v24 = vadd.f32 %v15065_v12, %v15064_v9  ;;  %v6951_v58 = vadd.f32 %v6950_v38, %v6949_v0  ;;  %v7029_v1 = vadd.f32 %v7028_v20, %v7027_v42  ;;  %v7055_v47 = vsel %vm2004_vm3, %v6993_v5, %v7054_v63 }
 0x585   : > { %v6963_v25 = vadd.f32 %v6962_v62, %v6961_v33  ;;  %v6974_v3 = vrot.slane %v6973_v41, 1  ;;  %v6994_v27 = vrot.slane %v15066_v28, 4  ;;  %v7006_v14 = vrot.slane %v6935_v48, 4 }
 0x586   : > { %v6984_v55 = vrot.slane %v6983_v24, 2  ;;  %v7056_v22 = vsel %vm2006_vm4, %v7005_v6, %v7055_v47  ;;  %v7018_v2 = vrot.slane %v6937_v46, 4  ;;  %v7030_v60 = vrot.slane %v6939_v45, 4 }
 0x587   : > { %v7057_v53 = vsel %vm2008_vm5, %v7017_v31, %v7056_v22  ;;  %v6975_v11 = vadd.f32 %v6974_v3, %v6973_v41  ;;  %v6995_v17 = vadd.f32 %v6994_v27, %v15066_v28  ;;  %v7007_v23 = vadd.f32 %v7006_v14, %v6935_v48 }
 0x588   : > { %v6985_v4 = vadd.f32 %v6984_v55, %v6983_v24  ;;  %v7058_v59 = vsel %vm2010_vm6, %v7029_v1, %v7057_v53  ;;  %v7019_v13 = vadd.f32 %v7018_v2, %v6937_v46  ;;  %v7031_v15 = vadd.f32 %v7030_v60, %v6939_v45 }
 0x589   : > { %7262 = vxpose.xlu0.b32.cont [15/16] %v7058_v59, 128  ;;  %v6996_v19 = vrot.slane %v6995_v17, 2  ;;  %v7008_v10 = vrot.slane %v7007_v23, 2  ;;  %v7059_v30 = vsel %vm1998_vm0, %v6963_v25, %v6951_v58  ;;  %v7080_v34 = vmul.f32 %v13083_v56, %v12555_v35 }
 0x58a   : > { %v6986_v52 = vrot.slane %v6985_v4, 1  ;;  %v7020_v8 = vrot.slane %v7019_v13, 2  ;;  %v7032_v42 = vrot.slane %v7031_v15, 2  ;;  %v7060_v63 = vsel %vm2000_vm1, %v6975_v11, %v7059_v30 }
 0x58b   : > { %v6997_v39 = vadd.f32 %v6996_v19, %v6995_v17  ;;  %v7009_v48 = vadd.f32 %v7008_v10, %v7007_v23  ;;  %v7082_v40 = vmul.f32 %v13090_v50, %v12555_v35  ;;  %v7084_v46 = vmul.f32 %v13097_v49, %v12555_v35 }
 0x58c   : > { %v6987_v0 = vadd.f32 %v6986_v52, %v6985_v4  ;;  %v7021_v45 = vadd.f32 %v7020_v8, %v7019_v13  ;;  %v7033_v33 = vadd.f32 %v7032_v42, %v7031_v15  ;;  %v15067_v56 = vrot.slane %v12575_v61, 2 }
 0x58d   : > { %v6998_v38 = vrot.slane %v6997_v39, 1  ;;  %v7010_v36 = vrot.slane %v7009_v48, 1  ;;  %v15068_v26 = vrot.slane %v12581_v21, 2  ;;  %v7112_v20 = vrot.slane %v12583_v43, 2 }
 0x58e   : > { %v7061_v54 = vsel %vm2002_vm2, %v6987_v0, %v7060_v63  ;;  %v7089_v44 = vadd.f32 %v15067_v56, %v12575_v61  ;;  %v7022_v50 = vrot.slane %v7021_v45, 1  ;;  %v7034_v62 = vrot.slane %v7033_v33, 1 }
 0x58f   : > { %v7101_v32 = vadd.f32 %v15068_v26, %v12581_v21  ;;  %v15069_v35 = vrot.slane %v12567_v16, 4  ;;  %v6999_v12 = vadd.f32 %v6998_v38, %v6997_v39  ;;  %v7011_v24 = vadd.f32 %v7010_v36, %v7009_v48 }
 0x590   : > { %v7090_v9 = vrot.slane %v7089_v44, 1  ;;  %v7113_v61 = vadd.f32 %v7112_v20, %v12583_v43  ;;  %v7023_v6 = vadd.f32 %v7022_v50, %v7021_v45  ;;  %v7035_v58 = vadd.f32 %v7034_v62, %v7033_v33  ;;  %v15073_v33 = vld [vmem:[#allocation42_spill] sm:$0xff] }
 0x591   : > { %v7123_v49 = vadd.f32 %v15069_v35, %v12567_v16  ;;  %v7102_v5 = vrot.slane %v7101_v32, 1  ;;  %v7062_v21 = vsel %vm2004_vm3, %v6999_v12, %v7061_v54  ;;  %v7134_v55 = vrot.slane %v12571_v57, 4 }
 0x592   : > { %v7091_v41 = vadd.f32 %v7090_v9, %v7089_v44  ;;  %v7114_v25 = vrot.slane %v7113_v61, 1  ;;  %v7063_v47 = vsel %vm2006_vm4, %v7011_v24, %v7062_v21  ;;  %v7146_v28 = vrot.slane %v7080_v34, 4 }
 0x593   : > { %v7124_v31 = vrot.slane %v7123_v49, 2  ;;  %v7103_v1 = vadd.f32 %v7102_v5, %v7101_v32  ;;  %v7158_v16 = vrot.slane %v7082_v40, 4  ;;  %v7064_v27 = vsel %vm2008_vm5, %v7023_v6, %v7063_v47  ;;  %v15076_v6 = vld [vmem:[#allocation119_spill] sm:$0xff] }
 0x594   : > { %v7115_v14 = vadd.f32 %v7114_v25, %v7113_v61  ;;  %v7135_v43 = vadd.f32 %v7134_v55, %v12571_v57  ;;  %v7170_v22 = vrot.slane %v7084_v46, 4  ;;  %v7065_v4 = vsel %vm2010_vm6, %v7035_v58, %v7064_v27 }
 0x595   : > { %v7125_v3 = vadd.f32 %v7124_v31, %v7123_v49  ;;  %v7147_v60 = vadd.f32 %v7146_v28, %v7080_v34  ;;  %v7159_v53 = vadd.f32 %v7158_v16, %v7082_v40  ;;  %7294 = vxpose.xlu1.b32.cont [15/16] %v7065_v4, 128  ;;  %v7198_v23 = vsel %vm1998_vm0, %v7103_v1, %v7091_v41  ;;  %v15071_v40 = vld [vmem:[#allocation122_spill] sm:$0xff] }
 0x596   : > { %v7136_v11 = vrot.slane %v7135_v43, 2  ;;  %v7171_v17 = vadd.f32 %v7170_v22, %v7084_v46  ;;  %v7081_v59 = vmul.f32 %v13126_v18, %v12605_v51  ;;  %v7199_v19 = vsel %vm2000_vm1, %v7115_v14, %v7198_v23 }
 0x597   : > { %v7126_v2 = vrot.slane %v7125_v3, 1  ;;  %v7148_v13 = vrot.slane %v7147_v60, 2  ;;  %v7160_v15 = vrot.slane %v7159_v53, 2  ;;  %v7083_v30 = vmul.f32 %v13129_v37, %v12605_v51 }
 0x598   : > { %v7137_v57 = vadd.f32 %v7136_v11, %v7135_v43  ;;  %v7172_v10 = vrot.slane %v7171_v17, 2  ;;  %v7085_v34 = vmul.f32 %v13134_v7, %v12605_v51  ;;  %v15070_v18 = vrot.slane %v12625_v29, 2  ;;  %v15074_v51 = vld [vmem:[#allocation39_spill] sm:$0xff] }
 0x599   : > { %v7127_v52 = vadd.f32 %v7126_v2, %v7125_v3  ;;  %v7149_v0 = vadd.f32 %v7148_v13, %v7147_v60  ;;  %v7161_v8 = vadd.f32 %v7160_v15, %v7159_v53  ;;  %v15072_v46 = vrot.slane %v15071_v40, 2 }
 0x59a   : > { %v7095_v63 = vadd.f32 %v15070_v18, %v12625_v29  ;;  %v7138_v39 = vrot.slane %v7137_v57, 1  ;;  %v7173_v48 = vadd.f32 %v7172_v10, %v7171_v17  ;;  %v7118_v54 = vrot.slane %v15073_v33, 2 }
 0x59b   : > { %v7200_v42 = vsel %vm2002_vm2, %v7127_v52, %v7199_v19  ;;  %v7107_v45 = vadd.f32 %v15072_v46, %v15071_v40  ;;  %v7150_v37 = vrot.slane %v7149_v0, 1  ;;  %v7162_v56 = vrot.slane %v7161_v8, 1 }
 0x59c   : > { %v7096_v44 = vrot.slane %v7095_v63, 1  ;;  %v15075_v7 = vrot.slane %v15074_v51, 4  ;;  %v7139_v36 = vadd.f32 %v7138_v39, %v7137_v57  ;;  %v7174_v26 = vrot.slane %v7173_v48, 1 }
 0x59d   : > { %v7108_v32 = vrot.slane %v7107_v45, 1  ;;  %v7119_v29 = vadd.f32 %v7118_v54, %v15073_v33  ;;  %v7151_v20 = vadd.f32 %v7150_v37, %v7149_v0  ;;  %v7163_v50 = vadd.f32 %v7162_v56, %v7161_v8 }
 0x59e   : > { %v7129_v38 = vadd.f32 %v15075_v7, %v15074_v51  ;;  %v7097_v62 = vadd.f32 %v7096_v44, %v7095_v63  ;;  %v7175_v35 = vadd.f32 %v7174_v26, %v7173_v48  ;;  %v7201_v49 = vsel %vm2004_vm3, %v7139_v36, %v7200_v42 }
 0x59f   : > { %v7109_v12 = vadd.f32 %v7108_v32, %v7107_v45  ;;  %v7120_v24 = vrot.slane %v7119_v29, 1  ;;  %v7202_v5 = vsel %vm2006_vm4, %v7151_v20, %v7201_v49  ;;  %v7140_v58 = vrot.slane %v15076_v6, 4 }
 0x5a0   : > { %v7130_v9 = vrot.slane %v7129_v38, 2  ;;  %v7152_v41 = vrot.slane %v7081_v59, 4  ;;  %v7203_v31 = vsel %vm2008_vm5, %v7163_v50, %v7202_v5  ;;  %v7164_v1 = vrot.slane %v7083_v30, 4 }
 0x5a1   : > { %v7121_v21 = vadd.f32 %v7120_v24, %v7119_v29  ;;  %v7176_v25 = vrot.slane %v7085_v34, 4  ;;  %v7204_v55 = vsel %vm2010_vm6, %v7175_v35, %v7203_v31  ;;  %v7141_v3 = vadd.f32 %v7140_v58, %v15076_v6 }
 0x5a2   : > { %v7131_v61 = vadd.f32 %v7130_v9, %v7129_v38  ;;  %v7153_v28 = vadd.f32 %v7152_v41, %v7081_v59  ;;  %7263 = vxpose.xlu0.b32.end [16/16] %v7204_v55, 128  ;;  %v7165_v16 = vadd.f32 %v7164_v1, %v7083_v30  ;;  %v7205_v14 = vsel %vm1998_vm0, %v7109_v12, %v7097_v62  ;;  %v15077_v55 = vld [vmem:[#allocation13_spill] sm:$0xff] }
 0x5a3   : > { %v7177_v27 = vadd.f32 %v7176_v25, %v7085_v34  ;;  %v7142_v22 = vrot.slane %v7141_v3, 2  ;;  %v7206_v2 = vsel %vm2000_vm1, %v7121_v21, %v7205_v14  ;;  %v8337_v60 = vmov 0.0   ;;  %v7344_v25 = vld [vmem:[%s13515_s4] sm:$0x3] }
 0x5a4   : > { %v7132_v47 = vrot.slane %v7131_v61, 1  ;;  %v7154_v4 = vrot.slane %v7153_v28, 2  ;;  %7420 = vmatprep.mubr.f32.mxu1 %v8337_v60  ;;  %v7166_v53 = vrot.slane %v7165_v16, 2 }
 0x5a5   : > { %v7178_v11 = vrot.slane %v7177_v27, 2  ;;  %v7143_v17 = vadd.f32 %v7142_v22, %v7141_v3  ;;  %v15078_v3 = vld [vmem:[#allocation14_spill] sm:$0xff] }
 0x5a6   : > { %v7133_v43 = vadd.f32 %v7132_v47, %v7131_v61  ;;  %v7155_v23 = vadd.f32 %v7154_v4, %v7153_v28  ;;  %v7167_v59 = vadd.f32 %v7166_v53, %v7165_v16  ;;  %v13324_v47 = vrot.slane %v7344_v25, %v15077_v55 }
 0x5a7   : > { %v7179_v13 = vadd.f32 %v7178_v11, %v7177_v27  ;;  %v7144_v15 = vrot.slane %v7143_v17, 1  ;;  %v13327_v28 = vrot.slane %v7344_v25, %v15078_v3 }
 0x5a8   : > { %v7207_v52 = vsel %vm2002_vm2, %v7133_v43, %v7206_v2  ;;  %v7156_v19 = vrot.slane %v7155_v23, 1  ;;  %v7168_v57 = vrot.slane %v7167_v59, 1 }
 0x5a9   : > { %v7180_v10 = vrot.slane %v7179_v13, 1  ;;  %v7145_v30 = vadd.f32 %v7144_v15, %v7143_v17 }
 0x5aa   : > { %v7157_v34 = vadd.f32 %v7156_v19, %v7155_v23  ;;  %v7169_v0 = vadd.f32 %v7168_v57, %v7167_v59 }
 0x5ab   : > { %v7208_v8 = vsel %vm2004_vm3, %v7145_v30, %v7207_v52  ;;  %v7181_v42 = vadd.f32 %v7180_v10, %v7179_v13 }
 0x5ac   : > { %v7209_v18 = vsel %vm2006_vm4, %v7157_v34, %v7208_v8 }
 0x5ad   : > { %v7210_v63 = vsel %vm2008_vm5, %v7169_v0, %v7209_v18 }
 0x5ae   : > { %v7211_v39 = vsel %vm2010_vm6, %v7181_v42, %v7210_v63 }
 0x5af   : > { %7295 = vxpose.xlu1.b32.end [16/16] %v7211_v39, 128 }
 0x5e2   : > { %v7264_v48 = vpop.trf.xlu0 }
 0x5e3   : > { %7421 = vmatmul.mubr.f32.vlgmr.msra.gmra.mxu1 %v7264_v48 }
 0x5e4   : > { %7426 = vmatprep.mubr.f32.mxu1 %v8337_v60 }
 0x5e6   : > { %v7265_v40 = vpop.trf.xlu0 }
 0x5e7   : > { %7427 = vmatmul.mubr.f32.gmra.mxu1 %v7265_v40 }
 0x5e8   : > { %7432 = vmatprep.mubr.f32.mxu1 %v8337_v60 }
 0x5ea   : > { %v7266_v46 = vpop.trf.xlu0 }
 0x5eb   : > { %7433 = vmatmul.mubr.f32.gmra.mxu1 %v7266_v46 }
 0x5ec   : > { %7438 = vmatprep.mubr.f32.mxu1 %v8337_v60 }
 0x5ee   : > { %v7267_v45 = vpop.trf.xlu0 }
 0x5ef   : > { %7439 = vmatmul.mubr.f32.gmra.mxu1 %v7267_v45  ;;  %v7296_v51 = vpop.trf.xlu1 }
 0x5f0   : > { %7444 = vmatprep.mubr.f32.mxu1 %v8337_v60 }
 0x5f2   : > { %v7268_v33 = vpop.trf.xlu0 }
 0x5f3   : > { %7445 = vmatmul.mubr.f32.gmra.mxu1 %v7268_v33  ;;  %v7297_v38 = vpop.trf.xlu1 }
 0x5f4   : > { %7450 = vmatprep.mubr.f32.mxu1 %v8337_v60 }
 0x5f6   : > { %v7269_v54 = vpop.trf.xlu0 }
 0x5f7   : > { %7451 = vmatmul.mubr.f32.gmra.mxu1 %v7269_v54  ;;  %v7298_v32 = vpop.trf.xlu1 }
 0x5f8   : > { %7456 = vmatprep.mubr.f32.mxu1 %v8337_v60 }
 0x5fa   : > { %v7270_v37 = vpop.trf.xlu0 }
 0x5fb   : > { %7457 = vmatmul.mubr.f32.gmra.mxu1 %v7270_v37  ;;  %v7299_v20 = vpop.trf.xlu1 }
 0x5fc   : > { %7462 = vmatprep.mubr.f32.mxu1 %v8337_v60 }
 0x5fe   : > { %v7271_v56 = vpop.trf.xlu0 }
 0x5ff   : > { %7463 = vmatmul.mubr.f32.gmra.mxu1 %v7271_v56  ;;  %v7300_v9 = vpop.trf.xlu1 }
 0x600   : > { %7468 = vmatprep.mubr.f32.mxu1 %v8337_v60 }
 0x602   : > { %v7272_v44 = vpop.trf.xlu0 }
 0x603   : > { %7469 = vmatmul.mubr.f32.gmra.mxu1 %v7272_v44  ;;  %v7301_v49 = vpop.trf.xlu1 }
 0x604   : > { %7474 = vmatprep.mubr.f32.mxu1 %v8337_v60 }
 0x606   : > { %v7273_v7 = vpop.trf.xlu0 }
 0x607   : > { %7475 = vmatmul.mubr.f32.gmra.mxu1 %v7273_v7  ;;  %v7302_v12 = vpop.trf.xlu1 }
 0x608   : > { %7480 = vmatprep.mubr.f32.mxu1 %v8337_v60 }
 0x60a   : > { %v7274_v36 = vpop.trf.xlu0 }
 0x60b   : > { %7481 = vmatmul.mubr.f32.gmra.mxu1 %v7274_v36  ;;  %v7303_v24 = vpop.trf.xlu1 }
 0x60c   : > { %7486 = vmatprep.mubr.f32.mxu1 %v8337_v60 }
 0x60e   : > { %v7275_v26 = vpop.trf.xlu0 }
 0x60f   : > { %7487 = vmatmul.mubr.f32.gmra.mxu1 %v7275_v26  ;;  %v7304_v5 = vpop.trf.xlu1 }
 0x610   : > { %7492 = vmatprep.mubr.f32.mxu1 %v8337_v60 }
 0x612   : > { %v7276_v29 = vpop.trf.xlu0 }
 0x613   : > { %7493 = vmatmul.mubr.f32.gmra.mxu1 %v7276_v29  ;;  %v7305_v61 = vpop.trf.xlu1 }
 0x614   : > { %7498 = vmatprep.mubr.f32.mxu1 %v8337_v60 }
 0x616   : > { %v7277_v50 = vpop.trf.xlu0 }
 0x617   : > { %7499 = vmatmul.mubr.f32.gmra.mxu1 %v7277_v50  ;;  %v7306_v6 = vpop.trf.xlu1 }
 0x618   : > { %7504 = vmatprep.mubr.f32.mxu1 %v8337_v60 }
 0x61a   : > { %v7278_v62 = vpop.trf.xlu0 }
 0x61b   : > { %7505 = vmatmul.mubr.f32.gmra.mxu1 %v7278_v62  ;;  %v7307_v58 = vpop.trf.xlu1 }
 0x61c   : > { %7510 = vmatprep.mubr.f32.mxu1 %v8337_v60 }
 0x61e   : > { %v7279_v35 = vpop.trf.xlu0 }
 0x61f   : > { %7511 = vmatmul.mubr.f32.gmra.mxu1 %v7279_v35  ;;  %v7308_v41 = vpop.trf.xlu1 }
 0x620   : > { %7516 = vmatprep.mubr.f32.mxu1 %v8337_v60 }
 0x623   : > { %7517 = vmatmul.mubr.f32.gmra.mxu1 %v7296_v51  ;;  %v7309_v31 = vpop.trf.xlu1 }
 0x624   : > { %7522 = vmatprep.mubr.f32.mxu1 %v8337_v60 }
 0x627   : > { %7523 = vmatmul.mubr.f32.gmra.mxu1 %v7297_v38  ;;  %v7310_v21 = vpop.trf.xlu1 }
 0x628   : > { %7528 = vmatprep.mubr.f32.mxu1 %v8337_v60 }
 0x62b   : > { %7529 = vmatmul.mubr.f32.gmra.mxu1 %v7298_v32  ;;  %v7311_v1 = vpop.trf.xlu1 }
 0x62c   : > { %7534 = vmatprep.mubr.f32.mxu1 %v8337_v60 }
 0x62f   : > { %7535 = vmatmul.mubr.f32.gmra.mxu1 %v7299_v20 }
 0x630   : > { %7540 = vmatprep.mubr.f32.mxu1 %v8337_v60 }
 0x633   : > { %7541 = vmatmul.mubr.f32.gmra.mxu1 %v7300_v9 }
 0x634   : > { %7546 = vmatprep.mubr.f32.mxu1 %v8337_v60 }
 0x637   : > { %7547 = vmatmul.mubr.f32.gmra.mxu1 %v7301_v49 }
 0x638   : > { %7552 = vmatprep.mubr.f32.mxu1 %v8337_v60 }
 0x63b   : > { %7553 = vmatmul.mubr.f32.gmra.mxu1 %v7302_v12 }
 0x63c   : > { %7558 = vmatprep.mubr.f32.mxu1 %v8337_v60 }
 0x63f   : > { %7559 = vmatmul.mubr.f32.gmra.mxu1 %v7303_v24 }
 0x640   : > { %7564 = vmatprep.mubr.f32.mxu1 %v8337_v60 }
 0x643   : > { %7565 = vmatmul.mubr.f32.gmra.mxu1 %v7304_v5 }
 0x644   : > { %7570 = vmatprep.mubr.f32.mxu1 %v8337_v60 }
 0x647   : > { %7571 = vmatmul.mubr.f32.gmra.mxu1 %v7305_v61 }
 0x648   : > { %7576 = vmatprep.mubr.f32.mxu1 %v8337_v60 }
 0x64b   : > { %7577 = vmatmul.mubr.f32.gmra.mxu1 %v7306_v6 }
 0x64c   : > { %7582 = vmatprep.mubr.f32.mxu1 %v8337_v60 }
 0x64f   : > { %7583 = vmatmul.mubr.f32.gmra.mxu1 %v7307_v58 }
 0x650   : > { %7588 = vmatprep.mubr.f32.mxu1 %v8337_v60 }
 0x653   : > { %7589 = vmatmul.mubr.f32.gmra.mxu1 %v7308_v41 }
 0x654   : > { %7594 = vmatprep.mubr.f32.mxu1 %v8337_v60 }
 0x657   : > { %7595 = vmatmul.mubr.f32.gmra.mxu1 %v7309_v31 }
 0x658   : > { %7600 = vmatprep.mubr.f32.mxu1 %v8337_v60 }
 0x65b   : > { %7601 = vmatmul.mubr.f32.gmra.mxu1 %v7310_v21 }
 0x65c   : > { %7606 = vmatprep.mubr.f32.mxu1 %v8337_v60 }
 0x65f   : > { %7607 = vmatmul.mubr.f32.gmra.mxu1 %v7311_v1 }
 0x6a3   : > { %v7422_v16 = vpop.f32.mrf.mxu1 }
 0x6a4   : > { %v7423_v27 = vadd.f32 %v7422_v16, %v13324_v47 }
 0x6a5   : > { %v7424_v14 = vpop.f32.mrf.mxu1 }
 0x6a6   : > { %7613 = vst [vmem:[%s13332_s27] sm:$0xff] %v7423_v27  ;;  %v7425_v43 = vadd.f32 %v7424_v14, %v13327_v28 }
 0x6a7   : > { %v7428_v22 = vpop.f32.mrf.mxu1 }
 0x6a8   : > { %7614 = vst [vmem:[%s13332_s27 + $0x8] sm:$0xff] %v7425_v43  ;;  %v7429_v4 = vadd.f32 %v7428_v22, %v13324_v47 }
 0x6a9   : > { %v7430_v2 = vpop.f32.mrf.mxu1 }
 0x6aa   : > { %7615 = vst [vmem:[%s13332_s27 + $0x10] sm:$0xff] %v7429_v4  ;;  %v7431_v60 = vadd.f32 %v7430_v2, %v13327_v28 }
 0x6ab   : > { %v7434_v53 = vpop.f32.mrf.mxu1 }
 0x6ac   : > { %7616 = vst [vmem:[%s13332_s27 + $0x18] sm:$0xff] %v7431_v60  ;;  %v7435_v11 = vadd.f32 %v7434_v53, %v13324_v47 }
 0x6ad   : > { %v7436_v17 = vpop.f32.mrf.mxu1 }
 0x6ae   : > { %7617 = vst [vmem:[%s13332_s27 + $0x20] sm:$0xff] %v7435_v11  ;;  %v7437_v23 = vadd.f32 %v7436_v17, %v13327_v28 }
 0x6af   : > { %v7440_v52 = vpop.f32.mrf.mxu1 }
 0x6b0   : > { %7618 = vst [vmem:[%s13332_s27 + $0x28] sm:$0xff] %v7437_v23  ;;  %v7441_v59 = vadd.f32 %v7440_v52, %v13324_v47 }
 0x6b1   : > { %v7442_v13 = vpop.f32.mrf.mxu1 }
 0x6b2   : > { %7619 = vst [vmem:[%s13332_s27 + $0x30] sm:$0xff] %v7441_v59  ;;  %v7443_v15 = vadd.f32 %v7442_v13, %v13327_v28 }
 0x6b3   : > { %v7446_v19 = vpop.f32.mrf.mxu1 }
 0x6b4   : > { %7620 = vst [vmem:[%s13332_s27 + $0x38] sm:$0xff] %v7443_v15  ;;  %v7447_v57 = vadd.f32 %v7446_v19, %v13324_v47 }
 0x6b5   : > { %v7448_v10 = vpop.f32.mrf.mxu1 }
 0x6b6   : > { %7621 = vst [vmem:[%s13332_s27 + $0x40] sm:$0xff] %v7447_v57  ;;  %v7449_v30 = vadd.f32 %v7448_v10, %v13327_v28 }
 0x6b7   : > { %v7452_v34 = vpop.f32.mrf.mxu1 }
 0x6b8   : > { %7622 = vst [vmem:[%s13332_s27 + $0x48] sm:$0xff] %v7449_v30  ;;  %v7453_v0 = vadd.f32 %v7452_v34, %v13324_v47 }
 0x6b9   : > { %v7454_v8 = vpop.f32.mrf.mxu1 }
 0x6ba   : > { %7623 = vst [vmem:[%s13332_s27 + $0x50] sm:$0xff] %v7453_v0  ;;  %v7455_v42 = vadd.f32 %v7454_v8, %v13327_v28 }
 0x6bb   : > { %v7458_v18 = vpop.f32.mrf.mxu1 }
 0x6bc   : > { %7624 = vst [vmem:[%s13332_s27 + $0x58] sm:$0xff] %v7455_v42  ;;  %v7459_v63 = vadd.f32 %v7458_v18, %v13324_v47 }
 0x6bd   : > { %v7460_v39 = vpop.f32.mrf.mxu1 }
 0x6be   : > { %7625 = vst [vmem:[%s13332_s27 + $0x60] sm:$0xff] %v7459_v63  ;;  %v7461_v48 = vadd.f32 %v7460_v39, %v13327_v28 }
 0x6bf   : > { %v7464_v40 = vpop.f32.mrf.mxu1 }
 0x6c0   : > { %7626 = vst [vmem:[%s13332_s27 + $0x68] sm:$0xff] %v7461_v48  ;;  %v7465_v46 = vadd.f32 %v7464_v40, %v13324_v47 }
 0x6c1   : > { %v7466_v45 = vpop.f32.mrf.mxu1 }
 0x6c2   : > { %7627 = vst [vmem:[%s13332_s27 + $0x70] sm:$0xff] %v7465_v46  ;;  %v7467_v33 = vadd.f32 %v7466_v45, %v13327_v28 }
 0x6c3   : > { %v7470_v54 = vpop.f32.mrf.mxu1 }
 0x6c4   : > { %7628 = vst [vmem:[%s13332_s27 + $0x78] sm:$0xff] %v7467_v33  ;;  %v7471_v37 = vadd.f32 %v7470_v54, %v13324_v47 }
 0x6c5   : > { %v7472_v56 = vpop.f32.mrf.mxu1 }
 0x6c6   : > { %7629 = vst [vmem:[%s13332_s27 + $0x80] sm:$0xff] %v7471_v37  ;;  %v7473_v44 = vadd.f32 %v7472_v56, %v13327_v28 }
 0x6c7   : > { %v7476_v51 = vpop.f32.mrf.mxu1 }
 0x6c8   : > { %7630 = vst [vmem:[%s13332_s27 + $0x88] sm:$0xff] %v7473_v44  ;;  %v7477_v7 = vadd.f32 %v7476_v51, %v13324_v47 }
 0x6c9   : > { %v7478_v38 = vpop.f32.mrf.mxu1 }
 0x6ca   : > { %7631 = vst [vmem:[%s13332_s27 + $0x90] sm:$0xff] %v7477_v7  ;;  %v7479_v36 = vadd.f32 %v7478_v38, %v13327_v28 }
 0x6cb   : > { %v7482_v26 = vpop.f32.mrf.mxu1 }
 0x6cc   : > { %7632 = vst [vmem:[%s13332_s27 + $0x98] sm:$0xff] %v7479_v36  ;;  %v7483_v32 = vadd.f32 %v7482_v26, %v13324_v47 }
 0x6cd   : > { %v7484_v29 = vpop.f32.mrf.mxu1 }
 0x6ce   : > { %7633 = vst [vmem:[%s13332_s27 + $0xa0] sm:$0xff] %v7483_v32  ;;  %v7485_v20 = vadd.f32 %v7484_v29, %v13327_v28 }
 0x6cf   : > { %v7488_v50 = vpop.f32.mrf.mxu1 }
 0x6d0   : > { %7634 = vst [vmem:[%s13332_s27 + $0xa8] sm:$0xff] %v7485_v20  ;;  %v7489_v62 = vadd.f32 %v7488_v50, %v13324_v47 }
 0x6d1   : > { %v7490_v9 = vpop.f32.mrf.mxu1 }
 0x6d2   : > { %7635 = vst [vmem:[%s13332_s27 + $0xb0] sm:$0xff] %v7489_v62  ;;  %v7491_v35 = vadd.f32 %v7490_v9, %v13327_v28 }
 0x6d3   : > { %v7494_v49 = vpop.f32.mrf.mxu1 }
 0x6d4   : > { %7636 = vst [vmem:[%s13332_s27 + $0xb8] sm:$0xff] %v7491_v35  ;;  %v7495_v12 = vadd.f32 %v7494_v49, %v13324_v47 }
 0x6d5   : > { %v7496_v24 = vpop.f32.mrf.mxu1 }
 0x6d6   : > { %7637 = vst [vmem:[%s13332_s27 + $0xc0] sm:$0xff] %v7495_v12  ;;  %v7497_v5 = vadd.f32 %v7496_v24, %v13327_v28 }
 0x6d7   : > { %v7500_v61 = vpop.f32.mrf.mxu1 }
 0x6d8   : > { %7638 = vst [vmem:[%s13332_s27 + $0xc8] sm:$0xff] %v7497_v5  ;;  %v7501_v6 = vadd.f32 %v7500_v61, %v13324_v47 }
 0x6d9   : > { %v7502_v58 = vpop.f32.mrf.mxu1 }
 0x6da   : > { %7639 = vst [vmem:[%s13332_s27 + $0xd0] sm:$0xff] %v7501_v6  ;;  %v7503_v41 = vadd.f32 %v7502_v58, %v13327_v28 }
 0x6db   : > { %v7506_v31 = vpop.f32.mrf.mxu1 }
 0x6dc   : > { %7640 = vst [vmem:[%s13332_s27 + $0xd8] sm:$0xff] %v7503_v41  ;;  %v7507_v21 = vadd.f32 %v7506_v31, %v13324_v47 }
 0x6dd   : > { %v7508_v1 = vpop.f32.mrf.mxu1 }
 0x6de   : > { %7641 = vst [vmem:[%s13332_s27 + $0xe0] sm:$0xff] %v7507_v21  ;;  %v7509_v25 = vadd.f32 %v7508_v1, %v13327_v28 }
 0x6df   : > { %v7512_v55 = vpop.f32.mrf.mxu1 }
 0x6e0   : > { %7642 = vst [vmem:[%s13332_s27 + $0xe8] sm:$0xff] %v7509_v25  ;;  %v7513_v3 = vadd.f32 %v7512_v55, %v13324_v47 }
 0x6e1   : > { %v7514_v16 = vpop.f32.mrf.mxu1 }
 0x6e2   : > { %7643 = vst [vmem:[%s13332_s27 + $0xf0] sm:$0xff] %v7513_v3  ;;  %v7515_v27 = vadd.f32 %v7514_v16, %v13327_v28 }
 0x6e3   : > { %v7518_v14 = vpop.f32.mrf.mxu1 }
 0x6e4   : > { %7644 = vst [vmem:[%s13332_s27 + $0xf8] sm:$0xff] %v7515_v27  ;;  %v7519_v43 = vadd.f32 %v7518_v14, %v13324_v47 }
 0x6e5   : > { %v7520_v22 = vpop.f32.mrf.mxu1 }
 0x6e6   : > { %7645 = vst [vmem:[%s13332_s27 + $0x100] sm:$0xff] %v7519_v43  ;;  %v7521_v4 = vadd.f32 %v7520_v22, %v13327_v28 }
 0x6e7   : > { %v7524_v2 = vpop.f32.mrf.mxu1 }
 0x6e8   : > { %7646 = vst [vmem:[%s13332_s27 + $0x108] sm:$0xff] %v7521_v4  ;;  %v7525_v60 = vadd.f32 %v7524_v2, %v13324_v47 }
 0x6e9   : > { %v7526_v53 = vpop.f32.mrf.mxu1 }
 0x6ea   : > { %7647 = vst [vmem:[%s13332_s27 + $0x110] sm:$0xff] %v7525_v60  ;;  %v7527_v11 = vadd.f32 %v7526_v53, %v13327_v28 }
 0x6eb   : > { %v7530_v17 = vpop.f32.mrf.mxu1 }
 0x6ec   : > { %7648 = vst [vmem:[%s13332_s27 + $0x118] sm:$0xff] %v7527_v11  ;;  %v7531_v23 = vadd.f32 %v7530_v17, %v13324_v47 }
 0x6ed   : > { %v7532_v52 = vpop.f32.mrf.mxu1 }
 0x6ee   : > { %7649 = vst [vmem:[%s13332_s27 + $0x120] sm:$0xff] %v7531_v23  ;;  %v7533_v59 = vadd.f32 %v7532_v52, %v13327_v28 }
 0x6ef   : > { %v7536_v13 = vpop.f32.mrf.mxu1 }
 0x6f0   : > { %7650 = vst [vmem:[%s13332_s27 + $0x128] sm:$0xff] %v7533_v59  ;;  %v7537_v15 = vadd.f32 %v7536_v13, %v13324_v47 }
 0x6f1   : > { %v7538_v19 = vpop.f32.mrf.mxu1 }
 0x6f2   : > { %7651 = vst [vmem:[%s13332_s27 + $0x130] sm:$0xff] %v7537_v15  ;;  %v7539_v57 = vadd.f32 %v7538_v19, %v13327_v28 }
 0x6f3   : > { %v7542_v10 = vpop.f32.mrf.mxu1 }
 0x6f4   : > { %7652 = vst [vmem:[%s13332_s27 + $0x138] sm:$0xff] %v7539_v57  ;;  %v7543_v30 = vadd.f32 %v7542_v10, %v13324_v47 }
 0x6f5   : > { %v7544_v34 = vpop.f32.mrf.mxu1 }
 0x6f6   : > { %7653 = vst [vmem:[%s13332_s27 + $0x140] sm:$0xff] %v7543_v30  ;;  %v7545_v0 = vadd.f32 %v7544_v34, %v13327_v28 }
 0x6f7   : > { %v7548_v8 = vpop.f32.mrf.mxu1 }
 0x6f8   : > { %7654 = vst [vmem:[%s13332_s27 + $0x148] sm:$0xff] %v7545_v0  ;;  %v7549_v42 = vadd.f32 %v7548_v8, %v13324_v47 }
 0x6f9   : > { %v7550_v18 = vpop.f32.mrf.mxu1 }
 0x6fa   : > { %7655 = vst [vmem:[%s13332_s27 + $0x150] sm:$0xff] %v7549_v42  ;;  %v7551_v63 = vadd.f32 %v7550_v18, %v13327_v28 }
 0x6fb   : > { %v7554_v39 = vpop.f32.mrf.mxu1 }
 0x6fc   : > { %7656 = vst [vmem:[%s13332_s27 + $0x158] sm:$0xff] %v7551_v63  ;;  %v7555_v48 = vadd.f32 %v7554_v39, %v13324_v47 }
 0x6fd   : > { %v7556_v40 = vpop.f32.mrf.mxu1 }
 0x6fe   : > { %7657 = vst [vmem:[%s13332_s27 + $0x160] sm:$0xff] %v7555_v48  ;;  %v7557_v46 = vadd.f32 %v7556_v40, %v13327_v28 }
 0x6ff   : > { %v7560_v45 = vpop.f32.mrf.mxu1 }
 0x700   : > { %7658 = vst [vmem:[%s13332_s27 + $0x168] sm:$0xff] %v7557_v46  ;;  %v7561_v33 = vadd.f32 %v7560_v45, %v13324_v47 }
 0x701   : > { %v7562_v54 = vpop.f32.mrf.mxu1 }
 0x702   : > { %7659 = vst [vmem:[%s13332_s27 + $0x170] sm:$0xff] %v7561_v33  ;;  %v7563_v37 = vadd.f32 %v7562_v54, %v13327_v28 }
 0x703   : > { %v7566_v56 = vpop.f32.mrf.mxu1 }
 0x704   : > { %7660 = vst [vmem:[%s13332_s27 + $0x178] sm:$0xff] %v7563_v37  ;;  %v7567_v44 = vadd.f32 %v7566_v56, %v13324_v47 }
 0x705   : > { %v7568_v51 = vpop.f32.mrf.mxu1 }
 0x706   : > { %7661 = vst [vmem:[%s13332_s27 + $0x180] sm:$0xff] %v7567_v44  ;;  %v7569_v7 = vadd.f32 %v7568_v51, %v13327_v28 }
 0x707   : > { %v7572_v38 = vpop.f32.mrf.mxu1 }
 0x708   : > { %7662 = vst [vmem:[%s13332_s27 + $0x188] sm:$0xff] %v7569_v7  ;;  %v7573_v36 = vadd.f32 %v7572_v38, %v13324_v47 }
 0x709   : > { %v7574_v26 = vpop.f32.mrf.mxu1 }
 0x70a   : > { %7663 = vst [vmem:[%s13332_s27 + $0x190] sm:$0xff] %v7573_v36  ;;  %v7575_v32 = vadd.f32 %v7574_v26, %v13327_v28 }
 0x70b   : > { %v7578_v29 = vpop.f32.mrf.mxu1 }
 0x70c   : > { %7664 = vst [vmem:[%s13332_s27 + $0x198] sm:$0xff] %v7575_v32  ;;  %v7579_v20 = vadd.f32 %v7578_v29, %v13324_v47 }
 0x70d   : > { %v7580_v50 = vpop.f32.mrf.mxu1 }
 0x70e   : > { %7665 = vst [vmem:[%s13332_s27 + $0x1a0] sm:$0xff] %v7579_v20  ;;  %v7581_v62 = vadd.f32 %v7580_v50, %v13327_v28 }
 0x70f   : > { %v7584_v9 = vpop.f32.mrf.mxu1 }
 0x710   : > { %7666 = vst [vmem:[%s13332_s27 + $0x1a8] sm:$0xff] %v7581_v62  ;;  %v7585_v35 = vadd.f32 %v7584_v9, %v13324_v47 }
 0x711   : > { %v7586_v49 = vpop.f32.mrf.mxu1 }
 0x712   : > { %7667 = vst [vmem:[%s13332_s27 + $0x1b0] sm:$0xff] %v7585_v35  ;;  %v7587_v12 = vadd.f32 %v7586_v49, %v13327_v28 }
 0x713   : > { %v7590_v24 = vpop.f32.mrf.mxu1 }
 0x714   : > { %7668 = vst [vmem:[%s13332_s27 + $0x1b8] sm:$0xff] %v7587_v12  ;;  %v7591_v5 = vadd.f32 %v7590_v24, %v13324_v47 }
 0x715   : > { %v7592_v61 = vpop.f32.mrf.mxu1 }
 0x716   : > { %7669 = vst [vmem:[%s13332_s27 + $0x1c0] sm:$0xff] %v7591_v5  ;;  %v7593_v6 = vadd.f32 %v7592_v61, %v13327_v28 }
 0x717   : > { %v7596_v58 = vpop.f32.mrf.mxu1 }
 0x718   : > { %7670 = vst [vmem:[%s13332_s27 + $0x1c8] sm:$0xff] %v7593_v6  ;;  %v7597_v41 = vadd.f32 %v7596_v58, %v13324_v47 }
 0x719   : > { %v7598_v31 = vpop.f32.mrf.mxu1 }
 0x71a   : > { %7671 = vst [vmem:[%s13332_s27 + $0x1d0] sm:$0xff] %v7597_v41  ;;  %v7599_v21 = vadd.f32 %v7598_v31, %v13327_v28 }
 0x71b   : > { %v7602_v1 = vpop.f32.mrf.mxu1 }
 0x71c   : > { %7672 = vst [vmem:[%s13332_s27 + $0x1d8] sm:$0xff] %v7599_v21  ;;  %v7603_v25 = vadd.f32 %v7602_v1, %v13324_v47 }
 0x71d   : > { %v7604_v55 = vpop.f32.mrf.mxu1 }
 0x71e   : > { %7673 = vst [vmem:[%s13332_s27 + $0x1e0] sm:$0xff] %v7603_v25  ;;  %v7605_v3 = vadd.f32 %v7604_v55, %v13327_v28 }
 0x71f   : > { %v7608_v16 = vpop.f32.mrf.mxu1 }
 0x720   : > { %7674 = vst [vmem:[%s13332_s27 + $0x1e8] sm:$0xff] %v7605_v3  ;;  %v7609_v27 = vadd.f32 %v7608_v16, %v13324_v47 }
 0x721   : > { %v7610_v14 = vpop.f32.mrf.mxu1 }
 0x722   : > { %7675 = vst [vmem:[%s13332_s27 + $0x1f0] sm:$0xff] %v7609_v27  ;;  %v7611_v43 = vadd.f32 %v7610_v14, %v13327_v28 }
 0x724   : > { %7676 = vst [vmem:[%s13332_s27 + $0x1f8] sm:$0xff] %v7611_v43 }
 0x725   : > { %8274 = shalt.err (!%p8271_p0)
}
 0x726   : > { %s8275_s10 = scalar_lea.hbm %s13463_s12, 8192  ;;  %s8279_s8 = scalar_lea.hbm %s13516_s5, 16384 }
 0x727   : > { %p8276_p5 = scmp.ne.s32.totalorder %s13463_s12, %s8275_s10  ;;  %p8280_p4 = scmp.lt.s32.totalorder %s13463_s12, %s13516_s5 }
 0x728   : > { %p8281_p6 = scmp.lt.s32.totalorder %s8279_s8, %s8275_s10 }
 0x729   : > { %p8277_p2 = pnand %p8276_p5, %p15079_p11 }
 0x72a   : > { %p8282_p8 = por %p8281_p6, %p8280_p4 }
 0x72b   : > { %p8278_p1 = pneg %p8277_p2 }
 0x72d   : > { %p8283_p3 = pnand %p8282_p8, %p8278_p1 }
 0x72f   : > { %8286 = shalt.err (!%p8283_p3)
}
 0x730   : > { %s8339_s9 = smov 256   ;;  %s8340_s28 = smov 16  }
 0x731   : > { %7891 = dma.vmem_to_hbm [thread:$0]  (%p15079_p11), %s13465_s15, 8192, %s13463_s12, %s7678_s22, %s8339_s9, %s8339_s9, %s8340_s28  }
 0x732 PF: > { %s7707_s7 = sand.u32 1, %s8317_s18   ;;  %p15080_p7 = scmp.ne.s32.totalorder %s14049_s25, 0 }
 0x733   : > { %p15081_p9 = scmp.ge.s32.totalorder %s8329_s21, 2  ;;  %s7708_s11 = scalar_lea.sflag [#allocation6], %s7707_s7 }
 0x735   : > { %p7902_p10 = pnand %p15081_p9, %p15080_p7 }
 0x737   : > { %p7903_p12 = pneg %p7902_p10 }
 0x739   : > { %8312 = dma.done.wait (%p7903_p12), %s7708_s11, 8192  }
 0x73a   : > { %8314 = vsyncadd (%p7903_p12), %s7708_s11, 4294959104  ;;  %p19_p13 = scmp.ge.s32.totalorder %s8425_s30, 4   ;;  %s15082_s18 = smov %s8321_s19 }
 0x73b   : > { %s15083_s19 = smov %s8325_s20  ;;  %s15084_s20 = smov %s8445_s13 }
 0x73c   : > { %s15085_s21 = smov %s8425_s30  ;;  %21 = sbr.rel (!%p19_p13) target bundleno = 6 (0x6), region = 92 }
 0x741   :  { %7713 = vsyncpa [#allocation5], 1 }
 0x742   :  { %7715 = vsyncpa [#allocation5 + $0x1], 1 }
 0x743   :  { %7716 = vsyncpa [#allocation8], 1 }
 0x744   :  { %7717 = vsyncpa [#allocation6], 1 }
 0x745   :  { %7719 = vsyncpa [#allocation6 + $0x1], 1 }

</bundles_post_ra>
